<compile_context>
chip_gen: v7x
topology: tpu7x:2x2x1
jax: 0.10.0
libtpu: 0.0.40
codegen_flags: <defaults>
</compile_context>

<pallas_src>
import math

import jax
import jax.numpy as jnp
from jax import lax
from jax.experimental import pallas as pl
from jax.experimental.pallas import tpu as pltpu


# ------------------------------- fused kernel -------------------------------


def _make_lenet_kernel(num_layers: int, cst: float):
    """Fused kernel: Fourier features -> (num_layers-1) tanh layers -> softmax.

    Ref layout (inputs, then output):
      x_vt:  (1, V, tb)   batch tile, variable-major: x_vt[0, v, b] = x[b, v]
      sp3:   (V, J, T)    sin_params; harmonic axis split into J lane-tiles of
                          T = 128 (zero-padded past n)
      cp3:   (V, J, T)    cos_params, same layout
      fs_b:  (1, 1)       FourierSeries scalar bias
      (w_i, b_i) x num_layers:  w_i (f_in, f_out), b_i (1, f_out)
      out:   (1, tb, f_out_last)  softmax probabilities
    """

    def kernel(*refs):
        x_ref, sp_ref, cp_ref, fsb_ref = refs[:4]
        wb_refs = refs[4:4 + 2 * num_layers]
        o_ref = refs[4 + 2 * num_layers]

        _, n_tiles, tile = sp_ref.shape

        x_vt = x_ref[0]                                # (V, tb): x[b, v] at [v, b]
        x3 = x_vt[:, :, None]                          # (V, tb, 1)

        # Base angles: first lane-tile of harmonics, k = 1..T (small f32
        # arguments -> well-conditioned sin/cos).
        kf = (lax.broadcasted_iota(jnp.int32, (1, 1, tile), 2) + 1
              ).astype(jnp.float32)
        base = x3 * (kf * cst)                         # (V, tb, T)
        sin_base = jnp.sin(base)
        cos_base = jnp.cos(base)

        # Lane-tile jump angles j * (T * c * x), j = 0..J-1.
        jf = lax.broadcasted_iota(jnp.int32, (1, 1, n_tiles), 2
                                  ).astype(jnp.float32)
        ang = (x3 * (cst * tile)) * jf                 # (V, tb, J)
        sin_j = jnp.sin(ang)
        cos_j = jnp.cos(ang)

        # Angle addition:
        #   sum_{j,r} sp*sin(base_r + j*D) + cp*cos(base_r + j*D)
        # = sum_r sin(base_r)*A_r + cos(base_r)*B_r
        #   A = sum_j cos_j*sp - sin_j*cp,   B = sum_j sin_j*sp + cos_j*cp.
        # The j-contractions are tiny per-variable (tb, J) x (J, T) matmuls
        # -> batched einsum on the MXU.
        sp = sp_ref[...]                               # (V, J, T)
        cp = cp_ref[...]
        a_coef = (jnp.einsum('vbj,vjr->vbr', cos_j, sp,
                             preferred_element_type=jnp.float32)
                  - jnp.einsum('vbj,vjr->vbr', sin_j, cp,
                               preferred_element_type=jnp.float32))
        b_coef = (jnp.einsum('vbj,vjr->vbr', sin_j, sp,
                             preferred_element_type=jnp.float32)
                  + jnp.einsum('vbj,vjr->vbr', cos_j, cp,
                               preferred_element_type=jnp.float32))
        contrib = sin_base * a_coef + cos_base * b_coef    # (V, tb, T)
        sums = jnp.sum(contrib, axis=2)                    # (V, tb)

        # Variable-major layout makes the regroup a single tiny transpose.
        h = jnp.transpose(sums) + fsb_ref[...]             # (tb, V) + scalar bias

        # ---- MLP: hidden tanh layers, final linear + softmax ----
        # TODO(synk): dropout with p > 0 (training-time random masking) is not
        # implemented; the module default p = 0 is the identity.
        for layer in range(num_layers - 1):
            w_ref = wb_refs[2 * layer]
            b_ref = wb_refs[2 * layer + 1]
            y = jnp.dot(h, w_ref[...], preferred_element_type=jnp.float32)
            h = jnp.tanh(y + b_ref[...])

        w_ref = wb_refs[2 * (num_layers - 1)]
        b_ref = wb_refs[2 * (num_layers - 1) + 1]
        y = jnp.dot(h, w_ref[...], preferred_element_type=jnp.float32) + b_ref[...]
        m = jnp.max(y, axis=1, keepdims=True)
        e = jnp.exp(y - m)
        # (tb, num_classes) masked store: lane width < 128 is negligible here.
        o_ref[0] = e / jnp.sum(e, axis=1, keepdims=True)

    return kernel


# --------------------------------- wrapper ----------------------------------


def _pick_batch_tile(B: int) -> int:
    # >= 2 grid steps whenever B >= 2 so the "parallel" batch axis can shard
    # across v7x's two TensorCores.  With the matmul formulation the per-step
    # VMEM footprint is only a few MB, so a 32-row cap is safe on every
    # generation (v7x's 64 MiB included) without chip-specific code.
    tb = max(1, -(-B // 2))
    if tb > 8:
        tb = min(32, ((tb + 7) // 8) * 8)     # keep the sublane dim 8-aligned
    return tb


def lenet_forward(x, params):
    """x: (B, n_var) float32 -> (B, num_classes) softmax probabilities."""
    B, V = x.shape
    assert V == params["n_var"]
    sp3 = params["sin3"]              # (V, J, T)
    cp3 = params["cos3"]
    _, J, T = sp3.shape
    cst = params["cst"]
    fc = params["fc"]                 # list of (W^T (in, out), b (1, out))
    num_layers = len(fc)
    num_classes = fc[-1][0].shape[1]

    tb = _pick_batch_tile(B)
    grid_b = pl.cdiv(B, tb)
    b_pad = grid_b * tb
    if b_pad != B:
        x = jnp.pad(x, ((0, b_pad - B), (0, 0)))
    # Per-tile variable-major layout: block i is (V, tb) with
    # x_vt[i, v, b] = x[i*tb + b, v]; no in-kernel shuffling needed.
    x_vt = jnp.transpose(x.reshape(grid_b, tb, V), (0, 2, 1))

    kernel = _make_lenet_kernel(num_layers, cst)

    in_specs = [
        pl.BlockSpec((1, V, tb), lambda i: (i, 0, 0)),     # x tile
        pl.BlockSpec((V, J, T), lambda i: (0, 0, 0)),      # sin params (resident)
        pl.BlockSpec((V, J, T), lambda i: (0, 0, 0)),      # cos params (resident)
        pl.BlockSpec((1, 1), lambda i: (0, 0)),            # fs bias
    ]
    operands = [x_vt, sp3, cp3, params["fs_bias"]]
    for (w_t, b_row) in fc:
        in_specs.append(pl.BlockSpec(w_t.shape, lambda i: (0, 0)))
        in_specs.append(pl.BlockSpec(b_row.shape, lambda i: (0, 0)))
        operands.extend([w_t, b_row])

    out_specs = pl.BlockSpec((1, tb, num_classes), lambda i: (i, 0, 0))

    # Cost hint: transcendentals are now only the T base + J jump angles per
    # (row, variable); the bulk O(B*V*N) work is MXU flops.
    trans = (2 * b_pad * V * T + 2 * b_pad * V * J
             + b_pad * sum(w.shape[1] for (w, _) in fc[:-1])
             + b_pad * num_classes)
    flops = (8 * b_pad * V * J * T + 4 * b_pad * V * T
             + 2 * b_pad * sum(w.shape[0] * w.shape[1] for (w, _) in fc))
    bytes_accessed = 4 * (x_vt.size + 2 * V * J * T + 1
                          + sum(w.size + b.size for (w, b) in fc)
                          + b_pad * num_classes)
    cost = pl.CostEstimate(flops=flops, transcendentals=trans,
                           bytes_accessed=bytes_accessed)

    out = pl.pallas_call(
        kernel,
        out_shape=jax.ShapeDtypeStruct((grid_b, tb, num_classes), jnp.float32),
        grid=(grid_b,),
        in_specs=in_specs,
        out_specs=out_specs,
        compiler_params=pltpu.CompilerParams(
            dimension_semantics=("parallel",),
            # Real footprint is ~1-3 MiB (params ~0.9 MB + small tiles);
            # 32 MiB leaves double-buffer headroom and is safe on v5e/v6e/v7x.
            vmem_limit_bytes=32 * 1024 * 1024,
        ),
        cost_estimate=cost,
    )(*operands)

    return out.reshape(b_pad, num_classes)[:B]


# ------------------------------ parameter init ------------------------------


def init_lenet_params(key, features, n_var=11, n=10000, period=2.0):
    """Deterministic synthetic init mirroring the PyTorch module shapes.

    sin/cos params are reshaped once to (n_var, J, 128) lane-tiles of the
    harmonic axis (zero padded past n) for the angle-addition kernel.
    """
    cst = 2.0 * math.pi / period
    T = 128
    J = (n + T - 1) // T

    keys = jax.random.split(key, 3 + 2 * (len(features) - 1))
    sin_params = jax.random.normal(keys[0], (n_var * n,), jnp.float32)
    cos_params = jax.random.normal(keys[1], (n_var * n,), jnp.float32)
    fs_bias = jax.random.normal(keys[2], (1,), jnp.float32)

    def to_tiles(p_flat):
        p2 = p_flat.reshape(n_var, n)            # [v, m] == flat[v*n + m]
        # Padded harmonics MUST have zero coefficients so they contribute
        # nothing regardless of what sin/cos evaluate to there.
        p_pad = jnp.zeros((n_var, J * T), jnp.float32).at[:, :n].set(p2)
        return p_pad.reshape(n_var, J, T)

    fc = []
    for i in range(len(features) - 1):
        fan_in = features[i]
        bound = 1.0 / math.sqrt(fan_in)
        w = jax.random.uniform(keys[3 + 2 * i], (features[i + 1], features[i]),
                               jnp.float32, minval=-bound, maxval=bound)
        b = jax.random.uniform(keys[4 + 2 * i], (features[i + 1],),
                               jnp.float32, minval=-bound, maxval=bound)
        # Pre-transpose once to the (in, out) / (1, out) layout the fused
        # kernel's x @ W + b matmuls want.
        fc.append((jnp.transpose(w), b.reshape(1, -1)))

    return {
        "n_var": n_var,
        "n": n,
        "cst": cst,
        "sin3": to_tiles(sin_params),     # (n_var, J, 128)
        "cos3": to_tiles(cos_params),     # (n_var, J, 128)
        "fs_bias": fs_bias.reshape(1, 1),
        "fc": fc,                         # list of (W^T (in, out), b (1, out))
    }


# ------------------------------ plain-JAX ref --------------------------------


def lenet_reference(x, params):
    """Straightforward JAX translation of the PyTorch forward (tolerance test)."""
    V, n, cst = params["n_var"], params["n"], params["cst"]
    sp = params["sin3"].reshape(V, -1)[:, :n]
    cp = params["cos3"].reshape(V, -1)[:, :n]
    k = jnp.arange(1, n + 1, dtype=jnp.float32) * cst
    ang = x[:, :, None] * k[None, None, :]                      # (B, V, n)
    h = ((jnp.sin(ang) * sp[None]).sum(-1)
         + (jnp.cos(ang) * cp[None]).sum(-1)
         + params["fs_bias"][0, 0])
    for (w, b) in params["fc"][:-1]:
        h = jnp.tanh(h @ w + b)
    w, b = params["fc"][-1]
    return jax.nn.softmax(h @ w + b, axis=1)


# ----------------------------------- main -----------------------------------

if __name__ == "__main__":
    key = jax.random.PRNGKey(0)
    k_x, k_p = jax.random.split(key)

    # LeNet(*features) with FourierSeries(11, n=10000): input is (B, 11).
    features = (11, 32, 16, 4)
    B = 2

    # Small-magnitude inputs keep the k~1e4 sine arguments in a range where
    # f32 evaluation is well conditioned, so the kernel can be
    # tolerance-checked against the plain-JAX reference.
    x = 0.02 * jax.random.normal(k_x, (B, features[0]), jnp.float32)
    params = init_lenet_params(k_p, features, n_var=11, n=10000, period=2.0)

    out = lenet_forward(x, params)
    jax.block_until_ready(out)

    assert out.shape == (B, features[-1])
    assert bool(jnp.all(jnp.isfinite(out)))
    row_sums = jnp.sum(out, axis=1)
    assert bool(jnp.all(jnp.abs(row_sums - 1.0) < 1e-3))

    # Loose tolerance: large-harmonic f32 trig and matmul precision differ
    # slightly between the fused kernel and the reference expansion.
    ref = lenet_reference(x, params)
    assert bool(jnp.max(jnp.abs(out - ref)) < 0.2), (
        "kernel deviates from reference beyond tolerance")

    print("KERNEL_OK")
</pallas_src>

<mosaic_0001>
module attributes {stable_mosaic.version = 11 : i64} {
  func.func @kernel(%arg0: i32, %arg1: memref<1x11x1xf32, #tpu.memory_space<vmem>>, %arg2: memref<11x79x128xf32, #tpu.memory_space<vmem>>, %arg3: memref<11x79x128xf32, #tpu.memory_space<vmem>>, %arg4: memref<1x1xf32, #tpu.memory_space<vmem>>, %arg5: memref<11x32xf32, #tpu.memory_space<vmem>>, %arg6: memref<1x32xf32, #tpu.memory_space<vmem>>, %arg7: memref<32x16xf32, #tpu.memory_space<vmem>>, %arg8: memref<1x16xf32, #tpu.memory_space<vmem>>, %arg9: memref<16x4xf32, #tpu.memory_space<vmem>>, %arg10: memref<1x4xf32, #tpu.memory_space<vmem>>, %arg11: memref<1x1x4xf32, #tpu.memory_space<vmem>>) attributes {dimension_semantics = [#tpu.dimension_semantics<parallel>], iteration_bounds = array<i64: 2>, scalar_prefetch = 0 : i64, scratch_operands = 0 : i64, tpu.core_type = #tpu.core_type<tc>, window_params = [{transform_indices = @transform_0, window_bounds = array<i64: 1, 11, 1>}, {pipeline_mode = #tpu.pipeline_mode<synchronous>, transform_indices = @transform_1, window_bounds = array<i64: 11, 79, 128>}, {pipeline_mode = #tpu.pipeline_mode<synchronous>, transform_indices = @transform_2, window_bounds = array<i64: 11, 79, 128>}, {pipeline_mode = #tpu.pipeline_mode<synchronous>, transform_indices = @transform_3, window_bounds = array<i64: 1, 1>}, {pipeline_mode = #tpu.pipeline_mode<synchronous>, transform_indices = @transform_4, window_bounds = array<i64: 11, 32>}, {pipeline_mode = #tpu.pipeline_mode<synchronous>, transform_indices = @transform_5, window_bounds = array<i64: 1, 32>}, {pipeline_mode = #tpu.pipeline_mode<synchronous>, transform_indices = @transform_6, window_bounds = array<i64: 32, 16>}, {pipeline_mode = #tpu.pipeline_mode<synchronous>, transform_indices = @transform_7, window_bounds = array<i64: 1, 16>}, {pipeline_mode = #tpu.pipeline_mode<synchronous>, transform_indices = @transform_8, window_bounds = array<i64: 16, 4>}, {pipeline_mode = #tpu.pipeline_mode<synchronous>, transform_indices = @transform_9, window_bounds = array<i64: 1, 4>}, {transform_indices = @transform_10, window_bounds = array<i64: 1, 1, 4>}]} {
    %c0 = arith.constant 0 : index
    %c0_0 = arith.constant 0 : index
    %c0_1 = arith.constant 0 : index
    %0 = vector.load %arg1[%c0, %c0_0, %c0_1] : memref<1x11x1xf32, #tpu.memory_space<vmem>>, vector<1x11x1xf32>
    %1 = vector.shape_cast %0 : vector<1x11x1xf32> to vector<11x1xf32>
    %2 = vector.shape_cast %1 : vector<11x1xf32> to vector<11x1x1xf32>
    %3 = tpu.iota {dimensions = array<i32: 2>} : vector<1x1x128xi32>
    %c1_i32 = arith.constant 1 : i32
    %4 = vector.broadcast %c1_i32 : i32 to vector<1x1x128xi32>
    %5 = arith.addi %3, %4 : vector<1x1x128xi32>
    %6 = arith.sitofp %5 : vector<1x1x128xi32> to vector<1x1x128xf32>
    %cst = arith.constant 3.14159274 : f32
    %7 = vector.broadcast %cst : f32 to vector<1x1x128xf32>
    %8 = arith.mulf %6, %7 : vector<1x1x128xf32>
    %9 = vector.broadcast %2 : vector<11x1x1xf32> to vector<11x1x128xf32>
    %10 = vector.broadcast %8 : vector<1x1x128xf32> to vector<11x1x128xf32>
    %11 = arith.mulf %9, %10 : vector<11x1x128xf32>
    %12 = math.sin %11 : vector<11x1x128xf32>
    %13 = math.cos %11 : vector<11x1x128xf32>
    %14 = tpu.iota {dimensions = array<i32: 2>} : vector<1x1x79xi32>
    %15 = arith.sitofp %14 : vector<1x1x79xi32> to vector<1x1x79xf32>
    %cst_2 = arith.constant 402.123871 : f32
    %16 = vector.broadcast %cst_2 : f32 to vector<11x1x1xf32>
    %17 = arith.mulf %2, %16 : vector<11x1x1xf32>
    %18 = vector.broadcast %17 : vector<11x1x1xf32> to vector<11x1x79xf32>
    %19 = vector.broadcast %15 : vector<1x1x79xf32> to vector<11x1x79xf32>
    %20 = arith.mulf %18, %19 : vector<11x1x79xf32>
    %21 = math.sin %20 : vector<11x1x79xf32>
    %22 = math.cos %20 : vector<11x1x79xf32>
    %c0_3 = arith.constant 0 : index
    %c0_4 = arith.constant 0 : index
    %c0_5 = arith.constant 0 : index
    %23 = vector.load %arg2[%c0_3, %c0_4, %c0_5] : memref<11x79x128xf32, #tpu.memory_space<vmem>>, vector<11x79x128xf32>
    %c0_6 = arith.constant 0 : index
    %c0_7 = arith.constant 0 : index
    %c0_8 = arith.constant 0 : index
    %24 = vector.load %arg3[%c0_6, %c0_7, %c0_8] : memref<11x79x128xf32, #tpu.memory_space<vmem>>, vector<11x79x128xf32>
    "tpu.trace_start"() <{level = 10 : i32, message = "vbj,vjr->vbr"}> : () -> ()
    %cst_9 = arith.constant dense<0.000000e+00> : vector<11x1x128xf32>
    %25 = tpu.matmul %22, %23, %cst_9 {dimension_numbers = #tpu.dot_dimension_numbers<[2], [1], [1], [2], [0, 0, 0, 1, 1, 2], [0], [0]>} : vector<11x1x79xf32>, vector<11x79x128xf32>, vector<11x1x128xf32> -> vector<11x1x128xf32>
    %cst_10 = arith.constant dense<0.000000e+00> : vector<11x1x128xf32>
    %26 = tpu.matmul %21, %24, %cst_10 {dimension_numbers = #tpu.dot_dimension_numbers<[2], [1], [1], [2], [0, 0, 0, 1, 1, 2], [0], [0]>} : vector<11x1x79xf32>, vector<11x79x128xf32>, vector<11x1x128xf32> -> vector<11x1x128xf32>
    "tpu.trace_stop"() : () -> ()
    %27 = arith.subf %25, %26 : vector<11x1x128xf32>
    "tpu.trace_start"() <{level = 10 : i32, message = "vbj,vjr->vbr"}> : () -> ()
    %cst_11 = arith.constant dense<0.000000e+00> : vector<11x1x128xf32>
    %28 = tpu.matmul %21, %23, %cst_11 {dimension_numbers = #tpu.dot_dimension_numbers<[2], [1], [1], [2], [0, 0, 0, 1, 1, 2], [0], [0]>} : vector<11x1x79xf32>, vector<11x79x128xf32>, vector<11x1x128xf32> -> vector<11x1x128xf32>
    %cst_12 = arith.constant dense<0.000000e+00> : vector<11x1x128xf32>
    %29 = tpu.matmul %22, %24, %cst_12 {dimension_numbers = #tpu.dot_dimension_numbers<[2], [1], [1], [2], [0, 0, 0, 1, 1, 2], [0], [0]>} : vector<11x1x79xf32>, vector<11x79x128xf32>, vector<11x1x128xf32> -> vector<11x1x128xf32>
    "tpu.trace_stop"() : () -> ()
    %30 = arith.addf %28, %29 : vector<11x1x128xf32>
    %31 = arith.mulf %12, %27 : vector<11x1x128xf32>
    %32 = arith.mulf %13, %30 : vector<11x1x128xf32>
    %33 = arith.addf %31, %32 : vector<11x1x128xf32>
    %cst_13 = arith.constant dense<0.000000e+00> : vector<11x1xf32>
    %34 = vector.multi_reduction <add>, %33, %cst_13 [2] : vector<11x1x128xf32> to vector<11x1xf32>
    %35 = tpu.transpose %34, [1, 0] : vector<11x1xf32> -> vector<1x11xf32>
    %c0_14 = arith.constant 0 : index
    %c0_15 = arith.constant 0 : index
    %36 = vector.load %arg4[%c0_14, %c0_15] : memref<1x1xf32, #tpu.memory_space<vmem>>, vector<1x1xf32>
    %37 = vector.broadcast %36 : vector<1x1xf32> to vector<1x11xf32>
    %38 = arith.addf %35, %37 : vector<1x11xf32>
    %c0_16 = arith.constant 0 : index
    %c0_17 = arith.constant 0 : index
    %39 = vector.load %arg5[%c0_16, %c0_17] : memref<11x32xf32, #tpu.memory_space<vmem>>, vector<11x32xf32>
    %cst_18 = arith.constant dense<0.000000e+00> : vector<1x32xf32>
    %40 = tpu.matmul %38, %39, %cst_18 {dimension_numbers = #tpu.dot_dimension_numbers<[1], [0], [0], [1], [0, 0, 1, 1], [], []>} : vector<1x11xf32>, vector<11x32xf32>, vector<1x32xf32> -> vector<1x32xf32>
    %c0_19 = arith.constant 0 : index
    %c0_20 = arith.constant 0 : index
    %41 = vector.load %arg6[%c0_19, %c0_20] : memref<1x32xf32, #tpu.memory_space<vmem>>, vector<1x32xf32>
    %42 = arith.addf %40, %41 : vector<1x32xf32>
    %43 = math.tanh %42 : vector<1x32xf32>
    %c0_21 = arith.constant 0 : index
    %c0_22 = arith.constant 0 : index
    %44 = vector.load %arg7[%c0_21, %c0_22] : memref<32x16xf32, #tpu.memory_space<vmem>>, vector<32x16xf32>
    %cst_23 = arith.constant dense<0.000000e+00> : vector<1x16xf32>
    %45 = tpu.matmul %43, %44, %cst_23 {dimension_numbers = #tpu.dot_dimension_numbers<[1], [0], [0], [1], [0, 0, 1, 1], [], []>} : vector<1x32xf32>, vector<32x16xf32>, vector<1x16xf32> -> vector<1x16xf32>
    %c0_24 = arith.constant 0 : index
    %c0_25 = arith.constant 0 : index
    %46 = vector.load %arg8[%c0_24, %c0_25] : memref<1x16xf32, #tpu.memory_space<vmem>>, vector<1x16xf32>
    %47 = arith.addf %45, %46 : vector<1x16xf32>
    %48 = math.tanh %47 : vector<1x16xf32>
    %c0_26 = arith.constant 0 : index
    %c0_27 = arith.constant 0 : index
    %49 = vector.load %arg9[%c0_26, %c0_27] : memref<16x4xf32, #tpu.memory_space<vmem>>, vector<16x4xf32>
    %cst_28 = arith.constant dense<0.000000e+00> : vector<1x4xf32>
    %50 = tpu.matmul %48, %49, %cst_28 {dimension_numbers = #tpu.dot_dimension_numbers<[1], [0], [0], [1], [0, 0, 1, 1], [], []>} : vector<1x16xf32>, vector<16x4xf32>, vector<1x4xf32> -> vector<1x4xf32>
    %c0_29 = arith.constant 0 : index
    %c0_30 = arith.constant 0 : index
    %51 = vector.load %arg10[%c0_29, %c0_30] : memref<1x4xf32, #tpu.memory_space<vmem>>, vector<1x4xf32>
    %52 = arith.addf %50, %51 : vector<1x4xf32>
    %cst_31 = arith.constant dense<0xFF800000> : vector<1xf32>
    %53 = vector.multi_reduction <maximumf>, %52, %cst_31 [1] : vector<1x4xf32> to vector<1xf32>
    %54 = vector.shape_cast %53 : vector<1xf32> to vector<1x1xf32>
    %55 = vector.broadcast %54 : vector<1x1xf32> to vector<1x4xf32>
    %56 = arith.subf %52, %55 : vector<1x4xf32>
    %57 = math.exp %56 : vector<1x4xf32>
    %cst_32 = arith.constant dense<0.000000e+00> : vector<1xf32>
    %58 = vector.multi_reduction <add>, %57, %cst_32 [1] : vector<1x4xf32> to vector<1xf32>
    %59 = vector.shape_cast %58 : vector<1xf32> to vector<1x1xf32>
    %60 = vector.broadcast %59 : vector<1x1xf32> to vector<1x4xf32>
    %61 = arith.divf %57, %60 : vector<1x4xf32>
    %c0_33 = arith.constant 0 : index
    %c0_34 = arith.constant 0 : index
    %c0_35 = arith.constant 0 : index
    %62 = vector.load %arg11[%c0_33, %c0_34, %c0_35] : memref<1x1x4xf32, #tpu.memory_space<vmem>>, vector<1x1x4xf32>
    %63 = vector.shape_cast %62 : vector<1x1x4xf32> to vector<1x4xf32>
    %64 = vector.shape_cast %61 : vector<1x4xf32> to vector<1x1x4xf32>
    tpu.vector_store %arg11[%c0_33, %c0_34, %c0_35], %64 {strides = array<i32>} : memref<1x1x4xf32, #tpu.memory_space<vmem>>, vector<1x1x4xf32>,
    return
  }
  func.func @transform_0(%arg0: i32) -> (i32, i32, i32) {
    %c0_i32 = arith.constant 0 : i32
    %c0_i32_0 = arith.constant 0 : i32
    %c0_i32_1 = arith.constant 0 : i32
    return %arg0, %c0_i32, %c0_i32_0 : i32, i32, i32
  }
  func.func @transform_1(%arg0: i32) -> (i32, i32, i32) {
    %c0_i32 = arith.constant 0 : i32
    %c0_i32_0 = arith.constant 0 : i32
    %c0_i32_1 = arith.constant 0 : i32
    %c0_i32_2 = arith.constant 0 : i32
    return %c0_i32, %c0_i32_0, %c0_i32_1 : i32, i32, i32
  }
  func.func @transform_2(%arg0: i32) -> (i32, i32, i32) {
    %c0_i32 = arith.constant 0 : i32
    %c0_i32_0 = arith.constant 0 : i32
    %c0_i32_1 = arith.constant 0 : i32
    %c0_i32_2 = arith.constant 0 : i32
    return %c0_i32, %c0_i32_0, %c0_i32_1 : i32, i32, i32
  }
  func.func @transform_3(%arg0: i32) -> (i32, i32) {
    %c0_i32 = arith.constant 0 : i32
    %c0_i32_0 = arith.constant 0 : i32
    %c0_i32_1 = arith.constant 0 : i32
    return %c0_i32, %c0_i32_0 : i32, i32
  }
  func.func @transform_4(%arg0: i32) -> (i32, i32) {
    %c0_i32 = arith.constant 0 : i32
    %c0_i32_0 = arith.constant 0 : i32
    %c0_i32_1 = arith.constant 0 : i32
    return %c0_i32, %c0_i32_0 : i32, i32
  }
  func.func @transform_5(%arg0: i32) -> (i32, i32) {
    %c0_i32 = arith.constant 0 : i32
    %c0_i32_0 = arith.constant 0 : i32
    %c0_i32_1 = arith.constant 0 : i32
    return %c0_i32, %c0_i32_0 : i32, i32
  }
  func.func @transform_6(%arg0: i32) -> (i32, i32) {
    %c0_i32 = arith.constant 0 : i32
    %c0_i32_0 = arith.constant 0 : i32
    %c0_i32_1 = arith.constant 0 : i32
    return %c0_i32, %c0_i32_0 : i32, i32
  }
  func.func @transform_7(%arg0: i32) -> (i32, i32) {
    %c0_i32 = arith.constant 0 : i32
    %c0_i32_0 = arith.constant 0 : i32
    %c0_i32_1 = arith.constant 0 : i32
    return %c0_i32, %c0_i32_0 : i32, i32
  }
  func.func @transform_8(%arg0: i32) -> (i32, i32) {
    %c0_i32 = arith.constant 0 : i32
    %c0_i32_0 = arith.constant 0 : i32
    %c0_i32_1 = arith.constant 0 : i32
    return %c0_i32, %c0_i32_0 : i32, i32
  }
  func.func @transform_9(%arg0: i32) -> (i32, i32) {
    %c0_i32 = arith.constant 0 : i32
    %c0_i32_0 = arith.constant 0 : i32
    %c0_i32_1 = arith.constant 0 : i32
    return %c0_i32, %c0_i32_0 : i32, i32
  }
  func.func @transform_10(%arg0: i32) -> (i32, i32, i32) {
    %c0_i32 = arith.constant 0 : i32
    %c0_i32_0 = arith.constant 0 : i32
    %c0_i32_1 = arith.constant 0 : i32
    return %arg0, %c0_i32, %c0_i32_0 : i32, i32, i32
  }
}

</mosaic_0001>

<bundles_post_ra>
// kernel: tpu_custom_call.1
= control target key start
LH: loop header
LB: loop body
LE: loop exit
PB: predicated region body
PF: predicated region fallthrough
CT: control target
= control target key end

     0   :  { %s17035_s0 = inlined_call_operand.vmem [shape: f32[2,11,1], index: 0, kind: input, shape index: {}]   ;;  %s17036_s1 = inlined_call_operand.hbm [shape: f32[11,79,128], index: 1, kind: input, shape index: {}]   ;;  %s17037_s2 = inlined_call_operand.hbm [shape: f32[11,79,128], index: 2, kind: input, shape index: {}]   ;;  %s17038_s3 = inlined_call_operand.<no memory space> [shape: f32[1,1], index: 3, kind: input, shape index: {}]   ;;  %s17039_s4 = inlined_call_operand.vmem [shape: f32[11,32], index: 4, kind: input, shape index: {}]   ;;  %s17040_s5 = inlined_call_operand.vmem [shape: f32[1,32], index: 5, kind: input, shape index: {}]   ;;  %s17041_s6 = inlined_call_operand.vmem [shape: f32[32,16], index: 6, kind: input, shape index: {}]   ;;  %s17042_s7 = inlined_call_operand.vmem [shape: f32[1,16], index: 7, kind: input, shape index: {}]   ;;  %s17043_s8 = inlined_call_operand.vmem [shape: f32[16,4], index: 8, kind: input, shape index: {}]   ;;  %s17044_s9 = inlined_call_operand.vmem [shape: f32[1,4], index: 9, kind: input, shape index: {}]   ;;  %s17045_s10 = inlined_call_operand.hbm [shape: f32[2,1,4], index: 10, kind: output, shape index: {}]  }
   0x1   :  { %v15_v0 = vstv %s17038_s3 }
   0x2   :  { %16 = vst [vmem:[#allocation2] sm:$0x1] %v15_v0 }
   0x3   :  { %17 = vsyncpa [#allocation4], 0 }
   0x4   :  { %18 = vsyncpa [#allocation7], 0 }
   0x5   :  { %19 = vsyncpa [#allocation5], 0 }
   0x6   :  { %21 = vsyncpa [#allocation5 + $0x1], 0  ;;  %s12209_s15 = smov 0   ;;  %s12211_s16 = smov 0  }
   0x7   :  { %s12213_s17 = smov 0   ;;  %s12215_s18 = smov 0  }
   0x8 LB: > { %17348 = sst [smem:[#allocation12_spill]] %s12128_s17  ;;  %s12230_s3 = sadd.s32 4294967295, %s12132_s18   ;;  %s12132_s18 = sphi %s12215_s18, %s17944_s18   ;;  %s12128_s17 = sphi %s12213_s17, %s17946_s17   ;;  %s12124_s16 = sphi %s12211_s16, %s17948_s16   ;;  %s12120_s15 = sphi %s12209_s15, %s17947_s15  }
   0x9   : > { %s9191_s19 = sadd.s32 4294967294, %s12132_s18   ;;  %s12234_s20 = sadd.s32 1, %s12132_s18  }
   0xa   : > { %17349 = sst [smem:[#allocation13_spill]] %s12234_s20  ;;  %s249_s21 = sadd.s32 1, %s12128_s17 }
   0xb   : > { %s246_s22 = ssub.s32 %s12132_s18, %s12234_s20  ;;  %p259_p0 = scmp.ne.s32.totalorder %s12128_s17, %s12124_s16 }
   0xc   : > { %p247_p1 = scmp.eq.s32.totalorder %s246_s22, 0  ;;  %p260_p2 = scmp.eq.s32.totalorder %s12230_s3, 1 }
   0xd   : > { %p265_p3 = scmp.ne.s32.totalorder %s12124_s16, %s12120_s15  ;;  %p266_p4 = scmp.eq.s32.totalorder %s9191_s19, 1 }
   0xe   : > { %s12245_s23 = scalar_select %p247_p1, %s12128_s17, %s249_s21  }
   0xf   : > { %p12247_p5 = por %p260_p2, %p259_p0  ;;  %p12251_p6 = por %p266_p4, %p265_p3 }
  0x10   : > { %17350 = sst [smem:[#allocation14_spill]] %s12245_s23  ;;  %p9192_p7 = scmp.ge.s32.totalorder %s12132_s18, 1 }
  0x11   : > { %s17351_s24 = scalar_select %p12247_p5, 1, 0 }
  0x12   : > { %s17352_s25 = scalar_select %p12251_p6, 1, 0 }
  0x13   : > { %p273_p8 = scmp.lt.s32.totalorder %s12132_s18, 3  ;;  %p17046_p9 = scmp.eq.s32.totalorder %s12230_s3, 0 }
  0x14   : > { %s12134_s27 = smov [#allocation3]   ;;  %s12135_s30 = smov [#allocation6]  }
  0x15   : > { %p12258_p10 = pnand %p9192_p7, %p273_p8  ;;  %s285_s28 = sshll.u32 %s12134_s27, 4  ;;  %s286_s28 = int_to_ptr.vmem [resolvable:$true] %s285_s28 }
  0x16   : > { %s298_s11 = sshll.u32 %s12135_s30, 4  ;;  %s12006_s14 = scalar_lea.hbm %s17036_s1, 14080  ;;  %s12270_s11 = int_to_ptr.vmem [resolvable:$true] %s298_s11 }
  0x17   : > { %s17353_s26 = scalar_select %p12258_p10, 1, 0 }
  0x18   : > { %p11843_p11 = pneg %p12258_p10  ;;  %p12007_p13 = scmp.ne.s32.totalorder %s17036_s1, %s12006_s14 }
  0x19   : > { %p12013_p3 = scmp.lt.u32.totalorder %s12006_s14, %s17036_s1 }
  0x1a   : > { %p12266_p12 = pnand %p17046_p9, %p11843_p11 }
  0x1c   : > { %p12008_p0 = pneg %p12266_p12 }
  0x1e   : > { %p12009_p1 = pnand %p12008_p0, %p12007_p13 }
  0x20   : > { %p12010_p2 = pneg %p12009_p1 }
  0x22   : > { %p12015_p4 = pnand %p12013_p3, %p12010_p2 }
  0x24   : > { %12018 = shalt.err (!%p12015_p4)
}
  0x25   : > { %s12019_s30 = scalar_lea.vmem %s286_s28, 14080  ;;  %p12027_p9 = scmp.lt.s32.totalorder %s286_s28, %s286_s28 }
  0x26   : > { %p12020_p7 = scmp.ne.s32.totalorder %s286_s28, %s12019_s30  ;;  %p12028_p6 = scmp.lt.s32.totalorder %s12019_s30, %s12019_s30 }
  0x28   : > { %p12022_p8 = pnand %p12020_p7, %p12008_p0  ;;  %p12029_p5 = por %p12028_p6, %p12027_p9 }
  0x2a   : > { %p12023_p11 = pneg %p12022_p8 }
  0x2c   : > { %p12030_p10 = pnand %p12029_p5, %p12023_p11 }
  0x2e   : > { %12033 = shalt.err (!%p12030_p10)
}
  0x2f   : > { %s12136_s12 = smov 128   ;;  %s12137_s13 = smov 8  }
  0x30   : > { %11846 = dma.hbm_to_vmem [thread:$0]  (!%p12266_p12), %s17036_s1, 14080, %s286_s28, [#allocation4], %s12136_s12, %s12136_s12, %s12137_s13  }
  0x31   : > { %s12034_s27 = scalar_lea.hbm %s17037_s2, 14080 }
  0x32   : > { %p12035_p13 = scmp.ne.s32.totalorder %s17037_s2, %s12034_s27  ;;  %p12041_p9 = scmp.lt.u32.totalorder %s12034_s27, %s17037_s2 }
  0x34   : > { %p12037_p5 = pnand %p12035_p13, %p12008_p0 }
  0x36   : > { %p12038_p6 = pneg %p12037_p5 }
  0x38   : > { %p12043_p10 = pnand %p12041_p9, %p12038_p6 }
  0x3a   : > { %12046 = shalt.err (!%p12043_p10)
}
  0x3b   : > { %s12047_s28 = scalar_lea.vmem %s12270_s11, 14080  ;;  %p12055_p4 = scmp.lt.s32.totalorder %s12270_s11, %s12270_s11 }
  0x3c   : > { %p12048_p1 = scmp.ne.s32.totalorder %s12270_s11, %s12047_s28  ;;  %p12056_p7 = scmp.lt.s32.totalorder %s12047_s28, %s12047_s28 }
  0x3e   : > { %p12050_p2 = pnand %p12048_p1, %p12008_p0  ;;  %p12057_p8 = por %p12056_p7, %p12055_p4 }
  0x40   : > { %p12051_p3 = pneg %p12050_p2 }
  0x42   : > { %p12058_p11 = pnand %p12057_p8, %p12051_p3 }
  0x44   : > { %12061 = shalt.err (!%p12058_p11)
}
  0x45   : > { %11849 = dma.hbm_to_vmem [thread:$0]  (!%p12266_p12), %s17037_s2, 14080, %s12270_s11, [#allocation7], %s12136_s12, %s12136_s12, %s12137_s13  }
  0x46   : > { %p17355_p13 = scmp.ne.s32.totalorder %s17353_s26, 0 }
  0x48   : > { %343 = sbr.rel (%p17355_p13) target bundleno = 2389 (0x955), region = 60 }
  0x4f   : > { %p17356_p5 = scmp.eq.s32.totalorder %s12230_s3, 0 }
  0x51   : > { %12107 = dma.done.wait (%p17356_p5), [#allocation4], 14080   ;;  %p17357_p0 = pmov %p17356_p5 }
  0x53   : > { %12109 = vsyncadd (%p17357_p0), [#allocation4], 4294953216  ;;  %p17358_p6 = pmov %p17357_p0 }
  0x54   : > { %p17359_p9 = pmov %p17357_p0 }
  0x55   : > { %12111 = dma.done.wait (%p17358_p6), [#allocation7], 14080  }
  0x56   : > { %12113 = vsyncadd (%p17359_p9), [#allocation7], 4294953216  ;;  %p384_p10 = scmp.lt.s32.totalorder %s12230_s3, 1  ;;  %v397_v1 = vlaneseq  ;;  %v12138_v2 = vmov 0   ;;  %v12139_v3 = vmov 1966171168  }
  0x57   : > { %11907 = vset.pattern.permute.xlu0 %v12138_v2  ;;  %v395_v4 = vunpack.c.l.s4 %v12139_v3  ;;  %11908 = vset.pattern.permute.xlu1 %v12138_v2  ;;  %v17071_v60 = vmov 920167782   ;;  %v17057_v63 = vmov 1326507024   ;;  %v17073_v3 = vmov 2102212464  }
  0x58   : > { %s385_s23 = scalar_select %p384_p10, %s12230_s3, 1  ;;  %v398_v5 = vshrl.u32 %v397_v1, 7  ;;  %v12336_v38 = vand.u32 127, %v397_v1 }
  0x59   : > { %v396_v6 = vunpack.c.0.s8 %v395_v4  ;;  %s382_s28 = sand.u32 1, %s12124_s16   ;;  %s9470_s17 = sshll.u32 %s12230_s3, 4 }
  0x5a   : > { %s9473_s26 = sshll.u32 %s385_s23, 4  ;;  %17360 = vst [vmem:[#allocation15_spill] sm:$0xff] %v12336_v38  ;;  %v12338_v39 = vsub.s32 0, %v398_v5  ;;  %v12341_v41 = vcvt.s32.f32 %v12336_v38  ;;  %s383_s20 = scalar_lea.vmem [#allocation8], %s382_s28 }
  0x5b   : > { %s388_s12 = scalar_lea.vmem %s17035_s0, %s9473_s26  ;;  %v399_v7 = vsub.s32 %v396_v6, %v398_v5  ;;  %v17059_v5 = vmov 2475754826   ;;  %s9114_s23 = sshll.u32 %s383_s20, 4  ;;  %s16994_s23 = int_to_ptr.vmem [resolvable:$true] %s9114_s23 }
  0x5c   : > { %v389_v8 = vld [vmem:[%s388_s12] sm:$0xff]  ;;  %v9201_v24 = vld.sshfl [vmem:[%s388_s12 + $0x8] sm:$0x13 pattern:$0x75316420]  ;;  %17361 = vst [vmem:[#allocation16_spill] sm:$0xff] %v12338_v39  ;;  %s16992_s11 = scalar_lea.hbm %s17045_s10, %s9470_s17 }
  0x5d   : > { %v400_v9 = vrot.slane %v389_v8, %v399_v7  ;;  %v393_v10 = vcombine.high %v389_v8, %v389_v8  ;;  %v456_v28 = vrot.slane %v9201_v24, %v399_v7  ;;  %v449_v31 = vcombine.high %v9201_v24, %v9201_v24  ;;  %s9102_s12 = scalar_lea.sflag [#allocation5], %s382_s28  ;;  %s12062_s13 = scalar_lea.vmem %s16994_s23, 16 }
  0x5e   : > { %p12063_p12 = scmp.ne.s32.totalorder %s16994_s23, %s12062_s13  ;;  %p17942_p1 = scmp.ne.s32.totalorder %s17351_s24, 0 }
  0x5f   : > { %v416_v11 = vrot.slane %v400_v9, %v399_v7  ;;  %v408_v12 = vcombine.high %v400_v9, %v400_v9  ;;  %v407_v13 = vrot.slane %v393_v10, %v399_v7  ;;  %v2866_v32 = vmul.f32 402.12387, %v456_v28  ;;  %s12150_s3 = smov [#allocation8]  }
  0x60   : > { %v464_v33 = vcombine.high %v456_v28, %v456_v28  ;;  %v463_v35 = vrot.slane %v449_v31, %v399_v7  ;;  %p12064_p2 = pnand %p12063_p12, %p17942_p1  ;;  %s12066_s14 = sshll.u32 %s12150_s3, 4  ;;  %s12067_s14 = int_to_ptr.vmem [resolvable:$false] %s12066_s14 }
  0x61   : > { %v2858_v14 = vmul.f32 402.12387, %v416_v11  ;;  %v430_v15 = vrot.slane %v408_v12, %v399_v7  ;;  %v438_v16 = vcombine.high %v416_v11, %v416_v11  ;;  %v423_v17 = vrot.slane %v407_v13, %v399_v7  ;;  %s12068_s19 = scalar_lea.vmem %s12067_s14, 32  ;;  %p12069_p4 = scmp.lt.s32.totalorder %s16994_s23, %s12067_s14 }
  0x62   : > { %v409_v21 = vcombine.high %v407_v13, %v407_v13  ;;  %v2868_v36 = vmul.f32 402.12387, %v464_v33  ;;  %v2867_v37 = vmul.f32 402.12387, %v463_v35  ;;  %v17077_v13 = vmov 683565275   ;;  %p12065_p3 = pneg %p12064_p2  ;;  %p12070_p7 = scmp.lt.s32.totalorder %s12068_s19, %s12062_s13 }
  0x63   : > { %2871 = vperm.xlu0 %11907, %v2858_v14   ;;  %v2859_v18 = vmul.f32 402.12387, %v430_v15  ;;  %v2860_v19 = vmul.f32 402.12387, %v438_v16  ;;  %v440_v20 = vcombine.high %v430_v15, %v430_v15  ;;  %v2862_v22 = vmul.f32 402.12387, %v423_v17 }
  0x64   : > { %v439_v23 = vcombine.high %v423_v17, %v423_v17  ;;  %v437_v26 = vrot.slane %v409_v21, %v399_v7  ;;  %v17075_v7 = vmov 2131351028   ;;  %p12071_p8 = por %p12070_p7, %p12069_p4 }
  0x65   : > { %2880 = vperm.xlu1 %11908, %v2859_v18   ;;  %v2861_v25 = vmul.f32 402.12387, %v440_v20 }
  0x66   : > { %v2864_v27 = vmul.f32 402.12387, %v439_v23  ;;  %v2863_v29 = vmul.f32 402.12387, %v437_v26  ;;  %v441_v30 = vcombine.high %v437_v26, %v437_v26  ;;  %p12072_p11 = pnand %p12071_p8, %p12065_p3 }
  0x67   : > { %2889 = vperm.xlu0 %11907, %v2860_v19  }
  0x68   : > { %v2865_v34 = vmul.f32 402.12387, %v441_v30 }
  0x69   : > { %2907 = vperm.xlu1 %11908, %v2862_v22  }
  0x6b   : > { %2898 = vperm.xlu0 %11907, %v2861_v25  }
  0x6d   : > { %2925 = vperm.xlu1 %11908, %v2864_v27  }
  0x6f   : > { %2916 = vperm.xlu0 %11907, %v2863_v29  }
  0x71   : > { %2943 = vperm.xlu1 %11908, %v2866_v32  }
  0x73   : > { %2934 = vperm.xlu0 %11907, %v2865_v34  }
  0x75   : > { %2961 = vperm.xlu1 %11908, %v2868_v36  }
  0x77   : > { %2952 = vperm.xlu0 %11907, %v2867_v37  }
  0x79   : > { %490 = vperm.xlu1 %11908, %v430_v15  }
  0x7b   : > { %498 = vperm.xlu0 %11907, %v438_v16  }
  0x7d   : > { %482 = vperm.xlu1 %11908, %v416_v11  }
  0x7f   : > { %506 = vperm.xlu0 %11907, %v440_v20  }
  0x81   : > { %514 = vperm.xlu1 %11908, %v423_v17  }
  0x83   : > { %522 = vperm.xlu0 %11907, %v437_v26  }
  0x85   : > { %530 = vperm.xlu1 %11908, %v439_v23  }
  0x87   : > { %538 = vperm.xlu0 %11907, %v441_v30  }
  0x89   : > { %554 = vperm.xlu1 %11908, %v463_v35  }
  0x8b   : > { %562 = vperm.xlu0 %11907, %v464_v33  }
  0x8d   : > { %546 = vperm.xlu1 %11908, %v456_v28  }
  0xe2   : > { %v2872_v40 = vpop.permute.xlu0 %2871 }
  0xe3   : > { %v2877_v42 = vrot.slane %v2872_v40, %v12338_v39 }
  0xe4   : > { %v2881_v46 = vpop.permute.xlu1 %2880 }
  0xe5   : > { %v12345_v43 = vmul.f32 %v2877_v42, %v12341_v41  ;;  %v2886_v48 = vrot.slane %v2881_v46, %v12338_v39 }
  0xe6   : > { %v2890_v55 = vpop.permute.xlu0 %2889 }
  0xe7   : > { %17362 = vst [vmem:[#allocation17_spill] sm:$0xff] %v12345_v43  ;;  %v2982_v44 = vand.u32 2139095040, %v12345_v43  ;;  %v12350_v50 = vmul.f32 %v2886_v48, %v12341_v41  ;;  %v2895_v58 = vrot.slane %v2890_v55, %v12338_v39  ;;  %v17053_v1 = vand.u32 2147483647, %v12345_v43 }
  0xe8   : > { %v2908_v27 = vpop.permute.xlu1 %2907 }
  0xe9   : > { %v2983_v45 = vshrl.u32 %v2982_v44, 23  ;;  %v3086_v51 = vand.u32 2139095040, %v12350_v50  ;;  %v12359_v62 = vmul.f32 %v2895_v58, %v12341_v41  ;;  %v2986_v18 = vand.u32 8388607, %v17053_v1 }
  0xea   : > { %v2913_v34 = vrot.slane %v2908_v27, %v12338_v39  ;;  %v17056_v42 = vand.u32 2147483647, %v12350_v50 }
  0xeb   : > { %v9290_v47 = vadd.s32 4294967169, %v2983_v45  ;;  %v3087_v53 = vshrl.u32 %v3086_v51, 23  ;;  %17363 = vst [vmem:[#allocation18_spill] sm:$0xff] %v12359_v62  ;;  %v3190_v12 = vand.u32 2139095040, %v12359_v62  ;;  %v2987_v28 = vor.u32 8388608, %v2986_v18 }
  0xec   : > { %v12407_v46 = vmul.f32 %v2913_v34, %v12341_v41 }
  0xed   : > { %v2989_v49 = vadd.s32 1, %v9290_v47  ;;  %v9294_v56 = vadd.s32 4294967169, %v3087_v53  ;;  %v3191_v24 = vshrl.u32 %v3190_v12, 23  ;;  %v3027_v40 = vshll.u32 %v2987_v28, 8 }
  0xee   : > { %17364 = vst [vmem:[#allocation19_spill] sm:$0xff] %v12407_v46  ;;  %v3398_v12 = vand.u32 2139095040, %v12407_v46 }
  0xef   : > { %vm2990_vm0 = vcmp.gt.s32.totalorder %v2989_v49, 0  ;;  %v3093_v59 = vadd.s32 1, %v9294_v56  ;;  %v9298_v33 = vadd.s32 4294967169, %v3191_v24  ;;  %v3090_v56 = vand.u32 8388607, %v17056_v42 }
  0xf0   : > { %v2991_v52 = vsel %vm2990_vm0, %v2989_v49, 0 }
  0xf1   : > { %v2993_v54 = vand.u32 31, %v2991_v52  ;;  %v12364_v2 = vshrl.u32 %v2991_v52, 5  ;;  %vm3094_vm1 = vcmp.gt.s32.totalorder %v3093_v59, 0  ;;  %v3197_v45 = vadd.s32 1, %v9298_v33 }
  0xf2   : > { %v3095_v19 = vsel %vm3094_vm1, %v3093_v59, 0 }
  0xf3   : > { %v12353_v57 = vsub.s32 32, %v2993_v54  ;;  %v3005_v4 = vshll.u32 %v17073_v3, %v2993_v54  ;;  %v3008_v10 = vshll.u32 %v17071_v60, %v2993_v54  ;;  %v2996_v14 = vshll.u32 %v17077_v13, %v2993_v54 }
  0xf4   : > { %v2999_v15 = vshll.u32 %v17059_v5, %v2993_v54  ;;  %v3002_v16 = vshll.u32 %v17075_v7, %v2993_v54  ;;  %vm3014_vm2 = vcmp.lt.s32.totalorder %v12364_v2, 4  ;;  %v3097_v26 = vand.u32 31, %v3095_v19 }
  0xf5   : > { %v3006_v61 = vshrl.u32 %v17071_v60, %v12353_v57  ;;  %v3009_v0 = vshrl.u32 %v17057_v63, %v12353_v57  ;;  %v2997_v6 = vshrl.u32 %v17059_v5, %v12353_v57  ;;  %v3000_v8 = vshrl.u32 %v17075_v7, %v12353_v57 }
  0xf6   : > { %v3003_v9 = vshrl.u32 %v17073_v3, %v12353_v57  ;;  %vm3011_vm3 = vcmp.lt.s32.totalorder %v12364_v2, 1  ;;  %vm3013_vm4 = vcmp.lt.s32.totalorder %v12364_v2, 3  ;;  %vm3012_vm5 = vcmp.lt.s32.totalorder %v12364_v2, 2 }
  0xf7   : > { %v3007_v11 = vor.u32 %v3006_v61, %v3005_v4  ;;  %v3010_v17 = vor.u32 %v3009_v0, %v3008_v10  ;;  %v2998_v20 = vor.u32 %v2997_v6, %v2996_v14  ;;  %v3001_v21 = vor.u32 %v3000_v8, %v2999_v15 }
  0xf8   : > { %v3004_v22 = vor.u32 %v3003_v9, %v3002_v16  ;;  %v12397_v35 = vsub.s32 32, %v3097_v26  ;;  %v12404_v44 = vshrl.u32 %v3095_v19, 5  ;;  %v3109_v49 = vshll.u32 %v17073_v3, %v3097_v26 }
  0xf9   : > { %v3020_v23 = vsel %vm3014_vm2, %v3007_v11, 920167782  ;;  %v3024_v25 = vsel %vm3014_vm2, %v3010_v17, 1326507024  ;;  %v3019_v29 = vsel %vm3011_vm3, %v2998_v20, %v3001_v21  ;;  %v3112_v54 = vshll.u32 %v17071_v60, %v3097_v26 }
  0xfa   : > { %v3021_v30 = vsel %vm3013_vm4, %v3004_v22, %v3020_v23  ;;  %v3023_v31 = vsel %vm3011_vm3, %v3001_v21, %v3004_v22  ;;  %v3025_v32 = vsel %vm3013_vm4, %v3007_v11, %v3024_v25  ;;  %v3110_v51 = vshrl.u32 %v17071_v60, %v12397_v35  ;;  %v2899_v23 = vpop.permute.xlu0 %2898 }
  0xfb   : > { %v3022_v36 = vsel %vm3012_vm5, %v3019_v29, %v3021_v30  ;;  %v3026_v37 = vsel %vm3012_vm5, %v3023_v31, %v3025_v32  ;;  %v3113_v55 = vshrl.u32 %v17057_v63, %v12397_v35  ;;  %v3100_v58 = vshll.u32 %v17077_v13, %v3097_v26 }
  0xfc   : > { %v12409_v47 = vmul.u32.u64.low %v3027_v40, %v3022_v36  ;;  %v12410_v48 = vmul.u32.u64.high %v3027_v40, %v3022_v36, %v12409_v47  ;;  %v12416_v52 = vmul.u32.u64.low %v3027_v40, %v3026_v37  ;;  %v12417_v53 = vmul.u32.u64.high %v3027_v40, %v3026_v37, %v12416_v52 }
  0xfd   : > { %v3101_v59 = vshrl.u32 %v17059_v5, %v12397_v35  ;;  %v3103_v61 = vshll.u32 %v17059_v5, %v3097_v26  ;;  %v3104_v0 = vshrl.u32 %v17075_v7, %v12397_v35  ;;  %v3106_v4 = vshll.u32 %v17075_v7, %v3097_v26 }
  0xfe   : > { %v3107_v6 = vshrl.u32 %v17073_v3, %v12397_v35  ;;  %vm3198_vm6 = vcmp.gt.s32.totalorder %v3197_v45, 0  ;;  %v2995_v8 = vshrl.u32 %v17077_v13, %v12353_v57  ;;  %v3016_v9 = vsel %vm3014_vm2, %v3004_v22, 2102212464 }
  0xff   : > { %v3111_v10 = vor.u32 %v3110_v51, %v3109_v49  ;;  %v3114_v11 = vor.u32 %v3113_v55, %v3112_v54  ;;  %vm3118_vm7 = vcmp.lt.s32.totalorder %v12404_v44, 4  ;;  %v3091_v15 = vor.u32 8388608, %v3090_v56 }
 0x100   : > { %v3015_v14 = vsel %vm3011_vm3, %v2995_v8, %v2998_v20  ;;  %v3199_v16 = vsel %vm3198_vm6, %v3197_v45, 0  ;;  %v3017_v17 = vsel %vm3013_vm4, %v3001_v21, %v3016_v9  ;;  %v3102_v18 = vor.u32 %v3101_v59, %v3100_v58 }
 0x101   : > { %v3105_v19 = vor.u32 %v3104_v0, %v3103_v61  ;;  %v3108_v57 = vor.u32 %v3107_v6, %v3106_v4  ;;  %v3037_v22 = vadd.s32 1, %v12410_v48  ;;  %vm3115_vm8 = vcmp.lt.s32.totalorder %v12404_v44, 1 }
 0x102   : > { %vm3117_vm9 = vcmp.lt.s32.totalorder %v12404_v44, 3  ;;  %v3124_v24 = vsel %vm3118_vm7, %v3111_v10, 920167782  ;;  %vm3036_vm10 = vc.u32 %v12417_v53, %v12409_v47  ;;  %v3128_v20 = vsel %vm3118_vm7, %v3114_v11, 1326507024 }
 0x103   : > { %v3201_v21 = vand.u32 31, %v3199_v16  ;;  %v3399_v25 = vshrl.u32 %v3398_v12, 23  ;;  %v3018_v26 = vsel %vm3012_vm5, %v3015_v14, %v3017_v17  ;;  %v2904_v27 = vrot.slane %v2899_v23, %v12338_v39 }
 0x104   : > { %vm3116_vm11 = vcmp.lt.s32.totalorder %v12404_v44, 2  ;;  %v3123_v28 = vsel %vm3115_vm8, %v3102_v18, %v3105_v19  ;;  %v3125_v29 = vsel %vm3117_vm9, %v3108_v57, %v3124_v24  ;;  %v3038_v30 = vsel %vm3036_vm10, %v3037_v22, %v12410_v48 }
 0x105   : > { %v3127_v31 = vsel %vm3115_vm8, %v3105_v19, %v3108_v57  ;;  %v3129_v32 = vsel %vm3117_vm9, %v3111_v10, %v3128_v20  ;;  %v17052_v2 = vand.u32 2147483647, %v12359_v62  ;;  %v3034_v33 = vmul.u32 %v3027_v40, %v3018_v26 }
 0x106   : > { %v12466_v34 = vshll.u32 %v3091_v15, 8  ;;  %v12468_v36 = vsub.s32 32, %v3201_v21  ;;  %v9306_v37 = vadd.s32 4294967169, %v3399_v25  ;;  %v3126_v45 = vsel %vm3116_vm11, %v3123_v28, %v3125_v29  ;;  %v2926_v15 = vpop.permute.xlu1 %2925 }
 0x107   : > { %v12473_v49 = vmul.f32 %v2904_v27, %v12341_v41  ;;  %v3039_v48 = vadd.s32 %v3038_v30, %v3034_v33  ;;  %v3130_v51 = vsel %vm3116_vm11, %v3127_v31, %v3129_v32  ;;  %v3099_v52 = vshrl.u32 %v17077_v13, %v12397_v35 }
 0x108   : > { %v3194_v40 = vand.u32 8388607, %v17052_v2  ;;  %v12482_v54 = vmul.u32.u64.low %v12466_v34, %v3126_v45  ;;  %v12483_v55 = vmul.u32.u64.high %v12466_v34, %v3126_v45, %v12482_v54  ;;  %v3214_v56 = vshrl.u32 %v17071_v60, %v12468_v36 }
 0x109   : > { %17365 = vst [vmem:[#allocation20_spill] sm:$0xff] %v12473_v49  ;;  %v3405_v58 = vadd.s32 1, %v9306_v37  ;;  %v3120_v59 = vsel %vm3118_vm7, %v3108_v57, 2102212464  ;;  %v12491_v61 = vmul.u32.u64.low %v12466_v34, %v3130_v51  ;;  %v12492_v0 = vmul.u32.u64.high %v12466_v34, %v3130_v51, %v12491_v61 }
 0x10a   : > { %v3294_v35 = vand.u32 2139095040, %v12473_v49  ;;  %v3040_v4 = vadd.s32 536870912, %v3039_v48  ;;  %v3205_v6 = vshrl.u32 %v17059_v5, %v12468_v36  ;;  %v3213_v8 = vshll.u32 %v17073_v3, %v3201_v21 }
 0x10b   : > { %v3217_v9 = vshrl.u32 %v17057_v63, %v12468_v36  ;;  %v3119_v10 = vsel %vm3115_vm8, %v3099_v52, %v3102_v18  ;;  %v12502_v11 = vshrl.u32 %v3199_v16, 5  ;;  %v3208_v12 = vshrl.u32 %v17075_v7, %v12468_v36 }
 0x10c   : > { %v3211_v14 = vshrl.u32 %v17073_v3, %v12468_v36  ;;  %v3204_v17 = vshll.u32 %v17077_v13, %v3201_v21  ;;  %v3215_v57 = vor.u32 %v3214_v56, %v3213_v8  ;;  %v3216_v23 = vshll.u32 %v17071_v60, %v3201_v21 }
 0x10d   : > { %vm3406_vm12 = vcmp.gt.s32.totalorder %v3405_v58, 0  ;;  %v3121_v22 = vsel %vm3117_vm9, %v3105_v19, %v3120_v59  ;;  %v3207_v18 = vshll.u32 %v17059_v5, %v3201_v21  ;;  %v3210_v16 = vshll.u32 %v17075_v7, %v3201_v21 }
 0x10e   : > { %v3295_v24 = vshrl.u32 %v3294_v35, 23  ;;  %v12514_v20 = vshrl.u32 %v3040_v4, 30  ;;  %v12516_v25 = vor.u32 %v3205_v6, %v3204_v17  ;;  %v3218_v26 = vor.u32 %v3217_v9, %v3216_v23 }
 0x10f   : > { %v2931_v27 = vrot.slane %v2926_v15, %v12338_v39  ;;  %v12519_v28 = vor.u32 %v3208_v12, %v3207_v18  ;;  %v3212_v29 = vor.u32 %v3211_v14, %v3210_v16  ;;  %vm3222_vm13 = vcmp.lt.s32.totalorder %v12502_v11, 4 }
 0x110   : > { %17366 = vst [vmem:[#allocation21_spill] sm:$0xff] %v12514_v20  ;;  %v3407_v30 = vsel %vm3406_vm12, %v3405_v58, 0  ;;  %v3141_v19 = vadd.s32 1, %v12483_v55  ;;  %v3228_v31 = vsel %vm3222_vm13, %v3215_v57, 920167782  ;;  %v3122_v21 = vsel %vm3116_vm11, %v3119_v10, %v3121_v22 }
 0x111   : > { %vm3140_vm14 = vc.u32 %v12492_v0, %v12482_v54  ;;  %vm3219_vm15 = vcmp.lt.s32.totalorder %v12502_v11, 1  ;;  %v9302_v32 = vadd.s32 4294967169, %v3295_v24  ;;  %vm3221_vm0 = vcmp.lt.s32.totalorder %v12502_v11, 3 }
 0x112   : > { %v3232_v33 = vsel %vm3222_vm13, %v3218_v26, 1326507024  ;;  %v3409_v37 = vand.u32 31, %v3407_v30  ;;  %v12534_v45 = vmul.f32 %v2931_v27, %v12341_v41  ;;  %v3042_v51 = vshll.u32 %v12514_v20, 30 }
 0x113   : > { %v3195_v52 = vor.u32 8388608, %v3194_v40  ;;  %v3227_v44 = vsel %vm3219_vm15, %v12516_v25, %v12519_v28  ;;  %v3229_v56 = vsel %vm3221_vm0, %v3212_v29, %v3228_v31  ;;  %v3138_v58 = vmul.u32 %v12466_v34, %v3122_v21 }
 0x114   : > { %17367 = vst [vmem:[#allocation22_spill] sm:$0xff] %v12534_v45  ;;  %v3142_v59 = vsel %vm3140_vm14, %v3141_v19, %v12483_v55  ;;  %v17055_v61 = vand.u32 2147483647, %v12407_v46  ;;  %vm3220_vm1 = vcmp.lt.s32.totalorder %v12502_v11, 2  ;;  %v3231_v40 = vsel %vm3219_vm15, %v12519_v28, %v3212_v29 }
 0x115   : > { %v3233_v35 = vsel %vm3221_vm0, %v3215_v57, %v3232_v33  ;;  %v3301_v4 = vadd.s32 1, %v9302_v32  ;;  %v3230_v6 = vsel %vm3220_vm1, %v3227_v44, %v3229_v56  ;;  %v12554_v8 = vsub.s32 32, %v3409_v37 }
 0x116   : > { %v3606_v34 = vand.u32 2139095040, %v12534_v45  ;;  %v12557_v55 = vsub.s32 %v3039_v48, %v3042_v51  ;;  %v12559_v9 = vshll.u32 %v3195_v52, 8  ;;  %v12561_v10 = vadd.s32 %v3142_v59, %v3138_v58 }
 0x117   : > { %v3234_v12 = vsel %vm3220_vm1, %v3231_v40, %v3233_v35  ;;  %v3402_v14 = vand.u32 8388607, %v17055_v61  ;;  %v3421_v57 = vshll.u32 %v17073_v3, %v3409_v37  ;;  %vm3302_vm2 = vcmp.gt.s32.totalorder %v3301_v4, 0 }
 0x118   : > { %v12568_v15 = vmul.u32.u64.low %v12559_v9, %v3230_v6  ;;  %v12569_v17 = vmul.u32.u64.high %v12559_v9, %v3230_v6, %v12568_v15  ;;  %v3422_v48 = vshrl.u32 %v17071_v60, %v12554_v8  ;;  %v3424_v23 = vshll.u32 %v17071_v60, %v3409_v37 }
 0x119   : > { %v3425_v22 = vshrl.u32 %v17057_v63, %v12554_v8  ;;  %v3607_v18 = vshrl.u32 %v3606_v34, 23  ;;  %v3045_v16 = vsub.s32 0, %v12557_v55  ;;  %v12583_v27 = vshrl.u32 %v3407_v30, 5 }
 0x11a   : > { %v12580_v24 = vmul.u32.u64.low %v12559_v9, %v3234_v12  ;;  %v12581_v26 = vmul.u32.u64.high %v12559_v9, %v3234_v12, %v12580_v24  ;;  %v3144_v19 = vadd.s32 536870912, %v12561_v10  ;;  %v3412_v31 = vshll.u32 %v17077_v13, %v3409_v37 }
 0x11b   : > { %v3415_v21 = vshll.u32 %v17059_v5, %v3409_v37  ;;  %v3303_v32 = vsel %vm3302_vm2, %v3301_v4, 0  ;;  %v3413_v33 = vshrl.u32 %v17059_v5, %v12554_v8  ;;  %v3416_v51 = vshrl.u32 %v17075_v7, %v12554_v8 }
 0x11c   : > { %v3418_v52 = vshll.u32 %v17075_v7, %v3409_v37  ;;  %v3419_v44 = vshrl.u32 %v17073_v3, %v12554_v8  ;;  %v3203_v30 = vshrl.u32 %v17077_v13, %v12468_v36  ;;  %v3423_v56 = vor.u32 %v3422_v48, %v3421_v57 }
 0x11d   : > { %v3426_v58 = vor.u32 %v3425_v22, %v3424_v23  ;;  %v9314_v59 = vadd.s32 4294967169, %v3607_v18  ;;  %v3403_v40 = vor.u32 8388608, %v3402_v14  ;;  %vm3430_vm3 = vcmp.lt.s32.totalorder %v12583_v27, 4  ;;  %v2917_v14 = vpop.permute.xlu0 %2916 }
 0x11e   : > { %v3305_v35 = vand.u32 31, %v3303_v32  ;;  %v12599_v4 = vmin.u32 %v3045_v16, %v12557_v55  ;;  %v12601_v6 = vshrl.u32 %v3144_v19, 30  ;;  %v3223_v37 = vsel %vm3219_vm15, %v3203_v30, %v12516_v25 }
 0x11f   : > { %v3224_v34 = vsel %vm3222_vm13, %v3212_v29, 2102212464  ;;  %v3414_v36 = vor.u32 %v3413_v33, %v3412_v31  ;;  %v3417_v12 = vor.u32 %v3416_v51, %v3415_v21  ;;  %v3420_v57 = vor.u32 %v3419_v44, %v3418_v52 }
 0x120   : > { %17368 = vst [vmem:[#allocation23_spill] sm:$0xff] %v12601_v6  ;;  %vm3427_vm4 = vcmp.lt.s32.totalorder %v12583_v27, 1  ;;  %vm3429_vm5 = vcmp.lt.s32.totalorder %v12583_v27, 3  ;;  %v3436_v48 = vsel %vm3430_vm3, %v3423_v56, 920167782  ;;  %v3613_v22 = vadd.s32 1, %v9314_v59 }
 0x121   : > { %v3440_v23 = vsel %vm3430_vm3, %v3426_v58, 1326507024  ;;  %v3225_v25 = vsel %vm3221_vm0, %v12519_v28, %v3224_v34  ;;  %v3245_v29 = vadd.s32 1, %v12569_v17  ;;  %v17054_v18 = vand.u32 2147483647, %v12473_v49 }
 0x122   : > { %v12619_v16 = vsub.s32 32, %v3305_v35  ;;  %v3047_v24 = vclz %v12599_v4  ;;  %vm3244_vm6 = vc.u32 %v12581_v26, %v12568_v15  ;;  %vm3428_vm7 = vcmp.lt.s32.totalorder %v12583_v27, 2 }
 0x123   : > { %v2922_v19 = vrot.slane %v2917_v14, %v12338_v39  ;;  %v3435_v31 = vsel %vm3427_vm4, %v3414_v36, %v3417_v12  ;;  %v3437_v28 = vsel %vm3429_vm5, %v3420_v57, %v3436_v48  ;;  %v3439_v21 = vsel %vm3427_vm4, %v3417_v12, %v3420_v57 }
 0x124   : > { %v3441_v33 = vsel %vm3429_vm5, %v3423_v56, %v3440_v23  ;;  %v3146_v51 = vshll.u32 %v12601_v6, 30  ;;  %v3226_v52 = vsel %vm3220_vm1, %v3223_v37, %v3225_v25  ;;  %v12637_v44 = vshll.u32 %v3403_v40, 8 }
 0x125   : > { %vm3614_vm8 = vcmp.gt.s32.totalorder %v3613_v22, 0  ;;  %v3246_v30 = vsel %vm3244_vm6, %v3245_v29, %v12569_v17  ;;  %v3411_v58 = vshrl.u32 %v17077_v13, %v12554_v8  ;;  %v3298_v59 = vand.u32 8388607, %v17054_v18 }
 0x126   : > { %v3318_v4 = vshrl.u32 %v17071_v60, %v12619_v16  ;;  %v3432_v56 = vsel %vm3430_vm3, %v3420_v57, 2102212464  ;;  %v3438_v11 = vsel %vm3428_vm7, %v3435_v31, %v3437_v28  ;;  %v3442_v40 = vsel %vm3428_vm7, %v3439_v21, %v3441_v33 }
 0x127   : > { %v3321_v17 = vshrl.u32 %v17057_v63, %v12619_v16  ;;  %v12654_v37 = vshrl.u32 %v3303_v32, 5  ;;  %v3317_v8 = vshll.u32 %v17073_v3, %v3305_v35  ;;  %v3615_v34 = vsel %vm3614_vm8, %v3613_v22, 0 }
 0x128   : > { %v12658_v14 = vmul.f32 %v2922_v19, %v12341_v41  ;;  %v3309_v57 = vshrl.u32 %v17059_v5, %v12619_v16  ;;  %v3312_v48 = vshrl.u32 %v17075_v7, %v12619_v16  ;;  %v3315_v23 = vshrl.u32 %v17073_v3, %v12619_v16 }
 0x129   : > { %v3320_v25 = vshll.u32 %v17071_v60, %v3305_v35  ;;  %v12668_v32 = vmul.u32.u64.low %v12637_v44, %v3438_v11  ;;  %v12669_v29 = vmul.u32.u64.high %v12637_v44, %v3438_v11, %v12668_v32  ;;  %v3308_v22 = vshll.u32 %v17077_v13, %v3305_v35 }
 0x12a   : > { %17369 = vst [vmem:[#allocation24_spill] sm:$0xff] %v12658_v14  ;;  %v3319_v19 = vor.u32 %v3318_v4, %v3317_v8  ;;  %v3311_v31 = vshll.u32 %v17059_v5, %v3305_v35  ;;  %v3314_v28 = vshll.u32 %v17075_v7, %v3305_v35  ;;  %v3617_v33 = vand.u32 31, %v3615_v34 }
 0x12b   : > { %v3322_v21 = vor.u32 %v3321_v17, %v3320_v25  ;;  %v12676_v2 = vmul.u32.u64.low %v12637_v44, %v3442_v40  ;;  %v12677_v1 = vmul.u32.u64.high %v12637_v44, %v3442_v40, %v12676_v2  ;;  %v3299_v18 = vor.u32 8388608, %v3298_v59 }
 0x12c   : > { %v3502_v61 = vand.u32 2139095040, %v12658_v14  ;;  %v12680_v42 = vor.u32 %v3309_v57, %v3308_v22  ;;  %v12682_v11 = vor.u32 %v3312_v48, %v3311_v31  ;;  %v3316_v63 = vor.u32 %v3315_v23, %v3314_v28 }
 0x12d   : > { %vm3326_vm9 = vcmp.lt.s32.totalorder %v12654_v37, 4  ;;  %v3242_v4 = vmul.u32 %v12559_v9, %v3226_v52  ;;  %v3431_v35 = vsel %vm3427_vm4, %v3411_v58, %v3414_v36  ;;  %v3433_v17 = vsel %vm3429_vm5, %v3417_v12, %v3432_v56 }
 0x12e   : > { %v3332_v2 = vsel %vm3326_vm9, %v3319_v19, 920167782  ;;  %v12692_v59 = vadd.s32 4294967294, %v3047_v24  ;;  %v12695_v40 = vsub.s32 %v12561_v10, %v3146_v51  ;;  %v3336_v8 = vsel %vm3326_vm9, %v3322_v21, 1326507024 }
 0x12f   : > { %v12699_v57 = vsub.s32 32, %v3617_v33  ;;  %v12701_v9 = vadd.s32 %v3246_v30, %v3242_v4  ;;  %vm3323_vm10 = vcmp.lt.s32.totalorder %v12654_v37, 1  ;;  %vm3325_vm11 = vcmp.lt.s32.totalorder %v12654_v37, 3 }
 0x130   : > { %v3503_v36 = vshrl.u32 %v3502_v61, 23  ;;  %v3434_v12 = vsel %vm3428_vm7, %v3431_v35, %v3433_v17  ;;  %v3331_v10 = vsel %vm3323_vm10, %v12680_v42, %v12682_v11  ;;  %v3333_v24 = vsel %vm3325_vm11, %v3316_v63, %v3332_v2 }
 0x131   : > { %v12713_v51 = vshll.u32 %v3299_v18, 8  ;;  %v3453_v52 = vadd.s32 1, %v12669_v29  ;;  %vm3324_vm12 = vcmp.lt.s32.totalorder %v12654_v37, 2  ;;  %v3335_v61 = vsel %vm3323_vm10, %v12682_v11, %v3316_v63 }
 0x132   : > { %v3337_v27 = vsel %vm3325_vm11, %v3319_v19, %v3336_v8  ;;  %v3629_v30 = vshll.u32 %v17073_v3, %v3617_v33  ;;  %v3630_v58 = vshrl.u32 %v17071_v60, %v12699_v57  ;;  %v3632_v56 = vshll.u32 %v17071_v60, %v3617_v33 }
 0x133   : > { %v17370_v18 = vmov 1326507024   ;;  %vm3452_vm13 = vc.u32 %v12677_v1, %v12668_v32  ;;  %v3334_v23 = vsel %vm3324_vm12, %v3331_v10, %v3333_v24  ;;  %v12732_v25 = vshrl.u32 %v3615_v34, 5 }
 0x134   : > { %v3633_v48 = vshrl.u32 %v17370_v18, %v12699_v57  ;;  %v9310_v22 = vadd.s32 4294967169, %v3503_v36  ;;  %v3338_v19 = vsel %vm3324_vm12, %v3335_v61, %v3337_v27  ;;  %v17061_v31 = vand.u32 2147483647, %v12534_v45 }
 0x135   : > { %v3620_v28 = vshll.u32 %v17077_v13, %v3617_v33  ;;  %v3623_v21 = vshll.u32 %v17059_v5, %v3617_v33  ;;  %v3621_v4 = vshrl.u32 %v17059_v5, %v12699_v57  ;;  %v3624_v35 = vshrl.u32 %v17075_v7, %v12699_v57 }
 0x136   : > { %v3626_v17 = vshll.u32 %v17075_v7, %v3617_v33  ;;  %v3627_v34 = vshrl.u32 %v17073_v3, %v12699_v57  ;;  %v12747_v2 = vmul.u32.u64.low %v12713_v51, %v3334_v23  ;;  %v12748_v8 = vmul.u32.u64.high %v12713_v51, %v3334_v23, %v12747_v2 }
 0x137   : > { %v3631_v36 = vor.u32 %v3630_v58, %v3629_v30  ;;  %v3634_v10 = vor.u32 %v3633_v48, %v3632_v56  ;;  %v12752_v24 = vmul.u32.u64.low %v12713_v51, %v3338_v19  ;;  %v12753_v61 = vmul.u32.u64.high %v12713_v51, %v3338_v19, %v12752_v24 }
 0x138   : > { %17371 = vst [vmem:[#allocation25_spill] sm:$0xff] %v12747_v2  ;;  %vm3638_vm14 = vcmp.lt.s32.totalorder %v12732_v25, 4  ;;  %v3509_v27 = vadd.s32 1, %v9310_v22  ;;  %v3450_v5 = vmul.u32 %v12637_v44, %v3434_v12  ;;  %v3454_v33 = vsel %vm3452_vm13, %v3453_v52, %v12669_v29  ;;  %v2944_v52 = vpop.permute.xlu1 %2943 }
 0x139   : > { %v3307_v23 = vshrl.u32 %v17077_v13, %v12619_v16  ;;  %v3610_v30 = vand.u32 8388607, %v17061_v31  ;;  %v3328_v58 = vsel %vm3326_vm9, %v3316_v63, 2102212464  ;;  %v12767_v56 = vor.u32 %v3621_v4, %v3620_v28 }
 0x13a   : > { %v12769_v48 = vor.u32 %v3624_v35, %v3623_v21  ;;  %v3628_v22 = vor.u32 %v3627_v34, %v3626_v17  ;;  %vm3635_vm15 = vcmp.lt.s32.totalorder %v12732_v25, 1  ;;  %vm3637_vm0 = vcmp.lt.s32.totalorder %v12732_v25, 3 }
 0x13b   : > { %v3644_v44 = vsel %vm3638_vm14, %v3631_v36, 920167782  ;;  %v3648_v16 = vsel %vm3638_vm14, %v3634_v10, 1326507024  ;;  %v3149_v29 = vsub.s32 0, %v12695_v40  ;;  %v3248_v12 = vadd.s32 536870912, %v12701_v9 }
 0x13c   : > { %v12779_v63 = vadd.s32 %v3454_v33, %v3450_v5  ;;  %vm3510_vm1 = vcmp.gt.s32.totalorder %v3509_v27, 0  ;;  %v3327_v19 = vsel %vm3323_vm10, %v3307_v23, %v12680_v42  ;;  %v3329_v28 = vsel %vm3325_vm11, %v12682_v11, %v3328_v58 }
 0x13d   : > { %v3611_v21 = vor.u32 8388608, %v3610_v30  ;;  %vm3636_vm2 = vcmp.lt.s32.totalorder %v12732_v25, 2  ;;  %v3643_v4 = vsel %vm3635_vm15, %v12767_v56, %v12769_v48  ;;  %v3645_v5 = vsel %vm3637_vm0, %v3628_v22, %v3644_v44 }
 0x13e   : > { %v3647_v35 = vsel %vm3635_vm15, %v12769_v48, %v3628_v22  ;;  %v3649_v42 = vsel %vm3637_vm0, %v3631_v36, %v3648_v16  ;;  %v3349_v11 = vadd.s32 1, %v12748_v8  ;;  %v3511_v17 = vsel %vm3510_vm1, %v3509_v27, 0 }
 0x13f   : > { %v2949_v34 = vrot.slane %v2944_v52, %v12338_v39  ;;  %v9295_v10 = vmin.u32 %v3149_v29, %v12695_v40  ;;  %v3330_v24 = vsel %vm3324_vm12, %v3327_v19, %v3329_v28  ;;  %vm3348_vm3 = vc.u32 %v12753_v61, %v12747_v2  ;;  %v2935_v29 = vpop.permute.xlu0 %2934 }
 0x140   : > { %v12806_v33 = vshrl.u32 %v3248_v12, 30  ;;  %v3456_v23 = vadd.s32 536870912, %v12779_v63  ;;  %v3646_v36 = vsel %vm3636_vm2, %v3643_v4, %v3645_v5  ;;  %v3650_v27 = vsel %vm3636_vm2, %v3647_v35, %v3649_v42 }
 0x141   : > { %vm9293_vm4 = vcmp.lt.s32.totalorder %v12692_v59, 0  ;;  %v12814_v30 = vshll.u32 %v3611_v21, 8  ;;  %v3513_v58 = vand.u32 31, %v3511_v17  ;;  %v3346_v37 = vmul.u32 %v12713_v51, %v3330_v24 }
 0x142   : > { %17372 = vst [vmem:[#allocation26_spill] sm:$0xff] %v12806_v33  ;;  %v3350_v44 = vsel %vm3348_vm3, %v3349_v11, %v12748_v8  ;;  %v12819_v16 = vmul.f32 %v2949_v34, %v12341_v41  ;;  %v12831_v21 = vsel %vm9293_vm4, 0, %v12692_v59  ;;  %v3151_v4 = vclz %v9295_v10 }
 0x143   : > { %v12822_v12 = vmul.u32.u64.low %v12814_v30, %v3650_v27  ;;  %v12823_v52 = vmul.u32.u64.high %v12814_v30, %v3650_v27, %v12822_v12  ;;  %v12826_v19 = vmul.u32.u64.low %v12814_v30, %v3646_v36  ;;  %v12827_v28 = vmul.u32.u64.high %v12814_v30, %v3646_v36, %v12826_v19 }
 0x144   : > { %17373 = vst [vmem:[#allocation27_spill] sm:$0xff] %v12819_v16  ;;  %v3250_v51 = vshll.u32 %v12806_v33, 30  ;;  %v12834_v8 = vshrl.u32 %v3456_v23, 30  ;;  %v12836_v5 = vadd.s32 %v3350_v44, %v3346_v37  ;;  %v12838_v35 = vsub.s32 32, %v3513_v58  ;;  %v2962_v33 = vpop.permute.xlu1 %2961 }
 0x145   : > { %17374 = vst [vmem:[#allocation28_spill] sm:$0xff] %v12823_v52  ;;  %17375 = vst [vmem:[#allocation29_spill] sm:$0xff] %v12826_v19  ;;  %v2940_v42 = vrot.slane %v2935_v29, %v12338_v39  ;;  %v12843_v11 = vadd.s32 %v12409_v47, %v12417_v53  ;;  %v3619_v34 = vshrl.u32 %v17077_v13, %v12699_v57  ;;  %v3814_v59 = vand.u32 2139095040, %v12819_v16 }
 0x146   : > { %17376 = vst [vmem:[#allocation30_spill] sm:$0xff] %v12834_v8  ;;  %v12853_v23 = vadd.s32 %v12482_v54, %v12492_v0  ;;  %v3640_v36 = vsel %vm3638_vm14, %v3628_v22, 2102212464  ;;  %v3055_v47 = vsub.s32 4294967266, %v12831_v21  ;;  %v9296_v53 = vadd.s32 4294967294, %v3151_v4 }
 0x147   : > { %v12859_v27 = vsub.s32 %v12701_v9, %v3250_v51  ;;  %v3458_v57 = vshll.u32 %v12834_v8, 30  ;;  %v3352_v37 = vadd.s32 536870912, %v12836_v5  ;;  %v3526_v29 = vshrl.u32 %v17071_v60, %v12838_v35 }
 0x148   : > { %v12867_v54 = vmul.f32 %v2940_v42, %v12341_v41  ;;  %v3639_v0 = vsel %vm3635_vm15, %v3619_v34, %v12767_v56  ;;  %v3641_v9 = vsel %vm3637_vm0, %v12769_v48, %v3640_v36  ;;  %v3529_v22 = vshrl.u32 %v17370_v18, %v12838_v35 }
 0x149   : > { %17377 = vst [vmem:[#allocation31_spill] sm:$0xff] %v12859_v27  ;;  %v3815_v12 = vshrl.u32 %v3814_v59, 23  ;;  %vm3660_vm5 = vc.u32 %v12823_v52, %v12826_v19  ;;  %v3661_v4 = vadd.s32 1, %v12827_v28  ;;  %v12880_v51 = vshrl.u32 %v3511_v17, 5 }
 0x14a   : > { %17378 = vst [vmem:[#allocation32_spill] sm:$0xff] %v12867_v54  ;;  %v3525_v42 = vshll.u32 %v17073_v3, %v3513_v58  ;;  %v17379_v31 = vmov 2475754826   ;;  %v3520_v34 = vshrl.u32 %v17075_v7, %v12838_v35  ;;  %v3523_v48 = vshrl.u32 %v17073_v3, %v12838_v35 }
 0x14b   : > { %v3517_v56 = vshrl.u32 %v17379_v31, %v12838_v35  ;;  %v3528_v59 = vshll.u32 %v17071_v60, %v3513_v58  ;;  %v12890_v36 = vshrl.u32 %v3352_v37, 30  ;;  %v3642_v24 = vsel %vm3636_vm2, %v3639_v0, %v3641_v9 }
 0x14c   : > { %v3516_v17 = vshll.u32 %v17077_v13, %v3513_v58  ;;  %v3527_v10 = vor.u32 %v3526_v29, %v3525_v42  ;;  %v3519_v44 = vshll.u32 %v17379_v31, %v3513_v58  ;;  %v3522_v38 = vshll.u32 %v17075_v7, %v3513_v58 }
 0x14d   : > { %17380 = vst [vmem:[#allocation33_spill] sm:$0xff] %v12890_v36  ;;  %v3530_v8 = vor.u32 %v3529_v22, %v3528_v59  ;;  %v9322_v6 = vadd.s32 4294967169, %v3815_v12  ;;  %v12898_v45 = vsub.s32 %v12779_v63, %v3458_v57  ;;  %v3662_v37 = vsel %vm3660_vm5, %v3661_v4, %v12827_v28 }
 0x14e   : > { %v17381_v25 = vand.u32 2147483647, %v12658_v14  ;;  %v3710_v29 = vand.u32 2139095040, %v12867_v54  ;;  %v3518_v9 = vor.u32 %v3517_v56, %v3516_v17  ;;  %v3521_v42 = vor.u32 %v3520_v34, %v3519_v44 }
 0x14f   : > { %v3524_v60 = vor.u32 %v3523_v48, %v3522_v38  ;;  %vm3534_vm6 = vcmp.lt.s32.totalorder %v12880_v51, 4  ;;  %v3354_v58 = vshll.u32 %v12890_v36, 30  ;;  %v3658_v63 = vmul.u32 %v12814_v30, %v3642_v24 }
 0x150   : > { %v3506_v0 = vand.u32 8388607, %v17381_v25  ;;  %v3540_v57 = vsel %vm3534_vm6, %v3527_v10, 920167782  ;;  %v2967_v22 = vrot.slane %v2962_v33, %v12338_v39  ;;  %vm9297_vm7 = vcmp.lt.s32.totalorder %v9296_v53, 0 }
 0x151   : > { %v3253_v28 = vsub.s32 0, %v12859_v27  ;;  %v3544_v12 = vsel %vm3534_vm6, %v3530_v8, 1326507024  ;;  %v3821_v4 = vadd.s32 1, %v9322_v6  ;;  %v12916_v44 = vadd.s32 %v3662_v37, %v3658_v63 }
 0x152   : > { %vm3531_vm8 = vcmp.lt.s32.totalorder %v12880_v51, 1  ;;  %vm3533_vm9 = vcmp.lt.s32.totalorder %v12880_v51, 3  ;;  %v3711_v38 = vshrl.u32 %v3710_v29, 23  ;;  %v3461_v30 = vsub.s32 0, %v12898_v45  ;;  %v2953_v29 = vpop.permute.xlu0 %2952 }
 0x153   : > { %v3507_v24 = vor.u32 8388608, %v3506_v0  ;;  %v3539_v33 = vsel %vm3531_vm8, %v3518_v9, %v3521_v42  ;;  %v3541_v56 = vsel %vm3533_vm9, %v3524_v60, %v3540_v57  ;;  %v12926_v34 = vsub.s32 %v12836_v5, %v3354_v58 }
 0x154   : > { %v3543_v6 = vsel %vm3531_vm8, %v3521_v42, %v3524_v60  ;;  %v3545_v8 = vsel %vm3533_vm9, %v3527_v10, %v3544_v12  ;;  %v12933_v48 = vmul.f32 %v2967_v22, %v12341_v41  ;;  %v17384_v59 = vsub.s32 32, %v12831_v21 }
 0x155   : > { %17382 = vst [vmem:[#allocation34_spill] sm:$0xff] %v12926_v34  ;;  %v12939_v37 = vsel %vm9297_vm7, 0, %v9296_v53  ;;  %vm3532_vm10 = vcmp.lt.s32.totalorder %v12880_v51, 2  ;;  %vm3822_vm11 = vcmp.gt.s32.totalorder %v3821_v4, 0  ;;  %v12942_v5 = vadd.s32 127, %v3055_v47 }
 0x156   : > { %17383 = vst [vmem:[#allocation35_spill] sm:$0xff] %v12933_v48  ;;  %v3053_v17 = vshrl.u32 %v12843_v11, %v17384_v59  ;;  %v3664_v25 = vadd.s32 536870912, %v12916_v44  ;;  %v3542_v10 = vsel %vm3532_vm10, %v3539_v33, %v3541_v56  ;;  %v9318_v0 = vadd.s32 4294967169, %v3711_v38 }
 0x157   : > { %v9299_v58 = vmin.u32 %v3253_v28, %v12859_v27  ;;  %v9307_v63 = vmin.u32 %v3461_v30, %v12898_v45  ;;  %v3546_v11 = vsel %vm3532_vm10, %v3543_v6, %v3545_v8  ;;  %v12951_v53 = vshll.u32 %v3507_v24, 8 }
 0x158   : > { %v3155_v57 = vsub.s32 32, %v12939_v37  ;;  %v3357_v47 = vsub.s32 0, %v12926_v34  ;;  %v3823_v22 = vsel %vm3822_vm11, %v3821_v4, 0  ;;  %v4022_v12 = vand.u32 2139095040, %v12933_v48 }
 0x159   : > { %v3159_v33 = vsub.s32 4294967266, %v12939_v37  ;;  %v12958_v38 = vmul.u32.u64.low %v12951_v53, %v3542_v10  ;;  %v12959_v56 = vmul.u32.u64.high %v12951_v53, %v3542_v10, %v12958_v38  ;;  %v2958_v28 = vrot.slane %v2953_v29, %v12338_v39 }
 0x15a   : > { %v12963_v30 = vshrl.u32 %v3664_v25, 30  ;;  %v12966_v24 = vmul.u32.u64.low %v12951_v53, %v3546_v11  ;;  %v12967_v6 = vmul.u32.u64.high %v12951_v53, %v3546_v11, %v12966_v24  ;;  %v3717_v8 = vadd.s32 1, %v9318_v0 }
 0x15b   : > { %17385 = vst [vmem:[#allocation36_spill] sm:$0xff] %v12958_v38  ;;  %v3255_v59 = vclz %v9299_v58  ;;  %v3463_v4 = vclz %v9307_v63  ;;  %v3536_v3 = vsel %vm3534_vm6, %v3524_v60, 2102212464  ;;  %v3825_v7 = vand.u32 31, %v3823_v22 }
 0x15c   : > { %17386 = vst [vmem:[#allocation37_spill] sm:$0xff] %v12963_v30  ;;  %17387 = vst [vmem:[#allocation38_spill] sm:$0xff] %v12967_v6  ;;  %v12972_v13 = vmin.u32 %v3357_v47, %v12926_v34  ;;  %v17388_v10 = vmov 683565275   ;;  %v17081_v25 = vand.u32 2147483647, %v12819_v16  ;;  %v17389_v11 = vshll.u32 %v12557_v55, %v12831_v21 }
 0x15d   : > { %v3515_v36 = vshrl.u32 %v17388_v10, %v12838_v35  ;;  %v4023_v29 = vshrl.u32 %v4022_v12, 23  ;;  %v12985_v60 = vadd.s32 %v12568_v15, %v12581_v26  ;;  %v12988_v58 = vmul.f32 %v2958_v28, %v12341_v41 }
 0x15e   : > { %v12980_v24 = vor.u32 %v3053_v17, %v17389_v11  ;;  %v3666_v63 = vshll.u32 %v12963_v30, 30  ;;  %v3537_v47 = vsel %vm3533_vm9, %v3521_v42, %v3536_v3  ;;  %vm3718_vm12 = vcmp.gt.s32.totalorder %v3717_v8, 0 }
 0x15f   : > { %v3535_v35 = vsel %vm3531_vm8, %v3515_v36, %v3518_v9  ;;  %v12996_v55 = vshrl.u32 %v12853_v23, %v3155_v57  ;;  %v12998_v21 = vadd.s32 127, %v3159_v33  ;;  %v13000_v17 = vadd.s32 4294967294, %v3255_v59 }
 0x160   : > { %v3826_v15 = vsub.s32 32, %v3825_v7  ;;  %v13002_v26 = vadd.s32 4294967294, %v3463_v4  ;;  %v3818_v12 = vand.u32 8388607, %v17081_v25  ;;  %v9330_v36 = vadd.s32 4294967169, %v4023_v29 }
 0x161   : > { %v3538_v3 = vsel %vm3532_vm10, %v3535_v35, %v3537_v47  ;;  %v3719_v23 = vsel %vm3718_vm12, %v3717_v8, 0  ;;  %v3918_v42 = vand.u32 2139095040, %v12988_v58  ;;  %v13012_v57 = vsub.s32 %v12916_v44, %v3666_v63 }
 0x162   : > { %vm3556_vm13 = vc.u32 %v12967_v6, %v12958_v38  ;;  %v3557_v33 = vadd.s32 1, %v12959_v56  ;;  %v13017_v28 = vshrl.u32 %v3823_v22, 5  ;;  %v3828_v59 = vshll.u32 %v17388_v10, %v3825_v7 }
 0x163   : > { %v3829_v51 = vshrl.u32 %v17379_v31, %v3826_v15  ;;  %v17390_v4 = vmov 2131351028   ;;  %v17391_v11 = vmov 2102212464   ;;  %v17392_v47 = vmov 920167782  }
 0x164   : > { %v3834_v29 = vshll.u32 %v17390_v4, %v3825_v7  ;;  %v3835_v8 = vshrl.u32 %v17391_v11, %v3826_v15  ;;  %v3837_v35 = vshll.u32 %v17391_v11, %v3825_v7  ;;  %v3838_v44 = vshrl.u32 %v17392_v47, %v3826_v15 }
 0x165   : > { %v3721_v63 = vand.u32 31, %v3719_v23  ;;  %v4029_v25 = vadd.s32 1, %v9330_v36  ;;  %v3819_v0 = vor.u32 8388608, %v3818_v12  ;;  %v3840_v41 = vshll.u32 %v17392_v47, %v3825_v7 }
 0x166   : > { %v3841_v22 = vshrl.u32 %v17370_v18, %v3826_v15  ;;  %v3919_v9 = vshrl.u32 %v3918_v42, 23  ;;  %v3554_v39 = vmul.u32 %v12951_v53, %v3538_v3  ;;  %v3831_v30 = vshll.u32 %v17379_v31, %v3825_v7 }
 0x167   : > { %v3832_v16 = vshrl.u32 %v17390_v4, %v3826_v15  ;;  %v17393_v14 = vand.u32 2147483647, %v12867_v54  ;;  %v3558_v36 = vsel %vm3556_vm13, %v3557_v33, %v12959_v56  ;;  %v3827_v12 = vshrl.u32 %v17388_v10, %v3826_v15 }
 0x168   : > { %v3830_v62 = vor.u32 %v3829_v51, %v3828_v59  ;;  %v3836_v19 = vor.u32 %v3835_v8, %v3834_v29  ;;  %v3839_v52 = vor.u32 %v3838_v44, %v3837_v35  ;;  %vm3843_vm14 = vcmp.lt.s32.totalorder %v13017_v28, 1 }
 0x169   : > { %v3714_v20 = vand.u32 8388607, %v17393_v14  ;;  %v13038_v53 = vsub.s32 32, %v3721_v63  ;;  %vm4030_vm15 = vcmp.gt.s32.totalorder %v4029_v25, 0  ;;  %v3842_v7 = vor.u32 %v3841_v22, %v3840_v41 }
 0x16a   : > { %vm3846_vm0 = vcmp.lt.s32.totalorder %v13017_v28, 4  ;;  %v13041_v3 = vshll.u32 %v3819_v0, 8  ;;  %v9326_v14 = vadd.s32 4294967169, %v3919_v9  ;;  %v13043_v42 = vadd.s32 %v3558_v36, %v3554_v39 }
 0x16b   : > { %v3833_v54 = vor.u32 %v3832_v16, %v3831_v30  ;;  %v3715_v56 = vor.u32 8388608, %v3714_v20  ;;  %vm3844_vm1 = vcmp.lt.s32.totalorder %v13017_v28, 2  ;;  %vm3845_vm2 = vcmp.lt.s32.totalorder %v13017_v28, 3 }
 0x16c   : > { %v3847_v33 = vsel %vm3843_vm14, %v3827_v12, %v3830_v62  ;;  %v4031_v59 = vsel %vm4030_vm15, %v4029_v25, 0  ;;  %v3848_v41 = vsel %vm3846_vm0, %v3836_v19, 2102212464  ;;  %v3852_v51 = vsel %vm3846_vm0, %v3839_v52, 920167782 }
 0x16d   : > { %v3734_v0 = vshrl.u32 %v17392_v47, %v13038_v53  ;;  %v3737_v39 = vshrl.u32 %v17370_v18, %v13038_v53  ;;  %v3856_v16 = vsel %vm3846_vm0, %v3842_v7, 1326507024  ;;  %v3725_v20 = vshrl.u32 %v17379_v31, %v13038_v53 }
 0x16e   : > { %v3733_v30 = vshll.u32 %v17391_v11, %v3721_v63  ;;  %v3925_v9 = vadd.s32 1, %v9326_v14  ;;  %v3728_v29 = vshrl.u32 %v17390_v4, %v13038_v53  ;;  %v3731_v25 = vshrl.u32 %v17391_v11, %v13038_v53 }
 0x16f   : > { %v3736_v8 = vshll.u32 %v17392_v47, %v3721_v63  ;;  %v4033_v35 = vand.u32 31, %v4031_v59  ;;  %v3849_v44 = vsel %vm3845_vm2, %v3833_v54, %v3848_v41  ;;  %v3851_v22 = vsel %vm3843_vm14, %v3830_v62, %v3833_v54 }
 0x170   : > { %v13066_v36 = vshrl.u32 %v3719_v23, 5  ;;  %v3724_v12 = vshll.u32 %v17388_v10, %v3721_v63  ;;  %v3727_v7 = vshll.u32 %v17379_v31, %v3721_v63  ;;  %v3730_v14 = vshll.u32 %v17390_v4, %v3721_v63 }
 0x171   : > { %v3735_v15 = vor.u32 %v3734_v0, %v3733_v30  ;;  %v3738_v38 = vor.u32 %v3737_v39, %v3736_v8  ;;  %v3853_v6 = vsel %vm3845_vm2, %v3836_v19, %v3852_v51  ;;  %v3855_v49 = vsel %vm3843_vm14, %v3833_v54, %v3836_v19 }
 0x172   : > { %v3857_v41 = vsel %vm3845_vm2, %v3839_v52, %v3856_v16  ;;  %vm3926_vm3 = vcmp.gt.s32.totalorder %v3925_v9, 0  ;;  %v13077_v62 = vor.u32 %v3725_v20, %v3724_v12  ;;  %v13079_v23 = vor.u32 %v3728_v29, %v3727_v7 }
 0x173   : > { %v3732_v46 = vor.u32 %v3731_v25, %v3730_v14  ;;  %v13081_v34 = vsub.s32 32, %v4033_v35  ;;  %v13084_v63 = vadd.s32 536870912, %v13043_v42  ;;  %v13088_v51 = vsel %vm3844_vm1, %v3847_v33, %v3849_v44 }
 0x174   : > { %vm3742_vm4 = vcmp.lt.s32.totalorder %v13066_v36, 4  ;;  %v13091_v19 = vshll.u32 %v3715_v56, 8  ;;  %v3854_v52 = vsel %vm3844_vm1, %v3851_v22, %v3853_v6  ;;  %v3927_v39 = vsel %vm3926_vm3, %v3925_v9, 0 }
 0x175   : > { %v3748_v54 = vsel %vm3742_vm4, %v3735_v15, 920167782  ;;  %v3752_v0 = vsel %vm3742_vm4, %v3738_v38, 1326507024  ;;  %v3858_v16 = vsel %vm3844_vm1, %v3855_v49, %v3857_v41  ;;  %vm3739_vm5 = vcmp.lt.s32.totalorder %v13066_v36, 1 }
 0x176   : > { %vm3741_vm6 = vcmp.lt.s32.totalorder %v13066_v36, 3  ;;  %v17394_v56 = vand.u32 2147483647, %v12933_v48  ;;  %v3747_v6 = vsel %vm3739_vm5, %v13077_v62, %v13079_v23  ;;  %v3751_v38 = vsel %vm3739_vm5, %v13079_v23, %v3732_v46 }
 0x177   : > { %v4045_v28 = vshll.u32 %v17391_v11, %v4033_v35  ;;  %v4046_v49 = vshrl.u32 %v17392_v47, %v13081_v34  ;;  %v3749_v20 = vsel %vm3741_vm6, %v3732_v46, %v3748_v54  ;;  %v3753_v30 = vsel %vm3741_vm6, %v3735_v15, %v3752_v0 }
 0x178   : > { %v13105_v33 = vand.u32 8388607, %v17394_v56  ;;  %v13121_v9 = vshrl.u32 %v4031_v59, 5  ;;  %v3929_v29 = vand.u32 31, %v3927_v39  ;;  %v4036_v25 = vshll.u32 %v17388_v10, %v4033_v35 }
 0x179   : > { %v4037_v8 = vshrl.u32 %v17379_v31, %v13081_v34  ;;  %v4039_v44 = vshll.u32 %v17379_v31, %v4033_v35  ;;  %v4040_v22 = vshrl.u32 %v17390_v4, %v13081_v34  ;;  %v4042_v12 = vshll.u32 %v17390_v4, %v4033_v35 }
 0x17a   : > { %v4043_v7 = vshrl.u32 %v17391_v11, %v13081_v34  ;;  %v4048_v15 = vshll.u32 %v17392_v47, %v4033_v35  ;;  %v4049_v59 = vshrl.u32 %v17370_v18, %v13081_v34  ;;  %vm3740_vm7 = vcmp.lt.s32.totalorder %v13066_v36, 2 }
 0x17b   : > { %v13136_v14 = vmul.u32.u64.low %v13041_v3, %v3854_v52  ;;  %v13137_v41 = vmul.u32.u64.high %v13041_v3, %v3854_v52, %v13136_v14  ;;  %v4047_v54 = vor.u32 %v4046_v49, %v4045_v28  ;;  %v3750_v48 = vsel %vm3740_vm7, %v3747_v6, %v3749_v20 }
 0x17c   : > { %v13142_v0 = vmul.u32.u64.low %v13041_v3, %v3858_v16  ;;  %v13143_v56 = vmul.u32.u64.high %v13041_v3, %v3858_v16, %v13142_v0  ;;  %v13147_v43 = vsub.s32 32, %v3929_v29  ;;  %v3754_v35 = vsel %vm3740_vm7, %v3751_v38, %v3753_v30 }
 0x17d   : > { %v4027_v27 = vor.u32 8388608, %v13105_v33  ;;  %v13152_v52 = vor.u32 %v4037_v8, %v4036_v25  ;;  %v13154_v2 = vor.u32 %v4040_v22, %v4039_v44  ;;  %v3723_v28 = vshrl.u32 %v17388_v10, %v13038_v53 }
 0x17e   : > { %v13158_v49 = vor.u32 %v4043_v7, %v4042_v12  ;;  %v4050_v16 = vor.u32 %v4049_v59, %v4048_v15  ;;  %vm4054_vm8 = vcmp.lt.s32.totalorder %v13121_v9, 4  ;;  %v3744_v6 = vsel %vm3742_vm4, %v3732_v46, 2102212464 }
 0x17f   : > { %v13164_v20 = vmul.u32.u64.low %v13091_v19, %v3750_v48  ;;  %v13165_v38 = vmul.u32.u64.high %v13091_v19, %v3750_v48, %v13164_v20  ;;  %v4060_v33 = vsel %vm4054_vm8, %v4047_v54, 920167782  ;;  %vm4051_vm9 = vcmp.lt.s32.totalorder %v13121_v9, 1 }
 0x180   : > { %v13171_v30 = vmul.u32.u64.low %v13091_v19, %v3754_v35  ;;  %v13172_v25 = vmul.u32.u64.high %v13091_v19, %v3754_v35, %v13171_v30  ;;  %v3942_v53 = vshrl.u32 %v17392_v47, %v13147_v43  ;;  %vm4053_vm10 = vcmp.lt.s32.totalorder %v13121_v9, 3 }
 0x181   : > { %v4059_v46 = vsel %vm4051_vm9, %v13152_v52, %v13154_v2  ;;  %v3945_v8 = vshrl.u32 %v17370_v18, %v13147_v43  ;;  %v4061_v44 = vsel %vm4053_vm10, %v13158_v49, %v4060_v33  ;;  %v4064_v22 = vsel %vm4054_vm8, %v4050_v16, 1326507024 }
 0x182   : > { %v13190_v12 = vshrl.u32 %v3927_v39, 5  ;;  %v3941_v7 = vshll.u32 %v17391_v11, %v3929_v29  ;;  %v3933_v15 = vshrl.u32 %v17379_v31, %v13147_v43  ;;  %v3936_v59 = vshrl.u32 %v17390_v4, %v13147_v43 }
 0x183   : > { %v3939_v0 = vshrl.u32 %v17391_v11, %v13147_v43  ;;  %v3944_v35 = vshll.u32 %v17392_v47, %v3929_v29  ;;  %v3743_v33 = vsel %vm3739_vm5, %v3723_v28, %v13077_v62  ;;  %v3745_v39 = vsel %vm3741_vm6, %v13079_v23, %v3744_v6 }
 0x184   : > { %vm4052_vm11 = vcmp.lt.s32.totalorder %v13121_v9, 2  ;;  %v3943_v16 = vor.u32 %v3942_v53, %v3941_v7  ;;  %vm9309_vm12 = vcmp.lt.s32.totalorder %v13002_v26, 0  ;;  %v3932_v30 = vshll.u32 %v17388_v10, %v3929_v29 }
 0x185   : > { %v3935_v48 = vshll.u32 %v17379_v31, %v3929_v29  ;;  %v3938_v18 = vshll.u32 %v17390_v4, %v3929_v29  ;;  %v3946_v47 = vor.u32 %v3945_v8, %v3944_v35  ;;  %v4062_v11 = vsel %vm4052_vm11, %v4059_v46, %v4061_v44  ;;  %v17428_v31 = vld [vmem:[#allocation36_spill] sm:$0xff] }
 0x186   : > { %v4063_v62 = vsel %vm4051_vm9, %v13154_v2, %v13158_v49  ;;  %v4065_v23 = vsel %vm4053_vm10, %v4047_v54, %v4064_v22  ;;  %v17395_v28 = vand.u32 2147483647, %v12988_v58  ;;  %v13221_v53 = vor.u32 %v3933_v15, %v3932_v30 }
 0x187   : > { %v13223_v7 = vor.u32 %v3936_v59, %v3935_v48  ;;  %v3940_v29 = vor.u32 %v3939_v0, %v3938_v18  ;;  %vm3950_vm13 = vcmp.lt.s32.totalorder %v13190_v12, 4  ;;  %vm3868_vm14 = vc.u32 %v13143_v56, %v13136_v14 }
 0x188   : > { %v3922_v6 = vand.u32 8388607, %v17395_v28  ;;  %v3869_v46 = vadd.s32 1, %v13137_v41  ;;  %v13229_v8 = vshll.u32 %v4027_v27, 8  ;;  %v3956_v54 = vsel %vm3950_vm13, %v3943_v16, 920167782 }
 0x189   : > { %v3746_v44 = vsel %vm3740_vm7, %v3743_v33, %v3745_v39  ;;  %v3765_v22 = vadd.s32 1, %v13165_v38  ;;  %v4066_v18 = vsel %vm4052_vm11, %v4063_v62, %v4065_v23  ;;  %v3960_v48 = vsel %vm3950_vm13, %v3946_v47, 1326507024 }
 0x18a   : > { %v13241_v15 = vmul.u32.u64.low %v13229_v8, %v4062_v11  ;;  %v13242_v59 = vmul.u32.u64.high %v13229_v8, %v4062_v11, %v13241_v15  ;;  %vm3947_vm15 = vcmp.lt.s32.totalorder %v13190_v12, 1  ;;  %vm3949_vm0 = vcmp.lt.s32.totalorder %v13190_v12, 3 }
 0x18b   : > { %vm3764_vm1 = vc.u32 %v13172_v25, %v13164_v20  ;;  %v3923_v27 = vor.u32 8388608, %v3922_v6  ;;  %v3955_v36 = vsel %vm3947_vm15, %v13221_v53, %v13223_v7  ;;  %v3957_v47 = vsel %vm3949_vm0, %v3940_v29, %v3956_v54 }
 0x18c   : > { %v13256_v11 = vmul.u32.u64.low %v13229_v8, %v4066_v18  ;;  %v13257_v0 = vmul.u32.u64.high %v13229_v8, %v4066_v18, %v13256_v11  ;;  %v3959_v35 = vsel %vm3947_vm15, %v13223_v7, %v3940_v29  ;;  %v3961_v33 = vsel %vm3949_vm0, %v3943_v16, %v3960_v48 }
 0x18d   : > { %v3866_v39 = vmul.u32 %v13041_v3, %v13088_v51  ;;  %v3870_v30 = vsel %vm3868_vm14, %v3869_v46, %v13137_v41  ;;  %vm3948_vm2 = vcmp.lt.s32.totalorder %v13190_v12, 2  ;;  %v13272_v62 = vshrl.u32 %v13084_v63, 30 }
 0x18e   : > { %v3766_v23 = vsel %vm3764_vm1, %v3765_v22, %v13165_v38  ;;  %v4035_v28 = vshrl.u32 %v17388_v10, %v13081_v34  ;;  %v3958_v16 = vsel %vm3948_vm2, %v3955_v36, %v3957_v47  ;;  %v17120_v6 = vmov 0.0|0.0  }
 0x18f   : > { %11006 = vmatprep.subr.bf16.mxu1 %v17120_v6  ;;  %11038 = vmatprep.subr.bf16.mxu0 %v17120_v6  ;;  %v3762_v3 = vmul.u32 %v13091_v19, %v3746_v44  ;;  %v4056_v63 = vsel %vm4054_vm8, %v13158_v49, 2102212464  ;;  %v3962_v51 = vsel %vm3948_vm2, %v3959_v35, %v3961_v33  ;;  %v13287_v41 = vshll.u32 %v3923_v27, 8 }
 0x190   : > { %v3161_v34 = vshll.u32 %v12998_v21, 23  ;;  %v13293_v38 = vsel %vm9309_vm12, 0, %v13002_v26  ;;  %v17396_v46 = vclz %v12972_v13  ;;  %v3669_v19 = vsub.s32 0, %v13012_v57 }
 0x191   : > { %v13298_v44 = vadd.s32 %v3870_v30, %v3866_v39  ;;  %v13300_v49 = vadd.s32 %v3766_v23, %v3762_v3  ;;  %v13303_v22 = vmul.u32.u64.low %v13287_v41, %v3958_v16  ;;  %v13304_v18 = vmul.u32.u64.high %v13287_v41, %v3958_v16, %v13303_v22 }
 0x192   : > { %v9304_v54 = vadd.s32 4294967294, %v17396_v46  ;;  %v4055_v21 = vsel %vm4051_vm9, %v4035_v28, %v13152_v52  ;;  %v4057_v13 = vsel %vm4053_vm10, %v13154_v2, %v4056_v63  ;;  %vm9301_vm3 = vcmp.lt.s32.totalorder %v13000_v17, 0 }
 0x193   : > { %v13314_v26 = vmul.u32.u64.low %v13287_v41, %v3962_v51  ;;  %v13315_v48 = vmul.u32.u64.high %v13287_v41, %v3962_v51, %v13314_v26  ;;  %v3471_v27 = vsub.s32 4294967266, %v13293_v38  ;;  %v3562_v36 = vshll.u32 %v13272_v62, 30 }
 0x194   : > { %v4077_v47 = vadd.s32 1, %v13242_v59  ;;  %v17397_v11 = vshll.u32 %v12942_v5, 23  ;;  %v3156_v52 = vshll.u32 %v12695_v40, %v12939_v37  ;;  %vm9305_vm4 = vcmp.lt.s32.totalorder %v9304_v54, 0 }
 0x195   : > { %vm4076_vm5 = vc.u32 %v13257_v0, %v13241_v15  ;;  %v9315_v2 = vmin.u32 %v3669_v19, %v13012_v57  ;;  %v3872_v33 = vadd.s32 536870912, %v13298_v44  ;;  %v4058_v39 = vsel %vm4052_vm11, %v4055_v21, %v4057_v13 }
 0x196   : > { %v13323_v35 = vor.u32 4788187, %v17397_v11  ;;  %v3952_v30 = vsel %vm3950_vm13, %v3940_v29, 2102212464  ;;  %v3158_v5 = vor.u32 %v12996_v55, %v3156_v52  ;;  %v13337_v23 = vsel %vm9301_vm3, 0, %v13000_v17 }
 0x197   : > { %v3768_v40 = vadd.s32 536870912, %v13300_v49  ;;  %v3931_v37 = vshrl.u32 %v17388_v10, %v13147_v43  ;;  %v3162_v28 = vor.u32 4788187, %v3161_v34  ;;  %v3472_v16 = vadd.s32 127, %v3471_v27 }
 0x198   : > { %v13343_v3 = vsub.s32 %v13043_v42, %v3562_v36  ;;  %v4078_v9 = vsel %vm4076_vm5, %v4077_v47, %v13242_v59  ;;  %v13347_v63 = vsel %vm9305_vm4, 0, %v9304_v54  ;;  %v4074_v55 = vmul.u32 %v13229_v8, %v4058_v39 }
 0x199   : > { %v3951_v17 = vsel %vm3947_vm15, %v3931_v37, %v13221_v53  ;;  %v3953_v43 = vsel %vm3949_vm0, %v13223_v7, %v3952_v30  ;;  %v3263_v29 = vsub.s32 4294967266, %v13337_v23  ;;  %v3671_v51 = vclz %v9315_v2 }
 0x19a   : > { %v13357_v42 = vshrl.u32 %v3872_v33, 30  ;;  %v3973_v59 = vadd.s32 1, %v13304_v18  ;;  %v3467_v34 = vsub.s32 32, %v13293_v38  ;;  %v13361_v46 = vshrl.u32 %v3768_v40, 30 }
 0x19b   : > { %v13363_v8 = vadd.s32 %v4078_v9, %v4074_v55  ;;  %vm3972_vm6 = vc.u32 %v13315_v48, %v13303_v22  ;;  %v3165_v53 = vcvt.s32.f32 %v3158_v5  ;;  %v3367_v54 = vsub.s32 4294967266, %v13347_v63 }
 0x19c   : > { %v3565_v7 = vsub.s32 0, %v13343_v3  ;;  %v3954_v19 = vsel %vm3948_vm2, %v3951_v17, %v3953_v43  ;;  %v3163_v21 = vand.u32 2147483647, %v3162_v28  ;;  %v3259_v13 = vsub.s32 32, %v13337_v23 }
 0x19d   : > { %v3451_v26 = vadd.s32 %v12668_v32, %v12677_v1  ;;  %v3473_v27 = vshll.u32 %v3472_v16, 23  ;;  %v3264_v36 = vadd.s32 127, %v3263_v29  ;;  %v9316_v47 = vadd.s32 4294967294, %v3671_v51 }
 0x19e   : > { %v3874_v11 = vshll.u32 %v13357_v42, 30  ;;  %v3974_v52 = vsel %vm3972_vm6, %v3973_v59, %v13304_v18  ;;  %v3770_v33 = vshll.u32 %v13361_v46, 30  ;;  %v4080_v39 = vadd.s32 536870912, %v13363_v8  ;;  %v17399_v59 = vld [vmem:[#allocation31_spill] sm:$0xff] }
 0x19f   : > { %v3469_v2 = vshrl.u32 %v3451_v26, %v3467_v34  ;;  %v3970_v12 = vmul.u32 %v13287_v41, %v3954_v19  ;;  %v3059_v30 = vand.u32 2147483647, %v13323_v35  ;;  %v3061_v5 = vcvt.s32.f32 %v12980_v24 }
 0x1a0   : > { %v3368_v40 = vadd.s32 127, %v3367_v54  ;;  %v9311_v1 = vmin.u32 %v3565_v7, %v13343_v3  ;;  %vm17126_vm7 = vcmp.lt.s32.totalorder %v12350_v50, 0  ;;  %v3166_v32 = vmul.f32 %v3165_v53, %v3163_v21  ;;  %v17400_v21 = vld [vmem:[#allocation17_spill] sm:$0xff] }
 0x1a1   : > { %v3468_v18 = vshll.u32 %v12898_v45, %v13293_v38  ;;  %v3474_v37 = vor.u32 4788187, %v3473_v27  ;;  %v13385_v28 = vadd.s32 %v3974_v52, %v3970_v12  ;;  %v3265_v16 = vshll.u32 %v3264_v36, 23  ;;  %v17398_v45 = vld [vmem:[#allocation25_spill] sm:$0xff] }
 0x1a2   : > { %v3363_v9 = vsub.s32 32, %v13347_v63  ;;  %vm9317_vm8 = vcmp.lt.s32.totalorder %v9316_v47, 0  ;;  %v13389_v41 = vsub.s32 %v13298_v44, %v3874_v11  ;;  %v3261_v24 = vshrl.u32 %v12985_v60, %v3259_v13 }
 0x1a3   : > { %v3470_v35 = vor.u32 %v3469_v2, %v3468_v18  ;;  %v13393_v55 = vsub.s32 %v13300_v49, %v3770_v33  ;;  %v13395_v17 = vshrl.u32 %v4080_v39, 30  ;;  %v3062_v43 = vmul.f32 %v3061_v5, %v3059_v30  ;;  %v17405_v39 = vld [vmem:[#allocation19_spill] sm:$0xff] }
 0x1a4   : > { %v3347_v38 = vadd.s32 %v17398_v45, %v12753_v61  ;;  %v3369_v29 = vshll.u32 %v3368_v40, 23  ;;  %v3567_v51 = vclz %v9311_v1  ;;  %v3260_v34 = vshll.u32 %v17399_v59, %v13337_v23  ;;  %v17401_v23 = vld [vmem:[#allocation34_spill] sm:$0xff]  ;;  %v5257_v45 = vld [vmem:[#allocation3 + $0x8] sm:$0xff] }
 0x1a5   : > { %v3475_v53 = vand.u32 2147483647, %v3474_v37  ;;  %v13401_v44 = vsel %vm9317_vm8, 0, %v9316_v47  ;;  %v3976_v60 = vadd.s32 536870912, %v13385_v28  ;;  %v3167_v54 = vxor.u32 2147483648, %v3166_v32 }
 0x1a6   : > { %v3266_v7 = vor.u32 4788187, %v3265_v16  ;;  %v3365_v49 = vshrl.u32 %v3347_v38, %v3363_v9  ;;  %v3877_v19 = vsub.s32 0, %v13389_v41  ;;  %vm2981_vm9 = vcmp.lt.s32.totalorder %v17400_v21, 0  ;;  %v5303_v16 = vld [vmem:[#allocation3 + $0x178] sm:$0xff] }
 0x1a7   : > { %v3262_v13 = vor.u32 %v3261_v24, %v3260_v34  ;;  %v3477_v26 = vcvt.s32.f32 %v3470_v35  ;;  %v3773_v61 = vsub.s32 0, %v13393_v55  ;;  %v4082_v27 = vshll.u32 %v13395_v17, 30  ;;  %v5256_v35 = vld [vmem:[#allocation3] sm:$0xff] }
 0x1a8   : > { %v3364_v36 = vshll.u32 %v17401_v23, %v13347_v63  ;;  %v3370_v47 = vor.u32 4788187, %v3369_v29  ;;  %v3679_v11 = vsub.s32 4294967266, %v13401_v44  ;;  %v9312_v52 = vadd.s32 4294967294, %v3567_v51  ;;  %v17412_v23 = vld [vmem:[#allocation29_spill] sm:$0xff] }
 0x1a9   : > { %v17402_v2 = vand.u32 2147483647, %v12350_v50  ;;  %vm17125_vm11 = vcmp.lt.s32.totalorder %v17405_v39, 0  ;;  %v3478_v12 = vmul.f32 %v3477_v26, %v3475_v53  ;;  %v13418_v30 = vshrl.u32 %v3976_v60, 30  ;;  %v5258_v60 = vld [vmem:[#allocation3 + $0x10] sm:$0xff]  ;;  %v5277_v26 = vld [vmem:[#allocation3 + $0xa8] sm:$0xff] }
 0x1aa   : > { %v3168_v5 = vsel %vm17126_vm7, %v3167_v54, %v3166_v32  ;;  %v3267_v40 = vand.u32 2147483647, %v3266_v7  ;;  %v3366_v63 = vor.u32 %v3365_v49, %v3364_v36  ;;  %v9323_v1 = vmin.u32 %v3877_v19, %v13389_v41  ;;  %v5259_v54 = vld [vmem:[#allocation3 + $0x18] sm:$0xff] }
 0x1ab   : > { %vm13413_vm10 = vcmp.le.f32.partialorder %v17402_v2, 0.7853982  ;;  %v3063_v18 = vxor.u32 2147483648, %v3062_v43  ;;  %v17406_v37 = vand.u32 2147483647, %v17405_v39  ;;  %v9319_v9 = vmin.u32 %v3773_v61, %v13393_v55  ;;  %v17410_v61 = vld [vmem:[#allocation20_spill] sm:$0xff] }
 0x1ac   : > { %v13431_v24 = vsub.s32 %v13363_v8, %v4082_v27  ;;  %v3269_v38 = vcvt.s32.f32 %v3262_v13  ;;  %v3371_v32 = vand.u32 2147483647, %v3370_v47  ;;  %v3680_v29 = vadd.s32 127, %v3679_v11  ;;  %v5276_v13 = vld [vmem:[#allocation3 + $0xa0] sm:$0xff]  ;;  %v17411_v27 = vld [vmem:[#allocation28_spill] sm:$0xff] }
 0x1ad   : > { %vm13425_vm12 = vcmp.le.f32.partialorder %v17406_v37, 0.7853982  ;;  %vm9313_vm13 = vcmp.lt.s32.totalorder %v9312_v52, 0  ;;  %v13436_v51 = vsel %vm13413_vm10, %v12350_v50, %v3168_v5  ;;  %v3479_v59 = vxor.u32 2147483648, %v3478_v12  ;;  %v5278_v37 = vld [vmem:[#allocation3 + $0xb0] sm:$0xff] }
 0x1ae   : > { %v3675_v34 = vsub.s32 32, %v13401_v44  ;;  %v3978_v53 = vshll.u32 %v13418_v30, 30  ;;  %v13440_v8 = vmul.f32 %v3269_v38, %v3267_v40  ;;  %v3373_v7 = vcvt.s32.f32 %v3366_v63 }
 0x1af   : > { %v3879_v49 = vclz %v9323_v1  ;;  %v13442_v19 = vpack.c.bf16 %v5257_v45, %v5256_v35  ;;  %vm17124_vm14 = vcmp.lt.s32.totalorder %v17410_v61, 0  ;;  %v3659_v36 = vadd.s32 %v17412_v23, %v17411_v27  ;;  %v5279_v35 = vld [vmem:[#allocation3 + $0xb8] sm:$0xff] }
 0x1b0   : > { %v13447_v47 = vsel %vm9313_vm13, 0, %v9312_v52  ;;  %v3775_v11 = vclz %v9319_v9  ;;  %v4085_v2 = vsub.s32 0, %v13431_v24  ;;  %v3064_v5 = vsel %vm2981_vm9, %v3063_v18, %v3062_v43  ;;  %v5260_v43 = vld [vmem:[#allocation3 + $0x20] sm:$0xff]  ;;  %v5261_v18 = vld [vmem:[#allocation3 + $0x28] sm:$0xff] }
 0x1b1   : > { %17409 = vst [vmem:[#allocation25_spill] sm:$0xff] %v13442_v19  ;;  %v3374_v40 = vmul.f32 %v3373_v7, %v3371_v32  ;;  %v3681_v63 = vshll.u32 %v3680_v29, 23  ;;  %11008 = vmatpush3.bf16.msra.mxu1 %v13442_v19  ;;  %v13453_v1 = vpack.c.bf16 %v5259_v54, %v5258_v60  ;;  %v3480_v45 = vsel %vm17125_vm11, %v3479_v59, %v3478_v12  ;;  %v17461_v19 = vld [vmem:[#allocation24_spill] sm:$0xff] }
 0x1b2   : > { %v3677_v38 = vshrl.u32 %v3659_v36, %v3675_v34  ;;  %v13458_v52 = vsub.s32 %v13385_v28, %v3978_v53  ;;  %11009 = vmatprep.subr.bf16.mxu1 %v17120_v6  ;;  %v13461_v9 = vpack.c.bf16 %v5277_v26, %v5276_v13  ;;  %11910 = vcosq.f32 %v13436_v51  ;;  %v17417_v13 = vld [vmem:[#allocation18_spill] sm:$0xff] }
 0x1b3   : > { %17413 = vst [vmem:[#allocation31_spill] sm:$0xff] %v13453_v1  ;;  %v3575_v29 = vsub.s32 4294967266, %v13447_v47  ;;  %v9324_v60 = vadd.s32 4294967294, %v3879_v49  ;;  %v3676_v12 = vshll.u32 %v13012_v57, %v13401_v44  ;;  %v9320_v59 = vadd.s32 4294967294, %v3775_v11  ;;  %v5280_v57 = vld [vmem:[#allocation3 + $0xc0] sm:$0xff]  ;;  %v5281_v44 = vld [vmem:[#allocation3 + $0xc8] sm:$0xff] }
 0x1b4   : > { %17414 = vst [vmem:[#allocation17_spill] sm:$0xff] %v13461_v9  ;;  %v9331_v28 = vmin.u32 %v4085_v2, %v13431_v24  ;;  %11040 = vmatpush3.bf16.msra.mxu0 %v13461_v9  ;;  %v13470_v34 = vpack.c.bf16 %v5279_v35, %v5278_v37  ;;  %v13475_v53 = vsel %vm13425_vm12, %v17405_v39, %v3480_v45  ;;  %v3375_v54 = vxor.u32 2147483648, %v3374_v40  ;;  %v5262_v11 = vld [vmem:[#allocation3 + $0x30] sm:$0xff]  ;;  %v5263_v2 = vld [vmem:[#allocation3 + $0x38] sm:$0xff] }
 0x1b5   : > { %v3682_v7 = vor.u32 4788187, %v3681_v63  ;;  %11011 = vmatpush3.bf16.msra.mxu1 %v13453_v1  ;;  %11041 = vmatprep.subr.bf16.mxu0 %v17120_v6  ;;  %v13479_v49 = vpack.c.bf16 %v5261_v18, %v5260_v43  ;;  %vm3189_vm15 = vcmp.lt.s32.totalorder %v17417_v13, 0  ;;  %v17418_v26 = vand.u32 2147483647, %v17410_v61 }
 0x1b6   : > { %17415 = vst [vmem:[#allocation34_spill] sm:$0xff] %v13470_v34  ;;  %v3678_v23 = vor.u32 %v3677_v38, %v3676_v12  ;;  %v3981_v36 = vsub.s32 0, %v13458_v52  ;;  %11012 = vmatprep.subr.bf16.mxu1 %v17120_v6  ;;  %v3576_v63 = vadd.s32 127, %v3575_v29  ;;  %vm9325_vm1 = vcmp.lt.s32.totalorder %v9324_v60, 0  ;;  %v17424_v38 = vld [vmem:[#allocation21_spill] sm:$0xff] }
 0x1b7   : > { %17416 = vst [vmem:[#allocation19_spill] sm:$0xff] %v13479_v49  ;;  %vm13484_vm0 = vcmp.le.f32.partialorder %v17418_v26, 0.7853982  ;;  %vm17127_vm2 = vmmov 0   ;;  %v17114_v37 = vmov 0.0   ;;  %v3065_v43 = vsub.s32 4, %v17424_v38 }
 0x1b8   : > { %9989 = vmatprep.mubr.msk.f32.mxu1 %vm17127_vm2, %v17114_v37  ;;  %v17421_v35 = vand.u32 2147483647, %v17400_v21  ;;  %10035 = vmatprep.mubr.msk.f32.mxu0 %vm17127_vm2, %v17114_v37  ;;  %vm9321_vm4 = vcmp.lt.s32.totalorder %v9320_v59, 0  ;;  %v4087_v18 = vclz %v9331_v28  ;;  %v13502_v29 = vpack.c.bf16 %v5281_v44, %v5280_v57  ;;  %v5282_v37 = vld [vmem:[#allocation3 + $0xd0] sm:$0xff]  ;;  %v5283_v28 = vld [vmem:[#allocation3 + $0xd8] sm:$0xff] }
 0x1b9   : > { %11043 = vmatpush3.bf16.msra.mxu0 %v13470_v34  ;;  %v3376_v26 = vsel %vm17124_vm14, %v3375_v54, %v3374_v40  ;;  %11014 = vmatpush3.bf16.msra.mxu1 %v13479_v49  ;;  %v13511_v32 = vpack.c.bf16 %v5263_v2, %v5262_v11  ;;  %v3571_v57 = vsub.s32 32, %v13447_v47  ;;  %v13515_v44 = vsel %vm9325_vm1, 0, %v9324_v60  ;;  %v5264_v40 = vld [vmem:[#allocation3 + $0x40] sm:$0xff]  ;;  %v5265_v54 = vld [vmem:[#allocation3 + $0x48] sm:$0x7f] }
 0x1ba   : > { %vm13494_vm3 = vcmp.le.f32.partialorder %v17421_v35, 0.7853982  ;;  %17425 = vst [vmem:[#allocation20_spill] sm:$0xff] %v13502_v29  ;;  %v3683_v35 = vand.u32 2147483647, %v3682_v7  ;;  %11044 = vmatprep.subr.bf16.mxu0 %v17120_v6  ;;  %11015 = vmatprep.subr.bf16.mxu1 %v17120_v6  ;;  %v3066_v7 = vsel %vm2981_vm9, %v3065_v43, %v17424_v38  ;;  %v3577_v11 = vshll.u32 %v3576_v63, 23 }
 0x1bb   : > { %v3067_v12 = vsel %vm13494_vm3, %v17400_v21, %v3064_v5  ;;  %17426 = vst [vmem:[#allocation28_spill] sm:$0xff] %v13511_v32  ;;  %v9327_v5 = vmin.u32 %v3981_v36, %v13458_v52  ;;  %v13523_v2 = vsel %vm9321_vm4, 0, %v9320_v59  ;;  %vm5480_vm5 = vcmask 1046528   ;;  %v17427_v34 = vld [vmem:[#allocation38_spill] sm:$0xff] }
 0x1bc   : > { %11912 = vcosq.f32 %v3067_v12  ;;  %v3685_v10 = vcvt.s32.f32 %v3678_v23  ;;  %v3555_v60 = vadd.s32 %v17428_v31, %v17427_v34  ;;  %v9332_v4 = vadd.s32 4294967294, %v4087_v18  ;;  %v13530_v6 = vpop.eup %11910  ;;  %v5284_v31 = vld [vmem:[#allocation3 + $0xe0] sm:$0xff]  ;;  %v5285_v34 = vld [vmem:[#allocation3 + $0xe8] sm:$0x7f] }
 0x1bd   : > { %11046 = vmatpush3.bf16.msra.mxu0 %v13502_v29  ;;  %v13528_v36 = vpack.c.bf16 %v5283_v28, %v5282_v37  ;;  %v3887_v9 = vsub.s32 4294967266, %v13515_v44  ;;  %11017 = vmatpush3.bf16.msra.mxu1 %v13511_v32  ;;  %v17430_v63 = vmov 0.0|0.0   ;;  %v13535_v59 = vpack.c.bf16 %v5265_v54, %v5264_v40  ;;  %v5269_v32 = vld [vmem:[#allocation3 + $0x68] sm:$0xff] }
 0x1be   : > { %11047 = vmatprep.subr.bf16.mxu0 %v17430_v63  ;;  %v3068_v23 = vsel %vm13494_vm3, 0, %v3066_v7  ;;  %11914 = vsinq.f32 %v3067_v12  ;;  %v13540_v37 = vmul.f32 %v3685_v10, %v3683_v35  ;;  %v3783_v38 = vsub.s32 4294967266, %v13523_v2  ;;  %11018 = vmatprep.subr.bf16.mxu1 %v17430_v63 }
 0x1bf   : > { %17429 = vst [vmem:[#allocation29_spill] sm:$0xff] %v13528_v36  ;;  %17431 = vst [vmem:[#allocation18_spill] sm:$0xff] %v13535_v59  ;;  %11916 = vsinq.f32 %v13436_v51  ;;  %v3983_v43 = vclz %v9327_v5  ;;  %vm17123_vm6 = vmmov 1   ;;  %v17434_v45 = vxor.u32 2147483648, %v13440_v8 }
 0x1c0   : > { %vm13546_vm8 = vmpackc.low %vm5480_vm5, %vm17123_vm6  ;;  %v13558_v10 = vsel %vm13484_vm0, %v17410_v61, %v3376_v26  ;;  %v3573_v12 = vshrl.u32 %v3555_v60, %v3571_v57  ;;  %v13560_v35 = vor.u32 4788187, %v3577_v11  ;;  %11918 = vcosq.f32 %v13475_v53 }
 0x1c1   : > { %v3272_v51 = vsel %vm3189_vm15, %v17434_v45, %v13440_v8  ;;  %vm9333_vm9 = vcmp.lt.s32.totalorder %v9332_v4, 0  ;;  %11049 = vmatpush3.bf16.msra.mxu0 %v13528_v36  ;;  %v3072_v28 = vadd.s32 3, %v3068_v23  ;;  %v13564_v5 = vpack.c.bf16 %v5285_v34, %v5284_v31  ;;  %11021 = vmatpush3.bf16.msk.msra.mxu1 %vm13546_vm8, %v13535_v59  ;;  %v5267_v45 = vld [vmem:[#allocation3 + $0x58] sm:$0xff] }
 0x1c2   : > { %11920 = vsinq.f32 %v13475_v53  ;;  %v3572_v8 = vshll.u32 %v13343_v3, %v13447_v47  ;;  %v3883_v40 = vsub.s32 32, %v13515_v44  ;;  %v13570_v26 = vadd.s32 127, %v3887_v9  ;;  %11050 = vmatprep.subr.bf16.mxu0 %v17430_v63  ;;  %11022 = vmatprep.subr.bf16.mxu1 %v17430_v63 }
 0x1c3   : > { %17435 = vst [vmem:[#allocation21_spill] sm:$0xff] %v13564_v5  ;;  %11922 = vcosq.f32 %v13558_v10  ;;  %v13578_v54 = vadd.s32 127, %v3783_v38  ;;  %v9328_v53 = vadd.s32 4294967294, %v3983_v43  ;;  %v3867_v7 = vadd.s32 %v13136_v14, %v13143_v56  ;;  %v5266_v43 = vld [vmem:[#allocation3 + $0x50] sm:$0xff]  ;;  %v17436_v56 = vld [vmem:[#allocation22_spill] sm:$0xff] }
 0x1c4   : > { %v13581_v47 = vor.u32 %v3573_v12, %v3572_v8  ;;  %v13587_v11 = vsel %vm9333_vm9, 0, %v9332_v4  ;;  %v3763_v60 = vadd.s32 %v13164_v20, %v13172_v25  ;;  %v3073_v31 = vand.u32 3, %v3072_v28 }
 0x1c5   : > { %v4216_v38 = vand.u32 3, %v3068_v23  ;;  %11053 = vmatpush3.bf16.msk.msra.mxu0 %vm13546_vm8, %v13564_v5  ;;  %v3884_v12 = vshll.u32 %v13389_v41, %v13515_v44  ;;  %v3885_v8 = vshrl.u32 %v3867_v7, %v3883_v40  ;;  %v3889_v14 = vshll.u32 %v13570_v26, 23  ;;  %v17441_v7 = vld [vmem:[#allocation26_spill] sm:$0xff] }
 0x1c6   : > { %v11913_v3 = vpop.eup %11912  ;;  %v3779_v4 = vsub.s32 32, %v13523_v2  ;;  %11070 = vmatprep.subr.bf16.mxu0 %v17430_v63  ;;  %vm3605_vm13 = vcmp.lt.s32.totalorder %v17436_v56, 0  ;;  %v3785_v20 = vshll.u32 %v13578_v54, 23  ;;  %v4095_v25 = vsub.s32 4294967266, %v13587_v11 }
 0x1c7   : > { %v3079_v34 = vxor.u32 2147483648, %v11913_v3  ;;  %vm9329_vm1 = vcmp.lt.s32.totalorder %v9328_v53, 0  ;;  %vm3071_vm3 = vweird.f32 %v17400_v21  ;;  %vm3074_vm4 = vcmp.lt.s32.totalorder %v3073_v31, 2 }
 0x1c8   : > { %v11915_v23 = vpop.eup %11914  ;;  %vm3078_vm5 = vcmp.eq.s32.totalorder %v3073_v31, 2  ;;  %vm5476_vm9 = vcmask 646144   ;;  %v13603_v41 = vpack.c.bf16 %v5267_v45, %v5266_v43  ;;  %vm3075_vm6 = vcmp.eq.s32.totalorder %v3073_v31, 0 }
 0x1c9   : > { %v13605_v44 = vpop.eup %11916  ;;  %v3076_v28 = vxor.u32 2147483648, %v11915_v23  ;;  %v3080_v40 = vsel %vm3078_vm5, %v3079_v34, %v11915_v23  ;;  %vm4217_vm14 = vcmp.lt.s32.totalorder %v4216_v38, 2  ;;  %vm4218_vm11 = vcmp.eq.s32.totalorder %v4216_v38, 0 }
 0x1ca   : > { %17437 = vst [vmem:[#allocation38_spill] sm:$0xff] %v13603_v41  ;;  %vm4221_vm7 = vcmp.eq.s32.totalorder %v4216_v38, 2  ;;  %v17438_v26 = vand.u32 2147483647, %v17417_v13  ;;  %v3273_v9 = vsub.s32 4, %v17441_v7  ;;  %v13614_v57 = vpop.eup %11918  ;;  %v13638_v31 = vor.u32 %v3885_v8, %v3884_v12  ;;  %v5271_v8 = vld [vmem:[#allocation3 + $0x78] sm:$0xff] }
 0x1cb   : > { %v3077_v43 = vsel %vm3075_vm6, %v11913_v3, %v3076_v28  ;;  %v4220_v45 = vsel %vm4218_vm11, %v11913_v3, %v3076_v28  ;;  %v4223_v5 = vsel %vm4221_vm7, %v3079_v34, %v11915_v23  ;;  %v13643_v34 = vsel %vm9329_vm1, 0, %v9328_v53  ;;  %v17449_v28 = vld [vmem:[#allocation23_spill] sm:$0xff] }
 0x1cc   : > { %vm13609_vm2 = vcmp.le.f32.partialorder %v17438_v26, 0.7853982  ;;  %v13619_v29 = vpop.eup %11920  ;;  %v3081_v38 = vsel %vm3074_vm4, %v3077_v43, %v3080_v40  ;;  %v4224_v59 = vsel %vm4217_vm14, %v4220_v45, %v4223_v5  ;;  %v5268_v26 = vld [vmem:[#allocation3 + $0x60] sm:$0xff]  ;;  %v3274_v49 = vsel %vm3189_vm15, %v3273_v9, %v17441_v7 }
 0x1cd   : > { %v3275_v36 = vsel %vm13609_vm2, %v17417_v13, %v3272_v51  ;;  %v13625_v1 = vpop.eup %11922  ;;  %v13629_v3 = vsel %vm3071_vm3, nan, %v3081_v38  ;;  %v13633_v51 = vsel %vm3071_vm3, nan, %v4224_v59  ;;  %v3276_v5 = vsel %vm13609_vm2, 0, %v3274_v49  ;;  %v5296_v45 = vld [vmem:[#allocation3 + $0x140] sm:$0xff]  ;;  %v5297_v38 = vld [vmem:[#allocation3 + $0x148] sm:$0xff] }
 0x1ce   : > { %11924 = vcosq.f32 %v3275_v36  ;;  %17442 = vst [vmem:[#allocation36_spill] sm:$0xff] %v13629_v3  ;;  %17443 = vst [vmem:[#allocation26_spill] sm:$0xff] %v13633_v51  ;;  %v13640_v9 = vor.u32 4788187, %v3889_v14  ;;  %9990 = vmatmul.mubr.msk.f32.vlgmr.msra.gmra.mrb[0].mxu1 %vm5476_vm9, %v13633_v51  ;;  %v3581_v21 = vcvt.s32.f32 %v13581_v47  ;;  %v3781_v59 = vshrl.u32 %v3763_v60, %v3779_v4  ;;  %v5270_v60 = vld [vmem:[#allocation3 + $0x70] sm:$0xff] }
 0x1cf   : > { %11926 = vsinq.f32 %v3275_v36  ;;  %v13648_v23 = vor.u32 4788187, %v3785_v20  ;;  %11024 = vmatpush3.bf16.msra.mxu1 %v13603_v41  ;;  %v13651_v49 = vpack.c.bf16 %v5269_v32, %v5268_v26  ;;  %v17445_v36 = vxor.u32 2147483648, %v13540_v37  ;;  %v17455_v26 = vld [vmem:[#allocation30_spill] sm:$0xff] }
 0x1d0   : > { %11928 = vsinq.f32 %v13558_v10  ;;  %v4091_v53 = vsub.s32 32, %v13587_v11  ;;  %v13661_v12 = vadd.s32 127, %v4095_v25  ;;  %11025 = vmatprep.subr.bf16.mxu1 %v17430_v63  ;;  %v3280_v47 = vadd.s32 3, %v3276_v5 }
 0x1d1   : > { %17444 = vst [vmem:[#allocation39_spill] sm:$0xff] %v13651_v49  ;;  %v13658_v10 = vsel %vm3605_vm13, %v17445_v36, %v13540_v37  ;;  %v17446_v14 = vmov 0.0   ;;  %vm17447_vm7 = vmmov 0   ;;  %v17448_v32 = vand.u32 2147483647, %v13560_v35 }
 0x1d2   : > { %10012 = vmatprep.mubr.msk.f32.mxu1 %vm17447_vm7, %v17446_v14  ;;  %v3780_v37 = vshll.u32 %v13393_v55, %v13523_v2  ;;  %v3991_v20 = vsub.s32 4294967266, %v13643_v34  ;;  %v3169_v25 = vsub.s32 4, %v17449_v28  ;;  %v4075_v7 = vadd.s32 %v13241_v15, %v13257_v0  ;;  %v5272_v2 = vld [vmem:[#allocation3 + $0x80] sm:$0xff] }
 0x1d3   : > { %v13668_v4 = vmul.f32 %v3581_v21, %v17448_v32  ;;  %v4422_v43 = vand.u32 3, %v3276_v5  ;;  %11027 = vmatpush3.bf16.msra.mxu1 %v13651_v49  ;;  %v13682_v55 = vpack.c.bf16 %v5271_v8, %v5270_v60  ;;  %v5273_v21 = vld [vmem:[#allocation3 + $0x88] sm:$0xff]  ;;  %vm17451_vm11 = vcmp.lt.s32.totalorder %v12350_v50, 0 }
 0x1d4   : > { %v13678_v35 = vor.u32 %v3781_v59, %v3780_v37  ;;  %v3170_v36 = vsel %vm17451_vm11, %v3169_v25, %v17449_v28  ;;  %v4093_v32 = vshrl.u32 %v4075_v7, %v4091_v53  ;;  %v4097_v15 = vshll.u32 %v13661_v12, 23  ;;  %11028 = vmatprep.subr.bf16.mxu1 %v17430_v63  ;;  %v5274_v37 = vld [vmem:[#allocation3 + $0x90] sm:$0xff]  ;;  %v5275_v28 = vld [vmem:[#allocation3 + $0x98] sm:$0x7f] }
 0x1d5   : > { %17450 = vst [vmem:[#allocation23_spill] sm:$0xff] %v13682_v55  ;;  %v3281_v0 = vand.u32 3, %v3280_v47  ;;  %v13691_v5 = vsel %vm13413_vm10, 0, %v3170_v36  ;;  %v3987_v59 = vsub.s32 32, %v13643_v34  ;;  %v13694_v60 = vadd.s32 127, %v3991_v20 }
 0x1d6   : > { %vm3279_vm14 = vweird.f32 %v17417_v13  ;;  %v13697_v8 = vpack.c.bf16 %v5297_v38, %v5296_v45  ;;  %vm4423_vm15 = vcmp.lt.s32.totalorder %v4422_v43, 2  ;;  %vm4424_vm2 = vcmp.eq.s32.totalorder %v4422_v43, 0 }
 0x1d7   : > { %v13699_v12 = vpack.c.bf16 %v5273_v21, %v5272_v2  ;;  %v4319_v47 = vand.u32 3, %v13691_v5  ;;  %vm4427_vm10 = vcmp.eq.s32.totalorder %v4422_v43, 2  ;;  %11030 = vmatpush3.bf16.msra.mxu1 %v13682_v55  ;;  %vm3282_vm6 = vcmp.lt.s32.totalorder %v3281_v0, 2 }
 0x1d8   : > { %17452 = vst [vmem:[#allocation40_spill] sm:$0xff] %v13697_v8  ;;  %v11925_v53 = vpop.eup %11924  ;;  %vm3286_vm1 = vcmp.eq.s32.totalorder %v3281_v0, 2  ;;  %11031 = vmatprep.subr.bf16.mxu1 %v17430_v63  ;;  %v13708_v2 = vpack.c.bf16 %v5275_v28, %v5274_v37  ;;  %vm3283_vm3 = vcmp.eq.s32.totalorder %v3281_v0, 0  ;;  %v3481_v54 = vsub.s32 4, %v17455_v26  ;;  %v5298_v28 = vld [vmem:[#allocation3 + $0x150] sm:$0xff]  ;;  %v5299_v0 = vld [vmem:[#allocation3 + $0x158] sm:$0xff] }
 0x1d9   : > { %17453 = vst [vmem:[#allocation41_spill] sm:$0xff] %v13699_v12  ;;  %v11927_v33 = vpop.eup %11926  ;;  %v3287_v25 = vxor.u32 2147483648, %v11925_v53  ;;  %v17456_v40 = vand.u32 2147483647, %v17436_v56  ;;  %vm4321_vm5 = vcmp.eq.s32.totalorder %v4319_v47, 0  ;;  %vm4324_vm11 = vcmp.eq.s32.totalorder %v4319_v47, 2 }
 0x1da   : > { %v13705_v45 = vpop.eup %11928  ;;  %v3284_v38 = vxor.u32 2147483648, %v11927_v33  ;;  %17454 = vst [vmem:[#allocation42_spill] sm:$0xff] %v13708_v2  ;;  %v3789_v13 = vcvt.s32.f32 %v13678_v35  ;;  %v5301_v35 = vld [vmem:[#allocation3 + $0x168] sm:$0xff] }
 0x1db   : > { %v3288_v21 = vsel %vm3286_vm1, %v3287_v25, %v11927_v33  ;;  %v4429_v36 = vsel %vm4427_vm10, %v3287_v25, %v11927_v33  ;;  %vm13713_vm4 = vcmp.le.f32.partialorder %v17456_v40, 0.7853982  ;;  %11033 = vmatpush3.bf16.msra.mxu1 %v13699_v12  ;;  %v17459_v33 = vxor.u32 2147483648, %v13605_v44 }
 0x1dc   : > { %v3285_v7 = vsel %vm3283_vm3, %v11925_v53, %v3284_v38  ;;  %v4426_v55 = vsel %vm4424_vm2, %v11925_v53, %v3284_v38  ;;  %v17460_v40 = vxor.u32 2147483648, %v13530_v6  ;;  %vm3501_vm10 = vcmp.lt.s32.totalorder %v17461_v19, 0  ;;  %11034 = vmatprep.subr.bf16.mxu1 %v17430_v63  ;;  %v5286_v38 = vld [vmem:[#allocation3 + $0xf0] sm:$0xff] }
 0x1dd   : > { %v3289_v49 = vsel %vm3282_vm6, %v3285_v7, %v3288_v21  ;;  %v4430_v37 = vsel %vm4423_vm15, %v4426_v55, %v4429_v36  ;;  %v4323_v25 = vsel %vm4321_vm5, %v13530_v6, %v17459_v33  ;;  %v4092_v53 = vshll.u32 %v13431_v24, %v13587_v11  ;;  %v5287_v21 = vld [vmem:[#allocation3 + $0xf8] sm:$0xff] }
 0x1de   : > { %v4326_v41 = vsel %vm4324_vm11, %v17460_v40, %v13605_v44  ;;  %v4098_v7 = vor.u32 4788187, %v4097_v15  ;;  %v13731_v43 = vsel %vm3279_vm14, nan, %v3289_v49  ;;  %v13735_v55 = vsel %vm3279_vm14, nan, %v4430_v37 }
 0x1df   : > { %17462 = vst [vmem:[#allocation30_spill] sm:$0xff] %v13731_v43  ;;  %17463 = vst [vmem:[#allocation24_spill] sm:$0xff] %v13735_v55  ;;  %v17464_v36 = vand.u32 2147483647, %v13640_v9  ;;  %v17465_v33 = vcvt.s32.f32 %v13638_v31  ;;  %v3971_v24 = vadd.s32 %v13303_v22, %v13315_v48  ;;  %v3993_v11 = vshll.u32 %v13694_v60, 23  ;;  %10036 = vmatmul.mubr.msk.f32.vlgmr.msra.gmra.mrb[0].mxu0 %vm5476_vm9, %v13735_v55  ;;  %v5300_v60 = vld [vmem:[#allocation3 + $0x160] sm:$0xff]  ;;  %11037 = vmatpush3.bf16.msk.msra.mxu1 %vm13546_vm8, %v13708_v2 }
 0x1e0   : > { %vm4320_vm14 = vcmp.lt.s32.totalorder %v4319_v47, 2  ;;  %v4094_v49 = vor.u32 %v4093_v32, %v4092_v53  ;;  %11072 = vmatpush3.bf16.msra.mxu0 %v13697_v8  ;;  %v13751_v15 = vpack.c.bf16 %v5299_v0, %v5298_v28  ;;  %10081 = vmatprep.mubr.msk.f32.mxu0 %vm17447_vm7, %v17446_v14  ;;  %v17467_v31 = vand.u32 2147483647, %v17461_v19  ;;  %v5289_v0 = vld [vmem:[#allocation3 + $0x108] sm:$0xff]  ;;  %v5295_v8 = vld [vmem:[#allocation3 + $0x138] sm:$0x7f] }
 0x1e1   : > { %v13742_v40 = vmul.f32 %v17465_v33, %v17464_v36  ;;  %v4327_v9 = vsel %vm4320_vm14, %v4323_v25, %v4326_v41  ;;  %v3989_v48 = vshrl.u32 %v3971_v24, %v3987_v59  ;;  %11073 = vmatprep.subr.bf16.mxu0 %v17430_v63  ;;  %v13765_v32 = vpack.c.bf16 %v5287_v21, %v5286_v38  ;;  %v5288_v59 = vld [vmem:[#allocation3 + $0x100] sm:$0xff]  ;;  %v17473_v25 = vld [vmem:[#allocation33_spill] sm:$0xff] }
 0x1e2   : > { %17466 = vst [vmem:[#allocation43_spill] sm:$0xff] %v13751_v15  ;;  %vm13757_vm15 = vcmp.le.f32.partialorder %v17467_v31, 0.7853982  ;;  %vm17471_vm2 = vcmp.lt.s32.totalorder %v17405_v39, 0  ;;  %v17472_v47 = vand.u32 2147483647, %v13648_v23  ;;  %vm17144_vm6 = vweird.f32 %v12350_v50  ;;  %11054 = vmatprep.subr.bf16.mxu1 %v17430_v63 }
 0x1e3   : > { %17470 = vst [vmem:[#allocation44_spill] sm:$0xff] %v13765_v32  ;;  %v3482_v41 = vsel %vm17471_vm2, %v3481_v54, %v17455_v26  ;;  %v4099_v28 = vand.u32 2147483647, %v4098_v7  ;;  %v3377_v53 = vsub.s32 4, %v17473_v25  ;;  %v3583_v36 = vxor.u32 2147483648, %v13668_v4  ;;  %v17475_v23 = vld [vmem:[#allocation27_spill] sm:$0xff] }
 0x1e4   : > { %v3790_v37 = vmul.f32 %v3789_v13, %v17472_v47  ;;  %v3988_v38 = vshll.u32 %v13458_v52, %v13643_v34  ;;  %v3994_v21 = vor.u32 4788187, %v3993_v11  ;;  %v13780_v54 = vsel %vm17144_vm6, nan, %v4327_v9  ;;  %11075 = vmatpush3.bf16.msra.mxu0 %v13751_v15  ;;  %v17480_v11 = vld [vmem:[#allocation32_spill] sm:$0xff] }
 0x1e5   : > { %17474 = vst [vmem:[#allocation33_spill] sm:$0xff] %v13780_v54  ;;  %vm3813_vm1 = vcmp.lt.s32.totalorder %v17475_v23, 0  ;;  %v4101_v26 = vcvt.s32.f32 %v4094_v49  ;;  %v13784_v7 = vpack.c.bf16 %v5301_v35, %v5300_v60  ;;  %10013 = vmatmul.mubr.msk.f32.vlgmr.msra.gmra.mrb[2].mxu1 %vm5476_vm9, %v13780_v54  ;;  %v13790_v33 = vsel %vm13425_vm12, 0, %v3482_v41  ;;  %11076 = vmatprep.subr.bf16.mxu0 %v17430_v63  ;;  %v5302_v49 = vld [vmem:[#allocation3 + $0x170] sm:$0xff]  ;;  %v5291_v41 = vld [vmem:[#allocation3 + $0x118] sm:$0xff] }
 0x1e6   : > { %v3691_v52 = vsel %vm13713_vm4, %v17436_v56, %v13658_v10  ;;  %v17477_v34 = vand.u32 2147483647, %v17475_v23  ;;  %vm17145_vm5 = vcmp.lt.s32.totalorder %v17480_v11, 0  ;;  %v3990_v13 = vor.u32 %v3989_v48, %v3988_v38  ;;  %11056 = vmatpush3.bf16.msra.mxu1 %v13765_v32  ;;  %v5290_v35 = vld [vmem:[#allocation3 + $0x110] sm:$0xff]  ;;  %10058 = vmatprep.mubr.msk.f32.mxu1 %vm17447_vm7, %v17446_v14  ;;  %v5337_v32 = vld [vmem:[#allocation3 + $0x288] sm:$0xff] }
 0x1e7   : > { %17476 = vst [vmem:[#allocation27_spill] sm:$0xff] %v13784_v7  ;;  %v13805_v9 = vpack.c.bf16 %v5289_v0, %v5288_v59  ;;  %v3895_v31 = vxor.u32 2147483648, %v13742_v40  ;;  %v3791_v10 = vxor.u32 2147483648, %v3790_v37  ;;  %v4102_v60 = vmul.f32 %v4101_v26, %v4099_v28  ;;  %11057 = vmatprep.subr.bf16.mxu1 %v17430_v63  ;;  %v5314_v54 = vld [vmem:[#allocation3 + $0x1d0] sm:$0xff] }
 0x1e8   : > { %vm13798_vm3 = vcmp.le.f32.partialorder %v17477_v34, 0.7853982  ;;  %vm17482_vm12 = vcmp.lt.s32.totalorder %v17410_v61, 0  ;;  %v3584_v47 = vsel %vm3501_vm10, %v3583_v36, %v13668_v4  ;;  %v17483_v59 = vand.u32 2147483647, %v17480_v11  ;;  %11078 = vmatpush3.bf16.msra.mxu0 %v13784_v7  ;;  %v5304_v34 = vld [vmem:[#allocation3 + $0x180] sm:$0xff] }
 0x1e9   : > { %17481 = vst [vmem:[#allocation32_spill] sm:$0xff] %v13805_v9  ;;  %v3378_v48 = vsel %vm17482_vm12, %v3377_v53, %v17473_v25  ;;  %v3995_v28 = vand.u32 2147483647, %v3994_v21  ;;  %v4628_v38 = vand.u32 3, %v13790_v33  ;;  %11930 = vcosq.f32 %v3691_v52  ;;  %v5305_v25 = vld [vmem:[#allocation3 + $0x188] sm:$0x7f]  ;;  %11079 = vmatprep.subr.bf16.mxu0 %v17430_v63 }
 0x1ea   : > { %vm13819_vm11 = vcmp.le.f32.partialorder %v17483_v59, 0.7853982  ;;  %v13825_v26 = vpack.c.bf16 %v5303_v16, %v5302_v49  ;;  %11932 = vsinq.f32 %v3691_v52  ;;  %v3997_v36 = vcvt.s32.f32 %v3990_v13  ;;  %11059 = vmatpush3.bf16.msra.mxu1 %v13805_v9  ;;  %v17488_v4 = vld [vmem:[#allocation35_spill] sm:$0xff]  ;;  %v17496_v7 = vld [vmem:[#allocation37_spill] sm:$0xff] }
 0x1eb   : > { %v13831_v21 = vpack.c.bf16 %v5291_v41, %v5290_v35  ;;  %v13835_v59 = vsel %vm13484_vm0, 0, %v3378_v48  ;;  %v3587_v49 = vsel %vm13757_vm15, %v17461_v19, %v3584_v47  ;;  %v3896_v16 = vsel %vm3813_vm1, %v3895_v31, %v13742_v40  ;;  %11060 = vmatprep.subr.bf16.mxu1 %v17430_v63  ;;  %v5292_v35 = vld [vmem:[#allocation3 + $0x120] sm:$0xff]  ;;  %v5293_v41 = vld [vmem:[#allocation3 + $0x128] sm:$0xff] }
 0x1ec   : > { %17486 = vst [vmem:[#allocation45_spill] sm:$0xff] %v13825_v26  ;;  %v3792_v52 = vsel %vm17145_vm5, %v3791_v10, %v3790_v37  ;;  %v4103_v13 = vxor.u32 2147483648, %v4102_v60  ;;  %v17489_v27 = vand.u32 2147483647, %v17488_v4  ;;  %v17490_v48 = vmov 0  ;;  %11081 = vmatpush3.bf16.msra.mxu0 %v13825_v26  ;;  %v5294_v26 = vld [vmem:[#allocation3 + $0x130] sm:$0xff] }
 0x1ed   : > { %17487 = vst [vmem:[#allocation46_spill] sm:$0xff] %v13831_v21  ;;  %v3998_v53 = vmul.f32 %v3997_v36, %v3995_v28  ;;  %v13852_v47 = vpack.c.bf16 %v5305_v25, %v5304_v34  ;;  %vm4630_vm14 = vcmp.eq.s32.totalorder %v4628_v38, 0  ;;  %vm4633_vm2 = vcmp.eq.s32.totalorder %v4628_v38, 2  ;;  %11082 = vmatprep.subr.bf16.mxu0 %v17430_v63  ;;  %v5316_v28 = vld [vmem:[#allocation3 + $0x1e0] sm:$0xff]  ;;  %v5317_v34 = vld [vmem:[#allocation3 + $0x1e8] sm:$0xff] }
 0x1ee   : > { %vm13848_vm0 = vcmp.le.f32.partialorder %v17489_v27, 0.7853982  ;;  %v17494_v40 = vxor.u32 2147483648, %v13619_v29  ;;  %v17495_v31 = vxor.u32 2147483648, %v13614_v57  ;;  %v4525_v27 = vand.u32 3, %v13835_v59  ;;  %11062 = vmatpush3.bf16.msra.mxu1 %v13831_v21  ;;  %v5336_v9 = vld [vmem:[#allocation3 + $0x280] sm:$0xff] }
 0x1ef   : > { %v17491_v48 = vsel %vm13848_vm0, 4294967295, %v17490_v48  ;;  %17493 = vst [vmem:[#allocation47_spill] sm:$0xff] %v13852_v47  ;;  %v3689_v15 = vsub.s32 4, %v17496_v7  ;;  %11934 = vcosq.f32 %v3587_v49  ;;  %v13865_v25 = vpack.c.bf16 %v5293_v41, %v5292_v35  ;;  %11063 = vmatprep.subr.bf16.mxu1 %v17430_v63 }
 0x1f0   : > { %17492 = vst [vmem:[#allocation35_spill] sm:$0xff] %v17491_v48  ;;  %v4632_v37 = vsel %vm4630_vm14, %v13614_v57, %v17494_v40  ;;  %v4635_v10 = vsel %vm4633_vm2, %v17495_v31, %v13619_v29  ;;  %v17146_v36 = vxor.u32 2147483648, %v13705_v45  ;;  %11936 = vsinq.f32 %v3587_v49  ;;  %11085 = vmatpush3.bf16.msk.msra.mxu0 %vm13546_vm8, %v13852_v47 }
 0x1f1   : > { %17497 = vst [vmem:[#allocation37_spill] sm:$0xff] %v13865_v25  ;;  %v3899_v31 = vsel %vm13798_vm3, %v17475_v23, %v3896_v16  ;;  %vm4021_vm12 = vcmp.lt.s32.totalorder %v17488_v4, 0  ;;  %vm4629_vm14 = vcmp.lt.s32.totalorder %v4628_v38, 2  ;;  %v3795_v35 = vsel %vm13819_vm11, %v17480_v11, %v3792_v52  ;;  %11102 = vmatprep.subr.bf16.mxu0 %v17430_v63  ;;  %v5318_v52 = vld [vmem:[#allocation3 + $0x1f0] sm:$0xff] }
 0x1f2   : > { %v4104_v41 = vsel %vm4021_vm12, %v4103_v13, %v4102_v60  ;;  %v3999_v40 = vxor.u32 2147483648, %v3998_v53  ;;  %v4636_v49 = vsel %vm4629_vm14, %v4632_v37, %v4635_v10  ;;  %v13882_v16 = vpack.c.bf16 %v5317_v34, %v5316_v28  ;;  %v5319_v60 = vld [vmem:[#allocation3 + $0x1f8] sm:$0xff]  ;;  %11065 = vmatpush3.bf16.msra.mxu1 %v13865_v25 }
 0x1f3   : > { %vm4527_vm2 = vcmp.eq.s32.totalorder %v4525_v27, 0  ;;  %vm4530_vm6 = vcmp.eq.s32.totalorder %v4525_v27, 2  ;;  %v3690_v38 = vsel %vm3605_vm13, %v3689_v15, %v17496_v7  ;;  %vm17180_vm5 = vweird.f32 %v17405_v39  ;;  %v13898_v34 = vpop.eup %11930  ;;  %11066 = vmatprep.subr.bf16.mxu1 %v17430_v63  ;;  %v5307_v7 = vld [vmem:[#allocation3 + $0x198] sm:$0xff] }
 0x1f4   : > { %17498 = vst [vmem:[#allocation48_spill] sm:$0xff] %v13882_v16  ;;  %v13890_v13 = vpack.c.bf16 %v5295_v8, %v5294_v26  ;;  %v4529_v37 = vsel %vm4527_vm2, %v13625_v1, %v17146_v36  ;;  %v17500_v10 = vxor.u32 2147483648, %v13625_v1  ;;  %17501 = vst [vmem:[#allocation50_spill] sm:$0xff] %v13898_v34  ;;  %11938 = vcosq.f32 %v3899_v31  ;;  %v5306_v8 = vld [vmem:[#allocation3 + $0x190] sm:$0xff]  ;;  %v13907_v36 = vpop.eup %11932 }
 0x1f5   : > { %vm3917_vm13 = vcmp.lt.s32.totalorder %v12988_v58, 0  ;;  %v13903_v15 = vsel %vm17180_vm5, nan, %v4636_v49  ;;  %v3585_v26 = vsub.s32 4, %v13272_v62  ;;  %17503 = vst [vmem:[#allocation52_spill] sm:$0xff] %v13907_v36  ;;  %11940 = vsinq.f32 %v3899_v31 }
 0x1f6   : > { %17499 = vst [vmem:[#allocation49_spill] sm:$0xff] %v13890_v13  ;;  %v4532_v28 = vsel %vm4530_vm6, %v17500_v10, %v13705_v45  ;;  %17502 = vst [vmem:[#allocation51_spill] sm:$0xff] %v13903_v15  ;;  %v4000_v10 = vsel %vm3917_vm13, %v3999_v40, %v3998_v53  ;;  %10082 = vmatmul.mubr.msk.f32.vlgmr.msra.gmra.mrb[2].mxu0 %vm5476_vm9, %v13903_v15  ;;  %vm4526_vm6 = vcmp.lt.s32.totalorder %v4525_v27, 2  ;;  %v13915_v49 = vsel %vm13713_vm4, 0, %v3690_v38  ;;  %v5320_v27 = vld [vmem:[#allocation3 + $0x200] sm:$0xff]  ;;  %v5321_v40 = vld [vmem:[#allocation3 + $0x208] sm:$0xff] }
 0x1f7   : > { %11942 = vcosq.f32 %v3795_v35  ;;  %v4107_v47 = vsel %vm13848_vm0, %v17488_v4, %v4104_v41  ;;  %11104 = vmatpush3.bf16.msra.mxu0 %v13882_v16  ;;  %v13921_v25 = vpack.c.bf16 %v5319_v60, %v5318_v52  ;;  %v4533_v31 = vsel %vm4526_vm6, %v4529_v37, %v4532_v28  ;;  %10127 = vmatprep.mubr.msk.f32.mxu0 %vm17447_vm7, %v17446_v14  ;;  %v5308_v52 = vld [vmem:[#allocation3 + $0x1a0] sm:$0xff]  ;;  %v5309_v60 = vld [vmem:[#allocation3 + $0x1a8] sm:$0xff]  ;;  %v5311_v16 = vld [vmem:[#allocation3 + $0x1b8] sm:$0xff] }
 0x1f8   : > { %11944 = vsinq.f32 %v3795_v35  ;;  %v17505_v53 = vand.u32 2147483647, %v12988_v58  ;;  %11105 = vmatprep.subr.bf16.mxu0 %v17430_v63  ;;  %11069 = vmatpush3.bf16.msk.msra.mxu1 %vm13546_vm8, %v13890_v13  ;;  %v13935_v41 = vpack.c.bf16 %v5307_v7, %v5306_v8  ;;  %vm3383_vm4 = vweird.f32 %v17410_v61  ;;  %v5322_v8 = vld [vmem:[#allocation3 + $0x210] sm:$0xff]  ;;  %v5323_v7 = vld [vmem:[#allocation3 + $0x218] sm:$0xff]  ;;  %v5341_v15 = vld [vmem:[#allocation3 + $0x2a8] sm:$0xff] }
 0x1f9   : > { %17504 = vst [vmem:[#allocation53_spill] sm:$0xff] %v13921_v25  ;;  %11086 = vmatprep.subr.bf16.mxu1 %v17430_v63  ;;  %v13943_v38 = vand.u32 3, %v13915_v49  ;;  %v3586_v37 = vsel %vm3501_vm10, %v3585_v26, %v13272_v62  ;;  %v13948_v28 = vpop.eup %11934  ;;  %11946 = vcosq.f32 %v4107_v47  ;;  %v13959_v62 = vpack.c.bf16 %v5321_v40, %v5320_v27  ;;  %v5325_v26 = vld [vmem:[#allocation3 + $0x228] sm:$0x7f]  ;;  %v5310_v13 = vld [vmem:[#allocation3 + $0x1b0] sm:$0xff] }
 0x1fa   : > { %vm13927_vm14 = vcmp.le.f32.partialorder %v17505_v53, 0.7853982  ;;  %17508 = vst [vmem:[#allocation54_spill] sm:$0xff] %v13935_v41  ;;  %v5324_v53 = vld [vmem:[#allocation3 + $0x220] sm:$0xff]  ;;  %v13956_v21 = vpop.eup %11936  ;;  %11948 = vsinq.f32 %v4107_v47  ;;  %v5338_v47 = vld [vmem:[#allocation3 + $0x290] sm:$0xff]  ;;  %v13969_v27 = vsel %vm13757_vm15, 0, %v3586_v37  ;;  %vm17179_vm15 = vweird.f32 %v17436_v56 }
 0x1fb   : > { %v4003_v35 = vsel %vm13927_vm14, %v12988_v58, %v4000_v10  ;;  %v13952_v10 = vsel %vm3383_vm4, nan, %v4533_v31  ;;  %11107 = vmatpush3.bf16.msra.mxu0 %v13921_v25  ;;  %17510 = vst [vmem:[#allocation56_spill] sm:$0xff] %v13959_v62  ;;  %v13965_v31 = vpack.c.bf16 %v5309_v60, %v5308_v52  ;;  %v3897_v40 = vsub.s32 4, %v13357_v42  ;;  %v5339_v25 = vld [vmem:[#allocation3 + $0x298] sm:$0xff]  ;;  %v5313_v52 = vld [vmem:[#allocation3 + $0x1c8] sm:$0xff] }
 0x1fc   : > { %17509 = vst [vmem:[#allocation55_spill] sm:$0xff] %v13952_v10  ;;  %10059 = vmatmul.mubr.msk.f32.vlgmr.msra.gmra.mrb[4].mxu1 %vm5476_vm9, %v13952_v10  ;;  %11950 = vcosq.f32 %v4003_v35  ;;  %11108 = vmatprep.subr.bf16.mxu0 %v17430_v63  ;;  %vm4836_vm10 = vcmp.eq.s32.totalorder %v13943_v38, 0  ;;  %vm4839_vm2 = vcmp.eq.s32.totalorder %v13943_v38, 2  ;;  %v13977_v60 = vpack.c.bf16 %v5323_v7, %v5322_v8  ;;  %v5340_v10 = vld [vmem:[#allocation3 + $0x2a0] sm:$0xff]  ;;  %v5331_v56 = vld [vmem:[#allocation3 + $0x258] sm:$0xff] }
 0x1fd   : > { %11088 = vmatpush3.bf16.msra.mxu1 %v13935_v41  ;;  %17511 = vst [vmem:[#allocation57_spill] sm:$0xff] %v13965_v31  ;;  %11952 = vsinq.f32 %v4003_v35  ;;  %v5312_v41 = vld [vmem:[#allocation3 + $0x1c0] sm:$0xff]  ;;  %10104 = vmatprep.mubr.msk.f32.mxu1 %vm17447_vm7, %v17446_v14  ;;  %v13979_v22 = vpack.c.bf16 %v5325_v26, %v5324_v53  ;;  %v17514_v37 = vxor.u32 2147483648, %v13907_v36  ;;  %v17515_v2 = vxor.u32 2147483648, %v13898_v34  ;;  %v5315_v53 = vld [vmem:[#allocation3 + $0x1d8] sm:$0x7f] }
 0x1fe   : > { %11089 = vmatprep.subr.bf16.mxu1 %v17430_v63  ;;  %17512 = vst [vmem:[#allocation58_spill] sm:$0xff] %v13977_v60  ;;  %v13987_v55 = vpop.eup %11938  ;;  %v13991_v8 = vpack.c.bf16 %v5337_v32, %v5336_v9  ;;  %v13993_v7 = vpack.c.bf16 %v5311_v16, %v5310_v13  ;;  %v5342_v26 = vld [vmem:[#allocation3 + $0x2b0] sm:$0xff]  ;;  %v4731_v51 = vand.u32 3, %v13969_v27  ;;  %vm4835_vm6 = vcmp.lt.s32.totalorder %v13943_v38, 2 }
 0x1ff   : > { %17513 = vst [vmem:[#allocation59_spill] sm:$0xff] %v13979_v22  ;;  %v4838_v35 = vsel %vm4836_vm10, %v13898_v34, %v17514_v37  ;;  %v4841_v12 = vsel %vm4839_vm2, %v17515_v2, %v13907_v36  ;;  %11110 = vmatpush3.bf16.msra.mxu0 %v13959_v62  ;;  %v5343_v37 = vld [vmem:[#allocation3 + $0x2b8] sm:$0xff]  ;;  %v13996_v43 = vpop.eup %11940  ;;  %v3898_v9 = vsel %vm3813_vm1, %v3897_v40, %v13357_v42  ;;  %v5326_v38 = vld [vmem:[#allocation3 + $0x230] sm:$0xff]  ;;  %vm3591_vm1 = vweird.f32 %v17461_v19  ;;  %v5345_v40 = vld [vmem:[#allocation3 + $0x2c8] sm:$0x7f] }
 0x200   : > { %17516 = vst [vmem:[#allocation60_spill] sm:$0xff] %v13991_v8  ;;  %17517 = vst [vmem:[#allocation61_spill] sm:$0xff] %v13993_v7  ;;  %11111 = vmatprep.subr.bf16.mxu0 %v17430_v63  ;;  %v4842_v13 = vsel %vm4835_vm6, %v4838_v35, %v4841_v12  ;;  %v14009_v62 = vpack.c.bf16 %v5339_v25, %v5338_v47  ;;  %v14011_v3 = vpack.c.bf16 %v5313_v52, %v5312_v41  ;;  %v5327_v42 = vld [vmem:[#allocation3 + $0x238] sm:$0xff]  ;;  %v5344_v12 = vld [vmem:[#allocation3 + $0x2c0] sm:$0xff] }
 0x201   : > { %11091 = vmatpush3.bf16.msra.mxu1 %v13965_v31  ;;  %v14006_v16 = vpop.eup %11942  ;;  %v3176_v31 = vadd.s32 3, %v13691_v5  ;;  %v14016_v2 = vpack.c.bf16 %v5341_v15, %v5340_v10  ;;  %v14018_v32 = vpack.c.bf16 %v5315_v53, %v5314_v54  ;;  %v14020_v36 = vpack.c.bf16 %v5343_v37, %v5342_v26  ;;  %v5328_v52 = vld [vmem:[#allocation3 + $0x240] sm:$0xff] }
 0x202   : > { %11092 = vmatprep.subr.bf16.mxu1 %v17430_v63  ;;  %17518 = vst [vmem:[#allocation62_spill] sm:$0xff] %v14009_v62  ;;  %17519 = vst [vmem:[#allocation63_spill] sm:$0xff] %v14011_v3  ;;  %v14014_v34 = vpop.eup %11944  ;;  %vm4733_vm10 = vcmp.eq.s32.totalorder %v4731_v51, 0  ;;  %vm4736_vm2 = vcmp.eq.s32.totalorder %v4731_v51, 2  ;;  %v14026_v5 = vsel %vm13798_vm3, 0, %v3898_v9  ;;  %v14033_v54 = vsel %vm17179_vm15, nan, %v4842_v13 }
 0x203   : > { %17520 = vst [vmem:[#allocation64_spill] sm:$0xff] %v14016_v2  ;;  %17521 = vst [vmem:[#allocation65_spill] sm:$0xff] %v14018_v32  ;;  %11113 = vmatpush3.bf16.msra.mxu0 %v13977_v60  ;;  %v3177_v25 = vand.u32 3, %v3176_v31  ;;  %v14028_v15 = vpop.eup %11946  ;;  %v17524_v41 = vxor.u32 2147483648, %v13956_v21  ;;  %v17525_v24 = vxor.u32 2147483648, %v13948_v28  ;;  %v5329_v31 = vld [vmem:[#allocation3 + $0x248] sm:$0xff]  ;;  %v14046_v26 = vpack.c.bf16 %v5327_v42, %v5326_v38 }
 0x204   : > { %17522 = vst [vmem:[#allocation66_spill] sm:$0xff] %v14020_v36  ;;  %17523 = vst [vmem:[#allocation67_spill] sm:$0xff] %v14028_v15  ;;  %11114 = vmatprep.subr.bf16.mxu0 %v17430_v63  ;;  %v3793_v35 = vsub.s32 4, %v13361_v46  ;;  %v14043_v53 = vpop.eup %11948  ;;  %v14048_v37 = vpack.c.bf16 %v5345_v40, %v5344_v12  ;;  %v5356_v13 = vld [vmem:[#allocation3 + $0x320] sm:$0xff]  ;;  %v5330_v60 = vld [vmem:[#allocation3 + $0x250] sm:$0xff]  ;;  %vm4732_vm6 = vcmp.lt.s32.totalorder %v4731_v51, 2 }
 0x205   : > { %11094 = vmatpush3.bf16.msra.mxu1 %v13993_v7  ;;  %v4735_v10 = vsel %vm4733_vm10, %v13948_v28, %v17524_v41  ;;  %v4738_v47 = vsel %vm4736_vm2, %v17525_v24, %v13956_v21  ;;  %17526 = vst [vmem:[#allocation68_spill] sm:$0xff] %v14043_v53  ;;  %17527 = vst [vmem:[#allocation69_spill] sm:$0xff] %v14046_v26  ;;  %v5357_v41 = vld [vmem:[#allocation3 + $0x328] sm:$0xff]  ;;  %vm3179_vm3 = vcmp.eq.s32.totalorder %v3177_v25, 0  ;;  %v5040_v24 = vand.u32 3, %v14026_v5  ;;  %v5358_v15 = vld [vmem:[#allocation3 + $0x330] sm:$0xff] }
 0x206   : > { %11095 = vmatprep.subr.bf16.mxu1 %v17430_v63  ;;  %17528 = vst [vmem:[#allocation70_spill] sm:$0xff] %v14048_v37  ;;  %v14051_v7 = vpop.eup %11950  ;;  %v5359_v53 = vld [vmem:[#allocation3 + $0x338] sm:$0xff]  ;;  %v17530_v48 = vxor.u32 2147483648, %v13605_v44  ;;  %vm3182_vm10 = vcmp.eq.s32.totalorder %v3177_v25, 2  ;;  %v4739_v12 = vsel %vm4732_vm6, %v4735_v10, %v4738_v47  ;;  %v3911_v40 = vxor.u32 2147483648, %v13987_v55 }
 0x207   : > { %17529 = vst [vmem:[#allocation71_spill] sm:$0xff] %v14051_v7  ;;  %v14057_v42 = vpop.eup %11952  ;;  %11117 = vmatpush3.bf16.msk.msra.mxu0 %vm13546_vm8, %v13979_v22  ;;  %vm3178_vm2 = vcmp.lt.s32.totalorder %v3177_v25, 2  ;;  %v17531_v51 = vxor.u32 2147483648, %v13530_v6  ;;  %v3384_v10 = vadd.s32 3, %v13835_v59  ;;  %v14075_v25 = vpack.c.bf16 %v5357_v41, %v5356_v13  ;;  %v5334_v13 = vld [vmem:[#allocation3 + $0x270] sm:$0xff] }
 0x208   : > { %v3181_v38 = vsel %vm3179_vm3, %v13530_v6, %v17530_v48  ;;  %11134 = vmatprep.subr.bf16.mxu0 %v17430_v63  ;;  %v14068_v48 = vpack.c.bf16 %v5329_v31, %v5328_v52  ;;  %vm17533_vm3 = vcmp.lt.s32.totalorder %v17480_v11, 0  ;;  %v14077_v47 = vpack.c.bf16 %v5331_v56, %v5330_v60  ;;  %v5335_v41 = vld [vmem:[#allocation3 + $0x278] sm:$0x7f] }
 0x209   : > { %v3184_v9 = vsel %vm3182_vm10, %v17531_v51, %v13605_v44  ;;  %11097 = vmatpush3.bf16.msra.mxu1 %v14011_v3  ;;  %v3794_v7 = vsel %vm17533_vm3, %v3793_v35, %v13361_v46  ;;  %17534 = vst [vmem:[#allocation73_spill] sm:$0xff] %v14075_v25  ;;  %v14079_v6 = vpack.c.bf16 %v5359_v53, %v5358_v15  ;;  %v5332_v44 = vld [vmem:[#allocation3 + $0x260] sm:$0xff]  ;;  %v5333_v51 = vld [vmem:[#allocation3 + $0x268] sm:$0xff]  ;;  %vm17537_vm6 = vweird.f32 %v12350_v50 }
 0x20a   : > { %17532 = vst [vmem:[#allocation72_spill] sm:$0xff] %v14068_v48  ;;  %v3185_v37 = vsel %vm3178_vm2, %v3181_v38, %v3184_v9  ;;  %11098 = vmatprep.subr.bf16.mxu1 %v17430_v63  ;;  %17535 = vst [vmem:[#allocation74_spill] sm:$0xff] %v14077_v47  ;;  %10128 = vmatmul.mubr.msk.f32.vlgmr.msra.gmra.mrb[4].mxu0 %vm5476_vm9, %v14033_v54  ;;  %v14089_v46 = vsel %vm3591_vm1, nan, %v4739_v12  ;;  %vm3903_vm10 = vweird.f32 %v17475_v23  ;;  %vm5042_vm2 = vcmp.eq.s32.totalorder %v5040_v24, 0 }
 0x20b   : > { %17536 = vst [vmem:[#allocation75_spill] sm:$0xff] %v14079_v6  ;;  %v14083_v52 = vsel %vm17537_vm6, nan, %v3185_v37  ;;  %vm5045_vm3 = vcmp.eq.s32.totalorder %v5040_v24, 2  ;;  %v3385_v56 = vand.u32 3, %v3384_v10  ;;  %11136 = vmatpush3.bf16.msra.mxu0 %v13991_v8  ;;  %10173 = vmatprep.mubr.msk.f32.mxu0 %vm17447_vm7, %v17446_v14  ;;  %v17539_v50 = vxor.u32 2147483648, %v13996_v43 }
 0x20c   : > { %17538 = vst [vmem:[#allocation76_spill] sm:$0xff] %v14083_v52  ;;  %v5047_v60 = vsel %vm5045_vm3, %v3911_v40, %v13996_v43  ;;  %v3796_v15 = vsel %vm13819_vm11, 0, %v3794_v7  ;;  %v3592_v31 = vadd.s32 3, %v13969_v27  ;;  %11137 = vmatprep.subr.bf16.mxu0 %v17430_v63  ;;  %vm5041_vm6 = vcmp.lt.s32.totalorder %v5040_v24, 2 }
 0x20d   : > { %v5044_v59 = vsel %vm5042_vm2, %v13987_v55, %v17539_v50  ;;  %11101 = vmatpush3.bf16.msk.msra.mxu1 %vm13546_vm8, %v14018_v32  ;;  %v14108_v35 = vpack.c.bf16 %v5333_v51, %v5332_v44  ;;  %vm3387_vm15 = vcmp.eq.s32.totalorder %v3385_v56, 0  ;;  %vm3390_vm2 = vcmp.eq.s32.totalorder %v3385_v56, 2  ;;  %v5347_v44 = vld [vmem:[#allocation3 + $0x2d8] sm:$0xff]  ;;  %v5445_v32 = vld [vmem:[#allocation6 + $0x278] sm:$0x7f] }
 0x20e   : > { %11118 = vmatprep.subr.bf16.mxu1 %v17430_v63  ;;  %vm3386_vm5 = vcmp.lt.s32.totalorder %v3385_v56, 2  ;;  %v17541_v53 = vxor.u32 2147483648, %v13705_v45  ;;  %v17542_v27 = vxor.u32 2147483648, %v13625_v1  ;;  %v3593_v37 = vand.u32 3, %v3592_v31 }
 0x20f   : > { %17540 = vst [vmem:[#allocation77_spill] sm:$0xff] %v14108_v35  ;;  %v5048_v9 = vsel %vm5041_vm6, %v5044_v59, %v5047_v60  ;;  %v14117_v24 = vand.u32 3, %v3796_v15  ;;  %v4105_v38 = vsub.s32 4, %v13395_v17  ;;  %11139 = vmatpush3.bf16.msra.mxu0 %v14009_v62  ;;  %v4001_v10 = vsub.s32 4, %v13418_v30 }
 0x210   : > { %v3389_v0 = vsel %vm3387_vm15, %v13625_v1, %v17541_v53  ;;  %v3392_v7 = vsel %vm3390_vm2, %v17542_v27, %v13705_v45  ;;  %10105 = vmatmul.mubr.msk.f32.vlgmr.msra.gmra.mrb[6].mxu1 %vm5476_vm9, %v14089_v46  ;;  %vm3595_vm11 = vcmp.eq.s32.totalorder %v3593_v37, 0  ;;  %vm3598_vm15 = vcmp.eq.s32.totalorder %v3593_v37, 2  ;;  %11140 = vmatprep.subr.bf16.mxu0 %v17430_v63  ;;  %v5346_v45 = vld [vmem:[#allocation3 + $0x2d0] sm:$0xff] }
 0x211   : > { %v3393_v12 = vsel %vm3386_vm5, %v3389_v0, %v3392_v7  ;;  %11120 = vmatpush3.bf16.msra.mxu1 %v14046_v26  ;;  %vm3594_vm5 = vcmp.lt.s32.totalorder %v3593_v37, 2  ;;  %v17544_v51 = vxor.u32 2147483648, %v13956_v21  ;;  %v17545_v50 = vxor.u32 2147483648, %v13948_v28  ;;  %10150 = vmatprep.mubr.msk.f32.mxu1 %vm17447_vm7, %v17446_v14  ;;  %v5443_v26 = vld [vmem:[#allocation6 + $0x268] sm:$0xff] }
 0x212   : > { %v14126_v1 = vsel %vm3383_vm4, nan, %v3393_v12  ;;  %v3488_v61 = vadd.s32 3, %v13790_v33  ;;  %11121 = vmatprep.subr.bf16.mxu1 %v17430_v63  ;;  %v14138_v60 = vpack.c.bf16 %v5335_v41, %v5334_v13  ;;  %vm3799_vm4 = vweird.f32 %v17480_v11  ;;  %v5362_v11 = vld [vmem:[#allocation3 + $0x350] sm:$0xff] }
 0x213   : > { %17543 = vst [vmem:[#allocation78_spill] sm:$0xff] %v14126_v1  ;;  %v3597_v56 = vsel %vm3595_vm11, %v13948_v28, %v17544_v51  ;;  %v3600_v59 = vsel %vm3598_vm15, %v17545_v50, %v13956_v21  ;;  %v3800_v53 = vadd.s32 3, %v3796_v15  ;;  %v3804_v0 = vxor.u32 2147483648, %v14014_v34  ;;  %11142 = vmatpush3.bf16.msra.mxu0 %v14016_v2 }
 0x214   : > { %17546 = vst [vmem:[#allocation79_spill] sm:$0xff] %v14138_v60  ;;  %v3601_v31 = vsel %vm3594_vm5, %v3597_v56, %v3600_v59  ;;  %v3807_v27 = vxor.u32 2147483648, %v14006_v16  ;;  %v3489_v33 = vand.u32 3, %v3488_v61  ;;  %v14152_v28 = vsel %vm3903_vm10, nan, %v5048_v9  ;;  %11143 = vmatprep.subr.bf16.mxu0 %v17430_v63  ;;  %v17554_v56 = vld [vmem:[#allocation68_spill] sm:$0xff] }
 0x215   : > { %v14147_v21 = vsel %vm3591_vm1, nan, %v3601_v31  ;;  %v14154_v7 = vpack.c.bf16 %v5347_v44, %v5346_v45  ;;  %v4002_v15 = vsel %vm3917_vm13, %v4001_v10, %v13418_v30  ;;  %v3801_v37 = vand.u32 3, %v3800_v53  ;;  %11123 = vmatpush3.bf16.msra.mxu1 %v14068_v48  ;;  %v17556_v31 = vld [vmem:[#allocation70_spill] sm:$0xff]  ;;  %v5429_v48 = vld [vmem:[#allocation6 + $0x1f8] sm:$0xff] }
 0x216   : > { %17547 = vst [vmem:[#allocation80_spill] sm:$0xff] %v14147_v21  ;;  %vm4939_vm1 = vcmp.eq.s32.totalorder %v14117_v24, 0  ;;  %v4106_v19 = vsel %vm4021_vm12, %v4105_v38, %v13395_v17  ;;  %vm3491_vm3 = vcmp.eq.s32.totalorder %v3489_v33, 0  ;;  %vm3494_vm6 = vcmp.eq.s32.totalorder %v3489_v33, 2  ;;  %11124 = vmatprep.subr.bf16.mxu1 %v17430_v63 }
 0x217   : > { %17548 = vst [vmem:[#allocation81_spill] sm:$0xff] %v14154_v7  ;;  %vm3490_vm2 = vcmp.lt.s32.totalorder %v3489_v33, 2  ;;  %v17549_v9 = vxor.u32 2147483648, %v13619_v29  ;;  %v17550_v13 = vxor.u32 2147483648, %v13614_v57  ;;  %vm3803_vm13 = vcmp.eq.s32.totalorder %v3801_v37, 0  ;;  %11145 = vmatpush3.bf16.msra.mxu0 %v14020_v36  ;;  %v17558_v33 = vld [vmem:[#allocation71_spill] sm:$0xff] }
 0x218   : > { %v14174_v12 = vsel %vm13927_vm14, 0, %v4002_v15  ;;  %v3805_v17 = vsel %vm3803_vm13, %v14006_v16, %v3804_v0  ;;  %vm3806_vm12 = vcmp.eq.s32.totalorder %v3801_v37, 2  ;;  %vm4942_vm11 = vcmp.eq.s32.totalorder %v14117_v24, 2  ;;  %11146 = vmatprep.subr.bf16.mxu0 %v17430_v63  ;;  %v5422_v36 = vld [vmem:[#allocation6 + $0x1c0] sm:$0xff] }
 0x219   : > { %v3493_v30 = vsel %vm3491_vm3, %v13614_v57, %v17549_v9  ;;  %v3496_v41 = vsel %vm3494_vm6, %v17550_v13, %v13619_v29  ;;  %vm17551_vm15 = vweird.f32 %v17405_v39  ;;  %vm3802_vm5 = vcmp.lt.s32.totalorder %v3801_v37, 2  ;;  %11126 = vmatpush3.bf16.msra.mxu1 %v14077_v47 }
 0x21a   : > { %v3497_v10 = vsel %vm3490_vm2, %v3493_v30, %v3496_v41  ;;  %v3808_v29 = vsel %vm3806_vm12, %v3807_v27, %v14014_v34  ;;  %v4941_v57 = vsel %vm4939_vm1, %v14006_v16, %v3804_v0  ;;  %v4944_v20 = vsel %vm4942_vm11, %v3807_v27, %v14014_v34  ;;  %11127 = vmatprep.subr.bf16.mxu1 %v17430_v63  ;;  %v17557_v0 = vld [vmem:[#allocation67_spill] sm:$0xff]  ;;  %v17561_v30 = vld [vmem:[#allocation50_spill] sm:$0xff] }
 0x21b   : > { %v14181_v38 = vsel %vm17551_vm15, nan, %v3497_v10  ;;  %v3809_v45 = vsel %vm3802_vm5, %v3805_v17, %v3808_v29  ;;  %v3696_v44 = vadd.s32 3, %v13915_v49  ;;  %v14194_v51 = vsel %vm13848_vm0, 0, %v4106_v19  ;;  %11149 = vmatpush3.bf16.msk.msra.mxu0 %vm13546_vm8, %v17556_v31  ;;  %v5360_v17 = vld [vmem:[#allocation3 + $0x340] sm:$0xff]  ;;  %v5361_v29 = vld [vmem:[#allocation3 + $0x348] sm:$0xff] }
 0x21c   : > { %17552 = vst [vmem:[#allocation82_spill] sm:$0xff] %v14181_v38  ;;  %v4116_v50 = vxor.u32 2147483648, %v17554_v56  ;;  %v14199_v59 = vsel %vm3799_vm4, nan, %v3809_v45  ;;  %v4008_v61 = vadd.s32 3, %v14174_v12  ;;  %vm4938_vm14 = vcmp.lt.s32.totalorder %v14117_v24, 2  ;;  %11166 = vmatprep.subr.bf16.mxu0 %v17430_v63  ;;  %v17563_v45 = vld [vmem:[#allocation22_spill] sm:$0xff] }
 0x21d   : > { %17555 = vst [vmem:[#allocation35_spill] sm:$0xff] %v14199_v59  ;;  %v4012_v34 = vxor.u32 2147483648, %v14057_v42  ;;  %v3697_v16 = vand.u32 3, %v3696_v44  ;;  %v3904_v49 = vadd.s32 3, %v14026_v5  ;;  %v4945_v53 = vsel %vm4938_vm14, %v4941_v57, %v4944_v20  ;;  %11129 = vmatpush3.bf16.msra.mxu1 %v14108_v35  ;;  %v17559_v5 = vld [vmem:[#allocation52_spill] sm:$0xff] }
 0x21e   : > { %v4119_v27 = vxor.u32 2147483648, %v17557_v0  ;;  %v4015_v15 = vxor.u32 2147483648, %v17558_v33  ;;  %v4009_v37 = vand.u32 3, %v4008_v61  ;;  %v4112_v19 = vadd.s32 3, %v14194_v51  ;;  %11130 = vmatprep.subr.bf16.mxu1 %v17430_v63  ;;  %10174 = vmatmul.mubr.msk.f32.vlgmr.msra.gmra.mrb[6].mxu0 %vm5476_vm9, %v14152_v28 }
 0x21f   : > { %vm3699_vm0 = vcmp.eq.s32.totalorder %v3697_v16, 0  ;;  %vm3702_vm1 = vcmp.eq.s32.totalorder %v3697_v16, 2  ;;  %v3905_v24 = vand.u32 3, %v3904_v49  ;;  %vm3698_vm3 = vcmp.lt.s32.totalorder %v3697_v16, 2  ;;  %11168 = vmatpush3.bf16.msra.mxu0 %v14075_v25  ;;  %10219 = vmatprep.mubr.msk.f32.mxu0 %vm17447_vm7, %v17446_v14 }
 0x220   : > { %v17560_v9 = vxor.u32 2147483648, %v17559_v5  ;;  %v17562_v41 = vxor.u32 2147483648, %v17561_v30  ;;  %vm4011_vm6 = vcmp.eq.s32.totalorder %v4009_v37, 0  ;;  %vm4007_vm2 = vweird.f32 %v12988_v58  ;;  %11169 = vmatprep.subr.bf16.mxu0 %v17430_v63  ;;  %v5370_v58 = vld [vmem:[#allocation6 + $0x20] sm:$0xff] }
 0x221   : > { %v4013_v20 = vsel %vm4011_vm6, %v17558_v33, %v4012_v34  ;;  %vm4014_vm13 = vcmp.eq.s32.totalorder %v4009_v37, 2  ;;  %vm17564_vm12 = vweird.f32 %v17563_v45  ;;  %vm4010_vm11 = vcmp.lt.s32.totalorder %v4009_v37, 2  ;;  %11133 = vmatpush3.bf16.msk.msra.mxu1 %vm13546_vm8, %v14138_v60  ;;  %v5348_v37 = vld [vmem:[#allocation3 + $0x2e0] sm:$0xff] }
 0x222   : > { %v3701_v13 = vsel %vm3699_vm0, %v17561_v30, %v17560_v9  ;;  %v3704_v10 = vsel %vm3702_vm1, %v17562_v41, %v17559_v5  ;;  %v4016_v39 = vsel %vm4014_vm13, %v4015_v15, %v14057_v42  ;;  %vm3907_vm15 = vcmp.eq.s32.totalorder %v3905_v24, 0  ;;  %11150 = vmatprep.subr.bf16.mxu1 %v17430_v63  ;;  %v5349_v30 = vld [vmem:[#allocation3 + $0x2e8] sm:$0xff] }
 0x223   : > { %v3705_v57 = vsel %vm3698_vm3, %v3701_v13, %v3704_v10  ;;  %v4017_v61 = vsel %vm4010_vm11, %v4013_v20, %v4016_v39  ;;  %v17566_v16 = vxor.u32 2147483648, %v13996_v43  ;;  %vm3910_vm5 = vcmp.eq.s32.totalorder %v3905_v24, 2  ;;  %11171 = vmatpush3.bf16.msra.mxu0 %v14079_v6  ;;  %v5364_v39 = vld [vmem:[#allocation3 + $0x360] sm:$0xff] }
 0x224   : > { %v14231_v44 = vsel %vm17564_vm12, nan, %v3705_v57  ;;  %v4113_v5 = vand.u32 3, %v4112_v19  ;;  %v14243_v9 = vpack.c.bf16 %v5361_v29, %v5360_v17  ;;  %v14248_v13 = vsel %vm4007_vm2, nan, %v4017_v61  ;;  %11172 = vmatprep.subr.bf16.mxu0 %v17430_v63  ;;  %v5351_v29 = vld [vmem:[#allocation3 + $0x2f8] sm:$0xff]  ;;  %v5365_v61 = vld [vmem:[#allocation3 + $0x368] sm:$0x7f] }
 0x225   : > { %17565 = vst [vmem:[#allocation68_spill] sm:$0xff] %v14231_v44  ;;  %v3909_v49 = vsel %vm3907_vm15, %v13987_v55, %v17566_v16  ;;  %17568 = vst [vmem:[#allocation71_spill] sm:$0xff] %v14248_v13  ;;  %vm3906_vm14 = vcmp.lt.s32.totalorder %v3905_v24, 2  ;;  %v3912_v41 = vsel %vm3910_vm5, %v3911_v40, %v13996_v43  ;;  %v14255_v10 = vsel %vm3799_vm4, nan, %v4945_v53  ;;  %v5363_v40 = vld [vmem:[#allocation3 + $0x358] sm:$0xff]  ;;  %v5350_v24 = vld [vmem:[#allocation3 + $0x2f0] sm:$0xff] }
 0x226   : > { %17567 = vst [vmem:[#allocation67_spill] sm:$0xff] %v14243_v9  ;;  %v3913_v19 = vsel %vm3906_vm14, %v3909_v49, %v3912_v41  ;;  %vm4115_vm0 = vcmp.eq.s32.totalorder %v4113_v5, 0  ;;  %vm4118_vm1 = vcmp.eq.s32.totalorder %v4113_v5, 2  ;;  %10151 = vmatmul.mubr.msk.f32.vlgmr.msra.gmra.mrb[8].mxu1 %vm5476_vm9, %v14255_v10  ;;  %vm4114_vm3 = vcmp.lt.s32.totalorder %v4113_v5, 2  ;;  %v5352_v49 = vld [vmem:[#allocation3 + $0x300] sm:$0xff]  ;;  %v5353_v5 = vld [vmem:[#allocation3 + $0x308] sm:$0xff] }
 0x227   : > { %v14262_v17 = vsel %vm3903_vm10, nan, %v3913_v19  ;;  %v4117_v43 = vsel %vm4115_vm0, %v17557_v0, %v4116_v50  ;;  %v4120_v55 = vsel %vm4118_vm1, %v4119_v27, %v17554_v56  ;;  %11152 = vmatpush3.bf16.msra.mxu1 %v14154_v7  ;;  %vm4111_vm4 = vweird.f32 %v17488_v4  ;;  %10196 = vmatprep.mubr.msk.f32.mxu1 %vm17447_vm7, %v17446_v14  ;;  %v5376_v19 = vld [vmem:[#allocation6 + $0x50] sm:$0xff]  ;;  %v5425_v7 = vld [vmem:[#allocation6 + $0x1d8] sm:$0x7f] }
 0x228   : > { %17569 = vst [vmem:[#allocation52_spill] sm:$0xff] %v14262_v17  ;;  %v14273_v23 = vpack.c.bf16 %v5349_v30, %v5348_v37  ;;  %v4121_v53 = vsel %vm4114_vm3, %v4117_v43, %v4120_v55  ;;  %11153 = vmatprep.subr.bf16.mxu1 %v17430_v63  ;;  %v5246_v20 = vand.u32 3, %v14194_v51  ;;  %11174 = vmatpush3.bf16.msra.mxu0 %v14243_v9  ;;  %v5143_v41 = vand.u32 3, %v14174_v12  ;;  %v5377_v43 = vld [vmem:[#allocation6 + $0x58] sm:$0xff]  ;;  %v5378_v12 = vld [vmem:[#allocation6 + $0x60] sm:$0xff]  ;;  %v5380_v4 = vld [vmem:[#allocation6 + $0x70] sm:$0xff] }
 0x229   : > { %v14280_v57 = vsel %vm4111_vm4, nan, %v4121_v53  ;;  %v14284_v45 = vpack.c.bf16 %v5363_v40, %v5362_v11  ;;  %11175 = vmatprep.subr.bf16.mxu0 %v17430_v63  ;;  %v14288_v16 = vpack.c.bf16 %v5351_v29, %v5350_v24  ;;  %v14292_v51 = vpack.c.bf16 %v5365_v61, %v5364_v39  ;;  %v5354_v11 = vld [vmem:[#allocation3 + $0x310] sm:$0xff]  ;;  %v5355_v40 = vld [vmem:[#allocation3 + $0x318] sm:$0x7f] }
 0x22a   : > { %17570 = vst [vmem:[#allocation50_spill] sm:$0xff] %v14273_v23  ;;  %17571 = vst [vmem:[#allocation22_spill] sm:$0xff] %v14280_v57  ;;  %vm5248_vm10 = vcmp.eq.s32.totalorder %v5246_v20, 0  ;;  %vm5251_vm6 = vcmp.eq.s32.totalorder %v5246_v20, 2  ;;  %v14303_v55 = vpack.c.bf16 %v5353_v5, %v5352_v49  ;;  %vm5247_vm13 = vcmp.lt.s32.totalorder %v5246_v20, 2  ;;  %v5366_v20 = vld [vmem:[#allocation6] sm:$0xff] }
 0x22b   : > { %17572 = vst [vmem:[#allocation83_spill] sm:$0xff] %v14284_v45  ;;  %11155 = vmatpush3.bf16.msra.mxu1 %v14273_v23  ;;  %17573 = vst [vmem:[#allocation84_spill] sm:$0xff] %v14288_v16  ;;  %v5250_v37 = vsel %vm5248_vm10, %v17557_v0, %v4116_v50  ;;  %v5253_v30 = vsel %vm5251_vm6, %v4119_v27, %v17554_v56  ;;  %v14309_v56 = vpack.c.bf16 %v5377_v43, %v5376_v19  ;;  %v5379_v0 = vld [vmem:[#allocation6 + $0x68] sm:$0xff]  ;;  %v5369_v49 = vld [vmem:[#allocation6 + $0x18] sm:$0xff] }
 0x22c   : > { %11156 = vmatprep.subr.bf16.mxu1 %v17430_v63  ;;  %11177 = vmatpush3.bf16.msra.mxu0 %v14284_v45  ;;  %17574 = vst [vmem:[#allocation85_spill] sm:$0xff] %v14292_v51  ;;  %17575 = vst [vmem:[#allocation86_spill] sm:$0xff] %v14303_v55  ;;  %v5254_v50 = vsel %vm5247_vm13, %v5250_v37, %v5253_v30  ;;  %vm5145_vm12 = vcmp.eq.s32.totalorder %v5143_v41, 0  ;;  %vm5148_vm11 = vcmp.eq.s32.totalorder %v5143_v41, 2  ;;  %v5367_v39 = vld [vmem:[#allocation6 + $0x8] sm:$0xff]  ;;  %vm5144_vm15 = vcmp.lt.s32.totalorder %v5143_v41, 2 }
 0x22d   : > { %11178 = vmatprep.subr.bf16.mxu0 %v17430_v63  ;;  %v14313_v27 = vpack.c.bf16 %v5355_v40, %v5354_v11  ;;  %v5147_v53 = vsel %vm5145_vm12, %v17558_v33, %v4012_v34  ;;  %v5150_v24 = vsel %vm5148_vm11, %v4015_v15, %v14057_v42  ;;  %v14323_v29 = vsel %vm4111_vm4, nan, %v5254_v50  ;;  %v5381_v42 = vld [vmem:[#allocation6 + $0x78] sm:$0xff]  ;;  %v5368_v15 = vld [vmem:[#allocation6 + $0x10] sm:$0xff]  ;;  %v5382_v30 = vld [vmem:[#allocation6 + $0x80] sm:$0xff] }
 0x22e   : > { %17577 = vst [vmem:[#allocation88_spill] sm:$0xff] %v14323_v29  ;;  %v14329_v61 = vpack.c.bf16 %v5379_v0, %v5378_v12  ;;  %v5151_v34 = vsel %vm5144_vm15, %v5147_v53, %v5150_v24  ;;  %v14337_v33 = vpack.c.bf16 %v5367_v39, %v5366_v20  ;;  %v14345_v37 = vpack.c.bf16 %v5381_v42, %v5380_v4  ;;  %v5383_v41 = vld [vmem:[#allocation6 + $0x88] sm:$0xff]  ;;  %v5384_v40 = vld [vmem:[#allocation6 + $0x90] sm:$0xff]  ;;  %v5385_v50 = vld [vmem:[#allocation6 + $0x98] sm:$0x7f] }
 0x22f   : > { %11158 = vmatpush3.bf16.msra.mxu1 %v14288_v16  ;;  %17576 = vst [vmem:[#allocation87_spill] sm:$0xff] %v14313_v27  ;;  %v14342_v5 = vsel %vm4007_vm2, nan, %v5151_v34  ;;  %v14351_v19 = vpack.c.bf16 %v5369_v49, %v5368_v15  ;;  %v5371_v43 = vld [vmem:[#allocation6 + $0x28] sm:$0xff]  ;;  %v14357_v11 = vpack.c.bf16 %v5383_v41, %v5382_v30  ;;  %v5372_v0 = vld [vmem:[#allocation6 + $0x30] sm:$0xff]  ;;  %v5373_v53 = vld [vmem:[#allocation6 + $0x38] sm:$0xff]  ;;  %v14365_v24 = vpack.c.bf16 %v5385_v50, %v5384_v40 }
 0x230   : > { %11159 = vmatprep.subr.bf16.mxu1 %v17430_v63  ;;  %11181 = vmatpush3.bf16.msk.msra.mxu0 %vm13546_vm8, %v14292_v51  ;;  %17578 = vst [vmem:[#allocation89_spill] sm:$0xff] %v14342_v5  ;;  %v14361_v12 = vpack.c.bf16 %v5371_v43, %v5370_v58  ;;  %v5396_v20 = vld [vmem:[#allocation6 + $0xf0] sm:$0xff]  ;;  %v5397_v39 = vld [vmem:[#allocation6 + $0xf8] sm:$0xff]  ;;  %v14369_v34 = vpack.c.bf16 %v5373_v53, %v5372_v0  ;;  %v5374_v4 = vld [vmem:[#allocation6 + $0x40] sm:$0xff] }
 0x231   : > { %11198 = vmatprep.subr.bf16.mxu0 %v17430_v63  ;;  %v5375_v42 = vld [vmem:[#allocation6 + $0x48] sm:$0x7f]  ;;  %v14375_v15 = vpack.c.bf16 %v5397_v39, %v5396_v20  ;;  %v5398_v49 = vld [vmem:[#allocation6 + $0x100] sm:$0xff]  ;;  %v5400_v50 = vld [vmem:[#allocation6 + $0x110] sm:$0xff] }
 0x232   : > { %v5399_v30 = vld [vmem:[#allocation6 + $0x108] sm:$0xff]  ;;  %v14379_v41 = vpack.c.bf16 %v5375_v42, %v5374_v4  ;;  %v5386_v58 = vld [vmem:[#allocation6 + $0xa0] sm:$0xff]  ;;  %v5401_v0 = vld [vmem:[#allocation6 + $0x118] sm:$0xff] }
 0x233   : > { %11161 = vmatpush3.bf16.msra.mxu1 %v14303_v55  ;;  %10220 = vmatmul.mubr.msk.f32.vlgmr.msra.gmra.mrb[8].mxu0 %vm5476_vm9, %v14323_v29  ;;  %v5387_v43 = vld [vmem:[#allocation6 + $0xa8] sm:$0xff]  ;;  %v14385_v40 = vpack.c.bf16 %v5399_v30, %v5398_v49  ;;  %v5388_v20 = vld [vmem:[#allocation6 + $0xb0] sm:$0xff]  ;;  %v5389_v39 = vld [vmem:[#allocation6 + $0xb8] sm:$0xff]  ;;  %v14397_v4 = vpack.c.bf16 %v5401_v0, %v5400_v50 }
 0x234   : > { %11162 = vmatprep.subr.bf16.mxu1 %v17430_v63  ;;  %11200 = vmatpush3.bf16.msra.mxu0 %v14309_v56  ;;  %v14393_v53 = vpack.c.bf16 %v5387_v43, %v5386_v58  ;;  %v17579_v42 = vld [vmem:[#allocation36_spill] sm:$0xff]  ;;  %v5403_v30 = vld [vmem:[#allocation6 + $0x128] sm:$0xff]  ;;  %v14403_v51 = vpack.c.bf16 %v5389_v39, %v5388_v20  ;;  %v5404_v0 = vld [vmem:[#allocation6 + $0x130] sm:$0xff] }
 0x235   : > { %10265 = vmatprep.mubr.msk.f32.mxu0 %vm17447_vm7, %v17446_v14  ;;  %11201 = vmatprep.subr.bf16.mxu0 %v17430_v63  ;;  %v5402_v49 = vld [vmem:[#allocation6 + $0x120] sm:$0xff]  ;;  %v5391_v43 = vld [vmem:[#allocation6 + $0xc8] sm:$0xff]  ;;  %v5405_v45 = vld [vmem:[#allocation6 + $0x138] sm:$0x7f] }
 0x236   : > { %v5390_v58 = vld [vmem:[#allocation6 + $0xc0] sm:$0xff]  ;;  %v14409_v50 = vpack.c.bf16 %v5403_v30, %v5402_v49  ;;  %v5392_v20 = vld [vmem:[#allocation6 + $0xd0] sm:$0xff]  ;;  %v5393_v39 = vld [vmem:[#allocation6 + $0xd8] sm:$0xff]  ;;  %v14417_v6 = vpack.c.bf16 %v5405_v45, %v5404_v0 }
 0x237   : > { %11165 = vmatpush3.bf16.msk.msra.mxu1 %vm13546_vm8, %v14313_v27  ;;  %v14413_v9 = vpack.c.bf16 %v5391_v43, %v5390_v58  ;;  %v5416_v49 = vld [vmem:[#allocation6 + $0x190] sm:$0xff]  ;;  %v5417_v30 = vld [vmem:[#allocation6 + $0x198] sm:$0xff]  ;;  %v14421_v27 = vpack.c.bf16 %v5393_v39, %v5392_v20  ;;  %v5394_v58 = vld [vmem:[#allocation6 + $0xe0] sm:$0xff] }
 0x238   : > { %11182 = vmatprep.subr.bf16.mxu1 %v17430_v63  ;;  %11203 = vmatpush3.bf16.msra.mxu0 %v14329_v61  ;;  %v5395_v43 = vld [vmem:[#allocation6 + $0xe8] sm:$0x7f]  ;;  %v14427_v25 = vpack.c.bf16 %v5417_v30, %v5416_v49  ;;  %v5418_v45 = vld [vmem:[#allocation6 + $0x1a0] sm:$0xff]  ;;  %v5420_v49 = vld [vmem:[#allocation6 + $0x1b0] sm:$0xff] }
 0x239   : > { %11204 = vmatprep.subr.bf16.mxu0 %v17430_v63  ;;  %v5419_v0 = vld [vmem:[#allocation6 + $0x1a8] sm:$0xff]  ;;  %v14431_v55 = vpack.c.bf16 %v5395_v43, %v5394_v58  ;;  %v5406_v20 = vld [vmem:[#allocation6 + $0x140] sm:$0xff]  ;;  %v5421_v30 = vld [vmem:[#allocation6 + $0x1b8] sm:$0xff] }
 0x23a   : > { %10197 = vmatmul.mubr.msk.f32.vlgmr.msra.gmra.mrb[10].mxu1 %vm5476_vm9, %v14342_v5  ;;  %v5407_v39 = vld [vmem:[#allocation6 + $0x148] sm:$0xff]  ;;  %v14437_v31 = vpack.c.bf16 %v5419_v0, %v5418_v45  ;;  %v5408_v43 = vld [vmem:[#allocation6 + $0x150] sm:$0xff]  ;;  %v5409_v16 = vld [vmem:[#allocation6 + $0x158] sm:$0xff]  ;;  %v14449_v45 = vpack.c.bf16 %v5421_v30, %v5420_v49 }
 0x23b   : > { %11184 = vmatpush3.bf16.msra.mxu1 %v14337_v33  ;;  %10242 = vmatprep.mubr.msk.f32.mxu1 %vm17447_vm7, %v17446_v14  ;;  %v14445_v58 = vpack.c.bf16 %v5407_v39, %v5406_v20  ;;  %v17580_v0 = vld [vmem:[#allocation30_spill] sm:$0xff]  ;;  %v14455_v2 = vpack.c.bf16 %v5409_v16, %v5408_v43  ;;  %v5410_v20 = vld [vmem:[#allocation6 + $0x160] sm:$0xff]  ;;  %v5413_v43 = vld [vmem:[#allocation6 + $0x178] sm:$0xff] }
 0x23c   : > { %11185 = vmatprep.subr.bf16.mxu1 %v17430_v63  ;;  %11206 = vmatpush3.bf16.msra.mxu0 %v14345_v37  ;;  %v5423_v23 = vld [vmem:[#allocation6 + $0x1c8] sm:$0xff]  ;;  %v5424_v30 = vld [vmem:[#allocation6 + $0x1d0] sm:$0xff] }
 0x23d   : > { %11207 = vmatprep.subr.bf16.mxu0 %v17430_v63  ;;  %v5411_v39 = vld [vmem:[#allocation6 + $0x168] sm:$0xff]  ;;  %v14461_v49 = vpack.c.bf16 %v5423_v23, %v5422_v36  ;;  %v5412_v16 = vld [vmem:[#allocation6 + $0x170] sm:$0xff]  ;;  %v14469_v60 = vpack.c.bf16 %v5425_v7, %v5424_v30  ;;  %v5437_v23 = vld [vmem:[#allocation6 + $0x238] sm:$0xff] }
 0x23e   : > { %v14465_v62 = vpack.c.bf16 %v5411_v39, %v5410_v20  ;;  %v5436_v36 = vld [vmem:[#allocation6 + $0x230] sm:$0xff]  ;;  %v14473_v8 = vpack.c.bf16 %v5413_v43, %v5412_v16  ;;  %v5414_v20 = vld [vmem:[#allocation6 + $0x180] sm:$0xff]  ;;  %v5415_v39 = vld [vmem:[#allocation6 + $0x188] sm:$0x7f] }
 0x23f   : > { %11187 = vmatpush3.bf16.msra.mxu1 %v14351_v19  ;;  %v14479_v35 = vpack.c.bf16 %v5437_v23, %v5436_v36  ;;  %v5438_v7 = vld [vmem:[#allocation6 + $0x240] sm:$0xff]  ;;  %v5439_v30 = vld [vmem:[#allocation6 + $0x248] sm:$0xff]  ;;  %v14483_v22 = vpack.c.bf16 %v5415_v39, %v5414_v20  ;;  %v5440_v36 = vld [vmem:[#allocation6 + $0x250] sm:$0xff] }
 0x240   : > { %11188 = vmatprep.subr.bf16.mxu1 %v17430_v63  ;;  %11209 = vmatpush3.bf16.msra.mxu0 %v14357_v11  ;;  %v5426_v16 = vld [vmem:[#allocation6 + $0x1e0] sm:$0xff]  ;;  %v5427_v43 = vld [vmem:[#allocation6 + $0x1e8] sm:$0xff]  ;;  %v14489_v47 = vpack.c.bf16 %v5439_v30, %v5438_v7  ;;  %v5441_v23 = vld [vmem:[#allocation6 + $0x258] sm:$0xff] }
 0x241   : > { %11210 = vmatprep.subr.bf16.mxu0 %v17430_v63  ;;  %v14497_v20 = vpack.c.bf16 %v5427_v43, %v5426_v16  ;;  %v5428_v39 = vld [vmem:[#allocation6 + $0x1f0] sm:$0xff]  ;;  %v14501_v7 = vpack.c.bf16 %v5441_v23, %v5440_v36  ;;  %v5442_v30 = vld [vmem:[#allocation6 + $0x260] sm:$0xff]  ;;  %v5431_v43 = vld [vmem:[#allocation6 + $0x208] sm:$0xff] }
 0x242   : > { %v5430_v16 = vld [vmem:[#allocation6 + $0x200] sm:$0xff]  ;;  %v14513_v36 = vpack.c.bf16 %v5443_v26, %v5442_v30  ;;  %v5444_v23 = vld [vmem:[#allocation6 + $0x270] sm:$0xff]  ;;  %v5457_v30 = vld [vmem:[#allocation6 + $0x2d8] sm:$0xff] }
 0x243   : > { %11190 = vmatpush3.bf16.msra.mxu1 %v14361_v12  ;;  %v14521_v3 = vpack.c.bf16 %v5445_v32, %v5444_v23  ;;  %v5456_v26 = vld [vmem:[#allocation6 + $0x2d0] sm:$0xff]  ;;  %v5458_v32 = vld [vmem:[#allocation6 + $0x2e0] sm:$0xff]  ;;  %v5459_v23 = vld [vmem:[#allocation6 + $0x2e8] sm:$0xff] }
 0x244   : > { %11191 = vmatprep.subr.bf16.mxu1 %v17430_v63  ;;  %11213 = vmatpush3.bf16.msk.msra.mxu0 %vm13546_vm8, %v14365_v24  ;;  %v5463_v5 = vld [vmem:[#allocation6 + $0x308] sm:$0xff] }
 0x245   : > { %11230 = vmatprep.subr.bf16.mxu0 %v17430_v63 }
 0x247   : > { %11193 = vmatpush3.bf16.msra.mxu1 %v14369_v34  ;;  %10266 = vmatmul.mubr.msk.f32.vlgmr.msra.gmra.mrb[10].mxu0 %vm5476_vm9, %v14083_v52 }
 0x248   : > { %11194 = vmatprep.subr.bf16.mxu1 %v17430_v63  ;;  %11232 = vmatpush3.bf16.msra.mxu0 %v14375_v15 }
 0x249   : > { %10311 = vmatprep.mubr.msk.f32.mxu0 %vm17447_vm7, %v17446_v14  ;;  %11233 = vmatprep.subr.bf16.mxu0 %v17430_v63 }
 0x24b   : > { %11197 = vmatpush3.bf16.msk.msra.mxu1 %vm13546_vm8, %v14379_v41 }
 0x24c   : > { %11214 = vmatprep.subr.bf16.mxu1 %v17430_v63  ;;  %11235 = vmatpush3.bf16.msra.mxu0 %v14385_v40 }
 0x24d   : > { %11236 = vmatprep.subr.bf16.mxu0 %v17430_v63 }
 0x24e   : > { %10243 = vmatmul.mubr.msk.f32.vlgmr.msra.gmra.mrb[12].mxu1 %vm5476_vm9, %v17579_v42  ;;  %v14541_v42 = vpack.c.bf16 %v5459_v23, %v5458_v32  ;;  %v5462_v23 = vld [vmem:[#allocation6 + $0x300] sm:$0xff] }
 0x24f   : > { %11216 = vmatpush3.bf16.msra.mxu1 %v14393_v53  ;;  %10288 = vmatprep.mubr.msk.f32.mxu1 %vm17447_vm7, %v17446_v14 }
 0x250   : > { %11217 = vmatprep.subr.bf16.mxu1 %v17430_v63  ;;  %11238 = vmatpush3.bf16.msra.mxu0 %v14397_v4  ;;  %17582 = vst [vmem:[#allocation91_spill] sm:$0xff] %v14541_v42 }
 0x251   : > { %11239 = vmatprep.subr.bf16.mxu0 %v17430_v63 }
 0x253   : > { %11219 = vmatpush3.bf16.msra.mxu1 %v14403_v51 }
 0x254   : > { %11220 = vmatprep.subr.bf16.mxu1 %v17430_v63  ;;  %11241 = vmatpush3.bf16.msra.mxu0 %v14409_v50 }
 0x255   : > { %11242 = vmatprep.subr.bf16.mxu0 %v17430_v63 }
 0x257   : > { %11222 = vmatpush3.bf16.msra.mxu1 %v14413_v9 }
 0x258   : > { %11223 = vmatprep.subr.bf16.mxu1 %v17430_v63  ;;  %11245 = vmatpush3.bf16.msk.msra.mxu0 %vm13546_vm8, %v14417_v6 }
 0x259   : > { %11262 = vmatprep.subr.bf16.mxu0 %v17430_v63 }
 0x25b   : > { %11225 = vmatpush3.bf16.msra.mxu1 %v14421_v27  ;;  %10312 = vmatmul.mubr.msk.f32.vlgmr.msra.gmra.mrb[12].mxu0 %vm5476_vm9, %v14126_v1 }
 0x25c   : > { %11226 = vmatprep.subr.bf16.mxu1 %v17430_v63  ;;  %11264 = vmatpush3.bf16.msra.mxu0 %v14427_v25 }
 0x25d   : > { %10357 = vmatprep.mubr.msk.f32.mxu0 %vm17447_vm7, %v17446_v14  ;;  %11265 = vmatprep.subr.bf16.mxu0 %v17430_v63 }
 0x25f   : > { %11229 = vmatpush3.bf16.msk.msra.mxu1 %vm13546_vm8, %v14431_v55 }
 0x260   : > { %11246 = vmatprep.subr.bf16.mxu1 %v17430_v63  ;;  %11267 = vmatpush3.bf16.msra.mxu0 %v14437_v31 }
 0x261   : > { %11268 = vmatprep.subr.bf16.mxu0 %v17430_v63 }
 0x262   : > { %10289 = vmatmul.mubr.msk.f32.vlgmr.msra.gmra.mrb[14].mxu1 %vm5476_vm9, %v17580_v0  ;;  %v14531_v0 = vpack.c.bf16 %v5457_v30, %v5456_v26  ;;  %v5460_v26 = vld [vmem:[#allocation6 + $0x2f0] sm:$0xff]  ;;  %v5461_v30 = vld [vmem:[#allocation6 + $0x2f8] sm:$0xff] }
 0x263   : > { %11248 = vmatpush3.bf16.msra.mxu1 %v14445_v58  ;;  %10334 = vmatprep.mubr.msk.f32.mxu1 %vm17447_vm7, %v17446_v14  ;;  %v14553_v32 = vpack.c.bf16 %v5461_v30, %v5460_v26  ;;  %v14565_v26 = vpack.c.bf16 %v5463_v5, %v5462_v23  ;;  %v5464_v30 = vld [vmem:[#allocation6 + $0x310] sm:$0xff]  ;;  %v5454_v23 = vld [vmem:[#allocation6 + $0x2c0] sm:$0xff] }
 0x264   : > { %11249 = vmatprep.subr.bf16.mxu1 %v17430_v63  ;;  %11270 = vmatpush3.bf16.msra.mxu0 %v14449_v45  ;;  %17581 = vst [vmem:[#allocation90_spill] sm:$0xff] %v14531_v0 }
 0x265   : > { %11271 = vmatprep.subr.bf16.mxu0 %v17430_v63  ;;  %17583 = vst [vmem:[#allocation92_spill] sm:$0xff] %v14553_v32 }
 0x267   : > { %11251 = vmatpush3.bf16.msra.mxu1 %v14455_v2 }
 0x268   : > { %11252 = vmatprep.subr.bf16.mxu1 %v17430_v63  ;;  %11273 = vmatpush3.bf16.msra.mxu0 %v14461_v49 }
 0x269   : > { %11274 = vmatprep.subr.bf16.mxu0 %v17430_v63 }
 0x26b   : > { %11254 = vmatpush3.bf16.msra.mxu1 %v14465_v62 }
 0x26c   : > { %11255 = vmatprep.subr.bf16.mxu1 %v17430_v63  ;;  %11277 = vmatpush3.bf16.msk.msra.mxu0 %vm13546_vm8, %v14469_v60 }
 0x26d   : > { %11294 = vmatprep.subr.bf16.mxu0 %v17430_v63 }
 0x26f   : > { %11257 = vmatpush3.bf16.msra.mxu1 %v14473_v8  ;;  %10358 = vmatmul.mubr.msk.f32.vlgmr.msra.gmra.mrb[14].mxu0 %vm5476_vm9, %v14147_v21  ;;  %v14507_v21 = vpack.c.bf16 %v5429_v48, %v5428_v39  ;;  %v5432_v48 = vld [vmem:[#allocation6 + $0x210] sm:$0xff]  ;;  %v5433_v39 = vld [vmem:[#allocation6 + $0x218] sm:$0xff] }
 0x270   : > { %11258 = vmatprep.subr.bf16.mxu1 %v17430_v63  ;;  %11296 = vmatpush3.bf16.msra.mxu0 %v14479_v35  ;;  %v14525_v1 = vpack.c.bf16 %v5433_v39, %v5432_v48  ;;  %v5446_v48 = vld [vmem:[#allocation6 + $0x280] sm:$0xff]  ;;  %v5447_v39 = vld [vmem:[#allocation6 + $0x288] sm:$0xff] }
 0x271   : > { %10403 = vmatprep.mubr.msk.f32.mxu0 %vm17447_vm7, %v17446_v14  ;;  %11297 = vmatprep.subr.bf16.mxu0 %v17430_v63 }
 0x273   : > { %11261 = vmatpush3.bf16.msk.msra.mxu1 %vm13546_vm8, %v14483_v22 }
 0x274   : > { %11278 = vmatprep.subr.bf16.mxu1 %v17430_v63  ;;  %11299 = vmatpush3.bf16.msra.mxu0 %v14489_v47 }
 0x275   : > { %11300 = vmatprep.subr.bf16.mxu0 %v17430_v63 }
 0x276   : > { %10335 = vmatmul.mubr.msk.f32.vlgmr.msra.gmra.mrb[16].mxu1 %vm5476_vm9, %v14181_v38  ;;  %v14517_v38 = vpack.c.bf16 %v5431_v43, %v5430_v16  ;;  %v5434_v16 = vld [vmem:[#allocation6 + $0x220] sm:$0xff]  ;;  %v5435_v43 = vld [vmem:[#allocation6 + $0x228] sm:$0x7f] }
 0x277   : > { %11280 = vmatpush3.bf16.msra.mxu1 %v14497_v20  ;;  %10380 = vmatprep.mubr.msk.f32.mxu1 %vm17447_vm7, %v17446_v14  ;;  %v14535_v52 = vpack.c.bf16 %v5435_v43, %v5434_v16  ;;  %v14549_v16 = vpack.c.bf16 %v5447_v39, %v5446_v48  ;;  %v5448_v43 = vld [vmem:[#allocation6 + $0x290] sm:$0xff]  ;;  %v5450_v48 = vld [vmem:[#allocation6 + $0x2a0] sm:$0xff]  ;;  %v5451_v39 = vld [vmem:[#allocation6 + $0x2a8] sm:$0xff] }
 0x278   : > { %11281 = vmatprep.subr.bf16.mxu1 %v17430_v63  ;;  %11302 = vmatpush3.bf16.msra.mxu0 %v14501_v7 }
 0x279   : > { %11303 = vmatprep.subr.bf16.mxu0 %v17430_v63 }
 0x27b   : > { %11283 = vmatpush3.bf16.msra.mxu1 %v14507_v21 }
 0x27c   : > { %11284 = vmatprep.subr.bf16.mxu1 %v17430_v63  ;;  %11305 = vmatpush3.bf16.msra.mxu0 %v14513_v36 }
 0x27d   : > { %11306 = vmatprep.subr.bf16.mxu0 %v17430_v63 }
 0x27f   : > { %11286 = vmatpush3.bf16.msra.mxu1 %v14517_v38 }
 0x280   : > { %11287 = vmatprep.subr.bf16.mxu1 %v17430_v63  ;;  %11309 = vmatpush3.bf16.msk.msra.mxu0 %vm13546_vm8, %v14521_v3 }
 0x281   : > { %11326 = vmatprep.subr.bf16.mxu0 %v17430_v63 }
 0x283   : > { %11289 = vmatpush3.bf16.msra.mxu1 %v14525_v1  ;;  %10404 = vmatmul.mubr.msk.f32.vlgmr.msra.gmra.mrb[16].mxu0 %vm5476_vm9, %v14199_v59  ;;  %v5449_v59 = vld [vmem:[#allocation6 + $0x298] sm:$0xff] }
 0x284   : > { %11290 = vmatprep.subr.bf16.mxu1 %v17430_v63  ;;  %11328 = vmatpush3.bf16.msra.mxu0 %v14531_v0  ;;  %v14559_v29 = vpack.c.bf16 %v5449_v59, %v5448_v43  ;;  %v5452_v59 = vld [vmem:[#allocation6 + $0x2b0] sm:$0xff]  ;;  %v5453_v43 = vld [vmem:[#allocation6 + $0x2b8] sm:$0xff] }
 0x285   : > { %10449 = vmatprep.mubr.msk.f32.mxu0 %vm17447_vm7, %v17446_v14  ;;  %11329 = vmatprep.subr.bf16.mxu0 %v17430_v63  ;;  %v14577_v5 = vpack.c.bf16 %v5453_v43, %v5452_v59  ;;  %v5469_v59 = vld [vmem:[#allocation6 + $0x338] sm:$0xff]  ;;  %v5470_v43 = vld [vmem:[#allocation6 + $0x340] sm:$0xff] }
 0x287   : > { %11293 = vmatpush3.bf16.msk.msra.mxu1 %vm13546_vm8, %v14535_v52 }
 0x288   : > { %11310 = vmatprep.subr.bf16.mxu1 %v17430_v63  ;;  %11331 = vmatpush3.bf16.msra.mxu0 %v14541_v42  ;;  %v14569_v42 = vpack.c.bf16 %v5451_v39, %v5450_v48  ;;  %v5466_v48 = vld [vmem:[#allocation6 + $0x320] sm:$0xff]  ;;  %v5467_v39 = vld [vmem:[#allocation6 + $0x328] sm:$0xff] }
 0x289   : > { %11332 = vmatprep.subr.bf16.mxu0 %v17430_v63 }
 0x28a   : > { %10381 = vmatmul.mubr.msk.f32.vlgmr.msra.gmra.mrb[18].mxu1 %vm5476_vm9, %v14231_v44  ;;  %v5465_v44 = vld [vmem:[#allocation6 + $0x318] sm:$0x7f] }
 0x28b   : > { %11312 = vmatpush3.bf16.msra.mxu1 %v14549_v16  ;;  %10426 = vmatprep.mubr.msk.f32.mxu1 %vm17447_vm7, %v17446_v14  ;;  %v14573_v0 = vpack.c.bf16 %v5465_v44, %v5464_v30  ;;  %v5468_v30 = vld [vmem:[#allocation6 + $0x330] sm:$0xff] }
 0x28c   : > { %11313 = vmatprep.subr.bf16.mxu1 %v17430_v63  ;;  %11334 = vmatpush3.bf16.msra.mxu0 %v14553_v32  ;;  %v5455_v32 = vld [vmem:[#allocation6 + $0x2c8] sm:$0x7f] }
 0x28d   : > { %11335 = vmatprep.subr.bf16.mxu0 %v17430_v63  ;;  %v14585_v44 = vpack.c.bf16 %v5455_v32, %v5454_v23  ;;  %v14597_v32 = vpack.c.bf16 %v5467_v39, %v5466_v48  ;;  %v5471_v23 = vld [vmem:[#allocation6 + $0x348] sm:$0xff]  ;;  %v5472_v48 = vld [vmem:[#allocation6 + $0x350] sm:$0xff]  ;;  %v5473_v39 = vld [vmem:[#allocation6 + $0x358] sm:$0xff] }
 0x28f   : > { %11315 = vmatpush3.bf16.msra.mxu1 %v14559_v29 }
 0x290   : > { %11316 = vmatprep.subr.bf16.mxu1 %v17430_v63  ;;  %11337 = vmatpush3.bf16.msra.mxu0 %v14565_v26 }
 0x291   : > { %11338 = vmatprep.subr.bf16.mxu0 %v17430_v63 }
 0x293   : > { %11318 = vmatpush3.bf16.msra.mxu1 %v14569_v42 }
 0x294   : > { %11319 = vmatprep.subr.bf16.mxu1 %v17430_v63  ;;  %11341 = vmatpush3.bf16.msk.msra.mxu0 %vm13546_vm8, %v14573_v0 }
 0x295   : > { %11358 = vmatprep.subr.bf16.mxu0 %v17430_v63 }
 0x297   : > { %11321 = vmatpush3.bf16.msra.mxu1 %v14577_v5  ;;  %10450 = vmatmul.mubr.msk.f32.vlgmr.msra.gmra.mrb[18].mxu0 %vm5476_vm9, %v14248_v13 }
 0x298   : > { %11322 = vmatprep.subr.bf16.mxu1 %v17430_v63  ;;  %11360 = vmatpush3.bf16.msra.mxu0 %v14337_v33  ;;  %v14605_v33 = vpack.c.bf16 %v5469_v59, %v5468_v30  ;;  %v14619_v30 = vpack.c.bf16 %v5473_v39, %v5472_v48  ;;  %v5475_v59 = vld [vmem:[#allocation6 + $0x368] sm:$0x7f] }
 0x299   : > { %10495 = vmatprep.mubr.msk.f32.mxu0 %vm17447_vm7, %v17446_v14  ;;  %11361 = vmatprep.subr.bf16.mxu0 %v17430_v63  ;;  %v17610_v48 = vld [vmem:[#allocation89_spill] sm:$0xff] }
 0x29b   : > { %11325 = vmatpush3.bf16.msk.msra.mxu1 %vm13546_vm8, %v14585_v44 }
 0x29c   : > { %11342 = vmatprep.subr.bf16.mxu1 %v17430_v63  ;;  %11363 = vmatpush3.bf16.msra.mxu0 %v14351_v19  ;;  %v14613_v19 = vpack.c.bf16 %v5471_v23, %v5470_v43  ;;  %v17585_v23 = vld [vmem:[#allocation26_spill] sm:$0xff] }
 0x29d   : > { %11364 = vmatprep.subr.bf16.mxu0 %v17430_v63 }
 0x29e   : > { %10427 = vmatmul.mubr.msk.f32.vlgmr.msra.gmra.mrb[20].mxu1 %vm5476_vm9, %v14262_v17 }
 0x29f   : > { %11344 = vmatpush3.bf16.msra.mxu1 %v14597_v32  ;;  %10472 = vmatprep.mubr.msk.f32.mxu1 %vm17447_vm7, %v17446_v14 }
 0x2a0   : > { %11345 = vmatprep.subr.bf16.mxu1 %v17430_v63  ;;  %11366 = vmatpush3.bf16.msra.mxu0 %v14361_v12  ;;  %v5474_v12 = vld [vmem:[#allocation6 + $0x360] sm:$0xff] }
 0x2a1   : > { %11367 = vmatprep.subr.bf16.mxu0 %v17430_v63  ;;  %v14622_v13 = vpop.f32.mrb[0].mxu1 }
 0x2a2   : > { %17584 = vst [vmem:[#allocation93_spill] sm:$0xff] %v14622_v13  ;;  %v9991_v43 = vpop.f32.mrb[1].mxu1 }
 0x2a3   : > { %11347 = vmatpush3.bf16.msra.mxu1 %v14605_v33  ;;  %v17613_v43 = vld [vmem:[#allocation19_spill] sm:$0xff] }
 0x2a4   : > { %11348 = vmatprep.subr.bf16.mxu1 %v17430_v63  ;;  %11369 = vmatpush3.bf16.msra.mxu0 %v14369_v34  ;;  %v14629_v34 = vpack.c.bf16 %v5475_v59, %v5474_v12 }
 0x2a5   : > { %11370 = vmatprep.subr.bf16.mxu0 %v17430_v63 }
 0x2a7   : > { %11350 = vmatpush3.bf16.msra.mxu1 %v14613_v19 }
 0x2a8   : > { %11351 = vmatprep.subr.bf16.mxu1 %v17430_v63  ;;  %11373 = vmatpush3.bf16.msk.msra.mxu0 %vm13546_vm8, %v14379_v41 }
 0x2a9   : > { %11390 = vmatprep.subr.bf16.mxu0 %v17430_v63 }
 0x2ab   : > { %11353 = vmatpush3.bf16.msra.mxu1 %v14619_v30  ;;  %10496 = vmatmul.mubr.msk.f32.vlgmr.msra.gmra.mrb[20].mxu0 %vm5476_vm9, %v17585_v23 }
 0x2ac   : > { %11354 = vmatprep.subr.bf16.mxu1 %v17430_v63  ;;  %11392 = vmatpush3.bf16.msra.mxu0 %v14393_v53 }
 0x2ad   : > { %10541 = vmatprep.mubr.msk.f32.mxu0 %vm17447_vm7, %v17446_v14  ;;  %11393 = vmatprep.subr.bf16.mxu0 %v17430_v63 }
 0x2af   : > { %11357 = vmatpush3.bf16.msk.msra.mxu1 %vm13546_vm8, %v14629_v34 }
 0x2b0   : > { %11374 = vmatprep.subr.bf16.mxu1 %v17430_v63  ;;  %11395 = vmatpush3.bf16.msra.mxu0 %v14403_v51 }
 0x2b1   : > { %11396 = vmatprep.subr.bf16.mxu0 %v17430_v63 }
 0x2b2   : > { %10473 = vmatmul.mubr.msk.f32.vlgmr.msra.gmra.mrb[22].mxu1 %vm5476_vm9, %v14280_v57  ;;  %v14653_v41 = vpop.f32.mrb[0].mxu0 }
 0x2b3   : > { %11376 = vmatpush3.bf16.msra.mxu1 %v14309_v56  ;;  %10518 = vmatprep.mubr.msk.f32.mxu1 %vm17447_vm7, %v17446_v14  ;;  %17586 = vst [vmem:[#allocation26_spill] sm:$0xff] %v14653_v41  ;;  %v10037_v51 = vpop.f32.mrb[1].mxu0 }
 0x2b4   : > { %11377 = vmatprep.subr.bf16.mxu1 %v17430_v63  ;;  %11398 = vmatpush3.bf16.msra.mxu0 %v14413_v9 }
 0x2b5   : > { %11399 = vmatprep.subr.bf16.mxu0 %v17430_v63 }
 0x2b7   : > { %11379 = vmatpush3.bf16.msra.mxu1 %v14329_v61 }
 0x2b8   : > { %11380 = vmatprep.subr.bf16.mxu1 %v17430_v63  ;;  %11401 = vmatpush3.bf16.msra.mxu0 %v14421_v27  ;;  %v14660_v56 = vpop.f32.mrb[2].mxu1  ;;  %v17588_v27 = vld [vmem:[#allocation24_spill] sm:$0xff] }
 0x2b9   : > { %11402 = vmatprep.subr.bf16.mxu0 %v17430_v63  ;;  %17587 = vst [vmem:[#allocation94_spill] sm:$0xff] %v14660_v56  ;;  %v10014_v9 = vpop.f32.mrb[3].mxu1 }
 0x2bb   : > { %11382 = vmatpush3.bf16.msra.mxu1 %v14345_v37 }
 0x2bc   : > { %11383 = vmatprep.subr.bf16.mxu1 %v17430_v63  ;;  %11405 = vmatpush3.bf16.msk.msra.mxu0 %vm13546_vm8, %v14431_v55  ;;  %v17589_v55 = vld [vmem:[#allocation33_spill] sm:$0xff] }
 0x2bd   : > { %11422 = vmatprep.subr.bf16.mxu0 %v17430_v63 }
 0x2bf   : > { %11385 = vmatpush3.bf16.msra.mxu1 %v14357_v11  ;;  %10542 = vmatmul.mubr.msk.f32.vlgmr.msra.gmra.mrb[22].mxu0 %vm5476_vm9, %v17588_v27  ;;  %v17599_v11 = vld [vmem:[#allocation16_spill] sm:$0xff]  ;;  %v17641_v27 = vld [vmem:[#allocation46_spill] sm:$0xff] }
 0x2c0   : > { %11386 = vmatprep.subr.bf16.mxu1 %v17430_v63  ;;  %11424 = vmatpush3.bf16.msra.mxu0 %v14445_v58 }
 0x2c1   : > { %10587 = vmatprep.mubr.msk.f32.mxu0 %vm17447_vm7, %v17446_v14  ;;  %11425 = vmatprep.subr.bf16.mxu0 %v17430_v63 }
 0x2c3   : > { %11389 = vmatpush3.bf16.msk.msra.mxu1 %vm13546_vm8, %v14365_v24 }
 0x2c4   : > { %11406 = vmatprep.subr.bf16.mxu1 %v17430_v63  ;;  %11427 = vmatpush3.bf16.msra.mxu0 %v14455_v2 }
 0x2c5   : > { %11428 = vmatprep.subr.bf16.mxu0 %v17430_v63 }
 0x2c6   : > { %10519 = vmatmul.mubr.msk.f32.vlgmr.msra.gmra.mrb[24].mxu1 %vm5476_vm9, %v17589_v55 }
 0x2c7   : > { %11408 = vmatpush3.bf16.msra.mxu1 %v14375_v15  ;;  %10564 = vmatprep.mubr.msk.f32.mxu1 %vm17447_vm7, %v17446_v14  ;;  %v499_v15 = vpop.permute.xlu0 %498 }
 0x2c8   : > { %11409 = vmatprep.subr.bf16.mxu1 %v17430_v63  ;;  %11430 = vmatpush3.bf16.msra.mxu0 %v14465_v62 }
 0x2c9   : > { %11431 = vmatprep.subr.bf16.mxu0 %v17430_v63  ;;  %v14689_v61 = vpop.f32.mrb[2].mxu0 }
 0x2ca   : > { %17590 = vst [vmem:[#allocation24_spill] sm:$0xff] %v14689_v61  ;;  %v10083_v2 = vpop.f32.mrb[3].mxu0 }
 0x2cb   : > { %11411 = vmatpush3.bf16.msra.mxu1 %v14385_v40  ;;  %v17602_v40 = vld [vmem:[#allocation91_spill] sm:$0xff]  ;;  %v507_v39 = vpop.permute.xlu0 %506 }
 0x2cc   : > { %11412 = vmatprep.subr.bf16.mxu1 %v17430_v63  ;;  %11433 = vmatpush3.bf16.msra.mxu0 %v14473_v8  ;;  %v17592_v8 = vld [vmem:[#allocation51_spill] sm:$0xff]  ;;  %v512_v59 = vrot.slane %v507_v39, %v17599_v11  ;;  %v17630_v39 = vmov 920167782  }
 0x2cd   : > { %11434 = vmatprep.subr.bf16.mxu0 %v17430_v63 }
 0x2cf   : > { %11414 = vmatpush3.bf16.msra.mxu1 %v14397_v4  ;;  %v14696_v37 = vpop.f32.mrb[4].mxu1 }
 0x2d0   : > { %11415 = vmatprep.subr.bf16.mxu1 %v17430_v63  ;;  %17591 = vst [vmem:[#allocation33_spill] sm:$0xff] %v14696_v37  ;;  %11437 = vmatpush3.bf16.msk.msra.mxu0 %vm13546_vm8, %v14483_v22  ;;  %v10060_v62 = vpop.f32.mrb[5].mxu1  ;;  %v17593_v22 = vld [vmem:[#allocation55_spill] sm:$0xff] }
 0x2d1   : > { %11454 = vmatprep.subr.bf16.mxu0 %v17430_v63 }
 0x2d3   : > { %11417 = vmatpush3.bf16.msra.mxu1 %v14409_v50  ;;  %10588 = vmatmul.mubr.msk.f32.vlgmr.msra.gmra.mrb[24].mxu0 %vm5476_vm9, %v17592_v8  ;;  %v17604_v50 = vld [vmem:[#allocation92_spill] sm:$0xff] }
 0x2d4   : > { %11418 = vmatprep.subr.bf16.mxu1 %v17430_v63  ;;  %11456 = vmatpush3.bf16.msra.mxu0 %v14497_v20  ;;  %v17617_v8 = vld [vmem:[#allocation28_spill] sm:$0xff] }
 0x2d5   : > { %10633 = vmatprep.mubr.msk.f32.mxu0 %vm17447_vm7, %v17446_v14  ;;  %11457 = vmatprep.subr.bf16.mxu0 %v17430_v63 }
 0x2d7   : > { %11421 = vmatpush3.bf16.msk.msra.mxu1 %vm13546_vm8, %v14417_v6 }
 0x2d8   : > { %11438 = vmatprep.subr.bf16.mxu1 %v17430_v63  ;;  %11459 = vmatpush3.bf16.msra.mxu0 %v14507_v21 }
 0x2d9   : > { %11460 = vmatprep.subr.bf16.mxu0 %v17430_v63 }
 0x2da   : > { %10565 = vmatmul.mubr.msk.f32.vlgmr.msra.gmra.mrb[26].mxu1 %vm5476_vm9, %v17593_v22 }
 0x2db   : > { %11440 = vmatpush3.bf16.msra.mxu1 %v14427_v25  ;;  %10610 = vmatprep.mubr.msk.f32.mxu1 %vm17447_vm7, %v17446_v14 }
 0x2dc   : > { %11441 = vmatprep.subr.bf16.mxu1 %v17430_v63  ;;  %11462 = vmatpush3.bf16.msra.mxu0 %v14517_v38 }
 0x2dd   : > { %11463 = vmatprep.subr.bf16.mxu0 %v17430_v63  ;;  %v14725_v6 = vpop.f32.mrb[4].mxu0 }
 0x2de   : > { %17594 = vst [vmem:[#allocation51_spill] sm:$0xff] %v14725_v6  ;;  %v10129_v21 = vpop.f32.mrb[5].mxu0  ;;  %v17713_v6 = vld [vmem:[#allocation35_spill] sm:$0xff] }
 0x2df   : > { %11443 = vmatpush3.bf16.msra.mxu1 %v14437_v31  ;;  %v491_v31 = vpop.permute.xlu1 %490  ;;  %v17618_v21 = vld [vmem:[#allocation23_spill] sm:$0xff] }
 0x2e0   : > { %11444 = vmatprep.subr.bf16.mxu1 %v17430_v63  ;;  %11465 = vmatpush3.bf16.msra.mxu0 %v14525_v1  ;;  %v496_v24 = vrot.slane %v491_v31, %v17599_v11 }
 0x2e1   : > { %11466 = vmatprep.subr.bf16.mxu0 %v17430_v63 }
 0x2e3   : > { %11446 = vmatpush3.bf16.msra.mxu1 %v14449_v45  ;;  %v14732_v25 = vpop.f32.mrb[6].mxu1 }
 0x2e4   : > { %11447 = vmatprep.subr.bf16.mxu1 %v17430_v63  ;;  %17595 = vst [vmem:[#allocation55_spill] sm:$0xff] %v14732_v25  ;;  %11469 = vmatpush3.bf16.msk.msra.mxu0 %vm13546_vm8, %v14535_v52  ;;  %v10106_v38 = vpop.f32.mrb[7].mxu1 }
 0x2e5   : > { %11486 = vmatprep.subr.bf16.mxu0 %v17430_v63 }
 0x2e7   : > { %11449 = vmatpush3.bf16.msra.mxu1 %v14461_v49  ;;  %10634 = vmatmul.mubr.msk.f32.vlgmr.msra.gmra.mrb[26].mxu0 %vm5476_vm9, %v14033_v54 }
 0x2e8   : > { %11450 = vmatprep.subr.bf16.mxu1 %v17430_v63  ;;  %11488 = vmatpush3.bf16.msra.mxu0 %v14549_v16  ;;  %v17607_v16 = vld [vmem:[#allocation88_spill] sm:$0xff] }
 0x2e9   : > { %10679 = vmatprep.mubr.msk.f32.mxu0 %vm17447_vm7, %v17446_v14  ;;  %11489 = vmatprep.subr.bf16.mxu0 %v17430_v63 }
 0x2eb   : > { %11453 = vmatpush3.bf16.msk.msra.mxu1 %vm13546_vm8, %v14469_v60 }
 0x2ec   : > { %11470 = vmatprep.subr.bf16.mxu1 %v17430_v63  ;;  %11491 = vmatpush3.bf16.msra.mxu0 %v14559_v29 }
 0x2ed   : > { %11492 = vmatprep.subr.bf16.mxu0 %v17430_v63 }
 0x2ee   : > { %10611 = vmatmul.mubr.msk.f32.vlgmr.msra.gmra.mrb[28].mxu1 %vm5476_vm9, %v14089_v46  ;;  %v17597_v46 = vld [vmem:[#allocation15_spill] sm:$0xff] }
 0x2ef   : > { %11472 = vmatpush3.bf16.msra.mxu1 %v14479_v35  ;;  %10656 = vmatprep.mubr.msk.f32.mxu1 %vm17447_vm7, %v17446_v14  ;;  %v478_v35 = vadd.s32 1, %v17597_v46 }
 0x2f0   : > { %11473 = vmatprep.subr.bf16.mxu1 %v17430_v63  ;;  %11494 = vmatpush3.bf16.msra.mxu0 %v14569_v42  ;;  %v504_v42 = vrot.slane %v499_v15, %v17599_v11  ;;  %v17621_v15 = vld [vmem:[#allocation41_spill] sm:$0xff] }
 0x2f1   : > { %11495 = vmatprep.subr.bf16.mxu0 %v17430_v63  ;;  %v14761_v54 = vpop.f32.mrb[6].mxu0  ;;  %v479_v60 = vcvt.s32.f32 %v478_v35 }
 0x2f2   : > { %17596 = vst [vmem:[#allocation95_spill] sm:$0xff] %v14761_v54  ;;  %v10175_v52 = vpop.f32.mrb[7].mxu0  ;;  %v17678_v54 = vld [vmem:[#allocation48_spill] sm:$0xff] }
 0x2f3   : > { %11475 = vmatpush3.bf16.msra.mxu1 %v14489_v47  ;;  %v14787_v29 = vmul.f32 3.1415927, %v479_v60  ;;  %v17620_v60 = vld [vmem:[#allocation18_spill] sm:$0xff] }
 0x2f4   : > { %11476 = vmatprep.subr.bf16.mxu1 %v17430_v63  ;;  %11497 = vmatpush3.bf16.msra.mxu0 %v14577_v5 }
 0x2f5   : > { %11498 = vmatprep.subr.bf16.mxu0 %v17430_v63  ;;  %v14816_v49 = vmul.f32 %v504_v42, %v14787_v29  ;;  %v14858_v62 = vmul.f32 %v512_v59, %v14787_v29  ;;  %v17622_v42 = vld [vmem:[#allocation36_spill] sm:$0xff] }
 0x2f7   : > { %11478 = vmatpush3.bf16.msra.mxu1 %v14501_v7  ;;  %17606 = vst [vmem:[#allocation96_spill] sm:$0xff] %v14816_v49  ;;  %v791_v5 = vand.u32 2139095040, %v14816_v49 }
 0x2f8   : > { %11479 = vmatprep.subr.bf16.mxu1 %v17430_v63  ;;  %11501 = vmatpush3.bf16.msk.msra.mxu0 %vm13546_vm8, %v14585_v44  ;;  %v17608_v44 = vld [vmem:[#allocation25_spill] sm:$0xff] }
 0x2f9   : > { %v14769_v1 = vpop.f32.mrb[8].mxu1  ;;  %11518 = vmatprep.subr.bf16.mxu0 %v17430_v63 }
 0x2fa   : > { %17598 = vst [vmem:[#allocation15_spill] sm:$0xff] %v14769_v1  ;;  %v10152_v47 = vpop.f32.mrb[9].mxu1 }
 0x2fb   : > { %11481 = vmatpush3.bf16.msra.mxu1 %v14513_v36  ;;  %10680 = vmatmul.mubr.msk.f32.vlgmr.msra.gmra.mrb[28].mxu0 %vm5476_vm9, %v14152_v28  ;;  %v17600_v28 = vld [vmem:[#allocation90_spill] sm:$0xff]  ;;  %v483_v36 = vpop.permute.xlu1 %482  ;;  %v895_v47 = vand.u32 2139095040, %v14858_v62 }
 0x2fc   : > { %11482 = vmatprep.subr.bf16.mxu1 %v17430_v63  ;;  %11520 = vmatpush3.bf16.msra.mxu0 %v14597_v32 }
 0x2fd   : > { %10725 = vmatprep.mubr.msk.f32.mxu0 %vm17447_vm7, %v17446_v14  ;;  %11521 = vmatprep.subr.bf16.mxu0 %v17430_v63 }
 0x2ff   : > { %11485 = vmatpush3.bf16.msk.msra.mxu1 %vm13546_vm8, %v14521_v3  ;;  %v14799_v3 = vmul.f32 %v496_v24, %v14787_v29  ;;  %v515_v52 = vpop.permute.xlu1 %514 }
 0x300   : > { %11502 = vmatprep.subr.bf16.mxu1 %v17430_v63  ;;  %11523 = vmatpush3.bf16.msra.mxu0 %v14605_v33  ;;  %v792_v33 = vshrl.u32 %v791_v5, 23  ;;  %v17626_v5 = vmov 2102212464  }
 0x301   : > { %11524 = vmatprep.subr.bf16.mxu0 %v17430_v63  ;;  %17601 = vst [vmem:[#allocation90_spill] sm:$0xff] %v14799_v3  ;;  %v687_v53 = vand.u32 2139095040, %v14799_v3  ;;  %v17216_v35 = vand.u32 2147483647, %v14799_v3 }
 0x302   : > { %10657 = vmatmul.mubr.msk.f32.vlgmr.msra.gmra.mrb[30].mxu1 %vm5476_vm9, %v14255_v10 }
 0x303   : > { %11504 = vmatpush3.bf16.msra.mxu1 %v17600_v28  ;;  %10702 = vmatprep.mubr.msk.f32.mxu1 %vm17447_vm7, %v17446_v14  ;;  %v688_v58 = vshrl.u32 %v687_v53, 23  ;;  %v520_v53 = vrot.slane %v515_v52, %v17599_v11  ;;  %v531_v56 = vpop.permute.xlu1 %530 }
 0x304   : > { %11505 = vmatprep.subr.bf16.mxu1 %v17430_v63  ;;  %11526 = vmatpush3.bf16.msra.mxu0 %v14613_v19  ;;  %v17609_v19 = vld [vmem:[#allocation31_spill] sm:$0xff] }
 0x305   : > { %11527 = vmatprep.subr.bf16.mxu0 %v17430_v63  ;;  %v9206_v7 = vadd.s32 4294967169, %v688_v58  ;;  %17616 = vst [vmem:[#allocation31_spill] sm:$0xff] %v14858_v62  ;;  %v896_v58 = vshrl.u32 %v895_v47, 23  ;;  %v17634_v47 = vld [vmem:[#allocation44_spill] sm:$0xff] }
 0x306   : > { %v14804_v10 = vpop.f32.mrb[8].mxu0 }
 0x307   : > { %11507 = vmatpush3.bf16.msra.mxu1 %v17602_v40  ;;  %17603 = vst [vmem:[#allocation91_spill] sm:$0xff] %v14804_v10  ;;  %v10221_v4 = vpop.f32.mrb[9].mxu0  ;;  %v694_v32 = vadd.s32 1, %v9206_v7  ;;  %v17624_v7 = vmov 2131351028  }
 0x308   : > { %11508 = vmatprep.subr.bf16.mxu1 %v17430_v63  ;;  %11529 = vmatpush3.bf16.msra.mxu0 %v14619_v30  ;;  %v17611_v30 = vld [vmem:[#allocation38_spill] sm:$0xff] }
 0x309   : > { %11530 = vmatprep.subr.bf16.mxu0 %v17430_v63  ;;  %vm695_vm2 = vcmp.gt.s32.totalorder %v694_v32, 0 }
 0x30a   : > { %v696_v23 = vsel %vm695_vm2, %v694_v32, 0 }
 0x30b   : > { %11510 = vmatpush3.bf16.msra.mxu1 %v17604_v50  ;;  %v14861_v22 = vand.u32 31, %v696_v23  ;;  %v691_v50 = vand.u32 8388607, %v17216_v35 }
 0x30c   : > { %11511 = vmatprep.subr.bf16.mxu1 %v17430_v63  ;;  %11533 = vmatpush3.bf16.msk.msra.mxu0 %vm13546_vm8, %v14629_v34  ;;  %v17614_v34 = vld [vmem:[#allocation39_spill] sm:$0xff] }
 0x30d   : > { %v14813_v45 = vpop.f32.mrb[10].mxu1  ;;  %11534 = vmatprep.subr.bf16.mxu0 %v17430_v63  ;;  %v14876_v28 = vsub.s32 32, %v14861_v22  ;;  %v713_v52 = vshll.u32 %v17630_v39, %v14861_v22 }
 0x30e   : > { %17605 = vst [vmem:[#allocation92_spill] sm:$0xff] %v14813_v45  ;;  %v10198_v20 = vpop.f32.mrb[11].mxu1 }
 0x30f   : > { %11513 = vmatpush3.bf16.msra.mxu1 %v14565_v26  ;;  %10726 = vmatmul.mubr.msk.f32.vlgmr.msra.gmra.mrb[30].mxu0 %vm5476_vm9, %v17607_v16  ;;  %v488_v26 = vrot.slane %v483_v36, %v17599_v11  ;;  %v17623_v20 = vld [vmem:[#allocation17_spill] sm:$0xff]  ;;  %v705_v36 = vshrl.u32 %v17624_v7, %v14876_v28  ;;  %v17625_v16 = vld [vmem:[#allocation42_spill] sm:$0xff] }
 0x310   : > { %11514 = vmatprep.subr.bf16.mxu1 %v17430_v63  ;;  %11536 = vmatpush3.bf16.msra.mxu0 %v17608_v44  ;;  %v708_v44 = vshrl.u32 %v17626_v5, %v14876_v28 }
 0x311   : > { %10748 = vmatprep.mubr.msk.f32.mxu0 %vm17447_vm7, %v17446_v14  ;;  %11537 = vmatprep.subr.bf16.mxu0 %v17430_v63  ;;  %v14842_v12 = vmul.f32 %v488_v26, %v14787_v29 }
 0x313   : > { %11517 = vmatpush3.bf16.msk.msra.mxu1 %vm13546_vm8, %v14573_v0  ;;  %17612 = vst [vmem:[#allocation88_spill] sm:$0xff] %v14842_v12  ;;  %v9210_v0 = vadd.s32 4294967169, %v792_v33  ;;  %v583_v51 = vand.u32 2139095040, %v14842_v12  ;;  %v14903_v33 = vmul.f32 %v520_v53, %v14787_v29 }
 0x314   : > { %11550 = vmatprep.subr.bf16.mxu1 %v17430_v63  ;;  %11539 = vmatpush3.bf16.msra.mxu0 %v17609_v19  ;;  %v17629_v19 = vmov 2475754826  }
 0x315   : > { %11540 = vmatprep.subr.bf16.mxu0 %v17430_v63  ;;  %v798_v2 = vadd.s32 1, %v9210_v0  ;;  %v584_v38 = vshrl.u32 %v583_v51, 23  ;;  %17628 = vst [vmem:[#allocation19_spill] sm:$0xff] %v14903_v33  ;;  %v17631_v0 = vmov 1326507024   ;;  %v707_v51 = vshll.u32 %v17624_v7, %v14861_v22 }
 0x316   : > { %10703 = vmatmul.mubr.msk.f32.vlgmr.msra.gmra.mrb[32].mxu1 %vm5476_vm9, %v17610_v48  ;;  %v704_v48 = vshll.u32 %v17629_v19, %v14861_v22  ;;  %v714_v59 = vshrl.u32 %v17631_v0, %v14876_v28  ;;  %v17665_v57 = vand.u32 2147483647, %v14903_v33 }
 0x317   : > { %11552 = vmatpush3.bf16.msra.mxu1 %v17611_v30  ;;  %10771 = vmatprep.mubr.msk.f32.mxu1 %vm17447_vm7, %v17446_v14  ;;  %vm799_vm5 = vcmp.gt.s32.totalorder %v798_v2, 0  ;;  %v9202_v40 = vadd.s32 4294967169, %v584_v38  ;;  %v711_v30 = vshrl.u32 %v17630_v39, %v14876_v28  ;;  %v710_v38 = vshll.u32 %v17626_v5, %v14861_v22 }
 0x318   : > { %11553 = vmatprep.subr.bf16.mxu1 %v17430_v63  ;;  %11542 = vmatpush3.bf16.msra.mxu0 %v17613_v43  ;;  %v14882_v4 = vsel %vm799_vm5, %v798_v2, 0  ;;  %v692_v43 = vor.u32 8388608, %v691_v50  ;;  %v17632_v2 = vld [vmem:[#allocation34_spill] sm:$0xff]  ;;  %v715_v53 = vor.u32 %v714_v59, %v713_v52 }
 0x319   : > { %11543 = vmatprep.subr.bf16.mxu0 %v17430_v63  ;;  %v14900_v26 = vand.u32 31, %v14882_v4  ;;  %v590_v32 = vadd.s32 1, %v9202_v40  ;;  %v14937_v40 = vor.u32 %v711_v30, %v710_v38 }
 0x31a   : > { %v14852_v9 = vpop.f32.mrb[10].mxu0 }
 0x31b   : > { %11555 = vmatpush3.bf16.msra.mxu1 %v17614_v34  ;;  %17615 = vst [vmem:[#allocation25_spill] sm:$0xff] %v14852_v9  ;;  %v10267_v55 = vpop.f32.mrb[11].mxu0  ;;  %17627 = vst [vmem:[#allocation38_spill] sm:$0xff] %v14900_v26  ;;  %v14912_v34 = vshrl.u32 %v696_v23, 5  ;;  %v17215_v23 = vand.u32 2147483647, %v14816_v49  ;;  %v811_v35 = vshll.u32 %v17624_v7, %v14900_v26 }
 0x31c   : > { %11556 = vmatprep.subr.bf16.mxu1 %v17430_v63  ;;  %11545 = vmatpush3.bf16.msra.mxu0 %v17617_v8  ;;  %v9214_v55 = vadd.s32 4294967169, %v896_v58  ;;  %v17633_v8 = vld [vmem:[#allocation76_spill] sm:$0xff]  ;;  %vm591_vm14 = vcmp.gt.s32.totalorder %v590_v32, 0 }
 0x31d   : > { %11546 = vmatprep.subr.bf16.mxu0 %v17430_v63  ;;  %vm716_vm0 = vcmp.lt.s32.totalorder %v14912_v34, 1  ;;  %v17636_v58 = vld [vmem:[#allocation20_spill] sm:$0xff]  ;;  %vm718_vm1 = vcmp.lt.s32.totalorder %v14912_v34, 3  ;;  %vm719_vm3 = vcmp.lt.s32.totalorder %v14912_v34, 4  ;;  %v795_v30 = vand.u32 8388607, %v17215_v23 }
 0x31e   : > { %v902_v50 = vadd.s32 1, %v9214_v55  ;;  %v729_v55 = vsel %vm719_vm3, %v715_v53, 1326507024  ;;  %v808_v23 = vshll.u32 %v17629_v19, %v14900_v26 }
 0x31f   : > { %11558 = vmatpush3.bf16.msra.mxu1 %v17618_v21  ;;  %v14919_v21 = vor.u32 %v705_v36, %v704_v48  ;;  %v592_v36 = vsel %vm591_vm14, %v590_v32, 0  ;;  %v725_v32 = vsel %vm719_vm3, %v14937_v40, 920167782  ;;  %v796_v31 = vor.u32 8388608, %v795_v30 }
 0x320   : > { %11559 = vmatprep.subr.bf16.mxu1 %v17430_v63  ;;  %11549 = vmatpush3.bf16.msk.msra.mxu0 %vm13546_vm8, %v17620_v60  ;;  %v14928_v60 = vor.u32 %v708_v44, %v707_v51  ;;  %v17637_v44 = vld [vmem:[#allocation32_spill] sm:$0xff]  ;;  %vm903_vm4 = vcmp.gt.s32.totalorder %v902_v50, 0 }
 0x321   : > { %v14866_v46 = vpop.f32.mrb[12].mxu1  ;;  %11566 = vmatprep.subr.bf16.mxu0 %v17430_v63 }
 0x322   : > { %17619 = vst [vmem:[#allocation89_spill] sm:$0xff] %v14866_v46  ;;  %v10244_v24 = vpop.f32.mrb[13].mxu1  ;;  %v14952_v48 = vsel %vm716_vm0, %v14919_v21, %v14928_v60 }
 0x323   : > { %11561 = vmatpush3.bf16.msra.mxu1 %v17621_v15  ;;  %10749 = vmatmul.mubr.msk.f32.vlgmr.msra.gmra.mrb[20].mxu0 %vm5476_vm9, %v17622_v42  ;;  %v14931_v24 = vsub.s32 32, %v14900_v26  ;;  %v999_v15 = vand.u32 2139095040, %v14903_v33  ;;  %v14940_v42 = vshll.u32 %v692_v43, 8 }
 0x324   : > { %11562 = vmatprep.subr.bf16.mxu1 %v17430_v63  ;;  %11568 = vmatpush3.bf16.msra.mxu0 %v17623_v20  ;;  %v17217_v20 = vand.u32 2147483647, %v14842_v12  ;;  %v17657_v12 = vld [vmem:[#allocation78_spill] sm:$0xff] }
 0x325   : > { %10794 = vmatprep.mubr.msk.f32.mxu0 %vm17447_vm7, %v17446_v14  ;;  %11569 = vmatprep.subr.bf16.mxu0 %v17430_v63  ;;  %17635 = vst [vmem:[#allocation39_spill] sm:$0xff] %v14931_v24  ;;  %v815_v59 = vshrl.u32 %v17630_v39, %v14931_v24  ;;  %v1000_v43 = vshrl.u32 %v999_v15, 23  ;;  %v818_v52 = vshrl.u32 %v17631_v0, %v14931_v24 }
 0x326   : > { %v809_v53 = vshrl.u32 %v17624_v7, %v14931_v24 }
 0x327   : > { %11565 = vmatpush3.bf16.msk.msra.mxu1 %vm13546_vm8, %v17625_v16  ;;  %v523_v16 = vpop.permute.xlu0 %522 }
 0x328   : > { %11582 = vmatprep.subr.bf16.mxu1 %v17430_v63  ;;  %11571 = vmatpush3.bf16.msra.mxu0 %v17632_v2  ;;  %v814_v2 = vshll.u32 %v17626_v5, %v14900_v26  ;;  %v528_v15 = vrot.slane %v523_v16, %v17599_v11  ;;  %v15011_v9 = vor.u32 %v809_v53, %v808_v23  ;;  %v17649_v53 = vld [vmem:[#allocation30_spill] sm:$0xff] }
 0x329   : > { %11572 = vmatprep.subr.bf16.mxu0 %v17430_v63 }
 0x32a   : > { %10772 = vmatmul.mubr.msk.f32.vlgmr.msra.gmra.mrb[24].mxu1 %vm5476_vm9, %v17633_v8  ;;  %v812_v8 = vshrl.u32 %v17626_v5, %v14931_v24  ;;  %v816_v16 = vor.u32 %v815_v59, %v814_v2  ;;  %v17644_v2 = vld [vmem:[#allocation21_spill] sm:$0xff]  ;;  %17645 = vst [vmem:[#allocation36_spill] sm:$0xff] %v15011_v9 }
 0x32b   : > { %11584 = vmatpush3.bf16.msra.mxu1 %v17634_v47  ;;  %10817 = vmatprep.mubr.msk.f32.mxu1 %vm17447_vm7, %v17446_v14  ;;  %v14972_v47 = vand.u32 31, %v592_v36 }
 0x32c   : > { %11585 = vmatprep.subr.bf16.mxu1 %v17430_v63  ;;  %11574 = vmatpush3.bf16.msra.mxu0 %v17636_v58  ;;  %v17639_v58 = vld [vmem:[#allocation29_spill] sm:$0xff] }
 0x32d   : > { %11575 = vmatprep.subr.bf16.mxu0 %v17430_v63  ;;  %v15001_v59 = vsub.s32 32, %v14972_v47  ;;  %v609_v13 = vshll.u32 %v17630_v39, %v14972_v47 }
 0x32e   : > { %v14958_v51 = vpop.f32.mrb[12].mxu0 }
 0x32f   : > { %11587 = vmatpush3.bf16.msra.mxu1 %v17637_v44  ;;  %17638 = vst [vmem:[#allocation28_spill] sm:$0xff] %v14958_v51  ;;  %v10313_v38 = vpop.f32.mrb[13].mxu0  ;;  %v14977_v44 = vshrl.u32 %v14882_v4, 5  ;;  %v9218_v4 = vadd.s32 4294967169, %v1000_v43  ;;  %v14996_v51 = vsel %vm903_vm4, %v902_v50, 0  ;;  %v15004_v43 = vmul.f32 %v528_v15, %v14787_v29 }
 0x330   : > { %11588 = vmatprep.subr.bf16.mxu1 %v17430_v63  ;;  %11577 = vmatpush3.bf16.msra.mxu0 %v17639_v58  ;;  %v587_v38 = vand.u32 8388607, %v17217_v20  ;;  %v817_v58 = vshll.u32 %v17630_v39, %v14900_v26  ;;  %v15013_v50 = vor.u32 %v812_v8, %v811_v35  ;;  %v15021_v15 = vsel %vm718_vm1, %v14928_v60, %v725_v32  ;;  %v17676_v26 = vld [vmem:[#allocation82_spill] sm:$0xff] }
 0x331   : > { %17640 = vst [vmem:[#allocation23_spill] sm:$0xff] %v14977_v44  ;;  %11578 = vmatprep.subr.bf16.mxu0 %v17430_v63  ;;  %17643 = vst [vmem:[#allocation41_spill] sm:$0xff] %v15004_v43  ;;  %vm17273_vm10 = vcmp.lt.s32.totalorder %v14977_v44, 4  ;;  %v15026_v23 = vand.u32 31, %v14996_v51  ;;  %v1006_v35 = vadd.s32 1, %v9218_v4  ;;  %vm17277_vm6 = vcmp.lt.s32.totalorder %v14977_v44, 1 }
 0x332   : > { %v819_v30 = vor.u32 %v818_v52, %v817_v58  ;;  %17646 = vst [vmem:[#allocation17_spill] sm:$0xff] %v15013_v50  ;;  %v588_v52 = vor.u32 8388608, %v587_v38  ;;  %v17647_v58 = vld [vmem:[#allocation37_spill] sm:$0xff]  ;;  %vm17257_vm13 = vcmp.lt.s32.totalorder %v14977_v44, 3  ;;  %v17648_v32 = vand.u32 2147483647, %v14858_v62 }
 0x333   : > { %11590 = vmatpush3.bf16.msra.mxu1 %v17641_v27  ;;  %v15042_v4 = vshrl.u32 %v592_v36, 5  ;;  %v15059_v36 = vsel %vm17277_vm6, %v15011_v9, %v15013_v50  ;;  %v610_v37 = vshrl.u32 %v17631_v0, %v15001_v59  ;;  %vm1007_vm12 = vcmp.gt.s32.totalorder %v1006_v35, 0  ;;  %v17656_v62 = vld [vmem:[#allocation43_spill] sm:$0xff]  ;;  %v17667_v44 = vld [vmem:[#allocation45_spill] sm:$0xff]  ;;  %v555_v9 = vpop.permute.xlu1 %554 }
 0x334   : > { %11591 = vmatprep.subr.bf16.mxu1 %v17430_v63  ;;  %11581 = vmatpush3.bf16.msk.msra.mxu0 %vm13546_vm8, %v17644_v2  ;;  %v829_v2 = vsel %vm17273_vm10, %v816_v16, 920167782  ;;  %v899_v8 = vand.u32 8388607, %v17648_v32  ;;  %v833_v38 = vsel %vm17273_vm10, %v819_v30, 1326507024 }
 0x335   : > { %v14998_v27 = vpop.f32.mrb[14].mxu1  ;;  %11598 = vmatprep.subr.bf16.mxu0 %v17430_v63  ;;  %v15053_v32 = vsel %vm17257_vm13, %v15013_v50, %v829_v2  ;;  %17652 = vst [vmem:[#allocation34_spill] sm:$0xff] %v15059_v36  ;;  %v15061_v30 = vshll.u32 %v796_v31, 8  ;;  %v606_v2 = vshll.u32 %v17626_v5, %v14972_v47  ;;  %v15079_v31 = vsel %vm17257_vm13, %v816_v16, %v833_v38 }
 0x336   : > { %17642 = vst [vmem:[#allocation18_spill] sm:$0xff] %v14998_v27  ;;  %v10290_v20 = vpop.f32.mrb[15].mxu1  ;;  %17651 = vst [vmem:[#allocation42_spill] sm:$0xff] %v15053_v32  ;;  %v15074_v27 = vsub.s32 32, %v15026_v23  ;;  %v900_v41 = vor.u32 8388608, %v899_v8  ;;  %vm612_vm11 = vcmp.lt.s32.totalorder %v15042_v4, 1  ;;  %v600_v16 = vshll.u32 %v17629_v19, %v14972_v47 }
 0x337   : > { %11593 = vmatpush3.bf16.msra.mxu1 %v17647_v58  ;;  %v15032_v20 = vsel %vm718_vm1, %v14937_v40, %v729_v55  ;;  %10795 = vmatmul.mubr.msk.f32.vlgmr.msra.gmra.mrb[22].mxu0 %vm5476_vm9, %v17649_v53  ;;  %v607_v58 = vshrl.u32 %v17630_v39, %v15001_v59  ;;  %v1103_v40 = vand.u32 2139095040, %v15004_v43  ;;  %v17650_v55 = vld [vmem:[#allocation40_spill] sm:$0xff]  ;;  %17653 = vst [vmem:[#allocation76_spill] sm:$0xff] %v15061_v30  ;;  %v15063_v53 = vshll.u32 %v588_v52, 8  ;;  %v17661_v30 = vld [vmem:[#allocation27_spill] sm:$0xff] }
 0x338   : > { %11594 = vmatprep.subr.bf16.mxu1 %v17430_v63  ;;  %11600 = vmatpush3.bf16.msra.mxu0 %v17650_v55  ;;  %v17654_v55 = vld [vmem:[#allocation49_spill] sm:$0xff]  ;;  %17655 = vst [vmem:[#allocation44_spill] sm:$0xff] %v15079_v31  ;;  %v601_v52 = vshrl.u32 %v17624_v7, %v15001_v59  ;;  %v603_v38 = vshll.u32 %v17624_v7, %v14972_v47  ;;  %vm614_vm15 = vcmp.lt.s32.totalorder %v15042_v4, 3  ;;  %v15097_v8 = vsel %vm1007_vm12, %v1006_v35, 0 }
 0x339   : > { %10840 = vmatprep.mubr.msk.f32.mxu0 %vm17447_vm7, %v17446_v14  ;;  %11601 = vmatprep.subr.bf16.mxu0 %v17430_v63  ;;  %v608_v46 = vor.u32 %v607_v58, %v606_v2  ;;  %v1104_v49 = vshrl.u32 %v1103_v40, 23  ;;  %v17658_v58 = vld [vmem:[#allocation54_spill] sm:$0xff]  ;;  %v611_v40 = vor.u32 %v610_v37, %v609_v13  ;;  %vm615_vm2 = vcmp.lt.s32.totalorder %v15042_v4, 4 }
 0x33a   : > { %v15108_v2 = vor.u32 %v601_v52, %v600_v16  ;;  %v15112_v3 = vshll.u32 %v900_v41, 8  ;;  %v15124_v52 = vshrl.u32 %v14996_v51, 5  ;;  %v913_v41 = vshrl.u32 %v17624_v7, %v15074_v27 }
 0x33b   : > { %11597 = vmatpush3.bf16.msk.msra.mxu1 %vm13546_vm8, %v17654_v55  ;;  %v604_v55 = vshrl.u32 %v17626_v5, %v15001_v59  ;;  %v621_v37 = vsel %vm615_vm2, %v608_v46, 920167782  ;;  %v9222_v50 = vadd.s32 4294967169, %v1104_v49  ;;  %v922_v16 = vshrl.u32 %v17631_v0, %v15074_v27 }
 0x33c   : > { %11614 = vmatprep.subr.bf16.mxu1 %v17430_v63  ;;  %11603 = vmatpush3.bf16.msra.mxu0 %v17656_v62  ;;  %v536_v62 = vrot.slane %v531_v56, %v17599_v11  ;;  %17659 = vst [vmem:[#allocation20_spill] sm:$0xff] %v15112_v3  ;;  %v15120_v56 = vand.u32 31, %v15097_v8  ;;  %v625_v49 = vsel %vm615_vm2, %v611_v40, 1326507024  ;;  %v912_v51 = vshll.u32 %v17629_v19, %v15026_v23 }
 0x33d   : > { %11604 = vmatprep.subr.bf16.mxu0 %v17430_v63  ;;  %v15110_v35 = vor.u32 %v604_v55, %v603_v38  ;;  %v916_v55 = vshrl.u32 %v17626_v5, %v15074_v27  ;;  %v17662_v38 = vld [vmem:[#allocation57_spill] sm:$0xff]  ;;  %v915_v31 = vshll.u32 %v17624_v7, %v15026_v23  ;;  %v1003_v40 = vand.u32 8388607, %v17665_v57  ;;  %v539_v57 = vpop.permute.xlu0 %538 }
 0x33e   : > { %10818 = vmatmul.mubr.msk.f32.vlgmr.msra.gmra.mrb[26].mxu1 %vm5476_vm9, %v17657_v12  ;;  %v919_v12 = vshrl.u32 %v17630_v39, %v15074_v27  ;;  %17660 = vst [vmem:[#allocation32_spill] sm:$0xff] %v15120_v56  ;;  %v15139_v13 = vmul.f32 %v536_v62, %v14787_v29  ;;  %v15164_v10 = vsub.s32 32, %v15120_v56  ;;  %v1110_v33 = vadd.s32 1, %v9222_v50 }
 0x33f   : > { %11616 = vmatpush3.bf16.msra.mxu1 %v17658_v58  ;;  %10863 = vmatprep.mubr.msk.f32.mxu1 %vm17447_vm7, %v17446_v14  ;;  %v918_v58 = vshll.u32 %v17626_v5, %v15026_v23  ;;  %v15155_v62 = vsel %vm614_vm15, %v15110_v35, %v621_v37  ;;  %v15167_v32 = vor.u32 %v913_v41, %v912_v51  ;;  %vm927_vm5 = vcmp.lt.s32.totalorder %v15124_v52, 4  ;;  %v17669_v37 = vld [vmem:[#allocation61_spill] sm:$0xff]  ;;  %v17671_v51 = vld [vmem:[#allocation47_spill] sm:$0xff] }
 0x340   : > { %11617 = vmatprep.subr.bf16.mxu1 %v17430_v63  ;;  %11606 = vmatpush3.bf16.msra.mxu0 %v17661_v30  ;;  %17663 = vst [vmem:[#allocation29_spill] sm:$0xff] %v15139_v13  ;;  %17666 = vst [vmem:[#allocation21_spill] sm:$0xff] %v15164_v10  ;;  %v15176_v25 = vsel %vm614_vm15, %v608_v46, %v625_v49  ;;  %vm924_vm14 = vcmp.lt.s32.totalorder %v15124_v52, 1  ;;  %v1207_v50 = vand.u32 2139095040, %v15139_v13  ;;  %vm17278_vm4 = vcmp.lt.s32.totalorder %v15124_v52, 3 }
 0x341   : > { %11607 = vmatprep.subr.bf16.mxu0 %v17430_v63  ;;  %v920_v30 = vor.u32 %v919_v12, %v918_v58  ;;  %v15161_v58 = vsel %vm612_vm11, %v15108_v2, %v15110_v35  ;;  %v1023_v46 = vshrl.u32 %v17630_v39, %v15164_v10  ;;  %v1026_v49 = vshrl.u32 %v17631_v0, %v15164_v10 }
 0x342   : > { %v15141_v36 = vpop.f32.mrb[14].mxu0  ;;  %vm1111_vm12 = vcmp.gt.s32.totalorder %v1110_v33, 0  ;;  %v1208_v61 = vshrl.u32 %v1207_v50, 23  ;;  %v17677_v17 = vand.u32 2147483647, %v15004_v43  ;;  %v17684_v43 = vld [vmem:[#allocation53_spill] sm:$0xff] }
 0x343   : > { %11619 = vmatpush3.bf16.msra.mxu1 %v17662_v38  ;;  %17664 = vst [vmem:[#allocation46_spill] sm:$0xff] %v15141_v36  ;;  %v921_v38 = vshll.u32 %v17630_v39, %v15026_v23  ;;  %v10359_v12 = vpop.f32.mrb[15].mxu0 }
 0x344   : > { %11620 = vmatprep.subr.bf16.mxu1 %v17430_v63  ;;  %11609 = vmatpush3.bf16.msra.mxu0 %v17667_v44  ;;  %v15169_v12 = vor.u32 %v916_v55, %v915_v31  ;;  %v933_v44 = vsel %vm927_vm5, %v920_v30, 920167782  ;;  %v1004_v31 = vor.u32 8388608, %v1003_v40  ;;  %v544_v55 = vrot.slane %v539_v57, %v17599_v11 }
 0x345   : > { %v923_v36 = vor.u32 %v922_v16, %v921_v38  ;;  %11610 = vmatprep.subr.bf16.mxu0 %v17430_v63  ;;  %v17673_v38 = vld [vmem:[#allocation63_spill] sm:$0xff]  ;;  %v1107_v3 = vand.u32 8388607, %v17677_v17 }
 0x346   : > { %17668 = vst [vmem:[#allocation37_spill] sm:$0xff] %v15169_v12  ;;  %v15200_v57 = vsel %vm17278_vm4, %v15169_v12, %v933_v44  ;;  %v1022_v44 = vshll.u32 %v17626_v5, %v15120_v56 }
 0x347   : > { %11622 = vmatpush3.bf16.msra.mxu1 %v17669_v37  ;;  %v15206_v37 = vsel %vm924_vm14, %v15167_v32, %v15169_v12  ;;  %v937_v41 = vsel %vm927_vm5, %v923_v36, 1326507024  ;;  %v1017_v36 = vshrl.u32 %v17624_v7, %v15164_v10 }
 0x348   : > { %11623 = vmatprep.subr.bf16.mxu1 %v17430_v63  ;;  %11613 = vmatpush3.bf16.msk.msra.mxu0 %vm13546_vm8, %v17671_v51  ;;  %17672 = vst [vmem:[#allocation40_spill] sm:$0xff] %v15206_v37  ;;  %v1020_v51 = vshrl.u32 %v17626_v5, %v15164_v10  ;;  %v15233_v50 = vsel %vm17278_vm4, %v920_v30, %v937_v41  ;;  %v17680_v30 = vand.u32 2147483647, %v15139_v13  ;;  %v17687_v10 = vld [vmem:[#allocation69_spill] sm:$0xff]  ;;  %v17694_v37 = vld [vmem:[#allocation56_spill] sm:$0xff] }
 0x349   : > { %v15186_v16 = vpop.f32.mrb[16].mxu1  ;;  %11630 = vmatprep.subr.bf16.mxu0 %v17430_v63  ;;  %v1024_v24 = vor.u32 %v1023_v46, %v1022_v44  ;;  %v560_v46 = vrot.slane %v555_v9, %v17599_v11  ;;  %v702_v13 = vshrl.u32 %v17629_v19, %v14876_v28  ;;  %v1108_v9 = vor.u32 8388608, %v1107_v3 }
 0x34a   : > { %17670 = vst [vmem:[#allocation30_spill] sm:$0xff] %v15186_v16  ;;  %v10336_v40 = vpop.f32.mrb[17].mxu1  ;;  %v1025_v16 = vshll.u32 %v17630_v39, %v15120_v56  ;;  %v1211_v41 = vand.u32 8388607, %v17680_v30  ;;  %v15274_v30 = vpop.permute.xlu1 %546 }
 0x34b   : > { %11625 = vmatpush3.bf16.msra.mxu1 %v17673_v38  ;;  %v15214_v40 = vshrl.u32 %v15097_v8, 5  ;;  %v1112_v38 = vsel %vm1111_vm12, %v1110_v33, 0  ;;  %v15227_v8 = vmul.f32 %v544_v55, %v14787_v29  ;;  %10841 = vmatmul.mubr.msk.f32.vlgmr.msra.gmra.mrb[24].mxu0 %vm5476_vm9, %v17676_v26  ;;  %v1016_v33 = vshll.u32 %v17629_v19, %v15120_v56 }
 0x34c   : > { %11626 = vmatprep.subr.bf16.mxu1 %v17430_v63  ;;  %v1027_v12 = vor.u32 %v1026_v49, %v1025_v16  ;;  %11632 = vmatpush3.bf16.msra.mxu0 %v17678_v54  ;;  %v1019_v26 = vshll.u32 %v17624_v7, %v15120_v56  ;;  %v15244_v55 = vshll.u32 %v1004_v31, 8  ;;  %v17681_v16 = vld [vmem:[#allocation65_spill] sm:$0xff]  ;;  %v15253_v17 = vand.u32 31, %v1112_v38  ;;  %v563_v49 = vpop.permute.xlu0 %562 }
 0x34d   : > { %17674 = vst [vmem:[#allocation49_spill] sm:$0xff] %v15214_v40  ;;  %17675 = vst [vmem:[#allocation43_spill] sm:$0xff] %v15227_v8  ;;  %10886 = vmatprep.mubr.msk.f32.mxu0 %vm17447_vm7, %v17446_v14  ;;  %11633 = vmatprep.subr.bf16.mxu0 %v17430_v63  ;;  %vm17264_vm12 = vcmp.lt.s32.totalorder %v15214_v40, 4  ;;  %v9226_v54 = vadd.s32 4294967169, %v1208_v61  ;;  %v15257_v31 = vor.u32 %v1017_v36, %v1016_v33  ;;  %vm17270_vm13 = vcmp.lt.s32.totalorder %v15214_v40, 1  ;;  %v17685_v36 = vld [vmem:[#allocation80_spill] sm:$0xff] }
 0x34e   : > { %17679 = vst [vmem:[#allocation78_spill] sm:$0xff] %v15244_v55  ;;  %v15259_v44 = vor.u32 %v1020_v51, %v1019_v26  ;;  %v1041_v61 = vsel %vm17264_vm12, %v1027_v12, 1326507024  ;;  %v1212_v51 = vor.u32 8388608, %v1211_v41  ;;  %v1311_v33 = vand.u32 2139095040, %v15227_v8 }
 0x34f   : > { %11629 = vmatpush3.bf16.msk.msra.mxu1 %vm13546_vm8, %v17681_v16  ;;  %17682 = vst [vmem:[#allocation54_spill] sm:$0xff] %v15257_v31  ;;  %v1037_v16 = vsel %vm17264_vm12, %v1024_v24, 920167782  ;;  %v568_v26 = vrot.slane %v563_v49, %v17599_v11  ;;  %v17686_v55 = vmov 683565275   ;;  %vm17268_vm12 = vcmp.lt.s32.totalorder %v15214_v40, 3 }
 0x350   : > { %11646 = vmatprep.subr.bf16.mxu1 %v17430_v63  ;;  %17683 = vst [vmem:[#allocation27_spill] sm:$0xff] %v15259_v44  ;;  %11635 = vmatpush3.bf16.msra.mxu0 %v17684_v43  ;;  %v701_v56 = vshll.u32 %v17686_v55, %v14861_v22  ;;  %v15282_v3 = vsub.s32 32, %v15253_v17  ;;  %v1214_v43 = vadd.s32 1, %v9226_v54  ;;  %v15285_v12 = vmul.f32 %v560_v46, %v14787_v29 }
 0x351   : > { %11636 = vmatprep.subr.bf16.mxu0 %v17430_v63  ;;  %v15293_v22 = vsel %vm17268_vm12, %v15259_v44, %v1037_v16  ;;  %v17691_v41 = vand.u32 2147483647, %v15227_v8  ;;  %v15307_v49 = vsel %vm17268_vm12, %v1024_v24, %v1041_v61  ;;  %v15318_v8 = vshll.u32 %v1212_v51, 8  ;;  %v17697_v24 = vld [vmem:[#allocation72_spill] sm:$0xff] }
 0x352   : > { %10864 = vmatmul.mubr.msk.f32.vlgmr.msra.gmra.mrb[28].mxu1 %vm5476_vm9, %v17685_v36  ;;  %17688 = vst [vmem:[#allocation57_spill] sm:$0xff] %v15285_v12  ;;  %17689 = vst [vmem:[#allocation45_spill] sm:$0xff] %v15293_v22  ;;  %v15303_v46 = vor.u32 %v702_v13, %v701_v56  ;;  %v15309_v36 = vshll.u32 %v1108_v9, 8  ;;  %v598_v22 = vshrl.u32 %v17629_v19, %v15001_v59  ;;  %v1312_v13 = vshrl.u32 %v1311_v33, 23 }
 0x353   : > { %11648 = vmatpush3.bf16.msra.mxu1 %v17687_v10  ;;  %10909 = vmatprep.mubr.msk.f32.mxu1 %vm17447_vm7, %v17446_v14  ;;  %v15299_v10 = vsel %vm17270_vm13, %v15257_v31, %v15259_v44  ;;  %v1315_v54 = vand.u32 8388607, %v17691_v41  ;;  %17692 = vst [vmem:[#allocation47_spill] sm:$0xff] %v15307_v49  ;;  %v15316_v44 = vshrl.u32 %v1112_v38, 5  ;;  %17695 = vst [vmem:[#allocation82_spill] sm:$0xff] %v15318_v8  ;;  %vm1215_vm12 = vcmp.gt.s32.totalorder %v1214_v43, 0 }
 0x354   : > { %11649 = vmatprep.subr.bf16.mxu1 %v17430_v63  ;;  %17690 = vst [vmem:[#allocation61_spill] sm:$0xff] %v15299_v10  ;;  %17693 = vst [vmem:[#allocation63_spill] sm:$0xff] %v15309_v36  ;;  %11638 = vmatpush3.bf16.msra.mxu0 %v17694_v37  ;;  %v15321_v56 = vmul.f32 %v568_v26, %v14787_v29  ;;  %v1127_v61 = vshrl.u32 %v17630_v39, %v15282_v3  ;;  %v1519_v33 = vand.u32 2139095040, %v15285_v12  ;;  %v17699_v8 = vld [vmem:[#allocation58_spill] sm:$0xff] }
 0x355   : > { %11639 = vmatprep.subr.bf16.mxu0 %v17430_v63  ;;  %v597_v37 = vshll.u32 %v17686_v55, %v14972_v47  ;;  %v1316_v51 = vor.u32 8388608, %v1315_v54  ;;  %v724_v26 = vsel %vm716_vm0, %v15303_v46, %v14919_v21  ;;  %v1121_v16 = vshrl.u32 %v17624_v7, %v15282_v3 }
 0x356   : > { %17696 = vst [vmem:[#allocation48_spill] sm:$0xff] %v15321_v56  ;;  %v15330_v38 = vpop.f32.mrb[16].mxu0  ;;  %v1126_v47 = vshll.u32 %v17626_v5, %v15253_v17  ;;  %v1130_v54 = vshrl.u32 %v17631_v0, %v15282_v3  ;;  %v1120_v10 = vshll.u32 %v17629_v19, %v15253_v17  ;;  %v1123_v41 = vshll.u32 %v17624_v7, %v15253_v17 }
 0x357   : > { %11651 = vmatpush3.bf16.msra.mxu1 %v17697_v24  ;;  %17698 = vst [vmem:[#allocation65_spill] sm:$0xff] %v15330_v38  ;;  %v10405_v24 = vpop.f32.mrb[17].mxu0  ;;  %v15346_v9 = vor.u32 %v598_v22, %v597_v37  ;;  %vm717_vm13 = vcmp.lt.s32.totalorder %v14912_v34, 2  ;;  %v17700_v38 = vld [vmem:[#allocation74_spill] sm:$0xff]  ;;  %v1129_v22 = vshll.u32 %v17630_v39, %v15253_v17  ;;  %vm1135_vm10 = vcmp.lt.s32.totalorder %v15316_v44, 4 }
 0x358   : > { %11652 = vmatprep.subr.bf16.mxu1 %v17430_v63  ;;  %11641 = vmatpush3.bf16.msra.mxu0 %v17699_v8  ;;  %v1124_v24 = vshrl.u32 %v17626_v5, %v15282_v3  ;;  %v1128_v1 = vor.u32 %v1127_v61, %v1126_v47  ;;  %v1216_v8 = vsel %vm1215_vm12, %v1214_v43, 0  ;;  %v727_v37 = vsel %vm717_vm13, %v724_v26, %v15021_v15  ;;  %v17702_v26 = vld [vmem:[#allocation59_spill] sm:$0xff] }
 0x359   : > { %11642 = vmatprep.subr.bf16.mxu0 %v17430_v63  ;;  %v9230_v49 = vadd.s32 4294967169, %v1312_v13  ;;  %v1520_v36 = vshrl.u32 %v1519_v33, 23  ;;  %v731_v61 = vsel %vm717_vm13, %v14952_v48, %v15032_v20  ;;  %v15372_v47 = vor.u32 %v1121_v16, %v1120_v10  ;;  %v17705_v16 = vld [vmem:[#allocation77_spill] sm:$0xff] }
 0x35a   : > { %v1131_v43 = vor.u32 %v1130_v54, %v1129_v22  ;;  %v620_v15 = vsel %vm612_vm11, %v15346_v9, %v15108_v2  ;;  %v15383_v40 = vor.u32 %v1124_v24, %v1123_v41  ;;  %v15385_v48 = vand.u32 31, %v1216_v8 }
 0x35b   : > { %11654 = vmatpush3.bf16.msra.mxu1 %v17700_v38  ;;  %v15388_v20 = vmul.u32.u64.low %v14940_v42, %v727_v37  ;;  %v15389_v10 = vmul.u32.u64.high %v14940_v42, %v727_v37, %v15388_v20  ;;  %v1141_v54 = vsel %vm1135_vm10, %v1128_v1, 920167782  ;;  %vm613_vm12 = vcmp.lt.s32.totalorder %v15042_v4, 2  ;;  %v17707_v37 = vld [vmem:[#allocation68_spill] sm:$0xff] }
 0x35c   : > { %11655 = vmatprep.subr.bf16.mxu1 %v17430_v63  ;;  %11645 = vmatpush3.bf16.msk.msra.mxu0 %vm13546_vm8, %v17702_v26  ;;  %17703 = vst [vmem:[#allocation80_spill] sm:$0xff] %v15383_v40  ;;  %17704 = vst [vmem:[#allocation69_spill] sm:$0xff] %v15385_v48  ;;  %v15397_v22 = vmul.u32.u64.low %v14940_v42, %v731_v61  ;;  %v15398_v26 = vmul.u32.u64.high %v14940_v42, %v731_v61, %v15397_v22  ;;  %vm1132_vm6 = vcmp.lt.s32.totalorder %v15316_v44, 1  ;;  %vm1134_vm4 = vcmp.lt.s32.totalorder %v15316_v44, 3 }
 0x35d   : > { %v15370_v38 = vpop.f32.mrb[18].mxu1  ;;  %11662 = vmatprep.subr.bf16.mxu0 %v17430_v63  ;;  %v15404_v41 = vshll.u32 %v1316_v51, 8  ;;  %v623_v24 = vsel %vm613_vm12, %v620_v15, %v15155_v62  ;;  %v1145_v61 = vsel %vm1135_vm10, %v1131_v43, 1326507024  ;;  %v627_v51 = vsel %vm613_vm12, %v15161_v58, %v15176_v25  ;;  %v17709_v22 = vld [vmem:[#allocation60_spill] sm:$0xff]  ;;  %v17710_v58 = vld [vmem:[#allocation79_spill] sm:$0xff] }
 0x35e   : > { %17701 = vst [vmem:[#allocation53_spill] sm:$0xff] %v15370_v38  ;;  %v10382_v33 = vpop.f32.mrb[19].mxu1  ;;  %v15427_v62 = vsel %vm1134_vm4, %v15383_v40, %v1141_v54  ;;  %v721_v25 = vsel %vm719_vm3, %v14928_v60, 2102212464  ;;  %v15443_v43 = vsub.s32 32, %v15385_v48  ;;  %v700_v15 = vshrl.u32 %v17686_v55, %v14876_v28 }
 0x35f   : > { %11657 = vmatpush3.bf16.msra.mxu1 %v17705_v16  ;;  %17706 = vst [vmem:[#allocation56_spill] sm:$0xff] %v15404_v41  ;;  %10887 = vmatmul.mubr.msk.f32.vlgmr.msra.gmra.mrb[26].mxu0 %vm5476_vm9, %v17707_v37  ;;  %v15413_v33 = vshrl.u32 %v1216_v8, 5  ;;  %v15415_v16 = vadd.s32 1, %v9230_v49  ;;  %v15433_v49 = vsel %vm1132_vm6, %v15372_v47, %v15383_v40  ;;  %v9238_v8 = vadd.s32 4294967169, %v1520_v36  ;;  %v17715_v40 = vld [vmem:[#allocation64_spill] sm:$0xff] }
 0x360   : > { %11658 = vmatprep.subr.bf16.mxu1 %v17430_v63  ;;  %11664 = vmatpush3.bf16.msra.mxu0 %v17709_v22  ;;  %v15448_v54 = vmul.u32.u64.low %v15063_v53, %v623_v24  ;;  %v15449_v37 = vmul.u32.u64.high %v15063_v53, %v623_v24, %v15448_v54  ;;  %v15455_v60 = vsel %vm1134_vm4, %v1128_v1, %v1145_v61  ;;  %v1224_v36 = vshll.u32 %v17629_v19, %v15385_v48  ;;  %v17712_v61 = vld [vmem:[#allocation62_spill] sm:$0xff] }
 0x361   : > { %17708 = vst [vmem:[#allocation72_spill] sm:$0xff] %v15413_v33  ;;  %10932 = vmatprep.mubr.msk.f32.mxu0 %vm17447_vm7, %v17446_v14  ;;  %11665 = vmatprep.subr.bf16.mxu0 %v17430_v63  ;;  %v17711_v28 = vand.u32 2147483647, %v15285_v12  ;;  %v720_v24 = vsel %vm716_vm0, %v700_v15, %v15303_v46  ;;  %v722_v38 = vsel %vm718_vm1, %v14919_v21, %v721_v25  ;;  %v742_v15 = vadd.s32 1, %v15389_v10  ;;  %v17714_v21 = vld [vmem:[#allocation81_spill] sm:$0xff] }
 0x362   : > { %v910_v1 = vshrl.u32 %v17629_v19, %v15074_v27  ;;  %v1233_v46 = vshll.u32 %v17630_v39, %v15385_v48  ;;  %v1231_v25 = vshrl.u32 %v17630_v39, %v15443_v43  ;;  %vm741_vm0 = vc.u32 %v15398_v26, %v15388_v20 }
 0x363   : > { %11661 = vmatpush3.bf16.msk.msra.mxu1 %vm13546_vm8, %v17710_v58  ;;  %v15460_v22 = vmul.u32.u64.low %v15063_v53, %v627_v51  ;;  %v15461_v58 = vmul.u32.u64.high %v15063_v53, %v627_v51, %v15460_v22  ;;  %v1523_v13 = vand.u32 8388607, %v17711_v28  ;;  %v1227_v51 = vshll.u32 %v17624_v7, %v15385_v48 }
 0x364   : > { %11678 = vmatprep.subr.bf16.mxu1 %v17430_v63  ;;  %11667 = vmatpush3.bf16.msra.mxu0 %v17712_v61  ;;  %v1230_v22 = vshll.u32 %v17626_v5, %v15385_v48  ;;  %v909_v28 = vshll.u32 %v17686_v55, %v15026_v23  ;;  %v1225_v61 = vshrl.u32 %v17624_v7, %v15443_v43  ;;  %vm1236_vm1 = vcmp.lt.s32.totalorder %v15413_v33, 1 }
 0x365   : > { %11668 = vmatprep.subr.bf16.mxu0 %v17430_v63  ;;  %v723_v12 = vsel %vm717_vm13, %v720_v24, %v722_v38  ;;  %v1228_v23 = vshrl.u32 %v17626_v5, %v15443_v43  ;;  %vm1319_vm3 = vcmp.gt.s32.totalorder %v15415_v16, 0  ;;  %v1524_v41 = vor.u32 8388608, %v1523_v13  ;;  %v17716_v13 = vld [vmem:[#allocation50_spill] sm:$0xff] }
 0x366   : > { %10910 = vmatmul.mubr.msk.f32.vlgmr.msra.gmra.mrb[30].mxu1 %vm5476_vm9, %v17713_v6  ;;  %v617_v6 = vsel %vm615_vm2, %v15110_v35, 2102212464  ;;  %v596_v35 = vshrl.u32 %v17686_v55, %v15001_v59  ;;  %v15509_v48 = vor.u32 %v910_v1, %v909_v28  ;;  %vm1238_vm2 = vcmp.lt.s32.totalorder %v15413_v33, 3  ;;  %v17722_v28 = vld [vmem:[#allocation84_spill] sm:$0xff] }
 0x367   : > { %11680 = vmatpush3.bf16.msra.mxu1 %v17714_v21  ;;  %10955 = vmatprep.mubr.msk.f32.mxu1 %vm17447_vm7, %v17446_v14  ;;  %v1234_v21 = vshrl.u32 %v17631_v0, %v15443_v43  ;;  %v1526_v31 = vadd.s32 1, %v9238_v8  ;;  %v743_v34 = vsel %vm741_vm0, %v742_v15, %v15389_v10  ;;  %v618_v38 = vsel %vm614_vm15, %v15108_v2, %v617_v6 }
 0x368   : > { %11681 = vmatprep.subr.bf16.mxu1 %v17430_v63  ;;  %11670 = vmatpush3.bf16.msra.mxu0 %v17715_v40  ;;  %v616_v59 = vsel %vm612_vm11, %v596_v35, %v15346_v9  ;;  %v1232_v40 = vor.u32 %v1231_v25, %v1230_v22  ;;  %vm1239_vm13 = vcmp.lt.s32.totalorder %v15413_v33, 4  ;;  %v739_v8 = vmul.u32 %v14940_v42, %v723_v12 }
 0x369   : > { %11671 = vmatprep.subr.bf16.mxu0 %v17430_v63  ;;  %v638_v24 = vadd.s32 1, %v15449_v37  ;;  %v1235_v9 = vor.u32 %v1234_v21, %v1233_v46  ;;  %v1320_v2 = vsel %vm1319_vm3, %v15415_v16, 0  ;;  %vm637_vm11 = vc.u32 %v15461_v58, %v15448_v54  ;;  %v17719_v16 = vld [vmem:[#allocation66_spill] sm:$0xff] }
 0x36a   : > { %v15528_v10 = vpop.f32.mrb[18].mxu0  ;;  %v15538_v15 = vor.u32 %v1225_v61, %v1224_v36  ;;  %v15540_v42 = vadd.s32 %v743_v34, %v739_v8  ;;  %v619_v12 = vsel %vm613_vm12, %v616_v59, %v618_v38  ;;  %v932_v46 = vsel %vm924_vm14, %v15509_v48, %v15167_v32  ;;  %v17724_v38 = vld [vmem:[#allocation40_spill] sm:$0xff]  ;;  %v17725_v8 = vld [vmem:[#allocation70_spill] sm:$0xff]  ;;  %v17740_v61 = vld [vmem:[#allocation37_spill] sm:$0xff] }
 0x36b   : > { %11683 = vmatpush3.bf16.msra.mxu1 %v17716_v13  ;;  %17717 = vst [vmem:[#allocation58_spill] sm:$0xff] %v15528_v10  ;;  %v10451_v22 = vpop.f32.mrb[19].mxu0  ;;  %v15549_v25 = vor.u32 %v1228_v23, %v1227_v51  ;;  %vm1527_vm15 = vcmp.gt.s32.totalorder %v1526_v31, 0  ;;  %v15551_v6 = vshll.u32 %v1524_v41, 8  ;;  %v1623_v36 = vand.u32 2139095040, %v15321_v56 }
 0x36c   : > { %11684 = vmatprep.subr.bf16.mxu1 %v17430_v63  ;;  %17718 = vst [vmem:[#allocation74_spill] sm:$0xff] %v15538_v15  ;;  %11673 = vmatpush3.bf16.msra.mxu0 %v17719_v16  ;;  %v15556_v4 = vand.u32 31, %v1320_v2  ;;  %v639_v21 = vsel %vm637_vm11, %v638_v24, %v15449_v37  ;;  %vm925_vm12 = vcmp.lt.s32.totalorder %v15124_v52, 2  ;;  %v1245_v41 = vsel %vm1239_vm13, %v1232_v40, 920167782  ;;  %v17737_v24 = vld [vmem:[#allocation87_spill] sm:$0xff] }
 0x36d   : > { %17720 = vst [vmem:[#allocation59_spill] sm:$0xff] %v15549_v25  ;;  %17721 = vst [vmem:[#allocation77_spill] sm:$0xff] %v15551_v6  ;;  %11674 = vmatprep.subr.bf16.mxu0 %v17430_v63  ;;  %v1249_v51 = vsel %vm1239_vm13, %v1235_v9, 1326507024  ;;  %v635_v35 = vmul.u32 %v15063_v53, %v619_v12  ;;  %v935_v23 = vsel %vm925_vm12, %v932_v46, %v15200_v57  ;;  %v1528_v59 = vsel %vm1527_vm15, %v1526_v31, 0  ;;  %v17742_v53 = vld [vmem:[#allocation75_spill] sm:$0xff] }
 0x36e   : > { %v745_v37 = vadd.s32 536870912, %v15540_v42  ;;  %v939_v13 = vsel %vm925_vm12, %v17724_v38, %v15233_v50  ;;  %v15589_v57 = vsel %vm1236_vm1, %v15538_v15, %v15549_v25  ;;  %v15591_v31 = vshrl.u32 %v1320_v2, 5  ;;  %v17728_v50 = vld [vmem:[#allocation86_spill] sm:$0xff]  ;;  %v17743_v6 = vld [vmem:[#allocation71_spill] sm:$0xff] }
 0x36f   : > { %11686 = vmatpush3.bf16.msra.mxu1 %v17722_v28  ;;  %17727 = vst [vmem:[#allocation60_spill] sm:$0xff] %v15589_v57  ;;  %v1624_v22 = vshrl.u32 %v1623_v36, 23  ;;  %v15593_v12 = vadd.s32 %v639_v21, %v635_v35  ;;  %v15600_v46 = vsel %vm1238_vm2, %v15549_v25, %v1245_v41  ;;  %v15603_v16 = vsub.s32 32, %v15556_v4  ;;  %v17730_v28 = vld [vmem:[#allocation20_spill] sm:$0xff] }
 0x370   : > { %11687 = vmatprep.subr.bf16.mxu1 %v17430_v63  ;;  %11677 = vmatpush3.bf16.msk.msra.mxu0 %vm13546_vm8, %v17725_v8  ;;  %17729 = vst [vmem:[#allocation79_spill] sm:$0xff] %v15600_v46  ;;  %v15606_v38 = vmul.u32.u64.low %v17730_v28, %v935_v23  ;;  %v15607_v8 = vmul.u32.u64.high %v17730_v28, %v935_v23, %v15606_v38  ;;  %v15613_v2 = vsel %vm1238_vm2, %v1232_v40, %v1249_v51  ;;  %v15615_v36 = vand.u32 31, %v1528_v59  ;;  %v17734_v35 = vld [vmem:[#allocation52_spill] sm:$0xff]  ;;  %v17735_v51 = vld [vmem:[#allocation73_spill] sm:$0xff] }
 0x371   : > { %v15573_v34 = vpop.f32.mrb[20].mxu1  ;;  %11694 = vmatprep.subr.bf16.mxu0 %v17430_v63  ;;  %17732 = vst [vmem:[#allocation35_spill] sm:$0xff] %v15613_v2  ;;  %v15618_v21 = vmul.u32.u64.low %v17730_v28, %v939_v13  ;;  %v15619_v41 = vmul.u32.u64.high %v17730_v28, %v939_v13, %v15618_v21  ;;  %v1328_v23 = vshll.u32 %v17629_v19, %v15556_v4  ;;  %v15629_v40 = vshrl.u32 %v745_v37, 30 }
 0x372   : > { %17723 = vst [vmem:[#allocation68_spill] sm:$0xff] %v15573_v34  ;;  %v10428_v9 = vpop.f32.mrb[21].mxu1  ;;  %17731 = vst [vmem:[#allocation62_spill] sm:$0xff] %v15606_v38  ;;  %v1337_v13 = vshll.u32 %v17630_v39, %v15556_v4  ;;  %v15636_v21 = vshrl.u32 %v1528_v59, 5  ;;  %v641_v1 = vadd.s32 536870912, %v15593_v12  ;;  %v1329_v37 = vshrl.u32 %v17624_v7, %v15603_v16 }
 0x373   : > { %11689 = vmatpush3.bf16.msra.mxu1 %v17728_v50  ;;  %17733 = vst [vmem:[#allocation81_spill] sm:$0xff] %v15615_v36  ;;  %10933 = vmatmul.mubr.msk.f32.vlgmr.msra.gmra.mrb[28].mxu0 %vm5476_vm9, %v17734_v35  ;;  %v1331_v9 = vshll.u32 %v17624_v7, %v15556_v4  ;;  %v1334_v50 = vshll.u32 %v17626_v5, %v15556_v4  ;;  %v9242_v35 = vadd.s32 4294967169, %v1624_v22  ;;  %vm1340_vm0 = vcmp.lt.s32.totalorder %v15591_v31, 1 }
 0x374   : > { %11690 = vmatprep.subr.bf16.mxu1 %v17430_v63  ;;  %11696 = vmatpush3.bf16.msra.mxu0 %v17735_v51  ;;  %17736 = vst [vmem:[#allocation64_spill] sm:$0xff] %v15636_v21  ;;  %v1332_v51 = vshrl.u32 %v17626_v5, %v15603_v16  ;;  %vm1343_vm3 = vcmp.lt.s32.totalorder %v15591_v31, 4  ;;  %v17738_v59 = vrot.slane %v15274_v30, %v17599_v11  ;;  %v15664_v34 = vsub.s32 32, %v15615_v36 }
 0x375   : > { %10978 = vmatprep.mubr.msk.f32.mxu0 %vm17447_vm7, %v17446_v14  ;;  %11697 = vmatprep.subr.bf16.mxu0 %v17430_v63  ;;  %v1335_v10 = vshrl.u32 %v17630_v39, %v15603_v16  ;;  %v1338_v45 = vshrl.u32 %v17631_v0, %v15603_v16  ;;  %v908_v30 = vshrl.u32 %v17686_v55, %v15074_v27  ;;  %v747_v11 = vshll.u32 %v15629_v40, 30 }
 0x376   : > { %v15653_v22 = vmul.f32 %v17738_v59, %v14787_v29  ;;  %17741 = vst [vmem:[#allocation66_spill] sm:$0xff] %v15664_v34  ;;  %v1536_v29 = vshll.u32 %v17629_v19, %v15615_v36  ;;  %v1542_v59 = vshll.u32 %v17626_v5, %v15615_v36  ;;  %v1630_v25 = vadd.s32 1, %v9242_v35 }
 0x377   : > { %11693 = vmatpush3.bf16.msk.msra.mxu1 %vm13546_vm8, %v17737_v24  ;;  %v929_v24 = vsel %vm927_vm5, %v17740_v61, 2102212464  ;;  %v1539_v61 = vshll.u32 %v17624_v7, %v15615_v36  ;;  %vm17320_vm5 = vcmp.lt.s32.totalorder %v15591_v31, 3  ;;  %v15679_v27 = vshrl.u32 %v641_v1, 30 }
 0x378   : > { %17739 = vst [vmem:[#allocation50_spill] sm:$0xff] %v15653_v22  ;;  %11710 = vmatprep.subr.bf16.mxu1 %v17430_v63  ;;  %11699 = vmatpush3.bf16.msra.mxu0 %v17742_v53  ;;  %v928_v57 = vsel %vm924_vm14, %v908_v30, %v15509_v48  ;;  %vm17744_vm11 = vcmp.lt.s32.totalorder %v15124_v52, 3  ;;  %v15690_v53 = vor.u32 %v1329_v37, %v1328_v23  ;;  %v1415_v1 = vand.u32 2139095040, %v15653_v22  ;;  %v17746_v37 = vld [vmem:[#allocation39_spill] sm:$0xff] }
 0x379   : > { %v930_v2 = vsel %vm17744_vm11, %v15167_v32, %v929_v24  ;;  %11700 = vmatprep.subr.bf16.mxu0 %v17430_v63  ;;  %v950_v35 = vadd.s32 1, %v15607_v8  ;;  %v1336_v46 = vor.u32 %v1335_v10, %v1334_v50  ;;  %v1339_v33 = vor.u32 %v1338_v45, %v1337_v13  ;;  %v17747_v10 = vld [vmem:[#allocation67_spill] sm:$0xff] }
 0x37a   : > { %10956 = vmatmul.mubr.msk.f32.vlgmr.msra.gmra.mrb[32].mxu1 %vm5476_vm9, %v17743_v6  ;;  %17745 = vst [vmem:[#allocation84_spill] sm:$0xff] %v15690_v53  ;;  %v15692_v6 = vor.u32 %v1332_v51, %v1331_v9  ;;  %v1537_v48 = vshrl.u32 %v17624_v7, %v15664_v34  ;;  %vm949_vm14 = vc.u32 %v15619_v41, %v15606_v38  ;;  %vm1631_vm15 = vcmp.gt.s32.totalorder %v1630_v25, 0 }
 0x37b   : > { %10985 = vmatprep.mubr.msk.f32.mxu1 %vm17447_vm7, %v17446_v14  ;;  %v1540_v32 = vshrl.u32 %v17626_v5, %v15664_v34  ;;  %v15703_v23 = vsub.s32 %v15540_v42, %v747_v11  ;;  %v931_v9 = vsel %vm925_vm12, %v928_v57, %v930_v2  ;;  %v806_v51 = vshrl.u32 %v17629_v19, %v17746_v37  ;;  %v17748_v57 = vld [vmem:[#allocation38_spill] sm:$0xff] }
 0x37c   : > { %11702 = vmatpush3.bf16.msra.mxu0 %v17747_v10  ;;  %v1543_v45 = vshrl.u32 %v17630_v39, %v15664_v34  ;;  %v1546_v50 = vshrl.u32 %v17631_v0, %v15664_v34  ;;  %v643_v13 = vshll.u32 %v15679_v27, 30  ;;  %v1416_v52 = vshrl.u32 %v1415_v1, 23  ;;  %v17750_v34 = vld [vmem:[#allocation83_spill] sm:$0xff] }
 0x37d   : > { %11703 = vmatprep.subr.bf16.mxu0 %v17430_v63  ;;  %v951_v42 = vsel %vm949_vm14, %v950_v35, %v15607_v8  ;;  %v805_v2 = vshll.u32 %v17686_v55, %v17748_v57  ;;  %v1349_v24 = vsel %vm1343_vm3, %v1336_v46, 920167782  ;;  %v15726_v30 = vsel %vm1340_vm0, %v15690_v53, %v15692_v6 }
 0x37e   : > { %17749 = vst [vmem:[#allocation40_spill] sm:$0xff] %v15726_v30  ;;  %v1545_v10 = vshll.u32 %v17630_v39, %v15615_v36  ;;  %v947_v11 = vmul.u32 %v17730_v28, %v931_v9  ;;  %v1353_v8 = vsel %vm1343_vm3, %v1339_v33, 1326507024  ;;  %v1632_v1 = vsel %vm1631_vm15, %v1630_v25, 0 }
 0x37f   : > { %v750_v35 = vsub.s32 0, %v15703_v23  ;;  %v15734_v57 = vor.u32 %v806_v51, %v805_v2  ;;  %v1544_v15 = vor.u32 %v1543_v45, %v1542_v59  ;;  %v17751_v38 = vand.u32 2147483647, %v15321_v56 }
 0x380   : > { %11705 = vmatpush3.bf16.msra.mxu0 %v17750_v34  ;;  %v15740_v30 = vsub.s32 %v15593_v12, %v643_v13  ;;  %v15742_v36 = vadd.s32 %v951_v42, %v947_v11  ;;  %v15748_v33 = vsel %vm17320_vm5, %v15692_v6, %v1349_v24  ;;  %v1547_v25 = vor.u32 %v1546_v50, %v1545_v10  ;;  %v17757_v13 = vld [vmem:[#allocation36_spill] sm:$0xff]  ;;  %v17758_v11 = vld [vmem:[#allocation23_spill] sm:$0xff]  ;;  %v17760_v42 = vld [vmem:[#allocation85_spill] sm:$0xff] }
 0x381   : > { %v1627_v53 = vand.u32 8388607, %v17751_v38  ;;  %11706 = vmatprep.subr.bf16.mxu0 %v17430_v63  ;;  %v9234_v28 = vadd.s32 4294967169, %v1416_v52  ;;  %v17752_v34 = vand.u32 2147483647, %v15653_v22  ;;  %v15754_v38 = vsel %vm17320_vm5, %v1336_v46, %v1353_v8 }
 0x382   : > { %v15756_v12 = vor.u32 %v1537_v48, %v1536_v29  ;;  %v15758_v9 = vor.u32 %v1540_v32, %v1539_v61  ;;  %v15760_v51 = vand.u32 31, %v1632_v1  ;;  %vm17318_vm12 = vcmp.lt.s32.totalorder %v15636_v21, 4  ;;  %v17768_v29 = vld [vmem:[#allocation34_spill] sm:$0xff] }
 0x383   : > { %v1419_v59 = vand.u32 8388607, %v17752_v34  ;;  %v9207_v50 = vmin.u32 %v750_v35, %v15703_v23  ;;  %vm17759_vm11 = vcmp.lt.s32.totalorder %v17758_v11, 1  ;;  %v1557_v48 = vsel %vm17318_vm12, %v1544_v15, 920167782 }
 0x384   : > { %17753 = vst [vmem:[#allocation70_spill] sm:$0xff] %v15756_v12  ;;  %17754 = vst [vmem:[#allocation86_spill] sm:$0xff] %v15758_v9  ;;  %v828_v52 = vsel %vm17759_vm11, %v15734_v57, %v17757_v13  ;;  %11709 = vmatpush3.bf16.msk.msra.mxu0 %vm13546_vm8, %v17760_v42  ;;  %v1628_v32 = vor.u32 8388608, %v1627_v53  ;;  %v646_v2 = vsub.s32 0, %v15740_v30  ;;  %v953_v24 = vadd.s32 536870912, %v15742_v36  ;;  %v17763_v53 = vld [vmem:[#allocation42_spill] sm:$0xff] }
 0x385   : > { %17755 = vst [vmem:[#allocation20_spill] sm:$0xff] %v15760_v51  ;;  %v15762_v45 = vpop.f32.mrb[22].mxu1  ;;  %11714 = vmatprep.subr.bf16.mxu0 %v17430_v63  ;;  %v1561_v10 = vsel %vm17318_vm12, %v1547_v25, 1326507024  ;;  %v1420_v8 = vor.u32 8388608, %v1419_v59  ;;  %v1422_v18 = vadd.s32 1, %v9234_v28  ;;  %v752_v59 = vclz %v9207_v50 }
 0x386   : > { %17756 = vst [vmem:[#allocation52_spill] sm:$0xff] %v15762_v45  ;;  %v10474_v61 = vpop.f32.mrb[23].mxu1  ;;  %vm821_vm8 = vcmp.lt.s32.totalorder %v17758_v11, 2  ;;  %vm17319_vm14 = vcmp.lt.s32.totalorder %v15636_v21, 1  ;;  %vm17315_vm15 = vcmp.lt.s32.totalorder %v15636_v21, 3  ;;  %v15786_v35 = vsub.s32 32, %v15760_v51 }
 0x387   : > { %v831_v34 = vsel %vm821_vm8, %v828_v52, %v17763_v53  ;;  %v17764_v42 = vld [vmem:[#allocation22_spill] sm:$0xff]  ;;  %v15796_v25 = vsel %vm17315_vm15, %v15758_v9, %v1557_v48  ;;  %v15802_v28 = vsel %vm17319_vm14, %v15756_v12, %v15758_v9  ;;  %v17767_v61 = vld [vmem:[#allocation44_spill] sm:$0xff]  ;;  %v15812_v53 = vsel %vm17315_vm15, %v1544_v15, %v1561_v10  ;;  %v17790_v21 = vld [vmem:[#allocation47_spill] sm:$0xff] }
 0x388   : > { %17762 = vst [vmem:[#allocation73_spill] sm:$0xff] %v15786_v35  ;;  %10979 = vmatmul.mubr.msk.f32.vlgmr.msra.gmra.mrb[30].mxu0 %vm5476_vm9, %v17764_v42  ;;  %17765 = vst [vmem:[#allocation87_spill] sm:$0xff] %v15796_v25  ;;  %v835_v52 = vsel %vm821_vm8, %v17768_v29, %v17767_v61  ;;  %v15814_v48 = vshll.u32 %v1628_v32, 8  ;;  %v9203_v42 = vmin.u32 %v646_v2, %v15740_v30  ;;  %v15817_v63 = vshrl.u32 %v953_v24, 30  ;;  %v17772_v45 = vld [vmem:[#allocation76_spill] sm:$0xff] }
 0x389   : > { %17766 = vst [vmem:[#allocation37_spill] sm:$0xff] %v15802_v28  ;;  %10996 = vmatprep.mubr.msk.f32.mxu0 %vm17447_vm7, %v17446_v14  ;;  %17769 = vst [vmem:[#allocation75_spill] sm:$0xff] %v15812_v53  ;;  %vm1423_vm9 = vcmp.gt.s32.totalorder %v1422_v18, 0  ;;  %v15819_v50 = vshll.u32 %v1420_v8, 8  ;;  %v15822_v46 = vmul.u32.u64.low %v17772_v45, %v831_v34  ;;  %v15823_v56 = vmul.u32.u64.high %v17772_v45, %v831_v34, %v15822_v46  ;;  %v17792_v12 = vld [vmem:[#allocation80_spill] sm:$0xff] }
 0x38a   : > { %17770 = vst [vmem:[#allocation71_spill] sm:$0xff] %v15814_v48  ;;  %v1641_v29 = vshrl.u32 %v17624_v7, %v15786_v35  ;;  %v1644_v15 = vshrl.u32 %v17626_v5, %v15786_v35  ;;  %v15831_v32 = vmul.u32.u64.low %v17772_v45, %v835_v52  ;;  %v15832_v10 = vmul.u32.u64.high %v17772_v45, %v835_v52, %v15831_v32  ;;  %v17773_v48 = vld [vmem:[#allocation17_spill] sm:$0xff] }
 0x38b   : > { %17771 = vst [vmem:[#allocation39_spill] sm:$0xff] %v15819_v50  ;;  %v1640_v2 = vshll.u32 %v17629_v19, %v15760_v51  ;;  %v1647_v24 = vshrl.u32 %v17630_v39, %v15786_v35  ;;  %v1650_v8 = vshrl.u32 %v17631_v0, %v15786_v35  ;;  %v9208_v34 = vadd.s32 4294967294, %v752_v59 }
 0x38c   : > { %v1643_v61 = vshll.u32 %v17624_v7, %v15760_v51  ;;  %v648_v14 = vclz %v9203_v42  ;;  %v955_v22 = vshll.u32 %v15817_v63, 30  ;;  %vm17774_vm11 = vcmp.lt.s32.totalorder %v17758_v11, 4 }
 0x38d   : > { %v825_v52 = vsel %vm17774_vm11, %v17773_v48, 2102212464  ;;  %v15846_v32 = vshrl.u32 %v1632_v1, 5  ;;  %v1646_v9 = vshll.u32 %v17626_v5, %v15760_v51  ;;  %v1649_v28 = vshll.u32 %v17630_v39, %v15760_v51 }
 0x38e   : > { %v1424_v59 = vsel %vm1423_vm9, %v1422_v18, 0  ;;  %v15853_v35 = vor.u32 %v1641_v29, %v1640_v2  ;;  %v15855_v53 = vor.u32 %v1644_v15, %v1643_v61  ;;  %v804_v42 = vshrl.u32 %v17686_v55, %v17746_v37 }
 0x38f   : > { %17775 = vst [vmem:[#allocation67_spill] sm:$0xff] %v15846_v32  ;;  %v1118_v48 = vshrl.u32 %v17629_v19, %v15282_v3  ;;  %v1648_v1 = vor.u32 %v1647_v24, %v1646_v9  ;;  %v1651_v25 = vor.u32 %v1650_v8, %v1649_v28  ;;  %vm9209_vm11 = vcmp.lt.s32.totalorder %v9208_v34, 0 }
 0x390   : > { %17776 = vst [vmem:[#allocation38_spill] sm:$0xff] %v15853_v35  ;;  %17777 = vst [vmem:[#allocation83_spill] sm:$0xff] %v15855_v53  ;;  %vm17778_vm15 = vcmp.lt.s32.totalorder %v17758_v11, 3  ;;  %v9204_v51 = vadd.s32 4294967294, %v648_v14  ;;  %v15865_v18 = vsub.s32 %v15742_v36, %v955_v22  ;;  %vm17779_vm9 = vcmp.lt.s32.totalorder %v17758_v11, 1 }
 0x391   : > { %v826_v50 = vsel %vm17778_vm15, %v17757_v13, %v825_v52  ;;  %v824_v29 = vsel %vm17779_vm9, %v804_v42, %v15734_v57  ;;  %v1117_v37 = vshll.u32 %v17686_v55, %v15253_v17  ;;  %vm17332_vm12 = vcmp.lt.s32.totalorder %v15846_v32, 1  ;;  %v17780_v13 = vld [vmem:[#allocation21_spill] sm:$0xff] }
 0x392   : > { %vm17330_vm14 = vcmp.lt.s32.totalorder %v15846_v32, 3  ;;  %v15874_v9 = vand.u32 31, %v1424_v59  ;;  %v846_v28 = vadd.s32 1, %v15823_v56  ;;  %vm17331_vm15 = vcmp.lt.s32.totalorder %v15846_v32, 4 }
 0x393   : > { %v15878_v14 = vsel %vm9209_vm11, 0, %v9208_v34  ;;  %vm845_vm5 = vc.u32 %v15832_v10, %v15822_v46  ;;  %v15882_v36 = vor.u32 %v1118_v48, %v1117_v37  ;;  %v1661_v17 = vsel %vm17331_vm15, %v1648_v1, 920167782 }
 0x394   : > { %v1665_v22 = vsel %vm17331_vm15, %v1651_v25, 1326507024  ;;  %v827_v57 = vsel %vm821_vm8, %v824_v29, %v826_v50  ;;  %v1014_v15 = vshrl.u32 %v17629_v19, %v17780_v13  ;;  %v15896_v2 = vsel %vm17332_vm12, %v15853_v35, %v15855_v53  ;;  %v17782_v50 = vld [vmem:[#allocation32_spill] sm:$0xff] }
 0x395   : > { %17781 = vst [vmem:[#allocation36_spill] sm:$0xff] %v15896_v2  ;;  %v15898_v24 = vshrl.u32 %v1424_v59, 5  ;;  %vm9205_vm11 = vcmp.lt.s32.totalorder %v9204_v51, 0  ;;  %v958_v8 = vsub.s32 0, %v15865_v18  ;;  %v15902_v34 = vsub.s32 32, %v15874_v9  ;;  %v17788_v2 = vld [vmem:[#allocation63_spill] sm:$0xff] }
 0x396   : > { %v760_v11 = vsub.s32 4294967266, %v15878_v14  ;;  %v847_v25 = vsel %vm845_vm5, %v846_v28, %v15823_v56  ;;  %v1013_v61 = vshll.u32 %v17686_v55, %v17782_v50  ;;  %v15911_v52 = vsel %vm17330_vm14, %v15855_v53, %v1661_v17 }
 0x397   : > { %17783 = vst [vmem:[#allocation23_spill] sm:$0xff] %v15911_v52  ;;  %v15915_v59 = vsel %vm17330_vm14, %v1648_v1, %v1665_v22  ;;  %v843_v42 = vmul.u32 %v17772_v45, %v827_v57  ;;  %v1140_v48 = vsel %vm1132_vm6, %v15882_v36, %v15372_v47  ;;  %v1432_v56 = vshll.u32 %v17629_v19, %v15874_v9 }
 0x398   : > { %17784 = vst [vmem:[#allocation85_spill] sm:$0xff] %v15915_v59  ;;  %v1435_v29 = vshll.u32 %v17624_v7, %v15874_v9  ;;  %v15926_v37 = vsel %vm9205_vm11, 0, %v9204_v51  ;;  %v15928_v28 = vor.u32 %v1014_v15, %v1013_v61  ;;  %v1438_v1 = vshll.u32 %v17626_v5, %v15874_v9 }
 0x399   : > { %v9215_v45 = vmin.u32 %v958_v8, %v15865_v18  ;;  %v15933_v17 = vadd.s32 %v847_v25, %v843_v42  ;;  %vm1133_vm5 = vcmp.lt.s32.totalorder %v15316_v44, 2  ;;  %v1433_v22 = vshrl.u32 %v17624_v7, %v15902_v34  ;;  %v17786_v42 = vld [vmem:[#allocation49_spill] sm:$0xff] }
 0x39a   : > { %v15940_v57 = vshll.u32 %v17630_v39, %v15874_v9  ;;  %v761_v51 = vadd.s32 127, %v760_v11  ;;  %v1143_v15 = vsel %vm1133_vm5, %v1140_v48, %v15427_v62  ;;  %v1436_v50 = vshrl.u32 %v17626_v5, %v15902_v34  ;;  %v17785_v5 = vld [vmem:[#allocation54_spill] sm:$0xff] }
 0x39b   : > { %v1439_v8 = vshrl.u32 %v17630_v39, %v15902_v34  ;;  %v656_v25 = vsub.s32 4294967266, %v15926_v37  ;;  %v1147_v7 = vsel %vm1133_vm5, %v15433_v49, %v15455_v60  ;;  %v15956_v11 = vshrl.u32 %v17631_v0, %v15902_v34 }
 0x39c   : > { %v740_v62 = vadd.s32 %v15388_v20, %v15398_v26  ;;  %v756_v61 = vsub.s32 32, %v15878_v14  ;;  %vm17787_vm8 = vcmp.lt.s32.totalorder %v17786_v42, 1  ;;  %v960_v48 = vclz %v9215_v45  ;;  %v17789_v45 = vld [vmem:[#allocation45_spill] sm:$0xff] }
 0x39d   : > { %v1036_v39 = vsel %vm17787_vm8, %v15928_v28, %v17785_v5  ;;  %v849_v53 = vadd.s32 536870912, %v15933_v17  ;;  %v15967_v59 = vmul.u32.u64.low %v17788_v2, %v1143_v15  ;;  %v15968_v49 = vmul.u32.u64.high %v17788_v2, %v1143_v15, %v15967_v59 }
 0x39e   : > { %v762_v0 = vshll.u32 %v761_v51, 23  ;;  %v15972_v60 = vmul.u32.u64.low %v17788_v2, %v1147_v7  ;;  %v15973_v52 = vmul.u32.u64.high %v17788_v2, %v1147_v7, %v15972_v60  ;;  %vm1029_vm9 = vcmp.lt.s32.totalorder %v17786_v42, 2  ;;  %v17791_v7 = vld [vmem:[#allocation61_spill] sm:$0xff] }
 0x39f   : > { %v15976_v20 = vor.u32 %v1433_v22, %v1432_v56  ;;  %vm17333_vm11 = vcmp.lt.s32.totalorder %v15898_v24, 4  ;;  %v657_v26 = vadd.s32 127, %v656_v25  ;;  %v1039_v32 = vsel %vm1029_vm9, %v1036_v39, %v17789_v45 }
 0x3a0   : > { %v758_v35 = vshrl.u32 %v740_v62, %v756_v61  ;;  %v636_v15 = vadd.s32 %v15448_v54, %v15461_v58  ;;  %v652_v51 = vsub.s32 32, %v15926_v37  ;;  %v1043_v60 = vsel %vm1029_vm9, %v17791_v7, %v17790_v21  ;;  %v17793_v61 = vld [vmem:[#allocation78_spill] sm:$0xff] }
 0x3a1   : > { %v757_v56 = vshll.u32 %v15703_v23, %v15878_v14  ;;  %v9216_v22 = vadd.s32 4294967294, %v960_v48  ;;  %v15991_v25 = vshrl.u32 %v849_v53, 30  ;;  %v1137_v62 = vsel %vm1135_vm10, %v17792_v12, 2102212464 }
 0x3a2   : > { %vm1444_vm8 = vcmp.lt.s32.totalorder %v15898_v24, 1  ;;  %v763_v54 = vor.u32 4788187, %v762_v0  ;;  %v1116_v58 = vshrl.u32 %v17686_v55, %v15282_v3  ;;  %v16004_v21 = vor.u32 %v1439_v8, %v1438_v1  ;;  %v17795_v0 = vld [vmem:[#allocation90_spill] sm:$0xff] }
 0x3a3   : > { %v16000_v39 = vmul.u32.u64.low %v17793_v61, %v1039_v32  ;;  %v16001_v45 = vmul.u32.u64.high %v17793_v61, %v1039_v32, %v16000_v39  ;;  %v658_v23 = vshll.u32 %v657_v26, 23  ;;  %vm1446_vm10 = vcmp.lt.s32.totalorder %v15898_v24, 3 }
 0x3a4   : > { %v16007_v53 = vmul.u32.u64.low %v17793_v61, %v1043_v60  ;;  %v16008_v14 = vmul.u32.u64.high %v17793_v61, %v1043_v60, %v16007_v53  ;;  %v759_v12 = vor.u32 %v758_v35, %v757_v56  ;;  %v654_v48 = vshrl.u32 %v636_v15, %v652_v51  ;;  %v17798_v15 = vld [vmem:[#allocation88_spill] sm:$0xff] }
 0x3a5   : > { %17794 = vst [vmem:[#allocation42_spill] sm:$0xff] %v16000_v39  ;;  %v1136_v3 = vsel %vm1132_vm6, %v1116_v58, %v15882_v36  ;;  %v1138_v32 = vsel %vm1134_vm4, %v15372_v47, %v1137_v62  ;;  %vm686_vm14 = vcmp.lt.s32.totalorder %v17795_v0, 0  ;;  %v16018_v1 = vor.u32 %v1436_v50, %v1435_v29  ;;  %v17796_v36 = vld [vmem:[#allocation27_spill] sm:$0xff] }
 0x3a6   : > { %vm9217_vm15 = vcmp.lt.s32.totalorder %v9216_v22, 0  ;;  %v851_v8 = vshll.u32 %v15991_v25, 30  ;;  %v1158_v26 = vadd.s32 1, %v15968_v49  ;;  %v764_v7 = vand.u32 2147483647, %v763_v54  ;;  %v17801_v53 = vld [vmem:[#allocation31_spill] sm:$0xff] }
 0x3a7   : > { %v653_v35 = vshll.u32 %v15740_v30, %v15926_v37  ;;  %vm1157_vm6 = vc.u32 %v15973_v52, %v15967_v59  ;;  %vm17797_vm12 = vcmp.lt.s32.totalorder %v17786_v42, 4  ;;  %vm582_vm4 = vcmp.lt.s32.totalorder %v17798_v15, 0 }
 0x3a8   : > { %v1033_v47 = vsel %vm17797_vm12, %v17796_v36, 2102212464  ;;  %v1443_v29 = vor.u32 %v15956_v11, %v15940_v57  ;;  %v659_v50 = vor.u32 4788187, %v658_v23  ;;  %v1139_v51 = vsel %vm1133_vm5, %v1136_v3, %v1138_v32 }
 0x3a9   : > { %v1012_v60 = vshrl.u32 %v17686_v55, %v17780_v13  ;;  %v1453_v30 = vsel %vm17333_vm11, %v16004_v21, 920167782  ;;  %v766_v37 = vcvt.s32.f32 %v759_v12  ;;  %v655_v56 = vor.u32 %v654_v48, %v653_v35 }
 0x3aa   : > { %v16040_v62 = vsel %vm9217_vm15, 0, %v9216_v22  ;;  %v16043_v54 = vsub.s32 %v15933_v17, %v851_v8  ;;  %v1159_v57 = vsel %vm1157_vm6, %v1158_v26, %v15968_v49  ;;  %vm17799_vm12 = vcmp.lt.s32.totalorder %v17786_v42, 1 }
 0x3ab   : > { %v1032_v44 = vsel %vm17799_vm12, %v1012_v60, %v15928_v28  ;;  %vm17800_vm5 = vcmp.lt.s32.totalorder %v17786_v42, 3  ;;  %v767_v11 = vmul.f32 %v766_v37, %v764_v7  ;;  %v770_v58 = vsub.s32 4, %v15629_v40  ;;  %v17805_v60 = vld [vmem:[#allocation69_spill] sm:$0xff] }
 0x3ac   : > { %v1034_v13 = vsel %vm17800_vm5, %v17785_v5, %v1033_v47  ;;  %v1155_v23 = vmul.u32 %v17788_v2, %v1139_v51  ;;  %v1054_v22 = vadd.s32 1, %v16001_v45  ;;  %vm894_vm15 = vcmp.lt.s32.totalorder %v17801_v53, 0 }
 0x3ad   : > { %v16060_v17 = vsel %vm1444_vm8, %v15976_v20, %v16018_v1  ;;  %v660_v28 = vand.u32 2147483647, %v659_v50  ;;  %v968_v49 = vsub.s32 4294967266, %v16040_v62  ;;  %vm1053_vm6 = vc.u32 %v16008_v14, %v16000_v39 }
 0x3ae   : > { %v16067_v5 = vsel %vm17333_vm11, %v1443_v29, 1326507024  ;;  %v666_v2 = vsub.s32 4, %v15679_v27  ;;  %v16070_v12 = vadd.s32 %v1159_v57, %v1155_v23  ;;  %v1035_v48 = vsel %vm1029_vm9, %v1032_v44, %v1034_v13  ;;  %v17806_v44 = vld [vmem:[#allocation96_spill] sm:$0xff] }
 0x3af   : > { %v16077_v3 = vsel %vm1446_vm10, %v16018_v1, %v1453_v30  ;;  %v662_v32 = vcvt.s32.f32 %v655_v56  ;;  %v854_v8 = vsub.s32 0, %v16043_v54  ;;  %v1222_v26 = vshrl.u32 %v17629_v19, %v15443_v43 }
 0x3b0   : > { %v17802_v7 = vand.u32 2147483647, %v17795_v0  ;;  %v768_v36 = vxor.u32 2147483648, %v767_v11  ;;  %v771_v42 = vsel %vm686_vm14, %v770_v58, %v15629_v40  ;;  %v1055_v47 = vsel %vm1053_vm6, %v1054_v22, %v16001_v45 }
 0x3b1   : > { %v663_v29 = vmul.f32 %v662_v32, %v660_v28  ;;  %v969_v50 = vadd.s32 127, %v968_v49  ;;  %v1051_v51 = vmul.u32 %v17793_v61, %v1035_v48  ;;  %v1221_v30 = vshll.u32 %v17686_v55, %v17805_v60 }
 0x3b2   : > { %vm16084_vm12 = vcmp.le.f32.partialorder %v17802_v7, 0.7853982  ;;  %v667_v37 = vsel %vm582_vm4, %v666_v2, %v15679_v27  ;;  %v978_v56 = vsub.s32 4, %v15817_v63  ;;  %v1161_v57 = vadd.s32 536870912, %v16070_v12  ;;  %v17815_v7 = vld [vmem:[#allocation62_spill] sm:$0xff] }
 0x3b3   : > { %v1326_v40 = vshrl.u32 %v17629_v19, %v15603_v16  ;;  %vm790_vm9 = vcmp.lt.s32.totalorder %v17806_v44, 0  ;;  %v17807_v45 = vand.u32 2147483647, %v17798_v15  ;;  %v9211_v13 = vmin.u32 %v854_v8, %v16043_v54 }
 0x3b4   : > { %v16110_v58 = vadd.s32 %v1055_v47, %v1051_v51  ;;  %v16112_v27 = vor.u32 %v1222_v26, %v1221_v30  ;;  %v16116_v23 = vsel %vm16084_vm12, 0, %v771_v42  ;;  %v17811_v22 = vand.u32 2147483647, %v17801_v53 }
 0x3b5   : > { %vm16105_vm5 = vcmp.le.f32.partialorder %v17807_v45, 0.7853982  ;;  %17810 = vst [vmem:[#allocation22_spill] sm:$0xff] %v16116_v23  ;;  %v964_v49 = vsub.s32 32, %v16040_v62  ;;  %v1325_v2 = vshll.u32 %v17686_v55, %v15556_v4  ;;  %v769_v48 = vsel %vm686_vm14, %v768_v36, %v767_v11 }
 0x3b6   : > { %vm16120_vm6 = vcmp.le.f32.partialorder %v17811_v22, 0.7853982  ;;  %v664_v32 = vxor.u32 2147483648, %v663_v29  ;;  %v16131_v8 = vsel %vm16105_vm5, 0, %v667_v37  ;;  %v970_v26 = vshll.u32 %v969_v50, 23  ;;  %v17820_v37 = vld [vmem:[#allocation72_spill] sm:$0xff] }
 0x3b7   : > { %17814 = vst [vmem:[#allocation44_spill] sm:$0xff] %v16131_v8  ;;  %v948_v42 = vadd.s32 %v17815_v7, %v15619_v41  ;;  %v979_v47 = vsel %vm894_vm15, %v978_v56, %v15817_v63  ;;  %v17816_v51 = vand.u32 2147483647, %v17806_v44  ;;  %v16144_v11 = vshrl.u32 %v1161_v57, 30  ;;  %v17819_v41 = vld [vmem:[#allocation74_spill] sm:$0xff] }
 0x3b8   : > { %v16146_v36 = vor.u32 %v1326_v40, %v1325_v2  ;;  %v777_v60 = vadd.s32 3, %v16116_v23  ;;  %v856_v50 = vclz %v9211_v13  ;;  %v1057_v30 = vadd.s32 536870912, %v16110_v58 }
 0x3b9   : > { %vm16140_vm11 = vcmp.le.f32.partialorder %v17816_v51, 0.7853982  ;;  %v1244_v63 = vsel %vm1236_vm1, %v16112_v27, %v17819_v41  ;;  %v772_v56 = vsel %vm16084_vm12, %v17795_v0, %v769_v48  ;;  %v673_v45 = vadd.s32 3, %v16131_v8  ;;  %v17822_v48 = vld [vmem:[#allocation84_spill] sm:$0xff] }
 0x3ba   : > { %v966_v57 = vshrl.u32 %v948_v42, %v964_v49  ;;  %v874_v40 = vsub.s32 4, %v15991_v25  ;;  %v665_v22 = vsel %vm582_vm4, %v664_v32, %v663_v29  ;;  %v971_v13 = vor.u32 4788187, %v970_v26  ;;  %v17823_v42 = vld [vmem:[#allocation79_spill] sm:$0xff]  ;;  %v17825_v51 = vld [vmem:[#allocation60_spill] sm:$0xff] }
 0x3bb   : > { %v16163_v2 = vsel %vm16120_vm6, 0, %v979_v47  ;;  %vm1237_vm14 = vcmp.lt.s32.totalorder %v17820_v37, 2  ;;  %v965_v7 = vshll.u32 %v15865_v18, %v16040_v62  ;;  %v1163_v35 = vshll.u32 %v16144_v11, 30  ;;  %v17824_v47 = vld [vmem:[#allocation35_spill] sm:$0xff] }
 0x3bc   : > { %17821 = vst [vmem:[#allocation34_spill] sm:$0xff] %v16163_v2  ;;  %v1348_v49 = vsel %vm1340_vm0, %v16146_v36, %v17822_v48  ;;  %v1247_v29 = vsel %vm1237_vm14, %v1244_v63, %v17823_v42  ;;  %11954 = vcosq.f32 %v772_v56  ;;  %v9212_v32 = vadd.s32 4294967294, %v856_v50 }
 0x3bd   : > { %v16176_v26 = vshrl.u32 %v1057_v30, 30  ;;  %v1251_v18 = vsel %vm1237_vm14, %v17825_v51, %v17824_v47  ;;  %v668_v62 = vsel %vm16105_vm5, %v17798_v15, %v665_v22  ;;  %v967_v23 = vor.u32 %v966_v57, %v965_v7  ;;  %v17826_v30 = vld [vmem:[#allocation82_spill] sm:$0xff]  ;;  %v17828_v57 = vld [vmem:[#allocation40_spill] sm:$0xff] }
 0x3be   : > { %v875_v8 = vsel %vm790_vm9, %v874_v40, %v15991_v25  ;;  %vm1341_vm4 = vcmp.lt.s32.totalorder %v15591_v31, 2  ;;  %v972_v63 = vand.u32 2147483647, %v971_v13  ;;  %v16198_v61 = vsub.s32 %v16070_v12, %v1163_v35  ;;  %v17830_v7 = vld [vmem:[#allocation56_spill] sm:$0xff] }
 0x3bf   : > { %v1351_v50 = vsel %vm1341_vm4, %v1348_v49, %v15748_v33  ;;  %v16193_v42 = vmul.u32.u64.low %v17826_v30, %v1247_v29  ;;  %v16194_v39 = vmul.u32.u64.high %v17826_v30, %v1247_v29, %v16193_v42  ;;  %v1355_v25 = vsel %vm1341_vm4, %v17828_v57, %v15754_v38 }
 0x3c0   : > { %v16205_v40 = vmul.u32.u64.low %v17826_v30, %v1251_v18  ;;  %v16206_v22 = vmul.u32.u64.high %v17826_v30, %v1251_v18, %v16205_v40  ;;  %11956 = vsinq.f32 %v772_v56  ;;  %vm9213_vm12 = vcmp.lt.s32.totalorder %v9212_v32, 0  ;;  %v17831_v56 = vld [vmem:[#allocation59_spill] sm:$0xff] }
 0x3c1   : > { %17827 = vst [vmem:[#allocation76_spill] sm:$0xff] %v16193_v42  ;;  %v16210_v33 = vsel %vm16140_vm11, 0, %v875_v8  ;;  %v1059_v13 = vshll.u32 %v16176_v26, 30  ;;  %11958 = vcosq.f32 %v668_v62  ;;  %v974_v12 = vcvt.s32.f32 %v967_v23 }
 0x3c2   : > { %17829 = vst [vmem:[#allocation17_spill] sm:$0xff] %v16210_v33  ;;  %v16214_v35 = vmul.u32.u64.low %v17830_v7, %v1351_v50  ;;  %v16215_v49 = vmul.u32.u64.high %v17830_v7, %v1351_v50, %v16214_v35  ;;  %11960 = vsinq.f32 %v668_v62  ;;  %v1241_v47 = vsel %vm1239_vm13, %v17831_v56, 2102212464 }
 0x3c3   : > { %v16219_v38 = vmul.u32.u64.low %v17830_v7, %v1355_v25  ;;  %v16220_v29 = vmul.u32.u64.high %v17830_v7, %v1355_v25, %v16219_v38  ;;  %v975_v8 = vmul.f32 %v974_v12, %v972_v63  ;;  %v16225_v51 = vsel %vm9213_vm12, 0, %v9212_v32 }
 0x3c4   : > { %v1166_v18 = vsub.s32 0, %v16198_v61  ;;  %v1220_v23 = vshrl.u32 %v17686_v55, %v15443_v43  ;;  %v16234_v62 = vsel %vm1446_vm10, %v16004_v21, %v16067_v5  ;;  %v16236_v50 = vand.u32 3, %v777_v60 }
 0x3c5   : > { %v985_v57 = vadd.s32 3, %v16163_v2  ;;  %v16240_v25 = vsub.s32 %v16110_v58, %v1059_v13  ;;  %v1324_v32 = vshrl.u32 %v17686_v55, %v15603_v16  ;;  %v1345_v43 = vsel %vm1343_vm3, %v15692_v6, 2102212464  ;;  %v17852_v2 = vld [vmem:[#allocation20_spill] sm:$0xff] }
 0x3c6   : > { %v1240_v63 = vsel %vm1236_vm1, %v1220_v23, %v16112_v27  ;;  %v1242_v21 = vsel %vm1238_vm2, %v17819_v41, %v1241_v47  ;;  %v16253_v5 = vpop.eup %11954  ;;  %v16255_v60 = vand.u32 3, %v673_v45  ;;  %v864_v58 = vsub.s32 4294967266, %v16225_v51 }
 0x3c7   : > { %v881_v16 = vadd.s32 3, %v16210_v33  ;;  %v1262_v40 = vadd.s32 1, %v16194_v39  ;;  %v976_v13 = vxor.u32 2147483648, %v975_v8  ;;  %v9223_v6 = vmin.u32 %v1166_v18, %v16198_v61 }
 0x3c8   : > { %v1344_v27 = vsel %vm1340_vm0, %v1324_v32, %v16146_v36  ;;  %vm1261_vm1 = vc.u32 %v16206_v22, %v16193_v42  ;;  %v1062_v41 = vsub.s32 0, %v16240_v25  ;;  %vm17832_vm2 = vcmp.lt.s32.totalorder %v15591_v31, 3 }
 0x3c9   : > { %v1346_v45 = vsel %vm17832_vm2, %v17822_v48, %v1345_v43  ;;  %v1243_v12 = vsel %vm1237_vm14, %v1240_v63, %v1242_v21  ;;  %v1430_v38 = vshrl.u32 %v17629_v19, %v15902_v34  ;;  %vm780_vm13 = vcmp.eq.s32.totalorder %v16236_v50, 0 }
 0x3ca   : > { %vm783_vm3 = vcmp.eq.s32.totalorder %v16236_v50, 2  ;;  %v16276_v36 = vand.u32 3, %v985_v57  ;;  %v844_v56 = vadd.s32 %v15822_v46, %v15832_v10  ;;  %v1366_v47 = vadd.s32 1, %v16215_v49  ;;  %v16281_v18 = vpop.eup %11956 }
 0x3cb   : > { %vm676_vm0 = vcmp.eq.s32.totalorder %v16255_v60, 0  ;;  %vm679_vm5 = vcmp.eq.s32.totalorder %v16255_v60, 2  ;;  %v865_v37 = vadd.s32 127, %v864_v58  ;;  %vm1365_vm14 = vc.u32 %v16220_v29, %v16214_v35  ;;  %v16290_v57 = vpop.eup %11958 }
 0x3cc   : > { %v1263_v48 = vsel %vm1261_vm1, %v1262_v40, %v16194_v39  ;;  %v1429_v23 = vshll.u32 %v17686_v55, %v15874_v9  ;;  %v977_v46 = vsel %vm894_vm15, %v976_v13, %v975_v8  ;;  %v860_v10 = vsub.s32 32, %v16225_v51  ;;  %v16298_v63 = vpop.eup %11960  ;;  %v17833_v40 = vld [vmem:[#allocation66_spill] sm:$0xff] }
 0x3cd   : > { %v1347_v32 = vsel %vm1341_vm4, %v1344_v27, %v1346_v45  ;;  %v1259_v43 = vmul.u32 %v17826_v30, %v1243_v12  ;;  %vm779_vm12 = vcmp.lt.s32.totalorder %v16236_v50, 2  ;;  %v16301_v39 = vand.u32 3, %v881_v16 }
 0x3ce   : > { %v1168_v21 = vclz %v9223_v6  ;;  %v9219_v9 = vmin.u32 %v1062_v41, %v16240_v25  ;;  %v16304_v58 = vor.u32 %v1430_v38, %v1429_v23  ;;  %v17337_v8 = vxor.u32 2147483648, %v16253_v5 }
 0x3cf   : > { %vm675_vm15 = vcmp.lt.s32.totalorder %v16255_v60, 2  ;;  %v1367_v31 = vsel %vm1365_vm14, %v1366_v47, %v16215_v49  ;;  %v16312_v30 = vadd.s32 %v1263_v48, %v1259_v43  ;;  %v1534_v16 = vshrl.u32 %v17629_v19, %v17833_v40  ;;  %v17834_v49 = vld [vmem:[#allocation81_spill] sm:$0xff] }
 0x3d0   : > { %v17338_v13 = vxor.u32 2147483648, %v16281_v18  ;;  %v980_v6 = vsel %vm16120_vm6, %v17801_v53, %v977_v46  ;;  %v866_v27 = vshll.u32 %v865_v37, 23  ;;  %v1363_v41 = vmul.u32 %v17830_v7, %v1347_v32 }
 0x3d1   : > { %v17340_v45 = vxor.u32 2147483648, %v16298_v63  ;;  %v17339_v12 = vxor.u32 2147483648, %v16290_v57  ;;  %v862_v38 = vshrl.u32 %v844_v56, %v860_v10  ;;  %v1533_v47 = vshll.u32 %v17686_v55, %v17834_v49 }
 0x3d2   : > { %vm776_vm4 = vweird.f32 %v17795_v0  ;;  %v9224_v48 = vadd.s32 4294967294, %v1168_v21  ;;  %v1064_v23 = vclz %v9219_v9  ;;  %v16326_v43 = vadd.s32 %v1367_v31, %v1363_v41 }
 0x3d3   : > { %v1452_v28 = vsel %vm1444_vm8, %v16304_v58, %v15976_v20  ;;  %vm672_vm6 = vweird.f32 %v17798_v15  ;;  %11962 = vcosq.f32 %v980_v6  ;;  %v861_v7 = vshll.u32 %v16043_v54, %v16225_v51 }
 0x3d4   : > { %v1265_v56 = vadd.s32 536870912, %v16312_v30  ;;  %v16336_v37 = vor.u32 %v1534_v16, %v1533_v47  ;;  %v782_v46 = vsel %vm780_vm13, %v16253_v5, %v17338_v13  ;;  %v785_v10 = vsel %vm783_vm3, %v17337_v8, %v16281_v18  ;;  %v17837_v47 = vld [vmem:[#allocation64_spill] sm:$0xff] }
 0x3d5   : > { %v867_v32 = vor.u32 4788187, %v866_v27  ;;  %vm1445_vm1 = vcmp.lt.s32.totalorder %v15898_v24, 2  ;;  %v678_v54 = vsel %vm676_vm0, %v16290_v57, %v17340_v45  ;;  %v681_v51 = vsel %vm679_vm5, %v17339_v12, %v16298_v63 }
 0x3d6   : > { %v863_v21 = vor.u32 %v862_v38, %v861_v7  ;;  %v1455_v9 = vsel %vm1445_vm1, %v1452_v28, %v16077_v3  ;;  %vm9225_vm2 = vcmp.lt.s32.totalorder %v9224_v48, 0  ;;  %v9220_v31 = vadd.s32 4294967294, %v1064_v23  ;;  %v17836_v38 = vld [vmem:[#allocation70_spill] sm:$0xff]  ;;  %v17839_v7 = vld [vmem:[#allocation39_spill] sm:$0xff] }
 0x3d7   : > { %v1369_v16 = vadd.s32 536870912, %v16326_v43  ;;  %v1459_v27 = vsel %vm1445_vm1, %v16060_v17, %v16234_v62  ;;  %v786_v41 = vsel %vm779_vm12, %v782_v46, %v785_v10  ;;  %11964 = vsinq.f32 %v980_v6  ;;  %v17840_v6 = vld [vmem:[#allocation41_spill] sm:$0xff]  ;;  %v17842_v46 = vld [vmem:[#allocation87_spill] sm:$0xff] }
 0x3d8   : > { %v16369_v49 = vshrl.u32 %v1265_v56, 30  ;;  %vm17838_vm13 = vcmp.lt.s32.totalorder %v17837_v47, 1  ;;  %v682_v23 = vsel %vm675_vm15, %v678_v54, %v681_v51  ;;  %v868_v28 = vand.u32 2147483647, %v867_v32  ;;  %v17843_v51 = vld [vmem:[#allocation75_spill] sm:$0xff] }
 0x3d9   : > { %v1556_v3 = vsel %vm17838_vm13, %v16336_v37, %v17836_v38  ;;  %v16378_v8 = vmul.u32.u64.low %v17839_v7, %v1455_v9  ;;  %v16379_v13 = vmul.u32.u64.high %v17839_v7, %v1455_v9, %v16378_v8  ;;  %v16382_v17 = vsel %vm9225_vm2, 0, %v9224_v48  ;;  %v17844_v9 = vld [vmem:[#allocation37_spill] sm:$0xff]  ;;  %vm17855_vm2 = vmmov %vm17838_vm13 }
 0x3da   : > { %17835 = vst [vmem:[#allocation21_spill] sm:$0xff] %v16369_v49  ;;  %vm1549_vm3 = vcmp.lt.s32.totalorder %v17837_v47, 2  ;;  %v16386_v62 = vmul.u32.u64.low %v17839_v7, %v1459_v27  ;;  %v16387_v50 = vmul.u32.u64.high %v17839_v7, %v1459_v27, %v16386_v62  ;;  %vm1102_vm0 = vcmp.lt.s32.totalorder %v17840_v6, 0 }
 0x3db   : > { %v870_v56 = vcvt.s32.f32 %v863_v21  ;;  %vm9221_vm5 = vcmp.lt.s32.totalorder %v9220_v31, 0  ;;  %v16390_v60 = vshrl.u32 %v1369_v16, 30  ;;  %v1559_v10 = vsel %vm1549_vm3, %v1556_v3, %v17842_v46 }
 0x3dc   : > { %v16397_v48 = vsel %vm776_vm4, nan, %v786_v41  ;;  %v1156_v32 = vadd.s32 %v15967_v59, %v15973_v52  ;;  %v1267_v54 = vshll.u32 %v16369_v49, 30  ;;  %v1563_v21 = vsel %vm1549_vm3, %v17844_v9, %v17843_v51  ;;  %v17846_v59 = vld [vmem:[#allocation77_spill] sm:$0xff] }
 0x3dd   : > { %17841 = vst [vmem:[#allocation32_spill] sm:$0xff] %v16390_v60  ;;  %v16408_v16 = vsel %vm672_vm6, nan, %v682_v23  ;;  %v871_v27 = vmul.f32 %v870_v56, %v868_v28  ;;  %v1176_v3 = vsub.s32 4294967266, %v16382_v17  ;;  %vm17845_vm14 = vcmp.lt.s32.totalorder %v15898_v24, 4  ;;  %v16414_v62 = vpop.eup %11962  ;;  %v17847_v9 = vld [vmem:[#allocation73_spill] sm:$0xff] }
 0x3de   : > { %v1449_v41 = vsel %vm17845_vm14, %v16018_v1, 2102212464  ;;  %v16416_v52 = vsel %vm9221_vm5, 0, %v9220_v31  ;;  %v16419_v46 = vmul.u32.u64.low %v17846_v59, %v1559_v10  ;;  %v16420_v12 = vmul.u32.u64.high %v17846_v59, %v1559_v10, %v16419_v46 }
 0x3df   : > { %v1428_v23 = vshrl.u32 %v17686_v55, %v15902_v34  ;;  %v1371_v28 = vshll.u32 %v16390_v60, 30  ;;  %v16427_v56 = vmul.u32.u64.low %v17846_v59, %v1563_v21  ;;  %v16428_v51 = vmul.u32.u64.high %v17846_v59, %v1563_v21, %v16427_v56 }
 0x3e0   : > { %v1638_v1 = vshrl.u32 %v17629_v19, %v17847_v9  ;;  %v17848_v31 = vand.u32 2147483647, %v17840_v6  ;;  %v1186_v10 = vsub.s32 4, %v16144_v11  ;;  %v16440_v49 = vsub.s32 %v16312_v30, %v1267_v54  ;;  %v17851_v56 = vld [vmem:[#allocation42_spill] sm:$0xff] }
 0x3e1   : > { %v1448_v34 = vsel %vm1444_vm8, %v1428_v23, %v16304_v58  ;;  %v1450_v21 = vsel %vm1446_vm10, %v15976_v20, %v1449_v41  ;;  %v1470_v60 = vadd.s32 1, %v16379_v13  ;;  %v1637_v33 = vshll.u32 %v17686_v55, %v17852_v2  ;;  %v16454_v30 = vpop.eup %11964  ;;  %v17853_v58 = vld [vmem:[#allocation86_spill] sm:$0xff] }
 0x3e2   : > { %vm16434_vm12 = vcmp.le.f32.partialorder %v17848_v31, 0.7853982  ;;  %v1052_v31 = vadd.s32 %v17851_v56, %v16008_v14  ;;  %v1177_v54 = vadd.s32 127, %v1176_v3  ;;  %v1072_v42 = vsub.s32 4294967266, %v16416_v52 }
 0x3e3   : > { %vm17854_vm8 = vcmp.lt.s32.totalorder %v17837_v47, 4  ;;  %vm1469_vm10 = vc.u32 %v16387_v50, %v16378_v8  ;;  %v16463_v20 = vsub.s32 %v16326_v43, %v1371_v28  ;;  %v1532_v14 = vshrl.u32 %v17686_v55, %v17833_v40 }
 0x3e4   : > { %v1553_v23 = vsel %vm17854_vm8, %v17853_v58, 2102212464  ;;  %v1451_v2 = vsel %vm1445_vm1, %v1448_v34, %v1450_v21  ;;  %v16469_v41 = vor.u32 %v1638_v1, %v1637_v33  ;;  %v872_v3 = vxor.u32 2147483648, %v871_v27 }
 0x3e5   : > { %v1172_v56 = vsub.s32 32, %v16382_v17  ;;  %v1187_v58 = vsel %vm1102_vm0, %v1186_v10, %v16144_v11  ;;  %v1270_v19 = vsub.s32 0, %v16440_v49  ;;  %v989_v43 = vxor.u32 2147483648, %v16454_v30 }
 0x3e6   : > { %vm991_vm15 = vcmp.eq.s32.totalorder %v16276_v36, 2  ;;  %v1552_v24 = vsel %vm17855_vm2, %v1532_v14, %v16336_v37  ;;  %vm17856_vm1 = vcmp.lt.s32.totalorder %v17837_v47, 3  ;;  %v1471_v40 = vsel %vm1469_vm10, %v1470_v60, %v16379_v13  ;;  %v17857_v37 = vld [vmem:[#allocation38_spill] sm:$0xff]  ;;  %v17858_v14 = vld [vmem:[#allocation67_spill] sm:$0xff] }
 0x3e7   : > { %v1554_v33 = vsel %vm17856_vm1, %v17836_v38, %v1553_v23  ;;  %v1178_v28 = vshll.u32 %v1177_v54, 23  ;;  %v1068_v1 = vsub.s32 32, %v16416_v52  ;;  %v1574_v11 = vadd.s32 1, %v16420_v12 }
 0x3e8   : > { %v1467_v10 = vmul.u32 %v17839_v7, %v1451_v2  ;;  %v1073_v34 = vadd.s32 127, %v1072_v42  ;;  %v1374_v21 = vsub.s32 0, %v16463_v20  ;;  %vm1573_vm13 = vc.u32 %v16428_v51, %v16419_v46  ;;  %v17860_v7 = vld [vmem:[#allocation19_spill] sm:$0xff] }
 0x3e9   : > { %vm17859_vm5 = vcmp.lt.s32.totalorder %v17858_v14, 1  ;;  %v1174_v23 = vshrl.u32 %v1156_v32, %v1172_v56  ;;  %v9227_v13 = vmin.u32 %v1270_v19, %v16440_v49  ;;  %v1555_v60 = vsel %vm1549_vm3, %v1552_v24, %v1554_v33  ;;  %v17861_v24 = vld [vmem:[#allocation23_spill] sm:$0xff] }
 0x3ea   : > { %v1660_v38 = vsel %vm17859_vm5, %v16469_v41, %v17857_v37  ;;  %v16498_v54 = vadd.s32 %v1471_v40, %v1467_v10  ;;  %vm998_vm14 = vcmp.lt.s32.totalorder %v17860_v7, 0  ;;  %vm988_vm8 = vcmp.eq.s32.totalorder %v16276_v36, 0  ;;  %vm17872_vm2 = vmmov %vm17859_vm5 }
 0x3eb   : > { %v873_v42 = vsel %vm790_vm9, %v872_v3, %v871_v27  ;;  %v1173_v2 = vshll.u32 %v16198_v61, %v16382_v17  ;;  %v16508_v32 = vsel %vm16434_vm12, 0, %v1187_v58  ;;  %vm1653_vm10 = vcmp.lt.s32.totalorder %v17858_v14, 2  ;;  %v17862_v61 = vld [vmem:[#allocation85_spill] sm:$0xff]  ;;  %v17863_v17 = vld [vmem:[#allocation36_spill] sm:$0xff] }
 0x3ec   : > { %v1179_v47 = vor.u32 4788187, %v1178_v28  ;;  %v1070_v19 = vshrl.u32 %v1052_v31, %v1068_v1  ;;  %v1575_v56 = vsel %vm1573_vm13, %v1574_v11, %v16420_v12  ;;  %v1663_v33 = vsel %vm1653_vm10, %v1660_v38, %v17861_v24 }
 0x3ed   : > { %v1074_v40 = vshll.u32 %v1073_v34, 23  ;;  %v9231_v27 = vmin.u32 %v1374_v21, %v16463_v20  ;;  %v1571_v3 = vmul.u32 %v17846_v59, %v1555_v60  ;;  %v1667_v58 = vsel %vm1653_vm10, %v17863_v17, %v17862_v61  ;;  %v17864_v34 = vld [vmem:[#allocation71_spill] sm:$0xff] }
 0x3ee   : > { %v876_v31 = vsel %vm16140_vm11, %v17806_v44, %v873_v42  ;;  %v1175_v28 = vor.u32 %v1174_v23, %v1173_v2  ;;  %v1272_v12 = vclz %v9227_v13  ;;  %v1473_v1 = vadd.s32 536870912, %v16498_v54 }
 0x3ef   : > { %v1069_v11 = vshll.u32 %v16240_v25, %v16416_v52  ;;  %v16527_v10 = vadd.s32 %v1575_v56, %v1571_v3  ;;  %v16530_v59 = vmul.u32.u64.low %v17864_v34, %v1663_v33  ;;  %v16531_v21 = vmul.u32.u64.high %v17864_v34, %v1663_v33, %v16530_v59 }
 0x3f0   : > { %vm987_vm9 = vcmp.lt.s32.totalorder %v16276_v36, 2  ;;  %v17865_v4 = vxor.u32 2147483648, %v16414_v62  ;;  %v1082_v23 = vsub.s32 4, %v16176_v26  ;;  %v1180_v52 = vand.u32 2147483647, %v1179_v47 }
 0x3f1   : > { %v16542_v13 = vmul.u32.u64.low %v17864_v34, %v1667_v58  ;;  %v16543_v25 = vmul.u32.u64.high %v17864_v34, %v1667_v58, %v16542_v13  ;;  %v17866_v60 = vand.u32 2147483647, %v17860_v7  ;;  %v1071_v2 = vor.u32 %v1070_v19, %v1069_v11 }
 0x3f2   : > { %v993_v38 = vsel %vm991_vm15, %v17865_v4, %v16454_v30  ;;  %v1075_v56 = vor.u32 4788187, %v1074_v40  ;;  %v1376_v24 = vclz %v9231_v27  ;;  %11966 = vcosq.f32 %v876_v31  ;;  %v17869_v4 = vld [vmem:[#allocation83_spill] sm:$0xff]  ;;  %v17871_v13 = vld [vmem:[#allocation44_spill] sm:$0xff] }
 0x3f3   : > { %vm16547_vm11 = vcmp.le.f32.partialorder %v17866_v60, 0.7853982  ;;  %v1193_v33 = vadd.s32 3, %v16508_v32  ;;  %v9228_v3 = vadd.s32 4294967294, %v1272_v12  ;;  %v16552_v61 = vshrl.u32 %v1473_v1, 30 }
 0x3f4   : > { %v1182_v17 = vcvt.s32.f32 %v1175_v28  ;;  %v1577_v58 = vadd.s32 536870912, %v16527_v10  ;;  %vm17870_vm3 = vcmp.lt.s32.totalorder %v17858_v14, 4  ;;  %v1817_v60 = vand.u32 3, %v17871_v13 }
 0x3f5   : > { %v1657_v47 = vsel %vm17870_vm3, %v17869_v4, 2102212464  ;;  %v990_v19 = vsel %vm988_vm8, %v16414_v62, %v989_v43  ;;  %11968 = vsinq.f32 %v876_v31  ;;  %v1083_v40 = vsel %vm998_vm14, %v1082_v23, %v16176_v26 }
 0x3f6   : > { %v1636_v27 = vshrl.u32 %v17686_v55, %v17847_v9  ;;  %v1183_v28 = vmul.f32 %v1182_v17, %v1180_v52  ;;  %v1076_v12 = vand.u32 2147483647, %v1075_v56  ;;  %v1078_v1 = vcvt.s32.f32 %v1071_v2 }
 0x3f7   : > { %v9232_v11 = vadd.s32 4294967294, %v1376_v24  ;;  %vm9229_vm15 = vcmp.lt.s32.totalorder %v9228_v3, 0  ;;  %v1475_v4 = vshll.u32 %v16552_v61, 30  ;;  %vm17873_vm1 = vcmp.lt.s32.totalorder %v17858_v14, 3 }
 0x3f8   : > { %v1656_v13 = vsel %vm17872_vm2, %v1636_v27, %v16469_v41  ;;  %v1658_v31 = vsel %vm17873_vm1, %v17857_v37, %v1657_v47  ;;  %vm984_vm13 = vweird.f32 %v17801_v53  ;;  %v16577_v26 = vshrl.u32 %v1577_v58, 30  ;;  %v17876_v37 = vld [vmem:[#allocation22_spill] sm:$0xff] }
 0x3f9   : > { %v1678_v55 = vadd.s32 1, %v16531_v21  ;;  %vm1819_vm5 = vcmp.eq.s32.totalorder %v1817_v60, 0  ;;  %vm1822_vm8 = vcmp.eq.s32.totalorder %v1817_v60, 2  ;;  %vm1677_vm3 = vc.u32 %v16543_v25, %v16530_v59 }
 0x3fa   : > { %v17874_v9 = vxor.u32 2147483648, %v16298_v63  ;;  %v17875_v41 = vxor.u32 2147483648, %v16290_v57  ;;  %v1920_v2 = vand.u32 3, %v17876_v37  ;;  %v994_v56 = vsel %vm987_vm9, %v990_v19, %v993_v38 }
 0x3fb   : > { %v16591_v24 = vand.u32 3, %v1193_v33  ;;  %v1079_v17 = vmul.f32 %v1078_v1, %v1076_v12  ;;  %v1659_v58 = vsel %vm1653_vm10, %v1656_v13, %v1658_v31  ;;  %v16597_v47 = vsel %vm16547_vm11, 0, %v1083_v40 }
 0x3fc   : > { %v1821_v23 = vsel %vm1819_vm5, %v16290_v57, %v17874_v9  ;;  %v1824_v52 = vsel %vm1822_vm8, %v17875_v41, %v16298_v63  ;;  %v16600_v27 = vsel %vm9229_vm15, 0, %v9228_v3  ;;  %v16603_v57 = vsub.s32 %v16498_v54, %v1475_v4  ;;  %v16607_v33 = vpop.eup %11966  ;;  %v17879_v9 = vld [vmem:[#allocation93_spill] sm:$0xff] }
 0x3fd   : > { %vm1818_vm2 = vcmp.lt.s32.totalorder %v1817_v60, 2  ;;  %vm9233_vm1 = vcmp.lt.s32.totalorder %v9232_v11, 0  ;;  %v1579_v36 = vshll.u32 %v16577_v26, 30  ;;  %v1679_v63 = vsel %vm1677_vm3, %v1678_v55, %v16531_v21  ;;  %v7997_v55 = vpop.f32.mrb[20].mxu0 }
 0x3fe   : > { %v1825_v38 = vsel %vm1818_vm2, %v1821_v23, %v1824_v52  ;;  %v1184_v14 = vxor.u32 2147483648, %v1183_v28  ;;  %v1675_v19 = vmul.u32 %v17864_v34, %v1659_v58  ;;  %vm1922_vm10 = vcmp.eq.s32.totalorder %v1920_v2, 0  ;;  %v17880_v23 = vld [vmem:[#allocation89_spill] sm:$0xff] }
 0x3ff   : > { %vm1925_vm9 = vcmp.eq.s32.totalorder %v1920_v2, 2  ;;  %v1080_v40 = vxor.u32 2147483648, %v1079_v17  ;;  %v1280_v3 = vsub.s32 4294967266, %v16600_v27  ;;  %v17877_v54 = vxor.u32 2147483648, %v16281_v18  ;;  %v16617_v21 = vpop.eup %11968 }
 0x400   : > { %v17878_v12 = vxor.u32 2147483648, %v16253_v5  ;;  %v16619_v4 = vsel %vm9233_vm1, 0, %v9232_v11  ;;  %v1478_v13 = vsub.s32 0, %v16603_v57  ;;  %v16622_v34 = vadd.s32 %v1679_v63, %v1675_v19  ;;  %v10750_v11 = vpop.f32.mrb[21].mxu0 }
 0x401   : > { %v1924_v60 = vsel %vm1922_vm10, %v16253_v5, %v17877_v54  ;;  %v1826_v31 = vsel %vm672_vm6, nan, %v1825_v38  ;;  %v17881_v41 = vsub.f32 %v17879_v9, %v17880_v23  ;;  %vm887_vm15 = vcmp.eq.s32.totalorder %v16301_v39, 2  ;;  %v17885_v9 = vld [vmem:[#allocation76_spill] sm:$0xff] }
 0x402   : > { %v1927_v1 = vsel %vm1925_vm9, %v17878_v12, %v16281_v18  ;;  %v16632_v5 = vsub.s32 %v16527_v10, %v1579_v36  ;;  %v8712_v18 = vmul.f32 %v7997_v55, %v1826_v31  ;;  %vm1921_vm5 = vcmp.lt.s32.totalorder %v1920_v2, 2 }
 0x403   : > { %v8701_v52 = vmul.f32 %v17881_v41, %v16408_v16  ;;  %v16636_v37 = vsel %vm984_vm13, nan, %v994_v56  ;;  %vm884_vm6 = vcmp.eq.s32.totalorder %v16301_v39, 0  ;;  %v16640_v15 = vadd.s32 3, %v16597_v47 }
 0x404   : > { %vm8734_vm8 = vcmask 1040384   ;;  %v1928_v58 = vsel %vm1921_vm5, %v1924_v60, %v1927_v1  ;;  %v1185_v16 = vsel %vm1102_vm0, %v1184_v14, %v1183_v28  ;;  %v1364_v10 = vadd.s32 %v16214_v35, %v16220_v29  ;;  %v8067_v29 = vpop.f32.mrb[24].mxu1  ;;  %v17882_v14 = vld [vmem:[#allocation94_spill] sm:$0xff] }
 0x405   : > { %v1281_v36 = vadd.s32 127, %v1280_v3  ;;  %v8723_v63 = vadd.f32 %v8712_v18, %v8701_v52  ;;  %v1081_v2 = vsel %vm998_vm14, %v1080_v40, %v1079_v17  ;;  %v1384_v56 = vsub.s32 4294967266, %v16619_v4  ;;  %v17883_v3 = vld [vmem:[#allocation25_spill] sm:$0xff]  ;;  %v10773_v31 = vpop.f32.mrb[25].mxu1 }
 0x406   : > { %v9235_v38 = vmin.u32 %v1478_v13, %v16603_v57  ;;  %v1681_v19 = vadd.s32 536870912, %v16622_v34  ;;  %v1276_v54 = vsub.s32 32, %v16600_v27  ;;  %v1582_v60 = vsub.s32 0, %v16632_v5 }
 0x407   : > { %v8735_v28 = vsel %vm8734_vm8, %v8723_v63, 0.0  ;;  %v1929_v35 = vsel %vm776_vm4, nan, %v1928_v58  ;;  %v17884_v17 = vsub.f32 %v17882_v14, %v17883_v3  ;;  %vm883_vm0 = vcmp.lt.s32.totalorder %v16301_v39, 2 }
 0x408   : > { %v888_v12 = vxor.u32 2147483648, %v16607_v33  ;;  %v1188_v1 = vsel %vm16434_vm12, %v17840_v6, %v1185_v16  ;;  %8736 = vadd.xlane.f32.xlu0 %v8735_v28  ;;  %v8713_v13 = vmul.f32 %v8067_v29, %v1929_v35  ;;  %v885_v0 = vxor.u32 2147483648, %v16617_v21  ;;  %v17886_v16 = vld [vmem:[#allocation17_spill] sm:$0xff] }
 0x409   : > { %v8702_v40 = vmul.f32 %v17884_v17, %v16397_v48  ;;  %v1084_v55 = vsel %vm16547_vm11, %v17860_v7, %v1081_v2  ;;  %v1260_v48 = vadd.s32 %v17885_v9, %v16206_v22  ;;  %v1282_v23 = vshll.u32 %v1281_v36, 23  ;;  %v17887_v2 = vld [vmem:[#allocation43_spill] sm:$0xff] }
 0x40a   : > { %v1385_v41 = vadd.s32 127, %v1384_v56  ;;  %v1480_v52 = vclz %v9235_v38  ;;  %v16671_v18 = vshrl.u32 %v1681_v19, 30  ;;  %vm880_vm4 = vweird.f32 %v17806_v44 }
 0x40b   : > { %v8724_v11 = vadd.f32 %v8713_v13, %v8702_v40  ;;  %11970 = vcosq.f32 %v1188_v1  ;;  %v1278_v45 = vshrl.u32 %v1260_v48, %v1276_v54  ;;  %v9239_v58 = vmin.u32 %v1582_v60, %v16632_v5  ;;  %v17888_v40 = vld [vmem:[#allocation34_spill] sm:$0xff] }
 0x40c   : > { %v2023_v63 = vand.u32 3, %v17886_v16  ;;  %v889_v42 = vsel %vm887_vm15, %v888_v12, %v16617_v21  ;;  %11972 = vsinq.f32 %v1188_v1  ;;  %v1380_v22 = vsub.s32 32, %v16619_v4 }
 0x40d   : > { %v8738_v36 = vsel %vm8734_vm8, %v8724_v11, 0.0  ;;  %vm1310_vm12 = vcmp.lt.s32.totalorder %v17887_v2, 0  ;;  %v886_v56 = vsel %vm884_vm6, %v16607_v33, %v885_v0  ;;  %11974 = vcosq.f32 %v1084_v55 }
 0x40e   : > { %v1277_v38 = vshll.u32 %v16440_v49, %v16600_v27  ;;  %v1283_v19 = vor.u32 4788187, %v1282_v23  ;;  %8739 = vadd.xlane.f32.xlu0 %v8738_v36  ;;  %11976 = vsinq.f32 %v1084_v55  ;;  %v1386_v54 = vshll.u32 %v1385_v41, 23  ;;  %v17892_v55 = vld [vmem:[#allocation32_spill] sm:$0xff]  ;;  %v17893_v23 = vld [vmem:[#allocation29_spill] sm:$0xff] }
 0x40f   : > { %v9236_v60 = vadd.s32 4294967294, %v1480_v52  ;;  %v1683_v28 = vshll.u32 %v16671_v18, 30  ;;  %v1584_v29 = vclz %v9239_v58  ;;  %vm2025_vm14 = vcmp.eq.s32.totalorder %v2023_v63, 0 }
 0x410   : > { %v1279_v35 = vor.u32 %v1278_v45, %v1277_v38  ;;  %vm2028_vm11 = vcmp.eq.s32.totalorder %v2023_v63, 2  ;;  %v1382_v14 = vshrl.u32 %v1364_v10, %v1380_v22  ;;  %v2027_v3 = vsel %vm2025_vm14, %v16607_v33, %v885_v0  ;;  %v8137_v22 = vpop.f32.mrb[22].mxu0 }
 0x411   : > { %v2030_v17 = vsel %vm2028_vm11, %v888_v12, %v16617_v21  ;;  %v2126_v1 = vand.u32 3, %v17888_v40  ;;  %v890_v49 = vsel %vm883_vm0, %v886_v56, %v889_v42  ;;  %v17889_v27 = vand.u32 2147483647, %v17887_v2 }
 0x412   : > { %v1381_v31 = vshll.u32 %v16463_v20, %v16619_v4  ;;  %v1394_v10 = vsub.s32 4, %v17892_v55  ;;  %v1284_v9 = vand.u32 2147483647, %v1283_v19  ;;  %v1387_v33 = vor.u32 4788187, %v1386_v54  ;;  %v10796_v54 = vpop.f32.mrb[23].mxu0 }
 0x413   : > { %vm16695_vm3 = vcmp.le.f32.partialorder %v17889_v27, 0.7853982  ;;  %vm9237_vm2 = vcmp.lt.s32.totalorder %v9236_v60, 0  ;;  %v16703_v21 = vsub.s32 %v16622_v34, %v1683_v28  ;;  %vm2024_vm1 = vcmp.lt.s32.totalorder %v2023_v63, 2 }
 0x414   : > { %v16706_v39 = vand.u32 3, %v16640_v15  ;;  %v1286_v12 = vcvt.s32.f32 %v1279_v35  ;;  %v9240_v0 = vadd.s32 4294967294, %v1584_v29  ;;  %v2031_v48 = vsel %vm2024_vm1, %v2027_v3, %v2030_v17 }
 0x415   : > { %vm1206_vm10 = vcmp.lt.s32.totalorder %v17893_v23, 0  ;;  %v891_v20 = vsel %vm880_vm4, nan, %v890_v49  ;;  %v1383_v4 = vor.u32 %v1382_v14, %v1381_v31  ;;  %vm2128_vm9 = vcmp.eq.s32.totalorder %v2126_v1, 0  ;;  %v16711_v41 = vpop.eup %11970 }
 0x416   : > { %vm2131_vm15 = vcmp.eq.s32.totalorder %v2126_v1, 2  ;;  %v1287_v52 = vmul.f32 %v1286_v12, %v1284_v9  ;;  %v16713_v34 = vsel %vm9237_vm2, 0, %v9236_v60  ;;  %v2130_v15 = vsel %vm2128_vm9, %v16414_v62, %v989_v43  ;;  %v16721_v58 = vpop.eup %11972  ;;  %v17901_v12 = vld [vmem:[#allocation33_spill] sm:$0xff] }
 0x417   : > { %v17894_v11 = vxor.u32 2147483648, %v16414_v62  ;;  %vm1196_vm5 = vcmp.eq.s32.totalorder %v16591_v24, 0  ;;  %vm1199_vm6 = vcmp.eq.s32.totalorder %v16591_v24, 2  ;;  %v1388_v16 = vand.u32 2147483647, %v1387_v33  ;;  %v16731_v36 = vpop.eup %11974  ;;  %v17895_v62 = vld [vmem:[#allocation26_spill] sm:$0xff] }
 0x418   : > { %v1395_v63 = vsel %vm1310_vm12, %v1394_v10, %v17892_v55  ;;  %v1686_v42 = vsub.s32 0, %v16703_v21  ;;  %v2032_v43 = vsel %vm880_vm4, nan, %v2031_v48  ;;  %vm9241_vm0 = vcmp.lt.s32.totalorder %v9240_v0, 0  ;;  %v11977_v60 = vpop.eup %11976  ;;  %v8207_v33 = vpop.f32.mrb[26].mxu1  ;;  %v17902_v48 = vld [vmem:[#allocation28_spill] sm:$0xff] }
 0x419   : > { %v2133_v45 = vsel %vm2131_vm15, %v17894_v11, %v16454_v30  ;;  %v17896_v30 = vld [vmem:[#allocation18_spill] sm:$0xff]  ;;  %v8714_v19 = vmul.f32 %v8137_v22, %v2032_v43  ;;  %vm2127_vm14 = vcmp.lt.s32.totalorder %v2126_v1, 2  ;;  %v1390_v28 = vcvt.s32.f32 %v1383_v4 }
 0x41a   : > { %v17897_v56 = vsub.f32 %v17895_v62, %v17896_v30  ;;  %v17898_v35 = vand.u32 2147483647, %v17893_v23  ;;  %v1488_v44 = vsub.s32 4294967266, %v16713_v34  ;;  %v2134_v14 = vsel %vm2127_vm14, %v2130_v15, %v2133_v45 }
 0x41b   : > { %vm1092_vm4 = vcmp.eq.s32.totalorder %v16706_v39, 0  ;;  %vm1095_vm2 = vcmp.eq.s32.totalorder %v16706_v39, 2  ;;  %v1288_v3 = vxor.u32 2147483648, %v1287_v52  ;;  %v1391_v40 = vmul.f32 %v1390_v28, %v1388_v16  ;;  %v10819_v16 = vpop.f32.mrb[27].mxu1 }
 0x41c   : > { %v8703_v38 = vmul.f32 %v17897_v56, %v891_v20  ;;  %vm16738_vm11 = vcmp.le.f32.partialorder %v17898_v35, 0.7853982  ;;  %v16747_v1 = vsel %vm16695_vm3, 0, %v1395_v63  ;;  %v16749_v49 = vsel %vm9241_vm0, 0, %v9240_v0  ;;  %v17904_v0 = vld [vmem:[#allocation21_spill] sm:$0xff]  ;;  %v17905_v16 = vld [vmem:[#allocation24_spill] sm:$0xff] }
 0x41d   : > { %v9243_v27 = vmin.u32 %v1686_v42, %v16703_v21  ;;  %v1197_v31 = vxor.u32 2147483648, %v16721_v58  ;;  %v1200_v55 = vxor.u32 2147483648, %v16711_v41  ;;  %v2135_v9 = vsel %vm984_vm13, nan, %v2134_v14 }
 0x41e   : > { %v8725_v17 = vadd.f32 %v8714_v19, %v8703_v38  ;;  %v17903_v20 = vsub.f32 %v17901_v12, %v17902_v48  ;;  %vm1195_vm1 = vcmp.lt.s32.totalorder %v16591_v24, 2  ;;  %v1290_v15 = vsub.s32 4, %v17904_v0 }
 0x41f   : > { %v1489_v11 = vadd.s32 127, %v1488_v44  ;;  %v8715_v45 = vmul.f32 %v8207_v33, %v2135_v9  ;;  %v1093_v63 = vxor.u32 2147483648, %v11977_v60  ;;  %v1096_v42 = vxor.u32 2147483648, %v16731_v36 }
 0x420   : > { %v8741_v10 = vsel %vm8734_vm8, %v8725_v17, 0.0  ;;  %v8704_v4 = vmul.f32 %v17903_v20, %v16636_v37  ;;  %v1289_v53 = vsel %vm1206_vm10, %v1288_v3, %v1287_v52  ;;  %v1592_v43 = vsub.s32 4294967266, %v16749_v49 }
 0x421   : > { %8742 = vadd.xlane.f32.xlu1 %v8741_v10  ;;  %vm1091_vm13 = vcmp.lt.s32.totalorder %v16706_v39, 2  ;;  %v1392_v22 = vxor.u32 2147483648, %v1391_v40  ;;  %v1484_v37 = vsub.s32 32, %v16713_v34  ;;  %v1688_v62 = vclz %v9243_v27 }
 0x422   : > { %v8726_v30 = vadd.f32 %v8715_v45, %v8704_v4  ;;  %v1198_v56 = vsel %vm1196_vm5, %v16711_v41, %v1197_v31  ;;  %v1201_v52 = vsel %vm1199_vm6, %v1200_v55, %v16721_v58  ;;  %v1401_v38 = vadd.s32 3, %v16747_v1 }
 0x423   : > { %v2229_v19 = vand.u32 3, %v16597_v47  ;;  %v1292_v54 = vsel %vm16738_vm11, %v17893_v23, %v1289_v53  ;;  %v1468_v28 = vadd.s32 %v16378_v8, %v16387_v50  ;;  %v1490_v35 = vshll.u32 %v1489_v11, 23 }
 0x424   : > { %v8744_v44 = vsel %vm8734_vm8, %v8726_v30, 0.0  ;;  %vm1088_vm9 = vweird.f32 %v17860_v7  ;;  %v1094_v14 = vsel %vm1092_vm4, %v16731_v36, %v1093_v63  ;;  %v1097_v3 = vsel %vm1095_vm2, %v1096_v42, %v11977_v60 }
 0x425   : > { %v1291_v47 = vsel %vm1206_vm10, %v1290_v15, %v17904_v0  ;;  %v1593_v17 = vadd.s32 127, %v1592_v43  ;;  %8745 = vadd.xlane.f32.xlu0 %v8744_v44  ;;  %v1393_v8 = vsel %vm1310_vm12, %v1392_v22, %v1391_v40  ;;  %v1588_v50 = vsub.s32 32, %v16749_v49  ;;  %v8347_v44 = vpop.f32.mrb[28].mxu1 }
 0x426   : > { %v1486_v27 = vshrl.u32 %v1468_v28, %v1484_v37  ;;  %v9244_v10 = vadd.s32 4294967294, %v1688_v62  ;;  %11978 = vcosq.f32 %v1292_v54  ;;  %v1485_v9 = vshll.u32 %v16603_v57, %v16713_v34 }
 0x427   : > { %vm2231_vm15 = vcmp.eq.s32.totalorder %v2229_v19, 0  ;;  %vm2234_vm5 = vcmp.eq.s32.totalorder %v2229_v19, 2  ;;  %v1491_v33 = vor.u32 4788187, %v1490_v35  ;;  %v2332_v20 = vand.u32 3, %v16508_v32 }
 0x428   : > { %v2233_v12 = vsel %vm2231_vm15, %v16731_v36, %v1093_v63  ;;  %v2236_v48 = vsel %vm2234_vm5, %v1096_v42, %v11977_v60  ;;  %v1202_v4 = vsel %vm1195_vm1, %v1198_v56, %v1201_v52  ;;  %11980 = vsinq.f32 %v1292_v54  ;;  %v17906_v63 = vld [vmem:[#allocation30_spill] sm:$0xff] }
 0x429   : > { %v1572_v40 = vadd.s32 %v16419_v46, %v16428_v51  ;;  %v1594_v0 = vshll.u32 %v1593_v17, 23  ;;  %v1293_v15 = vsel %vm16738_vm11, 0, %v1291_v47  ;;  %v1487_v57 = vor.u32 %v1486_v27, %v1485_v9  ;;  %v17911_v9 = vld [vmem:[#allocation57_spill] sm:$0xff] }
 0x42a   : > { %vm9245_vm12 = vcmp.lt.s32.totalorder %v9244_v10, 0  ;;  %vm2230_vm10 = vcmp.lt.s32.totalorder %v2229_v19, 2  ;;  %v1098_v34 = vsel %vm1091_vm13, %v1094_v14, %v1097_v3  ;;  %v1396_v32 = vsel %vm16695_vm3, %v17887_v2, %v1393_v8  ;;  %v17908_v14 = vld [vmem:[#allocation55_spill] sm:$0xff]  ;;  %v17909_v3 = vld [vmem:[#allocation46_spill] sm:$0xff] }
 0x42b   : > { %v1590_v24 = vshrl.u32 %v1572_v40, %v1588_v50  ;;  %v2237_v36 = vsel %vm2230_vm10, %v2233_v12, %v2236_v48  ;;  %v1589_v60 = vshll.u32 %v16632_v5, %v16749_v49  ;;  %v1492_v46 = vand.u32 2147483647, %v1491_v33  ;;  %v8277_v49 = vpop.f32.mrb[24].mxu0 }
 0x42c   : > { %vm2334_vm6 = vcmp.eq.s32.totalorder %v2332_v20, 0  ;;  %vm2337_vm0 = vcmp.eq.s32.totalorder %v2332_v20, 2  ;;  %v1595_v51 = vor.u32 4788187, %v1594_v0  ;;  %v16816_v29 = vsel %vm9245_vm12, 0, %v9244_v10  ;;  %v10865_v10 = vpop.f32.mrb[29].mxu1 }
 0x42d   : > { %v2336_v39 = vsel %vm2334_vm6, %v16711_v41, %v1197_v31  ;;  %v2339_v13 = vsel %vm2337_vm0, %v1200_v55, %v16721_v58  ;;  %v1099_v11 = vsel %vm1088_vm9, nan, %v1098_v34  ;;  %11982 = vcosq.f32 %v1396_v32  ;;  %v10842_v31 = vpop.f32.mrb[25].mxu0 }
 0x42e   : > { %v1494_v45 = vcvt.s32.f32 %v1487_v57  ;;  %v2238_v5 = vsel %vm1088_vm9, nan, %v2237_v36  ;;  %v17907_v42 = vsub.f32 %v17905_v16, %v17906_v63  ;;  %v1591_v43 = vor.u32 %v1590_v24, %v1589_v60 }
 0x42f   : > { %v8716_v22 = vmul.f32 %v8277_v49, %v2238_v5  ;;  %vm2333_vm3 = vcmp.lt.s32.totalorder %v2332_v20, 2  ;;  %11984 = vsinq.f32 %v1396_v32  ;;  %v1696_v58 = vsub.s32 4294967266, %v16816_v29 }
 0x430   : > { %v8705_v53 = vmul.f32 %v17907_v42, %v1099_v11  ;;  %v1495_v41 = vmul.f32 %v1494_v45, %v1492_v46  ;;  %v2340_v55 = vsel %vm2333_vm3, %v2336_v39, %v2339_v13  ;;  %v11979_v37 = vpop.eup %11978  ;;  %v1297_v62 = vadd.s32 3, %v1293_v15 }
 0x431   : > { %v1596_v30 = vand.u32 2147483647, %v1595_v51  ;;  %vm1192_vm14 = vweird.f32 %v17840_v6  ;;  %v16833_v7 = vand.u32 3, %v1401_v38  ;;  %v1598_v54 = vcvt.s32.f32 %v1591_v43 }
 0x432   : > { %v8727_v56 = vadd.f32 %v8716_v22, %v8705_v53  ;;  %v11981_v52 = vpop.eup %11980  ;;  %v1203_v19 = vsel %vm1192_vm14, nan, %v1202_v4  ;;  %v2341_v35 = vsel %vm1192_vm14, nan, %v2340_v55  ;;  %v17910_v47 = vsub.f32 %v17908_v14, %v17909_v3  ;;  %v17912_v4 = vld [vmem:[#allocation50_spill] sm:$0xff] }
 0x433   : > { %v1496_v8 = vxor.u32 2147483648, %v1495_v41  ;;  %v1697_v50 = vadd.s32 127, %v1696_v58  ;;  %v8717_v27 = vmul.f32 %v8347_v44, %v2341_v35  ;;  %vm1518_vm11 = vcmp.lt.s32.totalorder %v17911_v9, 0  ;;  %v17919_v35 = vld [vmem:[#allocation51_spill] sm:$0xff]  ;;  %v17920_v44 = vld [vmem:[#allocation53_spill] sm:$0xff] }
 0x434   : > { %v8747_v28 = vsel %vm8734_vm8, %v8727_v56, 0.0  ;;  %v8706_v17 = vmul.f32 %v17910_v47, %v1203_v19  ;;  %v1298_v6 = vand.u32 3, %v1297_v62  ;;  %v1599_v38 = vmul.f32 %v1598_v54, %v1596_v30 }
 0x435   : > { %8748 = vadd.xlane.f32.xlu1 %v8747_v28  ;;  %v1301_v33 = vxor.u32 2147483648, %v11981_v52  ;;  %v1304_v12 = vxor.u32 2147483648, %v11979_v37  ;;  %v1692_v48 = vsub.s32 32, %v16816_v29  ;;  %vm1414_vm4 = vcmp.lt.s32.totalorder %v17912_v4, 0  ;;  %v8417_v28 = vpop.f32.mrb[26].mxu0 }
 0x436   : > { %v8728_v20 = vadd.f32 %v8717_v27, %v8706_v17  ;;  %v17913_v40 = vand.u32 2147483647, %v17911_v9  ;;  %v17916_v57 = vand.u32 2147483647, %v17912_v4  ;;  %v2435_v32 = vand.u32 3, %v1293_v15  ;;  %v10888_v17 = vpop.f32.mrb[27].mxu0 }
 0x437   : > { %v11983_v24 = vpop.eup %11982  ;;  %vm1404_vm13 = vcmp.eq.s32.totalorder %v16833_v7, 0  ;;  %vm1407_vm9 = vcmp.eq.s32.totalorder %v16833_v7, 2  ;;  %v1497_v36 = vsel %vm1414_vm4, %v1496_v8, %v1495_v41  ;;  %v1676_v60 = vadd.s32 %v16530_v59, %v16543_v25 }
 0x438   : > { %vm16844_vm2 = vcmp.le.f32.partialorder %v17913_v40, 0.7853982  ;;  %vm16850_vm1 = vcmp.le.f32.partialorder %v17916_v57, 0.7853982  ;;  %v1698_v46 = vshll.u32 %v1697_v50, 23  ;;  %v8750_v51 = vsel %vm8734_vm8, %v8728_v20, 0.0 }
 0x439   : > { %vm1296_vm15 = vweird.f32 %v17893_v23  ;;  %vm1300_vm5 = vcmp.eq.s32.totalorder %v1298_v6, 0  ;;  %vm1303_vm12 = vcmp.eq.s32.totalorder %v1298_v6, 2  ;;  %v1600_v39 = vxor.u32 2147483648, %v1599_v38  ;;  %8751 = vadd.xlane.f32.xlu0 %v8750_v51  ;;  %v11985_v13 = vpop.eup %11984  ;;  %v17922_v40 = vld [vmem:[#allocation15_spill] sm:$0xff]  ;;  %v17923_v57 = vld [vmem:[#allocation65_spill] sm:$0xff] }
 0x43a   : > { %v1602_v15 = vsub.s32 4, %v16577_v26  ;;  %v1302_v11 = vsel %vm1300_vm5, %v11979_v37, %v1301_v33  ;;  %v1305_v45 = vsel %vm1303_vm12, %v1304_v12, %v11981_v52  ;;  %v1498_v5 = vsub.s32 4, %v16552_v61 }
 0x43b   : > { %v1694_v49 = vshrl.u32 %v1676_v60, %v1692_v48  ;;  %vm1403_vm10 = vcmp.lt.s32.totalorder %v16833_v7, 2  ;;  %v1500_v59 = vsel %vm16850_vm1, %v17912_v4, %v1497_v36  ;;  %v1693_v25 = vshll.u32 %v16703_v21, %v16816_v29  ;;  %v8487_v48 = vpop.f32.mrb[30].mxu1 }
 0x43c   : > { %vm2437_vm6 = vcmp.eq.s32.totalorder %v2435_v32, 0  ;;  %vm2440_vm0 = vcmp.eq.s32.totalorder %v2435_v32, 2  ;;  %v1699_v16 = vor.u32 4788187, %v1698_v46  ;;  %v2538_v53 = vand.u32 3, %v16747_v1  ;;  %v10911_v36 = vpop.f32.mrb[31].mxu1 }
 0x43d   : > { %v2439_v63 = vsel %vm2437_vm6, %v11979_v37, %v1301_v33  ;;  %v2442_v42 = vsel %vm2440_vm0, %v1304_v12, %v11981_v52  ;;  %v1405_v43 = vxor.u32 2147483648, %v11985_v13  ;;  %v1408_v22 = vxor.u32 2147483648, %v11983_v24 }
 0x43e   : > { %vm1299_vm3 = vcmp.lt.s32.totalorder %v1298_v6, 2  ;;  %v1601_v31 = vsel %vm1518_vm11, %v1600_v39, %v1599_v38  ;;  %v1603_v41 = vsel %vm1518_vm11, %v1602_v15, %v16577_v26  ;;  %11986 = vcosq.f32 %v1500_v59  ;;  %v17925_v39 = vld [vmem:[#allocation48_spill] sm:$0xff] }
 0x43f   : > { %v1695_v58 = vor.u32 %v1694_v49, %v1693_v25  ;;  %vm2436_vm14 = vcmp.lt.s32.totalorder %v2435_v32, 2  ;;  %v1306_v21 = vsel %vm1299_vm3, %v1302_v11, %v1305_v45  ;;  %v1499_v29 = vsel %vm1414_vm4, %v1498_v5, %v16552_v61 }
 0x440   : > { %11988 = vsinq.f32 %v1500_v59  ;;  %v2443_v1 = vsel %vm2436_vm14, %v2439_v63, %v2442_v42  ;;  %v1604_v55 = vsel %vm16844_vm2, %v17911_v9, %v1601_v31  ;;  %v1700_v37 = vand.u32 2147483647, %v1699_v16 }
 0x441   : > { %vm2540_vm5 = vcmp.eq.s32.totalorder %v2538_v53, 0  ;;  %vm2543_vm12 = vcmp.eq.s32.totalorder %v2538_v53, 2  ;;  %v1406_v26 = vsel %vm1404_vm13, %v11983_v24, %v1405_v43  ;;  %v1409_v62 = vsel %vm1407_vm9, %v1408_v22, %v11985_v13 }
 0x442   : > { %v2542_v30 = vsel %vm2540_vm5, %v11983_v24, %v1405_v43  ;;  %v2545_v56 = vsel %vm2543_vm12, %v1408_v22, %v11985_v13  ;;  %v1307_v61 = vsel %vm1296_vm15, nan, %v1306_v21  ;;  %v1501_v52 = vsel %vm16850_vm1, 0, %v1499_v29 }
 0x443   : > { %v1702_v19 = vcvt.s32.f32 %v1695_v58  ;;  %v2444_v54 = vsel %vm1296_vm15, nan, %v2443_v1  ;;  %v17921_v14 = vsub.f32 %v17919_v35, %v17920_v44  ;;  %11990 = vcosq.f32 %v1604_v55 }
 0x444   : > { %v8718_v47 = vmul.f32 %v8417_v28, %v2444_v54  ;;  %vm2539_vm11 = vcmp.lt.s32.totalorder %v2538_v53, 2  ;;  %v1410_v8 = vsel %vm1403_vm10, %v1406_v26, %v1409_v62  ;;  %11992 = vsinq.f32 %v1604_v55  ;;  %v17930_v54 = vld [vmem:[#allocation68_spill] sm:$0xff] }
 0x445   : > { %v8707_v3 = vmul.f32 %v17921_v14, %v1307_v61  ;;  %v1703_v50 = vmul.f32 %v1702_v19, %v1700_v37  ;;  %v2546_v27 = vsel %vm2539_vm11, %v2542_v30, %v2545_v56  ;;  %vm1400_vm4 = vweird.f32 %v17887_v2  ;;  %v17929_v19 = vld [vmem:[#allocation95_spill] sm:$0xff] }
 0x446   : > { %v1505_v23 = vadd.s32 3, %v1501_v52  ;;  %v1411_v6 = vsel %vm1400_vm4, nan, %v1410_v8  ;;  %v1605_v38 = vsel %vm16844_vm2, 0, %v1603_v41  ;;  %v2547_v12 = vsel %vm1400_vm4, nan, %v2546_v27 }
 0x447   : > { %v8729_v10 = vadd.f32 %v8718_v47, %v8707_v3  ;;  %v17924_v7 = vsub.f32 %v17922_v40, %v17923_v57  ;;  %v1704_v32 = vxor.u32 2147483648, %v1703_v50  ;;  %v8719_v24 = vmul.f32 %v8487_v48, %v2547_v12 }
 0x448   : > { %v11987_v20 = vpop.eup %11986  ;;  %v1609_v2 = vadd.s32 3, %v1605_v38  ;;  %v1506_v46 = vand.u32 3, %v1505_v23  ;;  %vm1622_vm1 = vcmp.lt.s32.totalorder %v17925_v39, 0  ;;  %v2641_v0 = vand.u32 3, %v1501_v52  ;;  %v8557_v52 = vpop.f32.mrb[28].mxu0  ;;  %v17932_v23 = vld [vmem:[#allocation92_spill] sm:$0xff] }
 0x449   : > { %v8753_v33 = vsel %vm8734_vm8, %v8729_v10, 0.0  ;;  %v8708_v34 = vmul.f32 %v17924_v7, %v1411_v6  ;;  %v1512_v13 = vxor.u32 2147483648, %v11987_v20  ;;  %v1705_v11 = vsel %vm1622_vm1, %v1704_v32, %v1703_v50  ;;  %v10934_v14 = vpop.f32.mrb[29].mxu0  ;;  %v17933_v6 = vld [vmem:[#allocation58_spill] sm:$0xff] }
 0x44a   : > { %8754 = vadd.xlane.f32.xlu1 %v8753_v33  ;;  %v11989_v60 = vpop.eup %11988  ;;  %v17926_v49 = vand.u32 2147483647, %v17925_v39  ;;  %v1610_v16 = vand.u32 3, %v1609_v2  ;;  %vm1508_vm13 = vcmp.eq.s32.totalorder %v1506_v46, 0  ;;  %vm1511_vm9 = vcmp.eq.s32.totalorder %v1506_v46, 2 }
 0x44b   : > { %v8730_v51 = vadd.f32 %v8719_v24, %v8708_v34  ;;  %v1509_v15 = vxor.u32 2147483648, %v11989_v60  ;;  %v1706_v63 = vsub.s32 4, %v16671_v18  ;;  %vm2643_vm15 = vcmp.eq.s32.totalorder %v2641_v0, 0 }
 0x44c   : > { %vm16910_vm2 = vcmp.le.f32.partialorder %v17926_v49, 0.7853982  ;;  %vm2646_vm10 = vcmp.eq.s32.totalorder %v2641_v0, 2  ;;  %v2744_v53 = vand.u32 3, %v1605_v38  ;;  %v1513_v22 = vsel %vm1511_vm9, %v1512_v13, %v11989_v60 }
 0x44d   : > { %v8756_v45 = vsel %vm8734_vm8, %v8730_v51, 0.0  ;;  %v11991_v5 = vpop.eup %11990  ;;  %v1708_v42 = vsel %vm16910_vm2, %v17925_v39, %v1705_v11  ;;  %v1510_v43 = vsel %vm1508_vm13, %v11987_v20, %v1509_v15  ;;  %v2645_v31 = vsel %vm2643_vm15, %v11987_v20, %v1509_v15  ;;  %v8627_v27 = vpop.f32.mrb[32].mxu1 }
 0x44e   : > { %8757 = vadd.xlane.f32.xlu0 %v8756_v45  ;;  %v11993_v25 = vpop.eup %11992  ;;  %v2648_v41 = vsel %vm2646_vm10, %v1512_v13, %v11989_v60  ;;  %v1616_v21 = vxor.u32 2147483648, %v11991_v5  ;;  %vm1504_vm6 = vweird.f32 %v17912_v4  ;;  %vm1507_vm0 = vcmp.lt.s32.totalorder %v1506_v46, 2  ;;  %v10957_v48 = vpop.f32.mrb[33].mxu1  ;;  %v17935_v45 = vld [vmem:[#allocation91_spill] sm:$0xff] }
 0x44f   : > { %v1613_v58 = vxor.u32 2147483648, %v11993_v25  ;;  %11994 = vcosq.f32 %v1708_v42  ;;  %vm2642_vm3 = vcmp.lt.s32.totalorder %v2641_v0, 2  ;;  %vm1612_vm14 = vcmp.eq.s32.totalorder %v1610_v16, 0 }
 0x450   : > { %v1514_v29 = vsel %vm1507_vm0, %v1510_v43, %v1513_v22  ;;  %11996 = vsinq.f32 %v1708_v42  ;;  %v2649_v1 = vsel %vm2642_vm3, %v2645_v31, %v2648_v41  ;;  %vm1615_vm5 = vcmp.eq.s32.totalorder %v1610_v16, 2  ;;  %v8849_v43 = vld [vmem:[%s17039_s4] sm:$0xff] }
 0x451   : > { %v1707_v55 = vsel %vm1622_vm1, %v1706_v63, %v16671_v18  ;;  %vm2746_vm12 = vcmp.eq.s32.totalorder %v2744_v53, 0  ;;  %vm2749_vm11 = vcmp.eq.s32.totalorder %v2744_v53, 2  ;;  %v1614_v37 = vsel %vm1612_vm14, %v11991_v5, %v1613_v58 }
 0x452   : > { %v1617_v26 = vsel %vm1615_vm5, %v1616_v21, %v11993_v25  ;;  %v2748_v62 = vsel %vm2746_vm12, %v11991_v5, %v1613_v58  ;;  %v2751_v30 = vsel %vm2749_vm11, %v1616_v21, %v11993_v25  ;;  %vm1611_vm4 = vcmp.lt.s32.totalorder %v1610_v16, 2  ;;  %v17936_v5 = vld [vmem:[#allocation52_spill] sm:$0xff] }
 0x453   : > { %v1515_v56 = vsel %vm1504_vm6, nan, %v1514_v29  ;;  %v2650_v61 = vsel %vm1504_vm6, nan, %v2649_v1  ;;  %v17931_v28 = vsub.f32 %v17929_v19, %v17930_v54  ;;  %v1709_v18 = vsel %vm16910_vm2, 0, %v1707_v55 }
 0x454   : > { %v8720_v44 = vmul.f32 %v8557_v52, %v2650_v61  ;;  %vm2745_vm1 = vcmp.lt.s32.totalorder %v2744_v53, 2  ;;  %v1618_v3 = vsel %vm1611_vm4, %v1614_v37, %v1617_v26  ;;  %vm1608_vm13 = vweird.f32 %v17911_v9  ;;  %v8838_v53 = vld [vmem:[#allocation2] sm:$0x1] }
 0x455   : > { %v8709_v35 = vmul.f32 %v17931_v28, %v1515_v56  ;;  %v2752_v47 = vsel %vm2745_vm1, %v2748_v62, %v2751_v30  ;;  %v1713_v8 = vadd.s32 3, %v1709_v18  ;;  %v1619_v50 = vsel %vm1608_vm13, nan, %v1618_v3 }
 0x456   : > { %v2753_v4 = vsel %vm1608_vm13, nan, %v2752_v47  ;;  %v17934_v38 = vsub.f32 %v17932_v23, %v17933_v6  ;;  %v2847_v34 = vand.u32 3, %v1709_v18  ;;  %vm1712_vm3 = vweird.f32 %v17925_v39  ;;  %v8850_v39 = vld [vmem:[%s17039_s4 + $0x8] sm:$0x7] }
 0x457   : > { %v8731_v17 = vadd.f32 %v8720_v44, %v8709_v35  ;;  %v8721_v12 = vmul.f32 %v8627_v27, %v2753_v4  ;;  %v1714_v40 = vand.u32 3, %v1713_v8  ;;  %v17937_v49 = vsub.f32 %v17935_v45, %v17936_v5 }
 0x458   : > { %v8710_v33 = vmul.f32 %v17934_v38, %v1619_v50  ;;  %vm2849_vm15 = vcmp.eq.s32.totalorder %v2847_v34, 0  ;;  %vm2852_vm10 = vcmp.eq.s32.totalorder %v2847_v34, 2  ;;  %vm2848_vm0 = vcmp.lt.s32.totalorder %v2847_v34, 2  ;;  %v17940_v38 = vld [vmem:[#allocation16_spill] sm:$0xff] }
 0x459   : > { %v11995_v10 = vpop.eup %11994  ;;  %vm1719_vm2 = vcmp.eq.s32.totalorder %v1714_v40, 2  ;;  %vm1716_vm9 = vcmp.eq.s32.totalorder %v1714_v40, 0  ;;  %v8759_v46 = vsel %vm8734_vm8, %v8731_v17, 0.0  ;;  %vm1715_vm6 = vcmp.lt.s32.totalorder %v1714_v40, 2  ;;  %v8931_v40 = vld [vmem:[%s17041_s6] sm:$0xff] }
 0x45a   : > { %v11997_v20 = vpop.eup %11996  ;;  %v8732_v57 = vadd.f32 %v8721_v12, %v8710_v33  ;;  %v1720_v7 = vxor.u32 2147483648, %v11995_v10  ;;  %vm8856_vm14 = vcmask 1042432   ;;  %v11711_v22 = vpack.c.bf16 %v8850_v39, %v8849_v43 }
 0x45b   : > { %v1717_v32 = vxor.u32 2147483648, %v11997_v20  ;;  %v8697_v11 = vpop.f32.mrb[30].mxu0  ;;  %vm17938_vm5 = vmmov 1   ;;  %v17939_v31 = vmov 0.0|0.0   ;;  %vm8783_vm11 = vcmask 1042434  }
 0x45c   : > { %v8762_v24 = vsel %vm8734_vm8, %v8732_v57, 0.0  ;;  %v1721_v9 = vsel %vm1719_vm2, %v1720_v7, %v11997_v20  ;;  %v2854_v2 = vsel %vm2852_vm10, %v1720_v7, %v11997_v20  ;;  %v10980_v16 = vpop.f32.mrb[31].mxu0  ;;  %vm11712_vm12 = vmpackc.low %vm8856_vm14, %vm17938_vm5  ;;  %vm8786_vm4 = vcmask 1043459   ;;  %v8932_v57 = vld [vmem:[%s17041_s6 + $0x8] sm:$0xff]  ;;  %v8933_v7 = vld [vmem:[%s17041_s6 + $0x10] sm:$0xff] }
 0x45d   : > { %8763 = vadd.xlane.f32.xlu1 %v8762_v24  ;;  %v1718_v36 = vsel %vm1716_vm9, %v11995_v10, %v1717_v32  ;;  %v2851_v60 = vsel %vm2849_vm15, %v11995_v10, %v1717_v32  ;;  %11713 = vmatpush3.bf16.msk.msra.mxu1 %vm11712_vm12, %v11711_v22  ;;  %vm8789_vm1 = vcmask 1044484   ;;  %vm8792_vm13 = vcmask 1045509   ;;  %v8934_v32 = vld [vmem:[%s17041_s6 + $0x18] sm:$0xff] }
 0x45e   : > { %v1722_v51 = vsel %vm1715_vm6, %v1718_v36, %v1721_v9  ;;  %v2855_v0 = vsel %vm2848_vm0, %v2851_v60, %v2854_v2  ;;  %11720 = vmatprep.subr.bf16.mxu1 %v17939_v31  ;;  %vm8795_vm2 = vcmask 1046534   ;;  %vm8798_vm9 = vcmask 1047559   ;;  %v8851_v9 = vld [vmem:[%s17040_s5] sm:$0x1] }
 0x45f   : > { %v1723_v15 = vsel %vm1712_vm3, nan, %v1722_v51  ;;  %v2856_v13 = vsel %vm1712_vm3, nan, %v2855_v0  ;;  %vm8852_vm15 = vcmask 89088   ;;  %v17941_v20 = vmov 0.0   ;;  %v9011_v51 = vld [vmem:[%s17043_s8] sm:$0xff]  ;;  %v9012_v0 = vld [vmem:[%s17043_s8 + $0x8] sm:$0xff] }
 0x460   : > { %v8711_v59 = vmul.f32 %v17937_v49, %v1723_v15  ;;  %v8722_v25 = vmul.f32 %v8697_v11, %v2856_v13  ;;  %v11715_v34 = vpack.c.bf16 %v8932_v57, %v8931_v40  ;;  %v11718_v24 = vpack.c.bf16 %v8934_v32, %v8933_v7  ;;  %v8935_v13 = vld [vmem:[%s17042_s7] sm:$0x1] }
 0x461   : > { %8760 = vadd.xlane.f32.xlu1 %v8759_v46  ;;  %v11721_v15 = vpack.c.bf16 %v9012_v0, %v9011_v51  ;;  %vm9014_vm10 = vcmask 130048   ;;  %vm9088_vm6 = vcmask 24576  }
 0x462   : > { %v8733_v63 = vadd.f32 %v8722_v25, %v8711_v59  ;;  %11716 = vmatpush3.bf16.msra.mxu0 %v11715_v34  ;;  %v9013_v59 = vld [vmem:[%s17044_s9] sm:$0x1] }
 0x463   : > { %11717 = vmatprep.subr.bf16.mxu0 %v17939_v31 }
 0x464   : > { %v8765_v42 = vsel %vm8734_vm8, %v8733_v63, 0.0  ;;  %vm8780_vm8 = vcmask 1041409  }
 0x465   : > { %8766 = vadd.xlane.f32.xlu0 %v8765_v42 }
 0x466   : > { %11719 = vmatpush3.bf16.msra.mxu0 %v11718_v24 }
 0x47b   : > { %8841 = vperm.xlu0 %11907, %v8838_v53  }
 0x495   : > { %v8737_v41 = vpop.xlane.xlu0 %8736 }
 0x49b   : > { %v8740_v58 = vpop.xlane.xlu0 %8739 }
 0x49c   : > { %v8779_v55 = vrot.slane %v8740_v58, 7 }
 0x49e   : > { %v8781_v61 = vsel %vm8780_vm8, %v8779_v55, %v8737_v41 }
 0x4ae   : > { %v8743_v21 = vpop.xlane.xlu1 %8742 }
 0x4af   : > { %v8782_v37 = vrot.slane %v8743_v21, 6 }
 0x4b1   : > { %v8784_v19 = vsel %vm8783_vm11, %v8782_v37, %v8781_v61 }
 0x4b2   : > { %v8746_v29 = vpop.xlane.xlu0 %8745 }
 0x4b3   : > { %v8785_v62 = vrot.slane %v8746_v29, 5 }
 0x4b5   : > { %v8787_v28 = vsel %vm8786_vm4, %v8785_v62, %v8784_v19 }
 0x4c2   : > { %v8749_v1 = vpop.xlane.xlu1 %8748 }
 0x4c3   : > { %v8788_v56 = vrot.slane %v8749_v1, 4 }
 0x4c5   : > { %v8790_v35 = vsel %vm8789_vm1, %v8788_v56, %v8787_v28 }
 0x4c6   : > { %v8752_v26 = vpop.xlane.xlu0 %8751 }
 0x4c7   : > { %v8791_v52 = vrot.slane %v8752_v26, 3 }
 0x4c9   : > { %v8793_v44 = vsel %vm8792_vm13, %v8791_v52, %v8790_v35 }
 0x4d7   : > { %v8755_v30 = vpop.xlane.xlu1 %8754 }
 0x4d8   : > { %v8794_v54 = vrot.slane %v8755_v30, 2 }
 0x4da   : > { %v8796_v3 = vsel %vm8795_vm2, %v8794_v54, %v8793_v44 }
 0x4db   : > { %v8758_v18 = vpop.xlane.xlu0 %8757 }
 0x4dc   : > { %v8797_v14 = vrot.slane %v8758_v18, 1 }
 0x4de   : > { %v8799_v47 = vsel %vm8798_vm9, %v8797_v14, %v8796_v3 }
 0x4df   : > { %8806 = vxpose.xlu1.b32.start [1/2] (short) (narrow) %v8799_v47, 8 }
 0x4ea   : > { %v8764_v17 = vpop.xlane.xlu1 %8763 }
 0x4eb   : > { %v8800_v50 = vrot.slane %v8764_v17, 7 }
 0x4ee   : > { %v8761_v8 = vpop.xlane.xlu1 %8760 }
 0x4ef   : > { %v8801_v4 = vsel %vm8780_vm8, %v8800_v50, %v8761_v8 }
 0x4f2   : > { %v8767_v27 = vpop.xlane.xlu0 %8766 }
 0x4f3   : > { %v8802_v10 = vrot.slane %v8767_v27, 6 }
 0x4f5   : > { %v8803_v23 = vsel %vm8783_vm11, %v8802_v10, %v8801_v4 }
 0x4f6   : > { %8807 = vxpose.xlu1.b32.end [2/2] (short) (narrow) %v8803_v23, 8 }
 0x4fa   : > { %v8842_v6 = vpop.permute.xlu0 %8841 }
 0x4fb   : > { %v8847_v33 = vrot.slane %v8842_v6, %v17940_v38 }
 0x572   : > { %v8822_v12 = vpop.trf.xlu1 }
 0x573   : > { %v8848_v48 = vadd.f32 %v8847_v33, %v8822_v12 }
 0x575   : > { %10986 = vmatmul.mubr.msk.f32.vlgmr.msra.gmra.mrb[34].mxu1 %vm8852_vm15, %v8848_v48 }
 0x576   : > { %11003 = vmatprep.mubr.msk.f32.mxu1 %vm17447_vm7, %v17941_v20  ;;  %vm8936_vm7 = vcmask 261120   ;;  %11722 = vmatpush3.bf16.msra.mxu1 %v11721_v15 }
 0x648   : > { %v8926_v36 = vpop.f32.mrb[34].mxu1 }
 0x649   : > { %v8927_v60 = vadd.f32 %v8926_v36, %v8851_v9  ;;  %v10987_v2 = vpop.f32.mrb[35].mxu1 }
 0x64b   : > { %11998 = vtanh.f32 %v8927_v60 }
 0x655   : > { %v11999_v46 = vpop.eup %11998 }
 0x656   : > { %10997 = vmatmul.mubr.msk.f32.vlgmr.msra.gmra.mrb[32].mxu0 %vm8936_vm7, %v11999_v46 }
 0x729   : > { %v9006_v11 = vpop.f32.mrb[32].mxu0 }
 0x72a   : > { %v9007_v45 = vadd.f32 %v9006_v11, %v8935_v13  ;;  %v10998_v5 = vpop.f32.mrb[33].mxu0 }
 0x72c   : > { %12000 = vtanh.f32 %v9007_v45 }
 0x736   : > { %v12001_v49 = vpop.eup %12000 }
 0x737   : > { %11004 = vmatmul.mubr.msk.f32.vlgmr.msra.gmra.mrb[36].mxu1 %vm9014_vm10, %v12001_v49 }
 0x80a   : > { %v9084_v25 = vpop.f32.mrb[36].mxu1 }
 0x80b   : > { %v9085_v16 = vadd.f32 %v9084_v25, %v9013_v59  ;;  %v11005_v63 = vpop.f32.mrb[37].mxu1 }
 0x80d   : > { %v9089_v42 = vsel %vm9088_vm6, %v9085_v16, -inf }
 0x80e   : > { %9090 = vmax.xlane.f32.xlu0 %v9089_v42 }
 0x89b   : > { %v9091_v53 = vpop.xlane.xlu0 %9090 }
 0x89c   : > { %v9092_v43 = vsub.f32 %v9085_v16, %v9091_v53 }
 0x89e   : > { %v9093_v39 = vmul.f32 1.442695, %v9092_v43 }
 0x8a0   : > { %12002 = vpow2.f32 %v9093_v39 }
 0x8aa   : > { %v12003_v22 = vpop.eup %12002 }
 0x8ab   : > { %v9095_v31 = vsel %vm9088_vm6, %v12003_v22, 0.0 }
 0x8ac   : > { %9096 = vadd.xlane.f32.xlu0 %v9095_v31 }
 0x939   : > { %v9097_v41 = vpop.xlane.xlu0 %9096 }
 0x93a   : > { %12004 = vrcp.f32 %v9097_v41 }
 0x944   : > { %v12005_v58 = vpop.eup %12004 }
 0x945   : > { %v9099_v21 = vmul.f32 %v12005_v58, %v12003_v22 }
 0x947   : > { %9100 = vst.msk [vmem:[%s383_s20] sm:$0x1] %vm9088_vm6, %v9099_v21 }
 0x948   : > { %12075 = shalt.err (!%p12072_p11)
}
 0x949   : > { %s12076_s21 = scalar_lea.hbm %s16992_s11, 16  ;;  %s12080_s30 = scalar_lea.hbm %s17045_s10, 32 }
 0x94a   : > { %p12077_p13 = scmp.ne.s32.totalorder %s16992_s11, %s12076_s21  ;;  %p12081_p6 = scmp.lt.u32.totalorder %s16992_s11, %s17045_s10 }
 0x94b   : > { %p12082_p9 = scmp.lt.u32.totalorder %s12080_s30, %s12076_s21  ;;  %p12084_p12 = scmp.lt.u32.totalorder %s12076_s21, %s16992_s11 }
 0x94c   : > { %p12078_p5 = pnand %p12077_p13, %p17942_p1 }
 0x94d   : > { %p12083_p10 = por %p12082_p9, %p12081_p6 }
 0x94e   : > { %p12079_p0 = pneg %p12078_p5 }
 0x94f   : > { %p12085_p2 = por %p12084_p12, %p12083_p10 }
 0x951   : > { %p12086_p3 = pnand %p12085_p2, %p12079_p0 }
 0x953   : > { %12089 = shalt.err (!%p12086_p3)
}
 0x954   : > { %11841 = dma.vmem_to_hbm [thread:$0]  (%p17942_p1), %s16994_s23, 16, %s16992_s11, %s9102_s12  }
 0x955 PF: > { %p11858_p4 = scmp.ge.s32.totalorder %s12132_s18, 2  ;;  %s9126_s20 = sand.u32 1, %s12120_s15  }
 0x956   : > { %p17943_p7 = scmp.ne.s32.totalorder %s17352_s25, 0  ;;  %s9127_s26 = scalar_lea.sflag [#allocation5], %s9126_s20 }
 0x958   : > { %p11851_p8 = pnand %p11858_p4, %p17943_p7 }
 0x95a   : > { %12115 = dma.done.wait (!%p11851_p8), %s9127_s26, 16  }
 0x95b   : > { %12117 = vsyncadd (!%p11851_p8), %s9127_s26, 4294967280  ;;  %s17944_s18 = sld [smem:[#allocation13_spill]]  ;;  %s17945_s29 = sld [smem:[#allocation12_spill]] }
 0x95c   : > { %s17946_s17 = sld [smem:[#allocation14_spill]]  ;;  %s17947_s15 = smov %s12124_s16 }
 0x961   : > { %p24_p11 = scmp.ge.s32.totalorder %s17944_s18, 4   ;;  %s17948_s16 = smov %s17945_s29 }
 0x963   :  { %26 = sbr.rel (!%p24_p11) target bundleno = 8 (0x8), region = 104 }
 0x96a   :  { %9131 = vsyncpa [#allocation4], 1 }
 0x96b   :  { %9133 = vsyncpa [#allocation4 + $0x1], 1 }
 0x96c   :  { %9134 = vsyncpa [#allocation7], 1 }
 0x96d   :  { %9135 = vsyncpa [#allocation5], 1 }
 0x96e   :  { %9137 = vsyncpa [#allocation5 + $0x1], 1 }

</bundles_post_ra>
